<compile_context>
chip_gen: v5e
topology: v5e:2x2
jax: 0.10.0
libtpu: 0.0.40
codegen_flags: <defaults>
</compile_context>

<pallas_src>
import functools
import math

import jax
import jax.numpy as jnp
from jax.experimental import pallas as pl
from jax.experimental.pallas import tpu as pltpu


# ----------------------------------------------------------------------------
# Pallas kernel 1: per-image conv matmul   patches @ W + b, ReLU
# ----------------------------------------------------------------------------
def _conv_matmul_kernel(p_ref, w_ref, b_ref, o_ref):
    # p_ref: (M, K) bf16  w_ref: (K, O) bf16  b_ref: (1, O) f32  o_ref: (M, O) bf16
    acc = jnp.dot(p_ref[...], w_ref[...], preferred_element_type=jnp.float32)
    acc = jnp.maximum(acc + b_ref[...], 0.0)
    o_ref[...] = acc.astype(o_ref.dtype)


def conv_matmul_relu(patches, w, b):
    """patches: (B, M, K) bf16, w: (K, O) bf16, b: (1, O) f32 -> (B, M, O) bf16."""
    B, M, K = patches.shape
    O = w.shape[1]
    return pl.pallas_call(
        _conv_matmul_kernel,
        out_shape=jax.ShapeDtypeStruct((B, M, O), jnp.bfloat16),
        grid_spec=pltpu.PrefetchScalarGridSpec(
            num_scalar_prefetch=0,
            grid=(B,),                                  # batch-parallel (v7x 2 TCs)
            in_specs=[
                pl.BlockSpec((None, M, K), lambda i: (i, 0, 0)),
                pl.BlockSpec((K, O), lambda i: (0, 0)),
                pl.BlockSpec((1, O), lambda i: (0, 0)),
            ],
            out_specs=pl.BlockSpec((None, M, O), lambda i: (i, 0, 0)),
        ),
        compiler_params=pltpu.CompilerParams(
            dimension_semantics=("parallel",)),
    )(patches, w, b)


def conv2d_relu_nhwc(x, w_km, b_1o, kh, kw, stride):
    """x: (B, H, W, C) bf16 NHWC; w_km: (kh*kw*C, O) bf16, rows in (kh, kw, c) order."""
    B, H, W, C = x.shape
    oh = (H - kh) // stride + 1
    ow = (W - kw) // stride + 1
    # Lightweight channels-last im2col: kh*kw strided slices concatenated on the
    # lane (channel) axis -- no stack, no 6-D transpose, no padding copies.
    # TODO(synk): patch extraction stays as XLA glue; a fully in-kernel im2col
    # would need strided VMEM slicing that is riskier to lower.
    cols = [x[:, i:i + stride * oh:stride, j:j + stride * ow:stride, :]
            for i in range(kh) for j in range(kw)]
    patches = jnp.concatenate(cols, axis=-1).reshape(B, oh * ow, kh * kw * C)
    y = conv_matmul_relu(patches, w_km, b_1o)           # (B, oh*ow, O) bf16
    return y.reshape(B, oh, ow, w_km.shape[1])


# ----------------------------------------------------------------------------
# Pallas kernel 2: fused dueling head
#   feat -> [v1 | a1] (single matmul) -> ReLU -> v2 & a2 -> dueling combine
# ----------------------------------------------------------------------------
def _head_kernel(feat_ref, w1_ref, b1_ref, w2v_ref, b2v_ref, w2a_ref, b2a_ref,
                 o_ref, *, batch, hidden, num_actions, num_atoms, lane):
    h = jnp.dot(feat_ref[...], w1_ref[...],
                preferred_element_type=jnp.float32) + b1_ref[...]
    h = jnp.maximum(h, 0.0).astype(jnp.bfloat16)        # (Bp, 2*hidden)
    v = jnp.dot(h[:, :hidden], w2v_ref[...],
                preferred_element_type=jnp.float32) + b2v_ref[...]   # (Bp, lane)
    a = jnp.dot(h[:, hidden:], w2a_ref[...],
                preferred_element_type=jnp.float32) + b2a_ref[...]   # (Bp, A*lane)
    v = v[:batch, :num_atoms]                           # (B, atoms)
    # per-action blocks are 128-lane aligned, so these slices need no rotation
    adv = [a[:batch, i * lane:i * lane + num_atoms] for i in range(num_actions)]
    adv_mean = adv[0]
    for i in range(1, num_actions):
        adv_mean = adv_mean + adv[i]
    adv_mean = adv_mean * (1.0 / num_actions)
    for i in range(num_actions):
        o_ref[:, i, :] = v + adv[i] - adv_mean          # q = v + (adv - mean)


def dueling_head(featp, batch, w1, b1, w2v, b2v, w2a, b2a, *,
                 hidden, num_actions, num_atoms, lane=128):
    Bp, F = featp.shape
    kernel = functools.partial(_head_kernel, batch=batch, hidden=hidden,
                               num_actions=num_actions, num_atoms=num_atoms,
                               lane=lane)
    return pl.pallas_call(
        kernel,
        out_shape=jax.ShapeDtypeStruct((batch, num_actions, num_atoms),
                                       jnp.float32),
        grid_spec=pltpu.PrefetchScalarGridSpec(
            num_scalar_prefetch=0,
            grid=(1,),
            in_specs=[
                pl.BlockSpec((Bp, F), lambda i: (0, 0)),
                pl.BlockSpec(w1.shape, lambda i: (0, 0)),
                pl.BlockSpec(b1.shape, lambda i: (0, 0)),
                pl.BlockSpec(w2v.shape, lambda i: (0, 0)),
                pl.BlockSpec(b2v.shape, lambda i: (0, 0)),
                pl.BlockSpec(w2a.shape, lambda i: (0, 0)),
                pl.BlockSpec(b2a.shape, lambda i: (0, 0)),
            ],
            out_specs=pl.BlockSpec((batch, num_actions, num_atoms),
                                   lambda i: (0, 0, 0)),
        ),
        compiler_params=pltpu.CompilerParams(
            dimension_semantics=("arbitrary",)),
    )(featp, w1, b1, w2v, b2v, w2a, b2a)


# ----------------------------------------------------------------------------
# Parameter construction (deterministic, PyTorch layouts / semantics)
# ----------------------------------------------------------------------------
def _noisy_linear_effective(key, in_f, out_f, sigma_init=0.5):
    """Effective (weight, bias) = mu + sigma * epsilon of a factorized NoisyLinear."""
    k1, k2, k3, k4 = jax.random.split(key, 4)
    bound = 1.0 / math.sqrt(in_f)
    w_mu = jax.random.uniform(k1, (out_f, in_f), jnp.float32, -bound, bound)
    b_mu = jax.random.uniform(k2, (out_f,), jnp.float32, -bound, bound)
    sig = sigma_init / math.sqrt(in_f)

    def f(v):  # _scale_noise
        return jnp.sign(v) * jnp.sqrt(jnp.abs(v))

    eps_in = f(jax.random.normal(k3, (in_f,), jnp.float32))
    eps_out = f(jax.random.normal(k4, (out_f,), jnp.float32))
    w_eps = jnp.outer(eps_out, eps_in)
    return w_mu + sig * w_eps, b_mu + sig * eps_out


def _conv_params(key, out_c, in_c, kh, kw):
    k1, k2 = jax.random.split(key)
    fan_in = in_c * kh * kw
    bound = 1.0 / math.sqrt(fan_in)
    w = jax.random.uniform(k1, (out_c, in_c, kh, kw), jnp.float32, -bound, bound)
    b = jax.random.uniform(k2, (out_c,), jnp.float32, -bound, bound)
    return w, b


def make_rainbow_params(key, in_channels=4, num_actions=11, num_atoms=51,
                        hidden=256, img=128):
    s1 = (img - 8) // 4 + 1
    s2 = (s1 - 4) // 2 + 1
    s3 = (s2 - 3) // 2 + 1
    conv_out = 64 * s3 * s3

    keys = jax.random.split(key, 7)
    c1_w, c1_b = _conv_params(keys[0], 32, in_channels, 8, 8)
    c2_w, c2_b = _conv_params(keys[1], 64, 32, 4, 4)
    c3_w, c3_b = _conv_params(keys[2], 64, 64, 3, 3)
    v1_w, v1_b = _noisy_linear_effective(keys[3], conv_out, hidden)
    v2_w, v2_b = _noisy_linear_effective(keys[4], hidden, num_atoms)
    a1_w, a1_b = _noisy_linear_effective(keys[5], conv_out, hidden)
    a2_w, a2_b = _noisy_linear_effective(keys[6], hidden, num_actions * num_atoms)
    return dict(c1_w=c1_w, c1_b=c1_b, c2_w=c2_w, c2_b=c2_b, c3_w=c3_w, c3_b=c3_b,
                v1_w=v1_w, v1_b=v1_b, v2_w=v2_w, v2_b=v2_b,
                a1_w=a1_w, a1_b=a1_b, a2_w=a2_w, a2_b=a2_b)


def prepare_params(p, *, num_actions, num_atoms, hidden, feat_hw, feat_c=64,
                   lane=128):
    """One-time (outside the jit'd step) conversion of PyTorch-layout params into
    kernel-friendly layouts: bf16, transposed, NHWC-column-permuted, lane-padded."""
    def conv_prep(w, b):
        O, C, KH, KW = w.shape
        wk = jnp.transpose(w, (2, 3, 1, 0)).reshape(KH * KW * C, O)  # (kh,kw,c) rows
        return wk.astype(jnp.bfloat16), b.reshape(1, O).astype(jnp.float32)

    c1_w, c1_b = conv_prep(p["c1_w"], p["c1_b"])
    c2_w, c2_b = conv_prep(p["c2_w"], p["c2_b"])
    c3_w, c3_b = conv_prep(p["c3_w"], p["c3_b"])

    # Permute FC-1 input columns from PyTorch's NCHW flatten (c,h,w) to the NHWC
    # flatten (h,w,c) used internally, and fuse the value/adv first layers.
    def to_nhwc_cols(w):
        out_f = w.shape[0]
        return (w.reshape(out_f, feat_c, feat_hw, feat_hw)
                 .transpose(0, 2, 3, 1).reshape(out_f, -1))

    v1 = to_nhwc_cols(p["v1_w"])
    a1 = to_nhwc_cols(p["a1_w"])
    w1 = jnp.concatenate([v1.T, a1.T], axis=1).astype(jnp.bfloat16)  # (F, 2*hidden)
    b1 = jnp.concatenate([p["v1_b"], p["a1_b"]]).reshape(1, -1).astype(jnp.float32)

    w2v = (jnp.zeros((hidden, lane), jnp.float32)
           .at[:, :num_atoms].set(p["v2_w"].T).astype(jnp.bfloat16))
    b2v = jnp.zeros((1, lane), jnp.float32).at[0, :num_atoms].set(p["v2_b"])

    a2t = p["a2_w"].T.reshape(hidden, num_actions, num_atoms)        # a*atoms+atom
    w2a = (jnp.zeros((hidden, num_actions, lane), jnp.float32)
           .at[:, :, :num_atoms].set(a2t)
           .reshape(hidden, num_actions * lane).astype(jnp.bfloat16))
    b2a = (jnp.zeros((1, num_actions, lane), jnp.float32)
           .at[0, :, :num_atoms].set(p["a2_b"].reshape(num_actions, num_atoms))
           .reshape(1, num_actions * lane))

    return dict(c1_w=c1_w, c1_b=c1_b, c2_w=c2_w, c2_b=c2_b, c3_w=c3_w, c3_b=c3_b,
                w1=w1, b1=b1, w2v=w2v, b2v=b2v, w2a=w2a, b2a=b2a)


# ----------------------------------------------------------------------------
# Forward pass
# ----------------------------------------------------------------------------
def rainbow_forward(prep, x, *, num_actions=11, num_atoms=51, hidden=256):
    # x: (B, 4, 128, 128) NCHW f32 (PyTorch interface); single boundary transpose.
    x = jnp.transpose(x, (0, 2, 3, 1)).astype(jnp.bfloat16)          # NHWC bf16
    h = conv2d_relu_nhwc(x, prep["c1_w"], prep["c1_b"], 8, 8, 4)     # (B,31,31,32)
    h = conv2d_relu_nhwc(h, prep["c2_w"], prep["c2_b"], 4, 4, 2)     # (B,14,14,64)
    h = conv2d_relu_nhwc(h, prep["c3_w"], prep["c3_b"], 3, 3, 2)     # (B, 6, 6,64)
    B = h.shape[0]
    feat = h.reshape(B, -1)                                          # NHWC flatten
    Bp = (B + 7) // 8 * 8                                            # sublane pad only
    featp = jnp.zeros((Bp, feat.shape[1]), jnp.bfloat16).at[:B].set(feat)
    return dueling_head(featp, B, prep["w1"], prep["b1"], prep["w2v"],
                        prep["b2v"], prep["w2a"], prep["b2a"],
                        hidden=hidden, num_actions=num_actions,
                        num_atoms=num_atoms)


if __name__ == "__main__":
    NUM_ACTIONS, NUM_ATOMS, HIDDEN, IMG = 11, 51, 256, 128
    key = jax.random.PRNGKey(0)
    k_params, k_x = jax.random.split(key)

    raw = make_rainbow_params(k_params, in_channels=4, num_actions=NUM_ACTIONS,
                              num_atoms=NUM_ATOMS, hidden=HIDDEN, img=IMG)
    s1 = (IMG - 8) // 4 + 1
    s2 = (s1 - 4) // 2 + 1
    s3 = (s2 - 3) // 2 + 1
    prep = prepare_params(raw, num_actions=NUM_ACTIONS, num_atoms=NUM_ATOMS,
                          hidden=HIDDEN, feat_hw=s3)
    prep = jax.tree_util.tree_map(jax.block_until_ready, prep)       # one-time prep

    # batch=2, 4 stacked grayscale frames of 128x128 (module-implied input size)
    x = jax.random.normal(k_x, (2, 4, IMG, IMG), jnp.float32)

    fwd = jax.jit(functools.partial(rainbow_forward, num_actions=NUM_ACTIONS,
                                    num_atoms=NUM_ATOMS, hidden=HIDDEN))
    q_dist = fwd(prep, x)
    jax.block_until_ready(q_dist)

    assert q_dist.shape == (2, NUM_ACTIONS, NUM_ATOMS), q_dist.shape
    assert bool(jnp.all(jnp.isfinite(q_dist)))
    print("KERNEL_OK")
</pallas_src>

<mosaic_0001>
module attributes {stable_mosaic.version = 11 : i64} {
  func.func @_conv_matmul_kernel(%arg0: i32, %arg1: memref<1x961x256xbf16, #tpu.memory_space<vmem>>, %arg2: memref<256x32xbf16, #tpu.memory_space<vmem>>, %arg3: memref<1x32xf32, #tpu.memory_space<vmem>>, %arg4: memref<1x961x32xbf16, #tpu.memory_space<vmem>>) attributes {dimension_semantics = [#tpu.dimension_semantics<parallel>], iteration_bounds = array<i64: 2>, scalar_prefetch = 0 : i64, scratch_operands = 0 : i64, tpu.core_type = #tpu.core_type<tc>, window_params = [{transform_indices = @transform_0, window_bounds = array<i64: 1, 961, 256>}, {pipeline_mode = #tpu.pipeline_mode<synchronous>, transform_indices = @transform_1, window_bounds = array<i64: 256, 32>}, {pipeline_mode = #tpu.pipeline_mode<synchronous>, transform_indices = @transform_2, window_bounds = array<i64: 1, 32>}, {transform_indices = @transform_3, window_bounds = array<i64: 1, 961, 32>}]} {
    %c0 = arith.constant 0 : index
    %c0_0 = arith.constant 0 : index
    %c0_1 = arith.constant 0 : index
    %0 = vector.load %arg1[%c0, %c0_0, %c0_1] : memref<1x961x256xbf16, #tpu.memory_space<vmem>>, vector<1x961x256xbf16>
    %1 = vector.shape_cast %0 : vector<1x961x256xbf16> to vector<961x256xbf16>
    %c0_2 = arith.constant 0 : index
    %c0_3 = arith.constant 0 : index
    %2 = vector.load %arg2[%c0_2, %c0_3] : memref<256x32xbf16, #tpu.memory_space<vmem>>, vector<256x32xbf16>
    %cst = arith.constant dense<0.000000e+00> : vector<961x32xf32>
    %3 = tpu.matmul %1, %2, %cst {dimension_numbers = #tpu.dot_dimension_numbers<[1], [0], [0], [1], [0, 0, 1, 1], [], []>} : vector<961x256xbf16>, vector<256x32xbf16>, vector<961x32xf32> -> vector<961x32xf32>
    %c0_4 = arith.constant 0 : index
    %c0_5 = arith.constant 0 : index
    %4 = vector.load %arg3[%c0_4, %c0_5] : memref<1x32xf32, #tpu.memory_space<vmem>>, vector<1x32xf32>
    %5 = vector.broadcast %4 : vector<1x32xf32> to vector<961x32xf32>
    %6 = arith.addf %3, %5 : vector<961x32xf32>
    %cst_6 = arith.constant 0.000000e+00 : f32
    %7 = vector.broadcast %cst_6 : f32 to vector<961x32xf32>
    %8 = arith.maximumf %6, %7 : vector<961x32xf32>
    %9 = arith.truncf %8 : vector<961x32xf32> to vector<961x32xbf16>
    %c0_7 = arith.constant 0 : index
    %c0_8 = arith.constant 0 : index
    %c0_9 = arith.constant 0 : index
    %10 = vector.load %arg4[%c0_7, %c0_8, %c0_9] : memref<1x961x32xbf16, #tpu.memory_space<vmem>>, vector<1x961x32xbf16>
    %11 = vector.shape_cast %10 : vector<1x961x32xbf16> to vector<961x32xbf16>
    %12 = vector.shape_cast %9 : vector<961x32xbf16> to vector<1x961x32xbf16>
    tpu.vector_store %arg4[%c0_7, %c0_8, %c0_9], %12 {strides = array<i32>} : memref<1x961x32xbf16, #tpu.memory_space<vmem>>, vector<1x961x32xbf16>,
    return
  }
  func.func @transform_0(%arg0: i32) -> (i32, i32, i32) {
    %c0_i32 = arith.constant 0 : i32
    %c0_i32_0 = arith.constant 0 : i32
    %c0_i32_1 = arith.constant 0 : i32
    return %arg0, %c0_i32, %c0_i32_0 : i32, i32, i32
  }
  func.func @transform_1(%arg0: i32) -> (i32, i32) {
    %c0_i32 = arith.constant 0 : i32
    %c0_i32_0 = arith.constant 0 : i32
    %c0_i32_1 = arith.constant 0 : i32
    return %c0_i32, %c0_i32_0 : i32, i32
  }
  func.func @transform_2(%arg0: i32) -> (i32, i32) {
    %c0_i32 = arith.constant 0 : i32
    %c0_i32_0 = arith.constant 0 : i32
    %c0_i32_1 = arith.constant 0 : i32
    return %c0_i32, %c0_i32_0 : i32, i32
  }
  func.func @transform_3(%arg0: i32) -> (i32, i32, i32) {
    %c0_i32 = arith.constant 0 : i32
    %c0_i32_0 = arith.constant 0 : i32
    %c0_i32_1 = arith.constant 0 : i32
    return %arg0, %c0_i32, %c0_i32_0 : i32, i32, i32
  }
}

module attributes {stable_mosaic.version = 11 : i64} {
  func.func @_conv_matmul_kernel(%arg0: i32, %arg1: memref<1x196x512xbf16, #tpu.memory_space<vmem>>, %arg2: memref<512x64xbf16, #tpu.memory_space<vmem>>, %arg3: memref<1x64xf32, #tpu.memory_space<vmem>>, %arg4: memref<1x196x64xbf16, #tpu.memory_space<vmem>>) attributes {dimension_semantics = [#tpu.dimension_semantics<parallel>], iteration_bounds = array<i64: 2>, scalar_prefetch = 0 : i64, scratch_operands = 0 : i64, tpu.core_type = #tpu.core_type<tc>, window_params = [{transform_indices = @transform_0, window_bounds = array<i64: 1, 196, 512>}, {pipeline_mode = #tpu.pipeline_mode<synchronous>, transform_indices = @transform_1, window_bounds = array<i64: 512, 64>}, {pipeline_mode = #tpu.pipeline_mode<synchronous>, transform_indices = @transform_2, window_bounds = array<i64: 1, 64>}, {transform_indices = @transform_3, window_bounds = array<i64: 1, 196, 64>}]} {
    %c0 = arith.constant 0 : index
    %c0_0 = arith.constant 0 : index
    %c0_1 = arith.constant 0 : index
    %0 = vector.load %arg1[%c0, %c0_0, %c0_1] : memref<1x196x512xbf16, #tpu.memory_space<vmem>>, vector<1x196x512xbf16>
    %1 = vector.shape_cast %0 : vector<1x196x512xbf16> to vector<196x512xbf16>
    %c0_2 = arith.constant 0 : index
    %c0_3 = arith.constant 0 : index
    %2 = vector.load %arg2[%c0_2, %c0_3] : memref<512x64xbf16, #tpu.memory_space<vmem>>, vector<512x64xbf16>
    %cst = arith.constant dense<0.000000e+00> : vector<196x64xf32>
    %3 = tpu.matmul %1, %2, %cst {dimension_numbers = #tpu.dot_dimension_numbers<[1], [0], [0], [1], [0, 0, 1, 1], [], []>} : vector<196x512xbf16>, vector<512x64xbf16>, vector<196x64xf32> -> vector<196x64xf32>
    %c0_4 = arith.constant 0 : index
    %c0_5 = arith.constant 0 : index
    %4 = vector.load %arg3[%c0_4, %c0_5] : memref<1x64xf32, #tpu.memory_space<vmem>>, vector<1x64xf32>
    %5 = vector.broadcast %4 : vector<1x64xf32> to vector<196x64xf32>
    %6 = arith.addf %3, %5 : vector<196x64xf32>
    %cst_6 = arith.constant 0.000000e+00 : f32
    %7 = vector.broadcast %cst_6 : f32 to vector<196x64xf32>
    %8 = arith.maximumf %6, %7 : vector<196x64xf32>
    %9 = arith.truncf %8 : vector<196x64xf32> to vector<196x64xbf16>
    %c0_7 = arith.constant 0 : index
    %c0_8 = arith.constant 0 : index
    %c0_9 = arith.constant 0 : index
    %10 = vector.load %arg4[%c0_7, %c0_8, %c0_9] : memref<1x196x64xbf16, #tpu.memory_space<vmem>>, vector<1x196x64xbf16>
    %11 = vector.shape_cast %10 : vector<1x196x64xbf16> to vector<196x64xbf16>
    %12 = vector.shape_cast %9 : vector<196x64xbf16> to vector<1x196x64xbf16>
    tpu.vector_store %arg4[%c0_7, %c0_8, %c0_9], %12 {strides = array<i32>} : memref<1x196x64xbf16, #tpu.memory_space<vmem>>, vector<1x196x64xbf16>,
    return
  }
  func.func @transform_0(%arg0: i32) -> (i32, i32, i32) {
    %c0_i32 = arith.constant 0 : i32
    %c0_i32_0 = arith.constant 0 : i32
    %c0_i32_1 = arith.constant 0 : i32
    return %arg0, %c0_i32, %c0_i32_0 : i32, i32, i32
  }
  func.func @transform_1(%arg0: i32) -> (i32, i32) {
    %c0_i32 = arith.constant 0 : i32
    %c0_i32_0 = arith.constant 0 : i32
    %c0_i32_1 = arith.constant 0 : i32
    return %c0_i32, %c0_i32_0 : i32, i32
  }
  func.func @transform_2(%arg0: i32) -> (i32, i32) {
    %c0_i32 = arith.constant 0 : i32
    %c0_i32_0 = arith.constant 0 : i32
    %c0_i32_1 = arith.constant 0 : i32
    return %c0_i32, %c0_i32_0 : i32, i32
  }
  func.func @transform_3(%arg0: i32) -> (i32, i32, i32) {
    %c0_i32 = arith.constant 0 : i32
    %c0_i32_0 = arith.constant 0 : i32
    %c0_i32_1 = arith.constant 0 : i32
    return %arg0, %c0_i32, %c0_i32_0 : i32, i32, i32
  }
}

module attributes {stable_mosaic.version = 11 : i64} {
  func.func @_conv_matmul_kernel(%arg0: i32, %arg1: memref<1x36x576xbf16, #tpu.memory_space<vmem>>, %arg2: memref<576x64xbf16, #tpu.memory_space<vmem>>, %arg3: memref<1x64xf32, #tpu.memory_space<vmem>>, %arg4: memref<1x36x64xbf16, #tpu.memory_space<vmem>>) attributes {dimension_semantics = [#tpu.dimension_semantics<parallel>], iteration_bounds = array<i64: 2>, scalar_prefetch = 0 : i64, scratch_operands = 0 : i64, tpu.core_type = #tpu.core_type<tc>, window_params = [{transform_indices = @transform_0, window_bounds = array<i64: 1, 36, 576>}, {pipeline_mode = #tpu.pipeline_mode<synchronous>, transform_indices = @transform_1, window_bounds = array<i64: 576, 64>}, {pipeline_mode = #tpu.pipeline_mode<synchronous>, transform_indices = @transform_2, window_bounds = array<i64: 1, 64>}, {transform_indices = @transform_3, window_bounds = array<i64: 1, 36, 64>}]} {
    %c0 = arith.constant 0 : index
    %c0_0 = arith.constant 0 : index
    %c0_1 = arith.constant 0 : index
    %0 = vector.load %arg1[%c0, %c0_0, %c0_1] : memref<1x36x576xbf16, #tpu.memory_space<vmem>>, vector<1x36x576xbf16>
    %1 = vector.shape_cast %0 : vector<1x36x576xbf16> to vector<36x576xbf16>
    %c0_2 = arith.constant 0 : index
    %c0_3 = arith.constant 0 : index
    %2 = vector.load %arg2[%c0_2, %c0_3] : memref<576x64xbf16, #tpu.memory_space<vmem>>, vector<576x64xbf16>
    %cst = arith.constant dense<0.000000e+00> : vector<36x64xf32>
    %3 = tpu.matmul %1, %2, %cst {dimension_numbers = #tpu.dot_dimension_numbers<[1], [0], [0], [1], [0, 0, 1, 1], [], []>} : vector<36x576xbf16>, vector<576x64xbf16>, vector<36x64xf32> -> vector<36x64xf32>
    %c0_4 = arith.constant 0 : index
    %c0_5 = arith.constant 0 : index
    %4 = vector.load %arg3[%c0_4, %c0_5] : memref<1x64xf32, #tpu.memory_space<vmem>>, vector<1x64xf32>
    %5 = vector.broadcast %4 : vector<1x64xf32> to vector<36x64xf32>
    %6 = arith.addf %3, %5 : vector<36x64xf32>
    %cst_6 = arith.constant 0.000000e+00 : f32
    %7 = vector.broadcast %cst_6 : f32 to vector<36x64xf32>
    %8 = arith.maximumf %6, %7 : vector<36x64xf32>
    %9 = arith.truncf %8 : vector<36x64xf32> to vector<36x64xbf16>
    %c0_7 = arith.constant 0 : index
    %c0_8 = arith.constant 0 : index
    %c0_9 = arith.constant 0 : index
    %10 = vector.load %arg4[%c0_7, %c0_8, %c0_9] : memref<1x36x64xbf16, #tpu.memory_space<vmem>>, vector<1x36x64xbf16>
    %11 = vector.shape_cast %10 : vector<1x36x64xbf16> to vector<36x64xbf16>
    %12 = vector.shape_cast %9 : vector<36x64xbf16> to vector<1x36x64xbf16>
    tpu.vector_store %arg4[%c0_7, %c0_8, %c0_9], %12 {strides = array<i32>} : memref<1x36x64xbf16, #tpu.memory_space<vmem>>, vector<1x36x64xbf16>,
    return
  }
  func.func @transform_0(%arg0: i32) -> (i32, i32, i32) {
    %c0_i32 = arith.constant 0 : i32
    %c0_i32_0 = arith.constant 0 : i32
    %c0_i32_1 = arith.constant 0 : i32
    return %arg0, %c0_i32, %c0_i32_0 : i32, i32, i32
  }
  func.func @transform_1(%arg0: i32) -> (i32, i32) {
    %c0_i32 = arith.constant 0 : i32
    %c0_i32_0 = arith.constant 0 : i32
    %c0_i32_1 = arith.constant 0 : i32
    return %c0_i32, %c0_i32_0 : i32, i32
  }
  func.func @transform_2(%arg0: i32) -> (i32, i32) {
    %c0_i32 = arith.constant 0 : i32
    %c0_i32_0 = arith.constant 0 : i32
    %c0_i32_1 = arith.constant 0 : i32
    return %c0_i32, %c0_i32_0 : i32, i32
  }
  func.func @transform_3(%arg0: i32) -> (i32, i32, i32) {
    %c0_i32 = arith.constant 0 : i32
    %c0_i32_0 = arith.constant 0 : i32
    %c0_i32_1 = arith.constant 0 : i32
    return %arg0, %c0_i32, %c0_i32_0 : i32, i32, i32
  }
}

module attributes {stable_mosaic.version = 11 : i64} {
  func.func @_head_kernel(%arg0: i32, %arg1: memref<8x2304xbf16, #tpu.memory_space<vmem>>, %arg2: memref<2304x512xbf16, #tpu.memory_space<vmem>>, %arg3: memref<1x512xf32, #tpu.memory_space<vmem>>, %arg4: memref<256x128xbf16, #tpu.memory_space<vmem>>, %arg5: memref<1x128xf32, #tpu.memory_space<vmem>>, %arg6: memref<256x1408xbf16, #tpu.memory_space<vmem>>, %arg7: memref<1x1408xf32, #tpu.memory_space<vmem>>, %arg8: memref<2x11x51xf32, #tpu.memory_space<vmem>>) attributes {dimension_semantics = [#tpu.dimension_semantics<arbitrary>], iteration_bounds = array<i64: 1>, scalar_prefetch = 0 : i64, scratch_operands = 0 : i64, tpu.core_type = #tpu.core_type<tc>, window_params = [{pipeline_mode = #tpu.pipeline_mode<synchronous>, transform_indices = @transform_0, window_bounds = array<i64: 8, 2304>}, {pipeline_mode = #tpu.pipeline_mode<synchronous>, transform_indices = @transform_1, window_bounds = array<i64: 2304, 512>}, {pipeline_mode = #tpu.pipeline_mode<synchronous>, transform_indices = @transform_2, window_bounds = array<i64: 1, 512>}, {pipeline_mode = #tpu.pipeline_mode<synchronous>, transform_indices = @transform_3, window_bounds = array<i64: 256, 128>}, {pipeline_mode = #tpu.pipeline_mode<synchronous>, transform_indices = @transform_4, window_bounds = array<i64: 1, 128>}, {pipeline_mode = #tpu.pipeline_mode<synchronous>, transform_indices = @transform_5, window_bounds = array<i64: 256, 1408>}, {pipeline_mode = #tpu.pipeline_mode<synchronous>, transform_indices = @transform_6, window_bounds = array<i64: 1, 1408>}, {pipeline_mode = #tpu.pipeline_mode<synchronous>, transform_indices = @transform_7, window_bounds = array<i64: 2, 11, 51>}]} {
    %c0 = arith.constant 0 : index
    %c0_0 = arith.constant 0 : index
    %0 = vector.load %arg1[%c0, %c0_0] : memref<8x2304xbf16, #tpu.memory_space<vmem>>, vector<8x2304xbf16>
    %c0_1 = arith.constant 0 : index
    %c0_2 = arith.constant 0 : index
    %1 = vector.load %arg2[%c0_1, %c0_2] : memref<2304x512xbf16, #tpu.memory_space<vmem>>, vector<2304x512xbf16>
    %cst = arith.constant dense<0.000000e+00> : vector<8x512xf32>
    %2 = tpu.matmul %0, %1, %cst {dimension_numbers = #tpu.dot_dimension_numbers<[1], [0], [0], [1], [0, 0, 1, 1], [], []>} : vector<8x2304xbf16>, vector<2304x512xbf16>, vector<8x512xf32> -> vector<8x512xf32>
    %c0_3 = arith.constant 0 : index
    %c0_4 = arith.constant 0 : index
    %3 = vector.load %arg3[%c0_3, %c0_4] : memref<1x512xf32, #tpu.memory_space<vmem>>, vector<1x512xf32>
    %4 = vector.broadcast %3 : vector<1x512xf32> to vector<8x512xf32>
    %5 = arith.addf %2, %4 : vector<8x512xf32>
    %cst_5 = arith.constant 0.000000e+00 : f32
    %6 = vector.broadcast %cst_5 : f32 to vector<8x512xf32>
    %7 = arith.maximumf %5, %6 : vector<8x512xf32>
    %8 = arith.truncf %7 : vector<8x512xf32> to vector<8x512xbf16>
    %9 = vector.extract_strided_slice %8 {offsets = [0, 0], sizes = [8, 256], strides = [1, 1]} : vector<8x512xbf16> to vector<8x256xbf16>
    %c0_6 = arith.constant 0 : index
    %c0_7 = arith.constant 0 : index
    %10 = vector.load %arg4[%c0_6, %c0_7] : memref<256x128xbf16, #tpu.memory_space<vmem>>, vector<256x128xbf16>
    %cst_8 = arith.constant dense<0.000000e+00> : vector<8x128xf32>
    %11 = tpu.matmul %9, %10, %cst_8 {dimension_numbers = #tpu.dot_dimension_numbers<[1], [0], [0], [1], [0, 0, 1, 1], [], []>} : vector<8x256xbf16>, vector<256x128xbf16>, vector<8x128xf32> -> vector<8x128xf32>
    %c0_9 = arith.constant 0 : index
    %c0_10 = arith.constant 0 : index
    %12 = vector.load %arg5[%c0_9, %c0_10] : memref<1x128xf32, #tpu.memory_space<vmem>>, vector<1x128xf32>
    %13 = vector.broadcast %12 : vector<1x128xf32> to vector<8x128xf32>
    %14 = arith.addf %11, %13 : vector<8x128xf32>
    %15 = vector.extract_strided_slice %8 {offsets = [0, 256], sizes = [8, 256], strides = [1, 1]} : vector<8x512xbf16> to vector<8x256xbf16>
    %c0_11 = arith.constant 0 : index
    %c0_12 = arith.constant 0 : index
    %16 = vector.load %arg6[%c0_11, %c0_12] : memref<256x1408xbf16, #tpu.memory_space<vmem>>, vector<256x1408xbf16>
    %cst_13 = arith.constant dense<0.000000e+00> : vector<8x1408xf32>
    %17 = tpu.matmul %15, %16, %cst_13 {dimension_numbers = #tpu.dot_dimension_numbers<[1], [0], [0], [1], [0, 0, 1, 1], [], []>} : vector<8x256xbf16>, vector<256x1408xbf16>, vector<8x1408xf32> -> vector<8x1408xf32>
    %c0_14 = arith.constant 0 : index
    %c0_15 = arith.constant 0 : index
    %18 = vector.load %arg7[%c0_14, %c0_15] : memref<1x1408xf32, #tpu.memory_space<vmem>>, vector<1x1408xf32>
    %19 = vector.broadcast %18 : vector<1x1408xf32> to vector<8x1408xf32>
    %20 = arith.addf %17, %19 : vector<8x1408xf32>
    %21 = vector.extract_strided_slice %14 {offsets = [0, 0], sizes = [2, 51], strides = [1, 1]} : vector<8x128xf32> to vector<2x51xf32>
    %22 = vector.extract_strided_slice %20 {offsets = [0, 0], sizes = [2, 51], strides = [1, 1]} : vector<8x1408xf32> to vector<2x51xf32>
    %23 = vector.extract_strided_slice %20 {offsets = [0, 128], sizes = [2, 51], strides = [1, 1]} : vector<8x1408xf32> to vector<2x51xf32>
    %24 = vector.extract_strided_slice %20 {offsets = [0, 256], sizes = [2, 51], strides = [1, 1]} : vector<8x1408xf32> to vector<2x51xf32>
    %25 = vector.extract_strided_slice %20 {offsets = [0, 384], sizes = [2, 51], strides = [1, 1]} : vector<8x1408xf32> to vector<2x51xf32>
    %26 = vector.extract_strided_slice %20 {offsets = [0, 512], sizes = [2, 51], strides = [1, 1]} : vector<8x1408xf32> to vector<2x51xf32>
    %27 = vector.extract_strided_slice %20 {offsets = [0, 640], sizes = [2, 51], strides = [1, 1]} : vector<8x1408xf32> to vector<2x51xf32>
    %28 = vector.extract_strided_slice %20 {offsets = [0, 768], sizes = [2, 51], strides = [1, 1]} : vector<8x1408xf32> to vector<2x51xf32>
    %29 = vector.extract_strided_slice %20 {offsets = [0, 896], sizes = [2, 51], strides = [1, 1]} : vector<8x1408xf32> to vector<2x51xf32>
    %30 = vector.extract_strided_slice %20 {offsets = [0, 1024], sizes = [2, 51], strides = [1, 1]} : vector<8x1408xf32> to vector<2x51xf32>
    %31 = vector.extract_strided_slice %20 {offsets = [0, 1152], sizes = [2, 51], strides = [1, 1]} : vector<8x1408xf32> to vector<2x51xf32>
    %32 = vector.extract_strided_slice %20 {offsets = [0, 1280], sizes = [2, 51], strides = [1, 1]} : vector<8x1408xf32> to vector<2x51xf32>
    %33 = arith.addf %22, %23 : vector<2x51xf32>
    %34 = arith.addf %33, %24 : vector<2x51xf32>
    %35 = arith.addf %34, %25 : vector<2x51xf32>
    %36 = arith.addf %35, %26 : vector<2x51xf32>
    %37 = arith.addf %36, %27 : vector<2x51xf32>
    %38 = arith.addf %37, %28 : vector<2x51xf32>
    %39 = arith.addf %38, %29 : vector<2x51xf32>
    %40 = arith.addf %39, %30 : vector<2x51xf32>
    %41 = arith.addf %40, %31 : vector<2x51xf32>
    %42 = arith.addf %41, %32 : vector<2x51xf32>
    %cst_16 = arith.constant 0.0909090936 : f32
    %43 = vector.broadcast %cst_16 : f32 to vector<2x51xf32>
    %44 = arith.mulf %42, %43 : vector<2x51xf32>
    %45 = arith.addf %21, %22 : vector<2x51xf32>
    %46 = arith.subf %45, %44 : vector<2x51xf32>
    %c0_17 = arith.constant 0 : index
    %c0_18 = arith.constant 0 : index
    %c0_19 = arith.constant 0 : index
    %47 = vector.load %arg8[%c0_17, %c0_18, %c0_19] : memref<2x11x51xf32, #tpu.memory_space<vmem>>, vector<2x1x51xf32>
    %48 = vector.shape_cast %47 : vector<2x1x51xf32> to vector<2x51xf32>
    %49 = vector.shape_cast %46 : vector<2x51xf32> to vector<2x1x51xf32>
    tpu.vector_store %arg8[%c0_17, %c0_18, %c0_19], %49 {strides = array<i32>} : memref<2x11x51xf32, #tpu.memory_space<vmem>>, vector<2x1x51xf32>,
    %50 = arith.addf %21, %23 : vector<2x51xf32>
    %51 = arith.subf %50, %44 : vector<2x51xf32>
    %c0_20 = arith.constant 0 : index
    %c1 = arith.constant 1 : index
    %c0_21 = arith.constant 0 : index
    %52 = vector.load %arg8[%c0_20, %c1, %c0_21] : memref<2x11x51xf32, #tpu.memory_space<vmem>>, vector<2x1x51xf32>
    %53 = vector.shape_cast %52 : vector<2x1x51xf32> to vector<2x51xf32>
    %54 = vector.shape_cast %51 : vector<2x51xf32> to vector<2x1x51xf32>
    tpu.vector_store %arg8[%c0_20, %c1, %c0_21], %54 {strides = array<i32>} : memref<2x11x51xf32, #tpu.memory_space<vmem>>, vector<2x1x51xf32>,
    %55 = arith.addf %21, %24 : vector<2x51xf32>
    %56 = arith.subf %55, %44 : vector<2x51xf32>
    %c0_22 = arith.constant 0 : index
    %c2 = arith.constant 2 : index
    %c0_23 = arith.constant 0 : index
    %57 = vector.load %arg8[%c0_22, %c2, %c0_23] : memref<2x11x51xf32, #tpu.memory_space<vmem>>, vector<2x1x51xf32>
    %58 = vector.shape_cast %57 : vector<2x1x51xf32> to vector<2x51xf32>
    %59 = vector.shape_cast %56 : vector<2x51xf32> to vector<2x1x51xf32>
    tpu.vector_store %arg8[%c0_22, %c2, %c0_23], %59 {strides = array<i32>} : memref<2x11x51xf32, #tpu.memory_space<vmem>>, vector<2x1x51xf32>,
    %60 = arith.addf %21, %25 : vector<2x51xf32>
    %61 = arith.subf %60, %44 : vector<2x51xf32>
    %c0_24 = arith.constant 0 : index
    %c3 = arith.constant 3 : index
    %c0_25 = arith.constant 0 : index
    %62 = vector.load %arg8[%c0_24, %c3, %c0_25] : memref<2x11x51xf32, #tpu.memory_space<vmem>>, vector<2x1x51xf32>
    %63 = vector.shape_cast %62 : vector<2x1x51xf32> to vector<2x51xf32>
    %64 = vector.shape_cast %61 : vector<2x51xf32> to vector<2x1x51xf32>
    tpu.vector_store %arg8[%c0_24, %c3, %c0_25], %64 {strides = array<i32>} : memref<2x11x51xf32, #tpu.memory_space<vmem>>, vector<2x1x51xf32>,
    %65 = arith.addf %21, %26 : vector<2x51xf32>
    %66 = arith.subf %65, %44 : vector<2x51xf32>
    %c0_26 = arith.constant 0 : index
    %c4 = arith.constant 4 : index
    %c0_27 = arith.constant 0 : index
    %67 = vector.load %arg8[%c0_26, %c4, %c0_27] : memref<2x11x51xf32, #tpu.memory_space<vmem>>, vector<2x1x51xf32>
    %68 = vector.shape_cast %67 : vector<2x1x51xf32> to vector<2x51xf32>
    %69 = vector.shape_cast %66 : vector<2x51xf32> to vector<2x1x51xf32>
    tpu.vector_store %arg8[%c0_26, %c4, %c0_27], %69 {strides = array<i32>} : memref<2x11x51xf32, #tpu.memory_space<vmem>>, vector<2x1x51xf32>,
    %70 = arith.addf %21, %27 : vector<2x51xf32>
    %71 = arith.subf %70, %44 : vector<2x51xf32>
    %c0_28 = arith.constant 0 : index
    %c5 = arith.constant 5 : index
    %c0_29 = arith.constant 0 : index
    %72 = vector.load %arg8[%c0_28, %c5, %c0_29] : memref<2x11x51xf32, #tpu.memory_space<vmem>>, vector<2x1x51xf32>
    %73 = vector.shape_cast %72 : vector<2x1x51xf32> to vector<2x51xf32>
    %74 = vector.shape_cast %71 : vector<2x51xf32> to vector<2x1x51xf32>
    tpu.vector_store %arg8[%c0_28, %c5, %c0_29], %74 {strides = array<i32>} : memref<2x11x51xf32, #tpu.memory_space<vmem>>, vector<2x1x51xf32>,
    %75 = arith.addf %21, %28 : vector<2x51xf32>
    %76 = arith.subf %75, %44 : vector<2x51xf32>
    %c0_30 = arith.constant 0 : index
    %c6 = arith.constant 6 : index
    %c0_31 = arith.constant 0 : index
    %77 = vector.load %arg8[%c0_30, %c6, %c0_31] : memref<2x11x51xf32, #tpu.memory_space<vmem>>, vector<2x1x51xf32>
    %78 = vector.shape_cast %77 : vector<2x1x51xf32> to vector<2x51xf32>
    %79 = vector.shape_cast %76 : vector<2x51xf32> to vector<2x1x51xf32>
    tpu.vector_store %arg8[%c0_30, %c6, %c0_31], %79 {strides = array<i32>} : memref<2x11x51xf32, #tpu.memory_space<vmem>>, vector<2x1x51xf32>,
    %80 = arith.addf %21, %29 : vector<2x51xf32>
    %81 = arith.subf %80, %44 : vector<2x51xf32>
    %c0_32 = arith.constant 0 : index
    %c7 = arith.constant 7 : index
    %c0_33 = arith.constant 0 : index
    %82 = vector.load %arg8[%c0_32, %c7, %c0_33] : memref<2x11x51xf32, #tpu.memory_space<vmem>>, vector<2x1x51xf32>
    %83 = vector.shape_cast %82 : vector<2x1x51xf32> to vector<2x51xf32>
    %84 = vector.shape_cast %81 : vector<2x51xf32> to vector<2x1x51xf32>
    tpu.vector_store %arg8[%c0_32, %c7, %c0_33], %84 {strides = array<i32>} : memref<2x11x51xf32, #tpu.memory_space<vmem>>, vector<2x1x51xf32>,
    %85 = arith.addf %21, %30 : vector<2x51xf32>
    %86 = arith.subf %85, %44 : vector<2x51xf32>
    %c0_34 = arith.constant 0 : index
    %c8 = arith.constant 8 : index
    %c0_35 = arith.constant 0 : index
    %87 = vector.load %arg8[%c0_34, %c8, %c0_35] : memref<2x11x51xf32, #tpu.memory_space<vmem>>, vector<2x1x51xf32>
    %88 = vector.shape_cast %87 : vector<2x1x51xf32> to vector<2x51xf32>
    %89 = vector.shape_cast %86 : vector<2x51xf32> to vector<2x1x51xf32>
    tpu.vector_store %arg8[%c0_34, %c8, %c0_35], %89 {strides = array<i32>} : memref<2x11x51xf32, #tpu.memory_space<vmem>>, vector<2x1x51xf32>,
    %90 = arith.addf %21, %31 : vector<2x51xf32>
    %91 = arith.subf %90, %44 : vector<2x51xf32>
    %c0_36 = arith.constant 0 : index
    %c9 = arith.constant 9 : index
    %c0_37 = arith.constant 0 : index
    %92 = vector.load %arg8[%c0_36, %c9, %c0_37] : memref<2x11x51xf32, #tpu.memory_space<vmem>>, vector<2x1x51xf32>
    %93 = vector.shape_cast %92 : vector<2x1x51xf32> to vector<2x51xf32>
    %94 = vector.shape_cast %91 : vector<2x51xf32> to vector<2x1x51xf32>
    tpu.vector_store %arg8[%c0_36, %c9, %c0_37], %94 {strides = array<i32>} : memref<2x11x51xf32, #tpu.memory_space<vmem>>, vector<2x1x51xf32>,
    %95 = arith.addf %21, %32 : vector<2x51xf32>
    %96 = arith.subf %95, %44 : vector<2x51xf32>
    %c0_38 = arith.constant 0 : index
    %c10 = arith.constant 10 : index
    %c0_39 = arith.constant 0 : index
    %97 = vector.load %arg8[%c0_38, %c10, %c0_39] : memref<2x11x51xf32, #tpu.memory_space<vmem>>, vector<2x1x51xf32>
    %98 = vector.shape_cast %97 : vector<2x1x51xf32> to vector<2x51xf32>
    %99 = vector.shape_cast %96 : vector<2x51xf32> to vector<2x1x51xf32>
    tpu.vector_store %arg8[%c0_38, %c10, %c0_39], %99 {strides = array<i32>} : memref<2x11x51xf32, #tpu.memory_space<vmem>>, vector<2x1x51xf32>,
    return
  }
  func.func @transform_0(%arg0: i32) -> (i32, i32) {
    %c0_i32 = arith.constant 0 : i32
    %c0_i32_0 = arith.constant 0 : i32
    %c0_i32_1 = arith.constant 0 : i32
    return %c0_i32, %c0_i32_0 : i32, i32
  }
  func.func @transform_1(%arg0: i32) -> (i32, i32) {
    %c0_i32 = arith.constant 0 : i32
    %c0_i32_0 = arith.constant 0 : i32
    %c0_i32_1 = arith.constant 0 : i32
    return %c0_i32, %c0_i32_0 : i32, i32
  }
  func.func @transform_2(%arg0: i32) -> (i32, i32) {
    %c0_i32 = arith.constant 0 : i32
    %c0_i32_0 = arith.constant 0 : i32
    %c0_i32_1 = arith.constant 0 : i32
    return %c0_i32, %c0_i32_0 : i32, i32
  }
  func.func @transform_3(%arg0: i32) -> (i32, i32) {
    %c0_i32 = arith.constant 0 : i32
    %c0_i32_0 = arith.constant 0 : i32
    %c0_i32_1 = arith.constant 0 : i32
    return %c0_i32, %c0_i32_0 : i32, i32
  }
  func.func @transform_4(%arg0: i32) -> (i32, i32) {
    %c0_i32 = arith.constant 0 : i32
    %c0_i32_0 = arith.constant 0 : i32
    %c0_i32_1 = arith.constant 0 : i32
    return %c0_i32, %c0_i32_0 : i32, i32
  }
  func.func @transform_5(%arg0: i32) -> (i32, i32) {
    %c0_i32 = arith.constant 0 : i32
    %c0_i32_0 = arith.constant 0 : i32
    %c0_i32_1 = arith.constant 0 : i32
    return %c0_i32, %c0_i32_0 : i32, i32
  }
  func.func @transform_6(%arg0: i32) -> (i32, i32) {
    %c0_i32 = arith.constant 0 : i32
    %c0_i32_0 = arith.constant 0 : i32
    %c0_i32_1 = arith.constant 0 : i32
    return %c0_i32, %c0_i32_0 : i32, i32
  }
  func.func @transform_7(%arg0: i32) -> (i32, i32, i32) {
    %c0_i32 = arith.constant 0 : i32
    %c0_i32_0 = arith.constant 0 : i32
    %c0_i32_1 = arith.constant 0 : i32
    %c0_i32_2 = arith.constant 0 : i32
    return %c0_i32, %c0_i32_0, %c0_i32_1 : i32, i32, i32
  }
}

</mosaic_0001>

<bundles_post_ra>
// kernel: rainbow_forward.4
= control target key start
LH: loop header
LB: loop body
LE: loop exit
PB: predicated region body
PF: predicated region fallthrough
CT: control target
= control target key end

     0   :  { %s2827_s12 = smov 0   ;;  %s3525_s0 = inlined_call_operand.vmem [shape: bf16[2,961,256], index: 0, kind: input, shape index: {}]   ;;  %s3526_s1 = inlined_call_operand.vmem [shape: bf16[256,32], index: 1, kind: input, shape index: {}]   ;;  %s3527_s2 = inlined_call_operand.vmem [shape: f32[1,32], index: 2, kind: input, shape index: {}]   ;;  %s3528_s3 = inlined_call_operand.vmem [shape: bf16[2,961,32], index: 3, kind: output, shape index: {}]  }
   0x1 LB: > { %s2081_s13 = sadd.s32 4294967295, %s2805_s12   ;;  %p2085_p0 = scmp.ge.s32.totalorder %s2805_s12, 1  ;;  %s2805_s12 = sphi %s2827_s12, %s13_s12  }
   0x2   : > { %p137_p1 = scmp.lt.s32.totalorder %s2805_s12, 3 }
   0x4   : > { %p138_p2 = pnand %p2085_p0, %p137_p1 }
   0x5   : > { %p161_p3 = scmp.lt.s32.totalorder (!%p138_p2), %s2081_s13, 1 }
   0x6   : > { %141 = sbr.rel (%p138_p2) target bundleno = 666 (0x29a), region = 32 }
   0xb   : > { %v2761_v0 = vld [vmem:[%s3526_s1 + $0x38] sm:$0xff]  ;;  %v2760_v2 = vld [vmem:[%s3526_s1 + $0x30] sm:$0xff]  ;;  %v2759_v4 = vld [vmem:[%s3526_s1 + $0x28] sm:$0xff]  ;;  %s3530_s13 = smov (!%p161_p3, %s2081_s13), 1  ;;  %vm1899_vm0 = vcmask 257024   ;;  %vm2020_vm1 = vcmask 253952  }
   0xc   : > { %v2769_v1 = vld [vmem:[%s3526_s1 + $0x78] sm:$0xff]  ;;  %1031 = vmatpush.bf16.msra.mxu0 %v2761_v0  ;;  %2770 = vmatpush.bf16.msra.mxu2 %v2761_v0  ;;  %v2768_v3 = vld [vmem:[%s3526_s1 + $0x70] sm:$0xff]  ;;  %v2767_v5 = vld [vmem:[%s3526_s1 + $0x68] sm:$0xff]  ;;  %s2786_s9 = smul.u32 968, %s3530_s13  ;;  %vm2021_vm2 = vsmask.f32 256 }
   0xd   : > { %1344 = vmatpush.bf16.msra.mxu1 %v2769_v1  ;;  %2778 = vmatpush.bf16.msra.mxu3 %v2769_v1  ;;  %v2758_v6 = vld [vmem:[%s3526_s1 + $0x20] sm:$0xff]  ;;  %v2757_v8 = vld [vmem:[%s3526_s1 + $0x18] sm:$0xff]  ;;  %v2756_v10 = vld [vmem:[%s3526_s1 + $0x10] sm:$0xff]  ;;  %s2787_s27 = smul.u32 484, %s3530_s13 }
   0xe   : > { %v2766_v7 = vld [vmem:[%s3526_s1 + $0x60] sm:$0xff]  ;;  %v2765_v9 = vld [vmem:[%s3526_s1 + $0x58] sm:$0xff]  ;;  %v2764_v11 = vld [vmem:[%s3526_s1 + $0x50] sm:$0xff]  ;;  %s2880_s18 = scalar_lea.vmem %s3525_s0, %s2786_s9 }
   0xf   : > { %v2755_v12 = vld [vmem:[%s3526_s1 + $0x8] sm:$0xff]  ;;  %v2754_v14 = vld [vmem:[%s3526_s1] sm:$0xff]  ;;  %v2696_v22 = vld [vmem:[%s2880_s18 + $0x1f4] sm:$0xf]  ;;  %s2973_s30 = scalar_lea.vmem %s3528_s3, %s2787_s27 }
  0x10   : > { %1032 = vmatpush.bf16.msra.mxu0 %v2760_v2  ;;  %2771 = vmatpush.bf16.msra.mxu2 %v2760_v2  ;;  %v2763_v13 = vld [vmem:[%s3526_s1 + $0x48] sm:$0xff]  ;;  %v2762_v15 = vld [vmem:[%s3526_s1 + $0x40] sm:$0xff]  ;;  %v2340_v23 = vld [vmem:[%s2880_s18 + $0x1f8] sm:$0xf0] }
  0x11   : > { %1345 = vmatpush.bf16.msra.mxu1 %v2768_v3  ;;  %2779 = vmatpush.bf16.msra.mxu3 %v2768_v3  ;;  %v2090_v16 = vld [vmem:[%s2880_s18] sm:$0xf]  ;;  %v2635_v17 = vld [vmem:[%s2880_s18 + $0x4] sm:$0xf0]  ;;  %v2634_v20 = vld [vmem:[%s2880_s18 + $0x4] sm:$0xf]  ;;  %v2343_v27 = vor.u32 %v2696_v22, %v2340_v23 }
  0x12   : > { %v2330_v18 = vld [vmem:[%s2880_s18 + $0x1e0] sm:$0xf]  ;;  %v2695_v19 = vld [vmem:[%s2880_s18 + $0x1e4] sm:$0xf0]  ;;  %v2092_v21 = vld [vmem:[%s2880_s18 + $0x8] sm:$0xf0]  ;;  %v2091_v24 = vor.u32 %v2635_v17, %v2090_v16 }
  0x13   : > { %v2331_v25 = vor.u32 %v2695_v19, %v2330_v18  ;;  %v2095_v26 = vor.u32 %v2634_v20, %v2092_v21  ;;  %v2098_v28 = vld [vmem:[%s2880_s18 + $0x10] sm:$0xf]  ;;  %v2637_v29 = vld [vmem:[%s2880_s18 + $0x14] sm:$0xf0]  ;;  %v2636_v32 = vld [vmem:[%s2880_s18 + $0x14] sm:$0xf] }
  0x14   : > { %1033 = vmatpush.bf16.msra.mxu0 %v2759_v4  ;;  %2772 = vmatpush.bf16.msra.mxu2 %v2759_v4  ;;  %v2338_v30 = vld [vmem:[%s2880_s18 + $0x1f0] sm:$0xf]  ;;  %v2697_v31 = vld [vmem:[%s2880_s18 + $0x1f4] sm:$0xf0]  ;;  %v2100_v33 = vld [vmem:[%s2880_s18 + $0x18] sm:$0xf0]  ;;  %v2099_v36 = vor.u32 %v2637_v29, %v2098_v28 }
  0x15   : > { %1346 = vmatpush.bf16.msra.mxu1 %v2767_v5  ;;  %2780 = vmatpush.bf16.msra.mxu3 %v2767_v5  ;;  %v2698_v34 = vld [vmem:[%s2880_s18 + $0x204] sm:$0xf]  ;;  %v2348_v35 = vld [vmem:[%s2880_s18 + $0x208] sm:$0xf0]  ;;  %v2339_v37 = vor.u32 %v2697_v31, %v2338_v30  ;;  %v2103_v38 = vor.u32 %v2636_v32, %v2100_v33  ;;  %v2106_v40 = vld [vmem:[%s2880_s18 + $0x20] sm:$0xf] }
  0x16   : > { %v2351_v39 = vor.u32 %v2698_v34, %v2348_v35  ;;  %v2639_v41 = vld [vmem:[%s2880_s18 + $0x24] sm:$0xf0]  ;;  %v2346_v42 = vld [vmem:[%s2880_s18 + $0x200] sm:$0xf]  ;;  %v2638_v44 = vld [vmem:[%s2880_s18 + $0x24] sm:$0xf] }
  0x17   : > { %v2699_v43 = vld [vmem:[%s2880_s18 + $0x204] sm:$0xf0]  ;;  %v2108_v45 = vld [vmem:[%s2880_s18 + $0x28] sm:$0xf0]  ;;  %v2700_v46 = vld [vmem:[%s2880_s18 + $0x214] sm:$0xf]  ;;  %v2107_v48 = vor.u32 %v2639_v41, %v2106_v40 }
  0x18   : > { %1034 = vmatpush.bf16.msra.mxu0 %v2758_v6  ;;  %2773 = vmatpush.bf16.msra.mxu2 %v2758_v6  ;;  %v2356_v47 = vld [vmem:[%s2880_s18 + $0x218] sm:$0xf0]  ;;  %v2347_v49 = vor.u32 %v2699_v43, %v2346_v42  ;;  %v2111_v50 = vor.u32 %v2638_v44, %v2108_v45  ;;  %v2114_v52 = vld [vmem:[%s2880_s18 + $0x30] sm:$0xf]  ;;  %v2641_v53 = vld [vmem:[%s2880_s18 + $0x34] sm:$0xf0] }
  0x19   : > { %1347 = vmatpush.bf16.msra.mxu1 %v2766_v7  ;;  %2781 = vmatpush.bf16.msra.mxu3 %v2766_v7  ;;  %v2359_v51 = vor.u32 %v2700_v46, %v2356_v47  ;;  %v2354_v54 = vld [vmem:[%s2880_s18 + $0x210] sm:$0xf]  ;;  %v2701_v55 = vld [vmem:[%s2880_s18 + $0x214] sm:$0xf0]  ;;  %v2640_v56 = vld [vmem:[%s2880_s18 + $0x34] sm:$0xf]  ;;  %v2115_v60 = vor.u32 %v2641_v53, %v2114_v52 }
  0x1a   : > { %v2116_v57 = vld [vmem:[%s2880_s18 + $0x38] sm:$0xf0]  ;;  %v2702_v58 = vld [vmem:[%s2880_s18 + $0x224] sm:$0xf]  ;;  %v2364_v59 = vld [vmem:[%s2880_s18 + $0x228] sm:$0xf0]  ;;  %v2355_v61 = vor.u32 %v2701_v55, %v2354_v54 }
  0x1b   : > { %v2119_v62 = vor.u32 %v2640_v56, %v2116_v57  ;;  %v2367_v63 = vor.u32 %v2702_v58, %v2364_v59  ;;  %v2122_v0 = vld [vmem:[%s2880_s18 + $0x40] sm:$0xf]  ;;  %v2643_v1 = vld [vmem:[%s2880_s18 + $0x44] sm:$0xf0]  ;;  %v2642_v4 = vld [vmem:[%s2880_s18 + $0x44] sm:$0xf] }
  0x1c   : > { %1035 = vmatpush.bf16.msra.mxu0 %v2757_v8  ;;  %2774 = vmatpush.bf16.msra.mxu2 %v2757_v8  ;;  %v2362_v2 = vld [vmem:[%s2880_s18 + $0x220] sm:$0xf]  ;;  %v2703_v3 = vld [vmem:[%s2880_s18 + $0x224] sm:$0xf0]  ;;  %v2124_v5 = vld [vmem:[%s2880_s18 + $0x48] sm:$0xf0]  ;;  %v2123_v8 = vor.u32 %v2643_v1, %v2122_v0 }
  0x1d   : > { %1348 = vmatpush.bf16.msra.mxu1 %v2765_v9  ;;  %2782 = vmatpush.bf16.msra.mxu3 %v2765_v9  ;;  %v2704_v6 = vld [vmem:[%s2880_s18 + $0x234] sm:$0xf]  ;;  %v2372_v7 = vld [vmem:[%s2880_s18 + $0x238] sm:$0xf0]  ;;  %v2363_v9 = vor.u32 %v2703_v3, %v2362_v2  ;;  %v2706_v18 = vld [vmem:[%s2880_s18 + $0x244] sm:$0xf] }
  0x1e   : > { %v2644_v16 = vld [vmem:[%s2880_s18 + $0x54] sm:$0xf]  ;;  %v2132_v17 = vld [vmem:[%s2880_s18 + $0x58] sm:$0xf0]  ;;  %v2380_v19 = vld [vmem:[%s2880_s18 + $0x248] sm:$0xf0] }
  0x1f   : > { %v2135_v22 = vor.u32 %v2644_v16, %v2132_v17  ;;  %v2383_v23 = vor.u32 %v2706_v18, %v2380_v19  ;;  %v2646_v28 = vld [vmem:[%s2880_s18 + $0x64] sm:$0xf]  ;;  %v2140_v29 = vld [vmem:[%s2880_s18 + $0x68] sm:$0xf0]  ;;  %v2708_v30 = vld [vmem:[%s2880_s18 + $0x254] sm:$0xf] }
  0x20   : > { %1036 = vmatpush.bf16.msra.mxu0 %v2756_v10  ;;  %2775 = vmatpush.bf16.msra.mxu2 %v2756_v10  ;;  %v2127_v10 = vor.u32 %v2642_v4, %v2124_v5  ;;  %v2388_v31 = vld [vmem:[%s2880_s18 + $0x258] sm:$0xf0]  ;;  %v2143_v34 = vor.u32 %v2646_v28, %v2140_v29  ;;  %v2648_v40 = vld [vmem:[%s2880_s18 + $0x74] sm:$0xf]  ;;  %v2710_v42 = vld [vmem:[%s2880_s18 + $0x264] sm:$0xf] }
  0x21   : > { %1349 = vmatpush.bf16.msra.mxu1 %v2764_v11  ;;  %2783 = vmatpush.bf16.msra.mxu3 %v2764_v11  ;;  %v2375_v11 = vor.u32 %v2704_v6, %v2372_v7  ;;  %v2391_v35 = vor.u32 %v2708_v30, %v2388_v31  ;;  %v2148_v41 = vld [vmem:[%s2880_s18 + $0x78] sm:$0xf0]  ;;  %v2396_v43 = vld [vmem:[%s2880_s18 + $0x268] sm:$0xf0]  ;;  %v2711_v52 = vld [vmem:[%s2880_s18 + $0x264] sm:$0xf0] }
  0x22   : > { %v2151_v46 = vor.u32 %v2648_v40, %v2148_v41  ;;  %v2399_v47 = vor.u32 %v2710_v42, %v2396_v43  ;;  %v2650_v53 = vld [vmem:[%s2880_s18 + $0x84] sm:$0xf]  ;;  %v2156_v54 = vld [vmem:[%s2880_s18 + $0x88] sm:$0xf0]  ;;  %v2712_v55 = vld [vmem:[%s2880_s18 + $0x274] sm:$0xf] }
  0x23   : > { %v2404_v56 = vld [vmem:[%s2880_s18 + $0x278] sm:$0xf0]  ;;  %v2714_v16 = vld [vmem:[%s2880_s18 + $0x284] sm:$0xf]  ;;  %v2412_v17 = vld [vmem:[%s2880_s18 + $0x288] sm:$0xf0] }
  0x24   : > { %1037 = vmatpush.bf16.msra.mxu0 %v2755_v12  ;;  %2776 = vmatpush.bf16.msra.mxu2 %v2755_v12  ;;  %v2130_v12 = vld [vmem:[%s2880_s18 + $0x50] sm:$0xf]  ;;  %v2655_v41 = vld [vmem:[%s2880_s18 + $0xa4] sm:$0xf0]  ;;  %v2410_v42 = vld [vmem:[%s2880_s18 + $0x280] sm:$0xf] }
  0x25   : > { %1350 = vmatpush.bf16.msra.mxu1 %v2763_v13  ;;  %2784 = vmatpush.bf16.msra.mxu3 %v2763_v13  ;;  %v2645_v13 = vld [vmem:[%s2880_s18 + $0x54] sm:$0xf0]  ;;  %v2715_v43 = vld [vmem:[%s2880_s18 + $0x284] sm:$0xf0]  ;;  %vm2022_vm3 = vmand %vm2020_vm1, %vm2021_vm2 }
  0x26   : > { %v2131_v20 = vor.u32 %v2645_v13, %v2130_v12  ;;  %v2713_v12 = vld [vmem:[%s2880_s18 + $0x274] sm:$0xf0]  ;;  %v2652_v13 = vld [vmem:[%s2880_s18 + $0x94] sm:$0xf] }
  0x28   : > { %1038 = vmatpush.bf16.msra.mxu0 %v2754_v14  ;;  %2777 = vmatpush.bf16.msra.mxu2 %v2754_v14  ;;  %v2370_v14 = vld [vmem:[%s2880_s18 + $0x230] sm:$0xf] }
  0x29   : > { %1351 = vmatpush.bf16.msra.mxu1 %v2762_v15  ;;  %2785 = vmatpush.bf16.msra.mxu3 %v2762_v15  ;;  %v2705_v15 = vld [vmem:[%s2880_s18 + $0x234] sm:$0xf0] }
  0x2a   : > { %v2371_v21 = vor.u32 %v2705_v15, %v2370_v14  ;;  %v2164_v14 = vld [vmem:[%s2880_s18 + $0x98] sm:$0xf0] }
  0x2b   : > { %1039 = vmatmul.bf16.vlgmr.msra.gmra.mxu0 %v2091_v24  ;;  %1189 = vmatmul.bf16.vlgmr.msra.gmra.mxu2 %v2331_v25  ;;  %v2138_v24 = vld [vmem:[%s2880_s18 + $0x60] sm:$0xf]  ;;  %v2647_v25 = vld [vmem:[%s2880_s18 + $0x64] sm:$0xf0] }
  0x2c   : > { %1352 = vmatmul.bf16.vlgmr.msra.gmra.mxu1 %v2095_v26  ;;  %1507 = vmatmul.bf16.vlgmr.msra.gmra.mxu3 %v2343_v27  ;;  %v2378_v26 = vld [vmem:[%s2880_s18 + $0x240] sm:$0xf]  ;;  %v2707_v27 = vld [vmem:[%s2880_s18 + $0x244] sm:$0xf0]  ;;  %v2139_v32 = vor.u32 %v2647_v25, %v2138_v24  ;;  %v2167_v24 = vor.u32 %v2652_v13, %v2164_v14  ;;  %v2415_v25 = vor.u32 %v2714_v16, %v2412_v17  ;;  %v2418_v16 = vld [vmem:[%s2880_s18 + $0x290] sm:$0xf] }
  0x2d   : > { %v2379_v33 = vor.u32 %v2707_v27, %v2378_v26  ;;  %v2717_v17 = vld [vmem:[%s2880_s18 + $0x294] sm:$0xf0] }
  0x3b   : > { %1044 = vmatmul.bf16.gmra.mxu0 %v2099_v36  ;;  %1194 = vmatmul.bf16.gmra.mxu2 %v2339_v37  ;;  %v2146_v36 = vld [vmem:[%s2880_s18 + $0x70] sm:$0xf]  ;;  %v2649_v37 = vld [vmem:[%s2880_s18 + $0x74] sm:$0xf0] }
  0x3c   : > { %1357 = vmatmul.bf16.gmra.mxu1 %v2103_v38  ;;  %1512 = vmatmul.bf16.gmra.mxu3 %v2351_v39  ;;  %v2386_v38 = vld [vmem:[%s2880_s18 + $0x250] sm:$0xf]  ;;  %v2709_v39 = vld [vmem:[%s2880_s18 + $0x254] sm:$0xf0]  ;;  %v2147_v44 = vor.u32 %v2649_v37, %v2146_v36 }
  0x3d   : > { %v2387_v45 = vor.u32 %v2709_v39, %v2386_v38  ;;  %v2170_v38 = vld [vmem:[%s2880_s18 + $0xa0] sm:$0xf] }
  0x4b   : > { %1049 = vmatmul.bf16.gmra.mxu0 %v2107_v48  ;;  %1199 = vmatmul.bf16.gmra.mxu2 %v2347_v49  ;;  %v2958_v48 = vld [vmem:[%s3527_s2] ss:$0 sm:$0xff] }
  0x4c   : > { %1362 = vmatmul.bf16.gmra.mxu1 %v2111_v50  ;;  %1517 = vmatmul.bf16.gmra.mxu3 %v2359_v51  ;;  %v2154_v49 = vld [vmem:[%s2880_s18 + $0x80] sm:$0xf]  ;;  %v2651_v50 = vld [vmem:[%s2880_s18 + $0x84] sm:$0xf0] }
  0x4d   : > { %v2394_v51 = vld [vmem:[%s2880_s18 + $0x260] sm:$0xf]  ;;  %v2155_v57 = vor.u32 %v2651_v50, %v2154_v49  ;;  %v2716_v49 = vld [vmem:[%s2880_s18 + $0x294] sm:$0xf]  ;;  %v2420_v50 = vld [vmem:[%s2880_s18 + $0x298] sm:$0xf0] }
  0x4e   : > { %v2395_v58 = vor.u32 %v2711_v52, %v2394_v51 }
  0x5b   : > { %1054 = vmatmul.bf16.gmra.mxu0 %v2115_v60  ;;  %1204 = vmatmul.bf16.gmra.mxu2 %v2355_v61  ;;  %v2159_v60 = vor.u32 %v2650_v53, %v2156_v54  ;;  %v2407_v61 = vor.u32 %v2712_v55, %v2404_v56  ;;  %v2171_v54 = vor.u32 %v2655_v41, %v2170_v38 }
  0x5c   : > { %1367 = vmatmul.bf16.gmra.mxu1 %v2119_v62  ;;  %1522 = vmatmul.bf16.gmra.mxu3 %v2367_v63  ;;  %v2411_v55 = vor.u32 %v2715_v43, %v2410_v42 }
  0x6b   : > { %1059 = vmatmul.bf16.gmra.mxu0 %v2123_v8  ;;  %1209 = vmatmul.bf16.gmra.mxu2 %v2363_v9  ;;  %v2162_v9 = vld [vmem:[%s2880_s18 + $0x90] sm:$0xf] }
  0x6c   : > { %1372 = vmatmul.bf16.gmra.mxu1 %v2127_v10  ;;  %1527 = vmatmul.bf16.gmra.mxu3 %v2375_v11  ;;  %v2653_v10 = vld [vmem:[%s2880_s18 + $0x94] sm:$0xf0]  ;;  %v2402_v11 = vld [vmem:[%s2880_s18 + $0x270] sm:$0xf] }
  0x7b   : > { %1064 = vmatmul.bf16.gmra.mxu0 %v2131_v20  ;;  %1214 = vmatmul.bf16.gmra.mxu2 %v2371_v21  ;;  %v2163_v20 = vor.u32 %v2653_v10, %v2162_v9  ;;  %v2403_v21 = vor.u32 %v2713_v12, %v2402_v11  ;;  %v2178_v12 = vld [vmem:[%s2880_s18 + $0xb0] sm:$0xf] }
  0x7c   : > { %1377 = vmatmul.bf16.gmra.mxu1 %v2135_v22  ;;  %1532 = vmatmul.bf16.gmra.mxu3 %v2383_v23 }
  0x8b   : > { %1069 = vmatmul.bf16.gmra.mxu0 %v2139_v32  ;;  %1219 = vmatmul.bf16.gmra.mxu2 %v2379_v33 }
  0x8c   : > { %1382 = vmatmul.bf16.gmra.mxu1 %v2143_v34  ;;  %1537 = vmatmul.bf16.gmra.mxu3 %v2391_v35 }
  0x9b   : > { %1074 = vmatmul.bf16.gmra.mxu0 %v2147_v44  ;;  %1224 = vmatmul.bf16.gmra.mxu2 %v2387_v45  ;;  %v2654_v44 = vld [vmem:[%s2880_s18 + $0xa4] sm:$0xf]  ;;  %v2172_v45 = vld [vmem:[%s2880_s18 + $0xa8] sm:$0xf0] }
  0x9c   : > { %1387 = vmatmul.bf16.gmra.mxu1 %v2151_v46  ;;  %1542 = vmatmul.bf16.gmra.mxu3 %v2399_v47 }
  0xa8   : > { %v1040_v59 = vpop.f32.mrf.mxu0 }
  0xa9   : > { %v1041_v62 = vadd.f32 %v2958_v48, %v1040_v59  ;;  %v1353_v63 = vpop.f32.mrf.mxu1  ;;  %v2423_v59 = vor.u32 %v2716_v49, %v2420_v50  ;;  %v2186_v50 = vld [vmem:[%s2880_s18 + $0xc0] sm:$0xf] }
  0xab   : > { %v1354_v0 = vadd.f32 %v1353_v63, %v1041_v62  ;;  %1079 = vmatmul.bf16.gmra.mxu0 %v2155_v57  ;;  %1229 = vmatmul.bf16.gmra.mxu2 %v2395_v58  ;;  %v2175_v58 = vor.u32 %v2654_v44, %v2172_v45 }
  0xac   : > { %1392 = vmatmul.bf16.gmra.mxu1 %v2159_v60  ;;  %1547 = vmatmul.bf16.gmra.mxu3 %v2407_v61 }
  0xad   : > { %v1657_v1 = vmax.f32 %v1354_v0, 0.0 }
  0xae   : > { %v2975_v2 = vpop.f32.mrf.mxu2 }
  0xaf   : > { %v1778_v3 = vpack.c.bf16 %v1657_v1, %v1657_v1  ;;  %v1508_v4 = vpop.f32.mrf.mxu3 }
  0xb0   : > { %v1042_v5 = vpop.f32.mrf.mxu0 }
  0xb1   : > { %1900 = vst.msk [vmem:[%s2973_s30] sm:$0xf] %vm1899_vm0, %v1778_v3  ;;  %v1043_v6 = vadd.f32 %v2958_v48, %v1042_v5  ;;  %v1355_v7 = vpop.f32.mrf.mxu1 }
  0xb3   : > { %v1356_v8 = vadd.f32 %v1355_v7, %v1043_v6 }
  0xb5   : > { %v1658_v15 = vmax.f32 %v1356_v8, 0.0 }
  0xb6   : > { %v2988_v18 = vpop.f32.mrf.mxu2 }
  0xb7   : > { %v1779_v19 = vpack.c.bf16 %v1658_v15, %v1658_v15  ;;  %v1510_v22 = vpop.f32.mrf.mxu3  ;;  %v2657_v15 = vld [vmem:[%s2880_s18 + $0xb4] sm:$0xf0] }
  0xb8   : > { %v1045_v23 = vpop.f32.mrf.mxu0 }
  0xb9   : > { %1901 = vst.msk [vmem:[%s2973_s30 + $0x4] sm:$0xf] %vm1899_vm0, %v1779_v19  ;;  %v1046_v26 = vadd.f32 %v2958_v48, %v1045_v23  ;;  %v1358_v27 = vpop.f32.mrf.mxu1  ;;  %v2656_v19 = vld [vmem:[%s2880_s18 + $0xb4] sm:$0xf]  ;;  %v2718_v23 = vld [vmem:[%s2880_s18 + $0x2a4] sm:$0xf] }
  0xbb   : > { %v1359_v28 = vadd.f32 %v1358_v27, %v1046_v26  ;;  %1084 = vmatmul.bf16.gmra.mxu0 %v2163_v20  ;;  %1234 = vmatmul.bf16.gmra.mxu2 %v2403_v21  ;;  %v2180_v20 = vld [vmem:[%s2880_s18 + $0xb8] sm:$0xf0] }
  0xbc   : > { %1397 = vmatmul.bf16.gmra.mxu1 %v2167_v24  ;;  %1552 = vmatmul.bf16.gmra.mxu3 %v2415_v25  ;;  %v2428_v24 = vld [vmem:[%s2880_s18 + $0x2a8] sm:$0xf0] }
  0xbd   : > { %v1659_v29 = vmax.f32 %v1359_v28, 0.0  ;;  %v2179_v28 = vor.u32 %v2657_v15, %v2178_v12 }
  0xbe   : > { %v1195_v30 = vpop.f32.mrf.mxu2 }
  0xbf   : > { %v1780_v31 = vpack.c.bf16 %v1659_v29, %v1659_v29  ;;  %v1196_v32 = vadd.f32 %v2958_v48, %v1195_v30  ;;  %v1513_v33 = vpop.f32.mrf.mxu3  ;;  %v2419_v29 = vor.u32 %v2717_v17, %v2418_v16 }
  0xc0   : > { %v1047_v34 = vpop.f32.mrf.mxu0 }
  0xc1   : > { %1902 = vst.msk [vmem:[%s2973_s30 + $0x8] sm:$0xf] %vm1899_vm0, %v1780_v31  ;;  %v1509_v35 = vadd.f32 %v1508_v4, %v1196_v32  ;;  %v1048_v36 = vadd.f32 %v2958_v48, %v1047_v34  ;;  %v1360_v37 = vpop.f32.mrf.mxu1  ;;  %v2183_v32 = vor.u32 %v2656_v19, %v2180_v20 }
  0xc3   : > { %v1719_v39 = vmax.f32 %v1509_v35, 0.0  ;;  %v1361_v40 = vadd.f32 %v1360_v37, %v1048_v36 }
  0xc5   : > { %v1840_v46 = vpack.c.bf16 %v1719_v39, %v1719_v39  ;;  %v1660_v47 = vmax.f32 %v1361_v40, 0.0 }
  0xc6   : > { %v1197_v51 = vpop.f32.mrf.mxu2 }
  0xc7   : > { %1962 = vst.msk [vmem:[%s2973_s30 + $0xf8] sm:$0xf] %vm1899_vm0, %v1840_v46  ;;  %v1781_v52 = vpack.c.bf16 %v1660_v47, %v1660_v47  ;;  %v1198_v53 = vadd.f32 %v2958_v48, %v1197_v51  ;;  %v1515_v56 = vpop.f32.mrf.mxu3 }
  0xc8   : > { %v1050_v57 = vpop.f32.mrf.mxu0 }
  0xc9   : > { %1903 = vst.msk [vmem:[%s2973_s30 + $0xc] sm:$0xf] %vm1899_vm0, %v1781_v52  ;;  %v1511_v60 = vadd.f32 %v1510_v22, %v1198_v53  ;;  %v1051_v61 = vadd.f32 %v2958_v48, %v1050_v57  ;;  %v1363_v62 = vpop.f32.mrf.mxu1  ;;  %v2659_v53 = vld [vmem:[%s2880_s18 + $0xc4] sm:$0xf0]  ;;  %v2188_v57 = vld [vmem:[%s2880_s18 + $0xc8] sm:$0xf0] }
  0xcb   : > { %v1720_v63 = vmax.f32 %v1511_v60, 0.0  ;;  %v1364_v0 = vadd.f32 %v1363_v62, %v1051_v61  ;;  %1089 = vmatmul.bf16.gmra.mxu0 %v2171_v54  ;;  %1239 = vmatmul.bf16.gmra.mxu2 %v2411_v55  ;;  %v2426_v54 = vld [vmem:[%s2880_s18 + $0x2a0] sm:$0xf]  ;;  %v2719_v55 = vld [vmem:[%s2880_s18 + $0x2a4] sm:$0xf0] }
  0xcc   : > { %1402 = vmatmul.bf16.gmra.mxu1 %v2175_v58  ;;  %1557 = vmatmul.bf16.gmra.mxu3 %v2423_v59  ;;  %v2720_v60 = vld [vmem:[%s2880_s18 + $0x2b4] sm:$0xf]  ;;  %v2436_v61 = vld [vmem:[%s2880_s18 + $0x2b8] sm:$0xf0] }
  0xcd   : > { %v1841_v1 = vpack.c.bf16 %v1720_v63, %v1720_v63  ;;  %v1661_v3 = vmax.f32 %v1364_v0, 0.0 }
  0xce   : > { %v1200_v4 = vpop.f32.mrf.mxu2 }
  0xcf   : > { %1963 = vst.msk [vmem:[%s2973_s30 + $0xfc] sm:$0xf] %vm1899_vm0, %v1841_v1  ;;  %v1782_v5 = vpack.c.bf16 %v1661_v3, %v1661_v3  ;;  %v1201_v6 = vadd.f32 %v2958_v48, %v1200_v4  ;;  %v1518_v7 = vpop.f32.mrf.mxu3  ;;  %v2187_v1 = vor.u32 %v2659_v53, %v2186_v50  ;;  %v2427_v3 = vor.u32 %v2719_v55, %v2426_v54 }
  0xd0   : > { %v1052_v8 = vpop.f32.mrf.mxu0 }
  0xd1   : > { %1904 = vst.msk [vmem:[%s2973_s30 + $0x10] sm:$0xf] %vm1899_vm0, %v1782_v5  ;;  %v1514_v9 = vadd.f32 %v1513_v33, %v1201_v6  ;;  %v1053_v10 = vadd.f32 %v2958_v48, %v1052_v8  ;;  %v1365_v11 = vpop.f32.mrf.mxu1  ;;  %v2431_v33 = vor.u32 %v2718_v23, %v2428_v24  ;;  %v2194_v24 = vld [vmem:[%s2880_s18 + $0xd0] sm:$0xf] }
  0xd3   : > { %v1721_v13 = vmax.f32 %v1514_v9, 0.0  ;;  %v1366_v14 = vadd.f32 %v1365_v11, %v1053_v10 }
  0xd5   : > { %v1842_v21 = vpack.c.bf16 %v1721_v13, %v1721_v13  ;;  %v1662_v22 = vmax.f32 %v1366_v14, 0.0 }
  0xd6   : > { %v1202_v25 = vpop.f32.mrf.mxu2 }
  0xd7   : > { %1964 = vst.msk [vmem:[%s2973_s30 + $0x100] sm:$0xf] %vm1899_vm0, %v1842_v21  ;;  %v1783_v26 = vpack.c.bf16 %v1662_v22, %v1662_v22  ;;  %v1203_v27 = vadd.f32 %v2958_v48, %v1202_v25  ;;  %v1520_v30 = vpop.f32.mrf.mxu3 }
  0xd8   : > { %v1055_v31 = vpop.f32.mrf.mxu0 }
  0xd9   : > { %1905 = vst.msk [vmem:[%s2973_s30 + $0x14] sm:$0xf] %vm1899_vm0, %v1783_v26  ;;  %v1516_v34 = vadd.f32 %v1515_v56, %v1203_v27  ;;  %v1056_v35 = vadd.f32 %v2958_v48, %v1055_v31  ;;  %v1368_v36 = vpop.f32.mrf.mxu1  ;;  %v2658_v56 = vld [vmem:[%s2880_s18 + $0xc4] sm:$0xf]  ;;  %v2661_v27 = vld [vmem:[%s2880_s18 + $0xd4] sm:$0xf0] }
  0xda   : > { %v2191_v6 = vor.u32 %v2658_v56, %v2188_v57  ;;  %v2196_v31 = vld [vmem:[%s2880_s18 + $0xd8] sm:$0xf0] }
  0xdb   : > { %v1722_v37 = vmax.f32 %v1516_v34, 0.0  ;;  %v1369_v38 = vadd.f32 %v1368_v36, %v1056_v35  ;;  %1094 = vmatmul.bf16.gmra.mxu0 %v2179_v28  ;;  %1244 = vmatmul.bf16.gmra.mxu2 %v2419_v29  ;;  %v2434_v28 = vld [vmem:[%s2880_s18 + $0x2b0] sm:$0xf]  ;;  %v2721_v29 = vld [vmem:[%s2880_s18 + $0x2b4] sm:$0xf0] }
  0xdc   : > { %1407 = vmatmul.bf16.gmra.mxu1 %v2183_v32  ;;  %1562 = vmatmul.bf16.gmra.mxu3 %v2431_v33  ;;  %v2722_v34 = vld [vmem:[%s2880_s18 + $0x2c4] sm:$0xf]  ;;  %v2444_v35 = vld [vmem:[%s2880_s18 + $0x2c8] sm:$0xf0] }
  0xdd   : > { %v1843_v39 = vpack.c.bf16 %v1722_v37, %v1722_v37  ;;  %v1663_v40 = vmax.f32 %v1369_v38, 0.0 }
  0xde   : > { %v1205_v41 = vpop.f32.mrf.mxu2 }
  0xdf   : > { %1965 = vst.msk [vmem:[%s2973_s30 + $0x104] sm:$0xf] %vm1899_vm0, %v1843_v39  ;;  %v1784_v42 = vpack.c.bf16 %v1663_v40, %v1663_v40  ;;  %v1206_v43 = vadd.f32 %v2958_v48, %v1205_v41  ;;  %v1523_v44 = vpop.f32.mrf.mxu3  ;;  %v2195_v39 = vor.u32 %v2661_v27, %v2194_v24  ;;  %v2435_v40 = vor.u32 %v2721_v29, %v2434_v28 }
  0xe0   : > { %v1057_v45 = vpop.f32.mrf.mxu0 }
  0xe1   : > { %1906 = vst.msk [vmem:[%s2973_s30 + $0x18] sm:$0xf] %vm1899_vm0, %v1784_v42  ;;  %v1519_v46 = vadd.f32 %v1518_v7, %v1206_v43  ;;  %v1058_v47 = vadd.f32 %v2958_v48, %v1057_v45  ;;  %v1370_v49 = vpop.f32.mrf.mxu1  ;;  %v2439_v7 = vor.u32 %v2720_v60, %v2436_v61  ;;  %v2202_v61 = vld [vmem:[%s2880_s18 + $0xe0] sm:$0xf] }
  0xe3   : > { %v1723_v51 = vmax.f32 %v1519_v46, 0.0  ;;  %v1371_v52 = vadd.f32 %v1370_v49, %v1058_v47 }
  0xe5   : > { %v1844_v58 = vpack.c.bf16 %v1723_v51, %v1723_v51  ;;  %v1664_v59 = vmax.f32 %v1371_v52, 0.0 }
  0xe6   : > { %v1207_v62 = vpop.f32.mrf.mxu2 }
  0xe7   : > { %1966 = vst.msk [vmem:[%s2973_s30 + $0x108] sm:$0xf] %vm1899_vm0, %v1844_v58  ;;  %v1785_v63 = vpack.c.bf16 %v1664_v59, %v1664_v59  ;;  %v1208_v0 = vadd.f32 %v2958_v48, %v1207_v62  ;;  %v1525_v4 = vpop.f32.mrf.mxu3 }
  0xe8   : > { %v1060_v5 = vpop.f32.mrf.mxu0 }
  0xe9   : > { %1907 = vst.msk [vmem:[%s2973_s30 + $0x1c] sm:$0xf] %vm1899_vm0, %v1785_v63  ;;  %v1521_v8 = vadd.f32 %v1520_v30, %v1208_v0  ;;  %v1061_v9 = vadd.f32 %v2958_v48, %v1060_v5  ;;  %v1373_v10 = vpop.f32.mrf.mxu1  ;;  %v2660_v30 = vld [vmem:[%s2880_s18 + $0xd4] sm:$0xf]  ;;  %v2663_v0 = vld [vmem:[%s2880_s18 + $0xe4] sm:$0xf0] }
  0xea   : > { %v2199_v43 = vor.u32 %v2660_v30, %v2196_v31  ;;  %v2204_v5 = vld [vmem:[%s2880_s18 + $0xe8] sm:$0xf0] }
  0xeb   : > { %v1724_v11 = vmax.f32 %v1521_v8, 0.0  ;;  %v1374_v12 = vadd.f32 %v1373_v10, %v1061_v9  ;;  %1099 = vmatmul.bf16.gmra.mxu0 %v2187_v1  ;;  %1249 = vmatmul.bf16.gmra.mxu2 %v2427_v3  ;;  %v2442_v1 = vld [vmem:[%s2880_s18 + $0x2c0] sm:$0xf]  ;;  %v2723_v3 = vld [vmem:[%s2880_s18 + $0x2c4] sm:$0xf0] }
  0xec   : > { %1412 = vmatmul.bf16.gmra.mxu1 %v2191_v6  ;;  %1567 = vmatmul.bf16.gmra.mxu3 %v2439_v7  ;;  %v2724_v8 = vld [vmem:[%s2880_s18 + $0x2d4] sm:$0xf]  ;;  %v2452_v9 = vld [vmem:[%s2880_s18 + $0x2d8] sm:$0xf0] }
  0xed   : > { %v1845_v13 = vpack.c.bf16 %v1724_v11, %v1724_v11  ;;  %v1665_v14 = vmax.f32 %v1374_v12, 0.0 }
  0xee   : > { %v1210_v15 = vpop.f32.mrf.mxu2 }
  0xef   : > { %1967 = vst.msk [vmem:[%s2973_s30 + $0x10c] sm:$0xf] %vm1899_vm0, %v1845_v13  ;;  %v1786_v16 = vpack.c.bf16 %v1665_v14, %v1665_v14  ;;  %v1211_v17 = vadd.f32 %v2958_v48, %v1210_v15  ;;  %v1528_v19 = vpop.f32.mrf.mxu3  ;;  %v2203_v13 = vor.u32 %v2663_v0, %v2202_v61  ;;  %v2443_v14 = vor.u32 %v2723_v3, %v2442_v1 }
  0xf0   : > { %v1062_v20 = vpop.f32.mrf.mxu0 }
  0xf1   : > { %1908 = vst.msk [vmem:[%s2973_s30 + $0x20] sm:$0xf] %vm1899_vm0, %v1786_v16  ;;  %v1524_v21 = vadd.f32 %v1523_v44, %v1211_v17  ;;  %v1063_v22 = vadd.f32 %v2958_v48, %v1062_v20  ;;  %v1375_v23 = vpop.f32.mrf.mxu1  ;;  %v2447_v44 = vor.u32 %v2722_v34, %v2444_v35  ;;  %v2210_v35 = vld [vmem:[%s2880_s18 + $0xf0] sm:$0xf] }
  0xf3   : > { %v1725_v25 = vmax.f32 %v1524_v21, 0.0  ;;  %v1376_v26 = vadd.f32 %v1375_v23, %v1063_v22 }
  0xf5   : > { %v1846_v32 = vpack.c.bf16 %v1725_v25, %v1725_v25  ;;  %v1666_v33 = vmax.f32 %v1376_v26, 0.0 }
  0xf6   : > { %v1212_v36 = vpop.f32.mrf.mxu2 }
  0xf7   : > { %1968 = vst.msk [vmem:[%s2973_s30 + $0x110] sm:$0xf] %vm1899_vm0, %v1846_v32  ;;  %v1787_v37 = vpack.c.bf16 %v1666_v33, %v1666_v33  ;;  %v1213_v38 = vadd.f32 %v2958_v48, %v1212_v36  ;;  %v1530_v41 = vpop.f32.mrf.mxu3 }
  0xf8   : > { %v1065_v42 = vpop.f32.mrf.mxu0 }
  0xf9   : > { %1909 = vst.msk [vmem:[%s2973_s30 + $0x24] sm:$0xf] %vm1899_vm0, %v1787_v37  ;;  %v1526_v45 = vadd.f32 %v1525_v4, %v1213_v38  ;;  %v1066_v46 = vadd.f32 %v2958_v48, %v1065_v42  ;;  %v1378_v47 = vpop.f32.mrf.mxu1  ;;  %v2662_v4 = vld [vmem:[%s2880_s18 + $0xe4] sm:$0xf]  ;;  %v2665_v38 = vld [vmem:[%s2880_s18 + $0xf4] sm:$0xf0] }
  0xfa   : > { %v2207_v17 = vor.u32 %v2662_v4, %v2204_v5  ;;  %v2212_v42 = vld [vmem:[%s2880_s18 + $0xf8] sm:$0xf0] }
  0xfb   : > { %v1726_v49 = vmax.f32 %v1526_v45, 0.0  ;;  %v1379_v50 = vadd.f32 %v1378_v47, %v1066_v46  ;;  %1104 = vmatmul.bf16.gmra.mxu0 %v2195_v39  ;;  %1254 = vmatmul.bf16.gmra.mxu2 %v2435_v40  ;;  %v2450_v39 = vld [vmem:[%s2880_s18 + $0x2d0] sm:$0xf]  ;;  %v2725_v40 = vld [vmem:[%s2880_s18 + $0x2d4] sm:$0xf0] }
  0xfc   : > { %1417 = vmatmul.bf16.gmra.mxu1 %v2199_v43  ;;  %1572 = vmatmul.bf16.gmra.mxu3 %v2447_v44  ;;  %v2726_v45 = vld [vmem:[%s2880_s18 + $0x2e4] sm:$0xf]  ;;  %v2460_v46 = vld [vmem:[%s2880_s18 + $0x2e8] sm:$0xf0] }
  0xfd   : > { %v1847_v51 = vpack.c.bf16 %v1726_v49, %v1726_v49  ;;  %v1667_v52 = vmax.f32 %v1379_v50, 0.0 }
  0xfe   : > { %v1215_v53 = vpop.f32.mrf.mxu2 }
  0xff   : > { %1969 = vst.msk [vmem:[%s2973_s30 + $0x114] sm:$0xf] %vm1899_vm0, %v1847_v51  ;;  %v1788_v54 = vpack.c.bf16 %v1667_v52, %v1667_v52  ;;  %v1216_v55 = vadd.f32 %v2958_v48, %v1215_v53  ;;  %v1533_v56 = vpop.f32.mrf.mxu3  ;;  %v2211_v51 = vor.u32 %v2665_v38, %v2210_v35  ;;  %v2451_v52 = vor.u32 %v2725_v40, %v2450_v39 }
 0x100   : > { %v1067_v57 = vpop.f32.mrf.mxu0 }
 0x101   : > { %1910 = vst.msk [vmem:[%s2973_s30 + $0x28] sm:$0xf] %vm1899_vm0, %v1788_v54  ;;  %v1529_v58 = vadd.f32 %v1528_v19, %v1216_v55  ;;  %v1068_v59 = vadd.f32 %v2958_v48, %v1067_v57  ;;  %v1380_v60 = vpop.f32.mrf.mxu1  ;;  %v2455_v19 = vor.u32 %v2724_v8, %v2452_v9  ;;  %v2218_v9 = vld [vmem:[%s2880_s18 + $0x100] sm:$0xf] }
 0x103   : > { %v1727_v62 = vmax.f32 %v1529_v58, 0.0  ;;  %v1381_v63 = vadd.f32 %v1380_v60, %v1068_v59 }
 0x105   : > { %v1848_v6 = vpack.c.bf16 %v1727_v62, %v1727_v62  ;;  %v1668_v7 = vmax.f32 %v1381_v63, 0.0 }
 0x106   : > { %v1217_v10 = vpop.f32.mrf.mxu2 }
 0x107   : > { %1970 = vst.msk [vmem:[%s2973_s30 + $0x118] sm:$0xf] %vm1899_vm0, %v1848_v6  ;;  %v1789_v11 = vpack.c.bf16 %v1668_v7, %v1668_v7  ;;  %v1218_v12 = vadd.f32 %v2958_v48, %v1217_v10  ;;  %v1535_v15 = vpop.f32.mrf.mxu3 }
 0x108   : > { %v1070_v16 = vpop.f32.mrf.mxu0 }
 0x109   : > { %1911 = vst.msk [vmem:[%s2973_s30 + $0x2c] sm:$0xf] %vm1899_vm0, %v1789_v11  ;;  %v1531_v20 = vadd.f32 %v1530_v41, %v1218_v12  ;;  %v1071_v21 = vadd.f32 %v2958_v48, %v1070_v16  ;;  %v1383_v22 = vpop.f32.mrf.mxu1  ;;  %v2664_v41 = vld [vmem:[%s2880_s18 + $0xf4] sm:$0xf]  ;;  %v2667_v12 = vld [vmem:[%s2880_s18 + $0x104] sm:$0xf0] }
 0x10a   : > { %v2215_v55 = vor.u32 %v2664_v41, %v2212_v42  ;;  %v2220_v16 = vld [vmem:[%s2880_s18 + $0x108] sm:$0xf0] }
 0x10b   : > { %v1728_v23 = vmax.f32 %v1531_v20, 0.0  ;;  %v1384_v24 = vadd.f32 %v1383_v22, %v1071_v21  ;;  %1109 = vmatmul.bf16.gmra.mxu0 %v2203_v13  ;;  %1259 = vmatmul.bf16.gmra.mxu2 %v2443_v14  ;;  %v2458_v13 = vld [vmem:[%s2880_s18 + $0x2e0] sm:$0xf]  ;;  %v2727_v14 = vld [vmem:[%s2880_s18 + $0x2e4] sm:$0xf0] }
 0x10c   : > { %1422 = vmatmul.bf16.gmra.mxu1 %v2207_v17  ;;  %1577 = vmatmul.bf16.gmra.mxu3 %v2455_v19  ;;  %v2728_v20 = vld [vmem:[%s2880_s18 + $0x2f4] sm:$0xf]  ;;  %v2468_v21 = vld [vmem:[%s2880_s18 + $0x2f8] sm:$0xf0] }
 0x10d   : > { %v1849_v25 = vpack.c.bf16 %v1728_v23, %v1728_v23  ;;  %v1669_v26 = vmax.f32 %v1384_v24, 0.0 }
 0x10e   : > { %v1220_v27 = vpop.f32.mrf.mxu2 }
 0x10f   : > { %1971 = vst.msk [vmem:[%s2973_s30 + $0x11c] sm:$0xf] %vm1899_vm0, %v1849_v25  ;;  %v1790_v28 = vpack.c.bf16 %v1669_v26, %v1669_v26  ;;  %v1221_v29 = vadd.f32 %v2958_v48, %v1220_v27  ;;  %v1538_v30 = vpop.f32.mrf.mxu3  ;;  %v2219_v25 = vor.u32 %v2667_v12, %v2218_v9  ;;  %v2459_v26 = vor.u32 %v2727_v14, %v2458_v13 }
 0x110   : > { %v1072_v31 = vpop.f32.mrf.mxu0 }
 0x111   : > { %1912 = vst.msk [vmem:[%s2973_s30 + $0x30] sm:$0xf] %vm1899_vm0, %v1790_v28  ;;  %v1534_v32 = vadd.f32 %v1533_v56, %v1221_v29  ;;  %v1073_v33 = vadd.f32 %v2958_v48, %v1072_v31  ;;  %v1385_v34 = vpop.f32.mrf.mxu1  ;;  %v2463_v56 = vor.u32 %v2726_v45, %v2460_v46  ;;  %v2226_v46 = vld [vmem:[%s2880_s18 + $0x110] sm:$0xf] }
 0x113   : > { %v1729_v36 = vmax.f32 %v1534_v32, 0.0  ;;  %v1386_v37 = vadd.f32 %v1385_v34, %v1073_v33 }
 0x115   : > { %v1850_v43 = vpack.c.bf16 %v1729_v36, %v1729_v36  ;;  %v1670_v44 = vmax.f32 %v1386_v37, 0.0 }
 0x116   : > { %v1222_v47 = vpop.f32.mrf.mxu2 }
 0x117   : > { %1972 = vst.msk [vmem:[%s2973_s30 + $0x120] sm:$0xf] %vm1899_vm0, %v1850_v43  ;;  %v1791_v49 = vpack.c.bf16 %v1670_v44, %v1670_v44  ;;  %v1223_v50 = vadd.f32 %v2958_v48, %v1222_v47  ;;  %v1540_v53 = vpop.f32.mrf.mxu3 }
 0x118   : > { %v1075_v54 = vpop.f32.mrf.mxu0 }
 0x119   : > { %1913 = vst.msk [vmem:[%s2973_s30 + $0x34] sm:$0xf] %vm1899_vm0, %v1791_v49  ;;  %v1536_v57 = vadd.f32 %v1535_v15, %v1223_v50  ;;  %v1076_v58 = vadd.f32 %v2958_v48, %v1075_v54  ;;  %v1388_v59 = vpop.f32.mrf.mxu1  ;;  %v2666_v15 = vld [vmem:[%s2880_s18 + $0x104] sm:$0xf]  ;;  %v2669_v50 = vld [vmem:[%s2880_s18 + $0x114] sm:$0xf0] }
 0x11a   : > { %v2223_v29 = vor.u32 %v2666_v15, %v2220_v16  ;;  %v2228_v54 = vld [vmem:[%s2880_s18 + $0x118] sm:$0xf0] }
 0x11b   : > { %v1730_v60 = vmax.f32 %v1536_v57, 0.0  ;;  %v1389_v61 = vadd.f32 %v1388_v59, %v1076_v58  ;;  %1114 = vmatmul.bf16.gmra.mxu0 %v2211_v51  ;;  %1264 = vmatmul.bf16.gmra.mxu2 %v2451_v52  ;;  %v2466_v51 = vld [vmem:[%s2880_s18 + $0x2f0] sm:$0xf]  ;;  %v2729_v52 = vld [vmem:[%s2880_s18 + $0x2f4] sm:$0xf0] }
 0x11c   : > { %1427 = vmatmul.bf16.gmra.mxu1 %v2215_v55  ;;  %1582 = vmatmul.bf16.gmra.mxu3 %v2463_v56  ;;  %v2730_v57 = vld [vmem:[%s2880_s18 + $0x304] sm:$0xf]  ;;  %v2476_v58 = vld [vmem:[%s2880_s18 + $0x308] sm:$0xf0] }
 0x11d   : > { %v1851_v62 = vpack.c.bf16 %v1730_v60, %v1730_v60  ;;  %v1671_v63 = vmax.f32 %v1389_v61, 0.0 }
 0x11e   : > { %v1225_v0 = vpop.f32.mrf.mxu2 }
 0x11f   : > { %1973 = vst.msk [vmem:[%s2973_s30 + $0x124] sm:$0xf] %vm1899_vm0, %v1851_v62  ;;  %v1792_v1 = vpack.c.bf16 %v1671_v63, %v1671_v63  ;;  %v1226_v3 = vadd.f32 %v2958_v48, %v1225_v0  ;;  %v1543_v4 = vpop.f32.mrf.mxu3  ;;  %v2227_v62 = vor.u32 %v2669_v50, %v2226_v46  ;;  %v2467_v63 = vor.u32 %v2729_v52, %v2466_v51 }
 0x120   : > { %v1077_v5 = vpop.f32.mrf.mxu0 }
 0x121   : > { %1914 = vst.msk [vmem:[%s2973_s30 + $0x38] sm:$0xf] %vm1899_vm0, %v1792_v1  ;;  %v1539_v6 = vadd.f32 %v1538_v30, %v1226_v3  ;;  %v1078_v7 = vadd.f32 %v2958_v48, %v1077_v5  ;;  %v1390_v8 = vpop.f32.mrf.mxu1  ;;  %v2471_v30 = vor.u32 %v2728_v20, %v2468_v21  ;;  %v2234_v21 = vld [vmem:[%s2880_s18 + $0x120] sm:$0xf] }
 0x123   : > { %v1731_v10 = vmax.f32 %v1539_v6, 0.0  ;;  %v1391_v11 = vadd.f32 %v1390_v8, %v1078_v7 }
 0x125   : > { %v1852_v17 = vpack.c.bf16 %v1731_v10, %v1731_v10  ;;  %v1672_v19 = vmax.f32 %v1391_v11, 0.0 }
 0x126   : > { %v1227_v22 = vpop.f32.mrf.mxu2 }
 0x127   : > { %1974 = vst.msk [vmem:[%s2973_s30 + $0x128] sm:$0xf] %vm1899_vm0, %v1852_v17  ;;  %v1793_v23 = vpack.c.bf16 %v1672_v19, %v1672_v19  ;;  %v1228_v24 = vadd.f32 %v2958_v48, %v1227_v22  ;;  %v1545_v27 = vpop.f32.mrf.mxu3 }
 0x128   : > { %v1080_v28 = vpop.f32.mrf.mxu0 }
 0x129   : > { %1915 = vst.msk [vmem:[%s2973_s30 + $0x3c] sm:$0xf] %vm1899_vm0, %v1793_v23  ;;  %v1541_v31 = vadd.f32 %v1540_v53, %v1228_v24  ;;  %v1081_v32 = vadd.f32 %v2958_v48, %v1080_v28  ;;  %v1393_v33 = vpop.f32.mrf.mxu1  ;;  %v2668_v53 = vld [vmem:[%s2880_s18 + $0x114] sm:$0xf]  ;;  %v2671_v24 = vld [vmem:[%s2880_s18 + $0x124] sm:$0xf0] }
 0x12a   : > { %v2231_v3 = vor.u32 %v2668_v53, %v2228_v54  ;;  %v2236_v28 = vld [vmem:[%s2880_s18 + $0x128] sm:$0xf0] }
 0x12b   : > { %v1732_v34 = vmax.f32 %v1541_v31, 0.0  ;;  %v1394_v35 = vadd.f32 %v1393_v33, %v1081_v32  ;;  %1119 = vmatmul.bf16.gmra.mxu0 %v2219_v25  ;;  %1269 = vmatmul.bf16.gmra.mxu2 %v2459_v26  ;;  %v2474_v25 = vld [vmem:[%s2880_s18 + $0x300] sm:$0xf]  ;;  %v2731_v26 = vld [vmem:[%s2880_s18 + $0x304] sm:$0xf0] }
 0x12c   : > { %1432 = vmatmul.bf16.gmra.mxu1 %v2223_v29  ;;  %1587 = vmatmul.bf16.gmra.mxu3 %v2471_v30  ;;  %v2732_v31 = vld [vmem:[%s2880_s18 + $0x314] sm:$0xf]  ;;  %v2484_v32 = vld [vmem:[%s2880_s18 + $0x318] sm:$0xf0] }
 0x12d   : > { %v1853_v36 = vpack.c.bf16 %v1732_v34, %v1732_v34  ;;  %v1673_v37 = vmax.f32 %v1394_v35, 0.0 }
 0x12e   : > { %v1230_v38 = vpop.f32.mrf.mxu2 }
 0x12f   : > { %1975 = vst.msk [vmem:[%s2973_s30 + $0x12c] sm:$0xf] %vm1899_vm0, %v1853_v36  ;;  %v1794_v39 = vpack.c.bf16 %v1673_v37, %v1673_v37  ;;  %v1231_v40 = vadd.f32 %v2958_v48, %v1230_v38  ;;  %v1548_v41 = vpop.f32.mrf.mxu3  ;;  %v2235_v36 = vor.u32 %v2671_v24, %v2234_v21  ;;  %v2475_v37 = vor.u32 %v2731_v26, %v2474_v25 }
 0x130   : > { %v1082_v42 = vpop.f32.mrf.mxu0 }
 0x131   : > { %1916 = vst.msk [vmem:[%s2973_s30 + $0x40] sm:$0xf] %vm1899_vm0, %v1794_v39  ;;  %v1544_v43 = vadd.f32 %v1543_v4, %v1231_v40  ;;  %v1083_v44 = vadd.f32 %v2958_v48, %v1082_v42  ;;  %v1395_v45 = vpop.f32.mrf.mxu1  ;;  %v2479_v4 = vor.u32 %v2730_v57, %v2476_v58  ;;  %v2242_v58 = vld [vmem:[%s2880_s18 + $0x130] sm:$0xf] }
 0x133   : > { %v1733_v47 = vmax.f32 %v1544_v43, 0.0  ;;  %v1396_v49 = vadd.f32 %v1395_v45, %v1083_v44 }
 0x135   : > { %v1854_v55 = vpack.c.bf16 %v1733_v47, %v1733_v47  ;;  %v1674_v56 = vmax.f32 %v1396_v49, 0.0 }
 0x136   : > { %v1232_v59 = vpop.f32.mrf.mxu2 }
 0x137   : > { %1976 = vst.msk [vmem:[%s2973_s30 + $0x130] sm:$0xf] %vm1899_vm0, %v1854_v55  ;;  %v1795_v60 = vpack.c.bf16 %v1674_v56, %v1674_v56  ;;  %v1233_v61 = vadd.f32 %v2958_v48, %v1232_v59  ;;  %v1550_v0 = vpop.f32.mrf.mxu3 }
 0x138   : > { %v1085_v1 = vpop.f32.mrf.mxu0 }
 0x139   : > { %1917 = vst.msk [vmem:[%s2973_s30 + $0x44] sm:$0xf] %vm1899_vm0, %v1795_v60  ;;  %v1546_v5 = vadd.f32 %v1545_v27, %v1233_v61  ;;  %v1086_v6 = vadd.f32 %v2958_v48, %v1085_v1  ;;  %v1398_v7 = vpop.f32.mrf.mxu1  ;;  %v2670_v27 = vld [vmem:[%s2880_s18 + $0x124] sm:$0xf]  ;;  %v2673_v61 = vld [vmem:[%s2880_s18 + $0x134] sm:$0xf0] }
 0x13a   : > { %v2239_v40 = vor.u32 %v2670_v27, %v2236_v28  ;;  %v2244_v1 = vld [vmem:[%s2880_s18 + $0x138] sm:$0xf0] }
 0x13b   : > { %v1734_v8 = vmax.f32 %v1546_v5, 0.0  ;;  %v1399_v9 = vadd.f32 %v1398_v7, %v1086_v6  ;;  %1124 = vmatmul.bf16.gmra.mxu0 %v2227_v62  ;;  %1274 = vmatmul.bf16.gmra.mxu2 %v2467_v63  ;;  %v2482_v62 = vld [vmem:[%s2880_s18 + $0x310] sm:$0xf]  ;;  %v2733_v63 = vld [vmem:[%s2880_s18 + $0x314] sm:$0xf0] }
 0x13c   : > { %1437 = vmatmul.bf16.gmra.mxu1 %v2231_v3  ;;  %1592 = vmatmul.bf16.gmra.mxu3 %v2479_v4  ;;  %v2734_v5 = vld [vmem:[%s2880_s18 + $0x324] sm:$0xf]  ;;  %v2492_v6 = vld [vmem:[%s2880_s18 + $0x328] sm:$0xf0] }
 0x13d   : > { %v1855_v10 = vpack.c.bf16 %v1734_v8, %v1734_v8  ;;  %v1675_v11 = vmax.f32 %v1399_v9, 0.0 }
 0x13e   : > { %v1235_v12 = vpop.f32.mrf.mxu2 }
 0x13f   : > { %1977 = vst.msk [vmem:[%s2973_s30 + $0x134] sm:$0xf] %vm1899_vm0, %v1855_v10  ;;  %v1796_v13 = vpack.c.bf16 %v1675_v11, %v1675_v11  ;;  %v1236_v14 = vadd.f32 %v2958_v48, %v1235_v12  ;;  %v1553_v15 = vpop.f32.mrf.mxu3  ;;  %v2243_v10 = vor.u32 %v2673_v61, %v2242_v58  ;;  %v2483_v11 = vor.u32 %v2733_v63, %v2482_v62 }
 0x140   : > { %v1087_v16 = vpop.f32.mrf.mxu0 }
 0x141   : > { %1918 = vst.msk [vmem:[%s2973_s30 + $0x48] sm:$0xf] %vm1899_vm0, %v1796_v13  ;;  %v1549_v17 = vadd.f32 %v1548_v41, %v1236_v14  ;;  %v1088_v19 = vadd.f32 %v2958_v48, %v1087_v16  ;;  %v1400_v20 = vpop.f32.mrf.mxu1  ;;  %v2487_v41 = vor.u32 %v2732_v31, %v2484_v32  ;;  %v2250_v32 = vld [vmem:[%s2880_s18 + $0x140] sm:$0xf] }
 0x143   : > { %v1735_v22 = vmax.f32 %v1549_v17, 0.0  ;;  %v1401_v23 = vadd.f32 %v1400_v20, %v1088_v19 }
 0x145   : > { %v1856_v29 = vpack.c.bf16 %v1735_v22, %v1735_v22  ;;  %v1676_v30 = vmax.f32 %v1401_v23, 0.0 }
 0x146   : > { %v1237_v33 = vpop.f32.mrf.mxu2 }
 0x147   : > { %1978 = vst.msk [vmem:[%s2973_s30 + $0x138] sm:$0xf] %vm1899_vm0, %v1856_v29  ;;  %v1797_v34 = vpack.c.bf16 %v1676_v30, %v1676_v30  ;;  %v1238_v35 = vadd.f32 %v2958_v48, %v1237_v33  ;;  %v1555_v38 = vpop.f32.mrf.mxu3 }
 0x148   : > { %v1090_v39 = vpop.f32.mrf.mxu0 }
 0x149   : > { %1919 = vst.msk [vmem:[%s2973_s30 + $0x4c] sm:$0xf] %vm1899_vm0, %v1797_v34  ;;  %v1551_v42 = vadd.f32 %v1550_v0, %v1238_v35  ;;  %v1091_v43 = vadd.f32 %v2958_v48, %v1090_v39  ;;  %v1403_v44 = vpop.f32.mrf.mxu1  ;;  %v2672_v0 = vld [vmem:[%s2880_s18 + $0x134] sm:$0xf]  ;;  %v2675_v35 = vld [vmem:[%s2880_s18 + $0x144] sm:$0xf0] }
 0x14a   : > { %v2247_v14 = vor.u32 %v2672_v0, %v2244_v1  ;;  %v2252_v39 = vld [vmem:[%s2880_s18 + $0x148] sm:$0xf0] }
 0x14b   : > { %v1736_v45 = vmax.f32 %v1551_v42, 0.0  ;;  %v1404_v46 = vadd.f32 %v1403_v44, %v1091_v43  ;;  %1129 = vmatmul.bf16.gmra.mxu0 %v2235_v36  ;;  %1279 = vmatmul.bf16.gmra.mxu2 %v2475_v37  ;;  %v2490_v36 = vld [vmem:[%s2880_s18 + $0x320] sm:$0xf]  ;;  %v2735_v37 = vld [vmem:[%s2880_s18 + $0x324] sm:$0xf0] }
 0x14c   : > { %1442 = vmatmul.bf16.gmra.mxu1 %v2239_v40  ;;  %1597 = vmatmul.bf16.gmra.mxu3 %v2487_v41  ;;  %v2736_v42 = vld [vmem:[%s2880_s18 + $0x334] sm:$0xf]  ;;  %v2500_v43 = vld [vmem:[%s2880_s18 + $0x338] sm:$0xf0] }
 0x14d   : > { %v1857_v47 = vpack.c.bf16 %v1736_v45, %v1736_v45  ;;  %v1677_v49 = vmax.f32 %v1404_v46, 0.0 }
 0x14e   : > { %v1240_v50 = vpop.f32.mrf.mxu2 }
 0x14f   : > { %1979 = vst.msk [vmem:[%s2973_s30 + $0x13c] sm:$0xf] %vm1899_vm0, %v1857_v47  ;;  %v1798_v51 = vpack.c.bf16 %v1677_v49, %v1677_v49  ;;  %v1241_v52 = vadd.f32 %v2958_v48, %v1240_v50  ;;  %v1558_v53 = vpop.f32.mrf.mxu3  ;;  %v2251_v47 = vor.u32 %v2675_v35, %v2250_v32  ;;  %v2491_v49 = vor.u32 %v2735_v37, %v2490_v36 }
 0x150   : > { %v1092_v54 = vpop.f32.mrf.mxu0 }
 0x151   : > { %1920 = vst.msk [vmem:[%s2973_s30 + $0x50] sm:$0xf] %vm1899_vm0, %v1798_v51  ;;  %v1554_v55 = vadd.f32 %v1553_v15, %v1241_v52  ;;  %v1093_v56 = vadd.f32 %v2958_v48, %v1092_v54  ;;  %v1405_v57 = vpop.f32.mrf.mxu1  ;;  %v2495_v15 = vor.u32 %v2734_v5, %v2492_v6  ;;  %v2258_v6 = vld [vmem:[%s2880_s18 + $0x150] sm:$0xf] }
 0x153   : > { %v1737_v59 = vmax.f32 %v1554_v55, 0.0  ;;  %v1406_v60 = vadd.f32 %v1405_v57, %v1093_v56 }
 0x155   : > { %v1858_v3 = vpack.c.bf16 %v1737_v59, %v1737_v59  ;;  %v1678_v4 = vmax.f32 %v1406_v60, 0.0 }
 0x156   : > { %v1242_v7 = vpop.f32.mrf.mxu2 }
 0x157   : > { %1980 = vst.msk [vmem:[%s2973_s30 + $0x140] sm:$0xf] %vm1899_vm0, %v1858_v3  ;;  %v1799_v8 = vpack.c.bf16 %v1678_v4, %v1678_v4  ;;  %v1243_v9 = vadd.f32 %v2958_v48, %v1242_v7  ;;  %v1560_v12 = vpop.f32.mrf.mxu3 }
 0x158   : > { %v1095_v13 = vpop.f32.mrf.mxu0 }
 0x159   : > { %1921 = vst.msk [vmem:[%s2973_s30 + $0x54] sm:$0xf] %vm1899_vm0, %v1799_v8  ;;  %v1556_v16 = vadd.f32 %v1555_v38, %v1243_v9  ;;  %v1096_v17 = vadd.f32 %v2958_v48, %v1095_v13  ;;  %v1408_v19 = vpop.f32.mrf.mxu1  ;;  %v2674_v38 = vld [vmem:[%s2880_s18 + $0x144] sm:$0xf]  ;;  %v2677_v9 = vld [vmem:[%s2880_s18 + $0x154] sm:$0xf0] }
 0x15a   : > { %v2255_v52 = vor.u32 %v2674_v38, %v2252_v39  ;;  %v2260_v13 = vld [vmem:[%s2880_s18 + $0x158] sm:$0xf0] }
 0x15b   : > { %v1738_v20 = vmax.f32 %v1556_v16, 0.0  ;;  %v1409_v21 = vadd.f32 %v1408_v19, %v1096_v17  ;;  %1134 = vmatmul.bf16.gmra.mxu0 %v2243_v10  ;;  %1284 = vmatmul.bf16.gmra.mxu2 %v2483_v11  ;;  %v2498_v10 = vld [vmem:[%s2880_s18 + $0x330] sm:$0xf]  ;;  %v2737_v11 = vld [vmem:[%s2880_s18 + $0x334] sm:$0xf0] }
 0x15c   : > { %1447 = vmatmul.bf16.gmra.mxu1 %v2247_v14  ;;  %1602 = vmatmul.bf16.gmra.mxu3 %v2495_v15  ;;  %v2738_v16 = vld [vmem:[%s2880_s18 + $0x344] sm:$0xf]  ;;  %v2508_v17 = vld [vmem:[%s2880_s18 + $0x348] sm:$0xf0] }
 0x15d   : > { %v1859_v22 = vpack.c.bf16 %v1738_v20, %v1738_v20  ;;  %v1679_v23 = vmax.f32 %v1409_v21, 0.0 }
 0x15e   : > { %v1245_v24 = vpop.f32.mrf.mxu2 }
 0x15f   : > { %1981 = vst.msk [vmem:[%s2973_s30 + $0x144] sm:$0xf] %vm1899_vm0, %v1859_v22  ;;  %v1800_v25 = vpack.c.bf16 %v1679_v23, %v1679_v23  ;;  %v1246_v26 = vadd.f32 %v2958_v48, %v1245_v24  ;;  %v1563_v27 = vpop.f32.mrf.mxu3  ;;  %v2259_v22 = vor.u32 %v2677_v9, %v2258_v6  ;;  %v2499_v23 = vor.u32 %v2737_v11, %v2498_v10 }
 0x160   : > { %v1097_v28 = vpop.f32.mrf.mxu0 }
 0x161   : > { %1922 = vst.msk [vmem:[%s2973_s30 + $0x58] sm:$0xf] %vm1899_vm0, %v1800_v25  ;;  %v1559_v29 = vadd.f32 %v1558_v53, %v1246_v26  ;;  %v1098_v30 = vadd.f32 %v2958_v48, %v1097_v28  ;;  %v1410_v31 = vpop.f32.mrf.mxu1  ;;  %v3210_v48 = vld [vmem:[%s3527_s2] ss:$0 sm:$0xff]  ;;  %v2503_v53 = vor.u32 %v2736_v42, %v2500_v43 }
 0x162   : > { %v2266_v43 = vld [vmem:[%s2880_s18 + $0x160] sm:$0xf] }
 0x163   : > { %v1739_v33 = vmax.f32 %v1559_v29, 0.0  ;;  %v1411_v34 = vadd.f32 %v1410_v31, %v1098_v30 }
 0x165   : > { %v1860_v40 = vpack.c.bf16 %v1739_v33, %v1739_v33  ;;  %v1680_v41 = vmax.f32 %v1411_v34, 0.0 }
 0x166   : > { %v1247_v44 = vpop.f32.mrf.mxu2 }
 0x167   : > { %1982 = vst.msk [vmem:[%s2973_s30 + $0x148] sm:$0xf] %vm1899_vm0, %v1860_v40  ;;  %v1801_v45 = vpack.c.bf16 %v1680_v41, %v1680_v41  ;;  %v1248_v46 = vadd.f32 %v3210_v48, %v1247_v44  ;;  %v1565_v50 = vpop.f32.mrf.mxu3 }
 0x168   : > { %v1100_v51 = vpop.f32.mrf.mxu0 }
 0x169   : > { %1923 = vst.msk [vmem:[%s2973_s30 + $0x5c] sm:$0xf] %vm1899_vm0, %v1801_v45  ;;  %v1561_v54 = vadd.f32 %v1560_v12, %v1248_v46  ;;  %v1101_v55 = vadd.f32 %v3210_v48, %v1100_v51  ;;  %v1413_v56 = vpop.f32.mrf.mxu1  ;;  %v2676_v12 = vld [vmem:[%s2880_s18 + $0x154] sm:$0xf]  ;;  %v2679_v46 = vld [vmem:[%s2880_s18 + $0x164] sm:$0xf0] }
 0x16a   : > { %v2263_v26 = vor.u32 %v2676_v12, %v2260_v13  ;;  %v2268_v51 = vld [vmem:[%s2880_s18 + $0x168] sm:$0xf0] }
 0x16b   : > { %v1740_v57 = vmax.f32 %v1561_v54, 0.0  ;;  %v1414_v58 = vadd.f32 %v1413_v56, %v1101_v55  ;;  %1139 = vmatmul.bf16.gmra.mxu0 %v2251_v47  ;;  %1289 = vmatmul.bf16.gmra.mxu2 %v2491_v49  ;;  %v2506_v47 = vld [vmem:[%s2880_s18 + $0x340] sm:$0xf]  ;;  %v2739_v49 = vld [vmem:[%s2880_s18 + $0x344] sm:$0xf0] }
 0x16c   : > { %1452 = vmatmul.bf16.gmra.mxu1 %v2255_v52  ;;  %1607 = vmatmul.bf16.gmra.mxu3 %v2503_v53  ;;  %v2740_v54 = vld [vmem:[%s2880_s18 + $0x354] sm:$0xf]  ;;  %v2516_v55 = vld [vmem:[%s2880_s18 + $0x358] sm:$0xf0] }
 0x16d   : > { %v1861_v59 = vpack.c.bf16 %v1740_v57, %v1740_v57  ;;  %v1681_v60 = vmax.f32 %v1414_v58, 0.0 }
 0x16e   : > { %v1250_v61 = vpop.f32.mrf.mxu2 }
 0x16f   : > { %1983 = vst.msk [vmem:[%s2973_s30 + $0x14c] sm:$0xf] %vm1899_vm0, %v1861_v59  ;;  %v1802_v62 = vpack.c.bf16 %v1681_v60, %v1681_v60  ;;  %v1251_v63 = vadd.f32 %v3210_v48, %v1250_v61  ;;  %v1568_v0 = vpop.f32.mrf.mxu3  ;;  %v2267_v59 = vor.u32 %v2679_v46, %v2266_v43  ;;  %v2507_v60 = vor.u32 %v2739_v49, %v2506_v47 }
 0x170   : > { %v1102_v1 = vpop.f32.mrf.mxu0 }
 0x171   : > { %1924 = vst.msk [vmem:[%s2973_s30 + $0x60] sm:$0xf] %vm1899_vm0, %v1802_v62  ;;  %v1564_v3 = vadd.f32 %v1563_v27, %v1251_v63  ;;  %v1103_v4 = vadd.f32 %v3210_v48, %v1102_v1  ;;  %v1415_v5 = vpop.f32.mrf.mxu1  ;;  %v2511_v27 = vor.u32 %v2738_v16, %v2508_v17  ;;  %v2274_v17 = vld [vmem:[%s2880_s18 + $0x170] sm:$0xf] }
 0x173   : > { %v1741_v7 = vmax.f32 %v1564_v3, 0.0  ;;  %v1416_v8 = vadd.f32 %v1415_v5, %v1103_v4 }
 0x175   : > { %v1862_v14 = vpack.c.bf16 %v1741_v7, %v1741_v7  ;;  %v1682_v15 = vmax.f32 %v1416_v8, 0.0 }
 0x176   : > { %v1252_v19 = vpop.f32.mrf.mxu2 }
 0x177   : > { %1984 = vst.msk [vmem:[%s2973_s30 + $0x150] sm:$0xf] %vm1899_vm0, %v1862_v14  ;;  %v1803_v20 = vpack.c.bf16 %v1682_v15, %v1682_v15  ;;  %v1253_v21 = vadd.f32 %v3210_v48, %v1252_v19  ;;  %v1570_v24 = vpop.f32.mrf.mxu3 }
 0x178   : > { %v1105_v25 = vpop.f32.mrf.mxu0 }
 0x179   : > { %1925 = vst.msk [vmem:[%s2973_s30 + $0x64] sm:$0xf] %vm1899_vm0, %v1803_v20  ;;  %v1566_v28 = vadd.f32 %v1565_v50, %v1253_v21  ;;  %v1106_v29 = vadd.f32 %v3210_v48, %v1105_v25  ;;  %v1418_v30 = vpop.f32.mrf.mxu1  ;;  %v2678_v50 = vld [vmem:[%s2880_s18 + $0x164] sm:$0xf]  ;;  %v2681_v21 = vld [vmem:[%s2880_s18 + $0x174] sm:$0xf0] }
 0x17a   : > { %v2271_v63 = vor.u32 %v2678_v50, %v2268_v51  ;;  %v2276_v25 = vld [vmem:[%s2880_s18 + $0x178] sm:$0xf0] }
 0x17b   : > { %v1742_v31 = vmax.f32 %v1566_v28, 0.0  ;;  %v1419_v32 = vadd.f32 %v1418_v30, %v1106_v29  ;;  %1144 = vmatmul.bf16.gmra.mxu0 %v2259_v22  ;;  %1294 = vmatmul.bf16.gmra.mxu2 %v2499_v23  ;;  %v2514_v22 = vld [vmem:[%s2880_s18 + $0x350] sm:$0xf]  ;;  %v2741_v23 = vld [vmem:[%s2880_s18 + $0x354] sm:$0xf0] }
 0x17c   : > { %1457 = vmatmul.bf16.gmra.mxu1 %v2263_v26  ;;  %1612 = vmatmul.bf16.gmra.mxu3 %v2511_v27  ;;  %v2742_v28 = vld [vmem:[%s2880_s18 + $0x364] sm:$0xf]  ;;  %v2524_v29 = vld [vmem:[%s2880_s18 + $0x368] sm:$0xf0] }
 0x17d   : > { %v1863_v33 = vpack.c.bf16 %v1742_v31, %v1742_v31  ;;  %v1683_v34 = vmax.f32 %v1419_v32, 0.0 }
 0x17e   : > { %v1255_v35 = vpop.f32.mrf.mxu2 }
 0x17f   : > { %1985 = vst.msk [vmem:[%s2973_s30 + $0x154] sm:$0xf] %vm1899_vm0, %v1863_v33  ;;  %v1804_v36 = vpack.c.bf16 %v1683_v34, %v1683_v34  ;;  %v1256_v37 = vadd.f32 %v3210_v48, %v1255_v35  ;;  %v1573_v38 = vpop.f32.mrf.mxu3  ;;  %v2275_v33 = vor.u32 %v2681_v21, %v2274_v17  ;;  %v2515_v34 = vor.u32 %v2741_v23, %v2514_v22 }
 0x180   : > { %v1107_v39 = vpop.f32.mrf.mxu0 }
 0x181   : > { %1926 = vst.msk [vmem:[%s2973_s30 + $0x68] sm:$0xf] %vm1899_vm0, %v1804_v36  ;;  %v1569_v40 = vadd.f32 %v1568_v0, %v1256_v37  ;;  %v1108_v41 = vadd.f32 %v3210_v48, %v1107_v39  ;;  %v1420_v42 = vpop.f32.mrf.mxu1  ;;  %v2519_v0 = vor.u32 %v2740_v54, %v2516_v55  ;;  %v2282_v55 = vld [vmem:[%s2880_s18 + $0x180] sm:$0xf] }
 0x183   : > { %v1743_v44 = vmax.f32 %v1569_v40, 0.0  ;;  %v1421_v45 = vadd.f32 %v1420_v42, %v1108_v41 }
 0x185   : > { %v1864_v52 = vpack.c.bf16 %v1743_v44, %v1743_v44  ;;  %v1684_v53 = vmax.f32 %v1421_v45, 0.0 }
 0x186   : > { %v1257_v56 = vpop.f32.mrf.mxu2 }
 0x187   : > { %1986 = vst.msk [vmem:[%s2973_s30 + $0x158] sm:$0xf] %vm1899_vm0, %v1864_v52  ;;  %v1805_v57 = vpack.c.bf16 %v1684_v53, %v1684_v53  ;;  %v1258_v58 = vadd.f32 %v3210_v48, %v1257_v56  ;;  %v1575_v61 = vpop.f32.mrf.mxu3 }
 0x188   : > { %v1110_v62 = vpop.f32.mrf.mxu0 }
 0x189   : > { %1927 = vst.msk [vmem:[%s2973_s30 + $0x6c] sm:$0xf] %vm1899_vm0, %v1805_v57  ;;  %v1571_v1 = vadd.f32 %v1570_v24, %v1258_v58  ;;  %v1111_v3 = vadd.f32 %v3210_v48, %v1110_v62  ;;  %v1423_v4 = vpop.f32.mrf.mxu1  ;;  %v2680_v24 = vld [vmem:[%s2880_s18 + $0x174] sm:$0xf]  ;;  %v2683_v58 = vld [vmem:[%s2880_s18 + $0x184] sm:$0xf0] }
 0x18a   : > { %v2279_v37 = vor.u32 %v2680_v24, %v2276_v25  ;;  %v2284_v62 = vld [vmem:[%s2880_s18 + $0x188] sm:$0xf0] }
 0x18b   : > { %v1744_v5 = vmax.f32 %v1571_v1, 0.0  ;;  %v1424_v6 = vadd.f32 %v1423_v4, %v1111_v3  ;;  %1149 = vmatmul.bf16.gmra.mxu0 %v2267_v59  ;;  %1299 = vmatmul.bf16.gmra.mxu2 %v2507_v60  ;;  %v2522_v59 = vld [vmem:[%s2880_s18 + $0x360] sm:$0xf]  ;;  %v2743_v60 = vld [vmem:[%s2880_s18 + $0x364] sm:$0xf0] }
 0x18c   : > { %1462 = vmatmul.bf16.gmra.mxu1 %v2271_v63  ;;  %1617 = vmatmul.bf16.gmra.mxu3 %v2519_v0  ;;  %v2744_v1 = vld [vmem:[%s2880_s18 + $0x374] sm:$0xf]  ;;  %v2532_v3 = vld [vmem:[%s2880_s18 + $0x378] sm:$0xf0] }
 0x18d   : > { %v1865_v7 = vpack.c.bf16 %v1744_v5, %v1744_v5  ;;  %v1685_v8 = vmax.f32 %v1424_v6, 0.0 }
 0x18e   : > { %v1260_v9 = vpop.f32.mrf.mxu2 }
 0x18f   : > { %1987 = vst.msk [vmem:[%s2973_s30 + $0x15c] sm:$0xf] %vm1899_vm0, %v1865_v7  ;;  %v1806_v10 = vpack.c.bf16 %v1685_v8, %v1685_v8  ;;  %v1261_v11 = vadd.f32 %v3210_v48, %v1260_v9  ;;  %v1578_v12 = vpop.f32.mrf.mxu3  ;;  %v2283_v7 = vor.u32 %v2683_v58, %v2282_v55  ;;  %v2523_v8 = vor.u32 %v2743_v60, %v2522_v59 }
 0x190   : > { %v1112_v13 = vpop.f32.mrf.mxu0 }
 0x191   : > { %1928 = vst.msk [vmem:[%s2973_s30 + $0x70] sm:$0xf] %vm1899_vm0, %v1806_v10  ;;  %v1574_v14 = vadd.f32 %v1573_v38, %v1261_v11  ;;  %v1113_v15 = vadd.f32 %v3210_v48, %v1112_v13  ;;  %v1425_v16 = vpop.f32.mrf.mxu1  ;;  %v2527_v38 = vor.u32 %v2742_v28, %v2524_v29  ;;  %v2290_v29 = vld [vmem:[%s2880_s18 + $0x190] sm:$0xf] }
 0x193   : > { %v1745_v19 = vmax.f32 %v1574_v14, 0.0  ;;  %v1426_v20 = vadd.f32 %v1425_v16, %v1113_v15 }
 0x195   : > { %v1866_v26 = vpack.c.bf16 %v1745_v19, %v1745_v19  ;;  %v1686_v27 = vmax.f32 %v1426_v20, 0.0 }
 0x196   : > { %v1262_v30 = vpop.f32.mrf.mxu2 }
 0x197   : > { %1988 = vst.msk [vmem:[%s2973_s30 + $0x160] sm:$0xf] %vm1899_vm0, %v1866_v26  ;;  %v1807_v31 = vpack.c.bf16 %v1686_v27, %v1686_v27  ;;  %v1263_v32 = vadd.f32 %v3210_v48, %v1262_v30  ;;  %v1580_v35 = vpop.f32.mrf.mxu3 }
 0x198   : > { %v1115_v36 = vpop.f32.mrf.mxu0 }
 0x199   : > { %1929 = vst.msk [vmem:[%s2973_s30 + $0x74] sm:$0xf] %vm1899_vm0, %v1807_v31  ;;  %v1576_v39 = vadd.f32 %v1575_v61, %v1263_v32  ;;  %v1116_v40 = vadd.f32 %v3210_v48, %v1115_v36  ;;  %v1428_v41 = vpop.f32.mrf.mxu1  ;;  %v2682_v61 = vld [vmem:[%s2880_s18 + $0x184] sm:$0xf]  ;;  %v2685_v32 = vld [vmem:[%s2880_s18 + $0x194] sm:$0xf0] }
 0x19a   : > { %v2287_v11 = vor.u32 %v2682_v61, %v2284_v62  ;;  %v2292_v36 = vld [vmem:[%s2880_s18 + $0x198] sm:$0xf0] }
 0x19b   : > { %v1746_v42 = vmax.f32 %v1576_v39, 0.0  ;;  %v1429_v43 = vadd.f32 %v1428_v41, %v1116_v40  ;;  %1154 = vmatmul.bf16.gmra.mxu0 %v2275_v33  ;;  %1304 = vmatmul.bf16.gmra.mxu2 %v2515_v34  ;;  %v2530_v33 = vld [vmem:[%s2880_s18 + $0x370] sm:$0xf]  ;;  %v2745_v34 = vld [vmem:[%s2880_s18 + $0x374] sm:$0xf0] }
 0x19c   : > { %1467 = vmatmul.bf16.gmra.mxu1 %v2279_v37  ;;  %1622 = vmatmul.bf16.gmra.mxu3 %v2527_v38  ;;  %v2746_v39 = vld [vmem:[%s2880_s18 + $0x384] sm:$0xf]  ;;  %v2540_v40 = vld [vmem:[%s2880_s18 + $0x388] sm:$0xf0] }
 0x19d   : > { %v1867_v44 = vpack.c.bf16 %v1746_v42, %v1746_v42  ;;  %v1687_v45 = vmax.f32 %v1429_v43, 0.0 }
 0x19e   : > { %v1265_v46 = vpop.f32.mrf.mxu2 }
 0x19f   : > { %1989 = vst.msk [vmem:[%s2973_s30 + $0x164] sm:$0xf] %vm1899_vm0, %v1867_v44  ;;  %v1808_v47 = vpack.c.bf16 %v1687_v45, %v1687_v45  ;;  %v1266_v49 = vadd.f32 %v3210_v48, %v1265_v46  ;;  %v1583_v50 = vpop.f32.mrf.mxu3  ;;  %v2291_v44 = vor.u32 %v2685_v32, %v2290_v29  ;;  %v2531_v45 = vor.u32 %v2745_v34, %v2530_v33 }
 0x1a0   : > { %v1117_v51 = vpop.f32.mrf.mxu0 }
 0x1a1   : > { %1930 = vst.msk [vmem:[%s2973_s30 + $0x78] sm:$0xf] %vm1899_vm0, %v1808_v47  ;;  %v1579_v52 = vadd.f32 %v1578_v12, %v1266_v49  ;;  %v1118_v53 = vadd.f32 %v3210_v48, %v1117_v51  ;;  %v1430_v54 = vpop.f32.mrf.mxu1  ;;  %v2535_v12 = vor.u32 %v2744_v1, %v2532_v3  ;;  %v2298_v3 = vld [vmem:[%s2880_s18 + $0x1a0] sm:$0xf] }
 0x1a3   : > { %v1747_v56 = vmax.f32 %v1579_v52, 0.0  ;;  %v1431_v57 = vadd.f32 %v1430_v54, %v1118_v53 }
 0x1a5   : > { %v1868_v63 = vpack.c.bf16 %v1747_v56, %v1747_v56  ;;  %v1688_v0 = vmax.f32 %v1431_v57, 0.0 }
 0x1a6   : > { %v1267_v4 = vpop.f32.mrf.mxu2 }
 0x1a7   : > { %1990 = vst.msk [vmem:[%s2973_s30 + $0x168] sm:$0xf] %vm1899_vm0, %v1868_v63  ;;  %v1809_v5 = vpack.c.bf16 %v1688_v0, %v1688_v0  ;;  %v1268_v6 = vadd.f32 %v3210_v48, %v1267_v4  ;;  %v1585_v9 = vpop.f32.mrf.mxu3 }
 0x1a8   : > { %v1120_v10 = vpop.f32.mrf.mxu0 }
 0x1a9   : > { %1931 = vst.msk [vmem:[%s2973_s30 + $0x7c] sm:$0xf] %vm1899_vm0, %v1809_v5  ;;  %v1581_v13 = vadd.f32 %v1580_v35, %v1268_v6  ;;  %v1121_v14 = vadd.f32 %v3210_v48, %v1120_v10  ;;  %v1433_v15 = vpop.f32.mrf.mxu1  ;;  %v2684_v35 = vld [vmem:[%s2880_s18 + $0x194] sm:$0xf]  ;;  %v2687_v6 = vld [vmem:[%s2880_s18 + $0x1a4] sm:$0xf0] }
 0x1aa   : > { %v2295_v49 = vor.u32 %v2684_v35, %v2292_v36  ;;  %v2300_v10 = vld [vmem:[%s2880_s18 + $0x1a8] sm:$0xf0] }
 0x1ab   : > { %v1748_v16 = vmax.f32 %v1581_v13, 0.0  ;;  %v1434_v17 = vadd.f32 %v1433_v15, %v1121_v14  ;;  %1159 = vmatmul.bf16.gmra.mxu0 %v2283_v7  ;;  %1309 = vmatmul.bf16.gmra.mxu2 %v2523_v8  ;;  %v2538_v7 = vld [vmem:[%s2880_s18 + $0x380] sm:$0xf]  ;;  %v2747_v8 = vld [vmem:[%s2880_s18 + $0x384] sm:$0xf0] }
 0x1ac   : > { %1472 = vmatmul.bf16.gmra.mxu1 %v2287_v11  ;;  %1627 = vmatmul.bf16.gmra.mxu3 %v2535_v12  ;;  %v2748_v13 = vld [vmem:[%s2880_s18 + $0x394] sm:$0xf]  ;;  %v2548_v14 = vld [vmem:[%s2880_s18 + $0x398] sm:$0xf0] }
 0x1ad   : > { %v1869_v19 = vpack.c.bf16 %v1748_v16, %v1748_v16  ;;  %v1689_v20 = vmax.f32 %v1434_v17, 0.0 }
 0x1ae   : > { %v1270_v21 = vpop.f32.mrf.mxu2 }
 0x1af   : > { %1991 = vst.msk [vmem:[%s2973_s30 + $0x16c] sm:$0xf] %vm1899_vm0, %v1869_v19  ;;  %v1810_v22 = vpack.c.bf16 %v1689_v20, %v1689_v20  ;;  %v1271_v23 = vadd.f32 %v3210_v48, %v1270_v21  ;;  %v1588_v24 = vpop.f32.mrf.mxu3  ;;  %v2299_v19 = vor.u32 %v2687_v6, %v2298_v3  ;;  %v2539_v20 = vor.u32 %v2747_v8, %v2538_v7 }
 0x1b0   : > { %v1122_v25 = vpop.f32.mrf.mxu0 }
 0x1b1   : > { %1932 = vst.msk [vmem:[%s2973_s30 + $0x80] sm:$0xf] %vm1899_vm0, %v1810_v22  ;;  %v1584_v26 = vadd.f32 %v1583_v50, %v1271_v23  ;;  %v1123_v27 = vadd.f32 %v3210_v48, %v1122_v25  ;;  %v1435_v28 = vpop.f32.mrf.mxu1  ;;  %v2543_v50 = vor.u32 %v2746_v39, %v2540_v40  ;;  %v2306_v40 = vld [vmem:[%s2880_s18 + $0x1b0] sm:$0xf] }
 0x1b3   : > { %v1749_v30 = vmax.f32 %v1584_v26, 0.0  ;;  %v1436_v31 = vadd.f32 %v1435_v28, %v1123_v27 }
 0x1b5   : > { %v1870_v37 = vpack.c.bf16 %v1749_v30, %v1749_v30  ;;  %v1690_v38 = vmax.f32 %v1436_v31, 0.0 }
 0x1b6   : > { %v1272_v41 = vpop.f32.mrf.mxu2 }
 0x1b7   : > { %1992 = vst.msk [vmem:[%s2973_s30 + $0x170] sm:$0xf] %vm1899_vm0, %v1870_v37  ;;  %v1811_v42 = vpack.c.bf16 %v1690_v38, %v1690_v38  ;;  %v1273_v43 = vadd.f32 %v3210_v48, %v1272_v41  ;;  %v1590_v46 = vpop.f32.mrf.mxu3 }
 0x1b8   : > { %v1125_v47 = vpop.f32.mrf.mxu0 }
 0x1b9   : > { %1933 = vst.msk [vmem:[%s2973_s30 + $0x84] sm:$0xf] %vm1899_vm0, %v1811_v42  ;;  %v1586_v51 = vadd.f32 %v1585_v9, %v1273_v43  ;;  %v1126_v52 = vadd.f32 %v3210_v48, %v1125_v47  ;;  %v1438_v53 = vpop.f32.mrf.mxu1  ;;  %v2686_v9 = vld [vmem:[%s2880_s18 + $0x1a4] sm:$0xf]  ;;  %v2689_v43 = vld [vmem:[%s2880_s18 + $0x1b4] sm:$0xf0] }
 0x1ba   : > { %v2303_v23 = vor.u32 %v2686_v9, %v2300_v10  ;;  %v2308_v47 = vld [vmem:[%s2880_s18 + $0x1b8] sm:$0xf0] }
 0x1bb   : > { %v1750_v54 = vmax.f32 %v1586_v51, 0.0  ;;  %v1439_v55 = vadd.f32 %v1438_v53, %v1126_v52  ;;  %1164 = vmatmul.bf16.gmra.mxu0 %v2291_v44  ;;  %1314 = vmatmul.bf16.gmra.mxu2 %v2531_v45  ;;  %v2546_v44 = vld [vmem:[%s2880_s18 + $0x390] sm:$0xf]  ;;  %v2749_v45 = vld [vmem:[%s2880_s18 + $0x394] sm:$0xf0] }
 0x1bc   : > { %1477 = vmatmul.bf16.gmra.mxu1 %v2295_v49  ;;  %1632 = vmatmul.bf16.gmra.mxu3 %v2543_v50  ;;  %v2750_v51 = vld [vmem:[%s2880_s18 + $0x3a4] sm:$0xf]  ;;  %v2556_v52 = vld [vmem:[%s2880_s18 + $0x3a8] sm:$0xf0] }
 0x1bd   : > { %v1871_v56 = vpack.c.bf16 %v1750_v54, %v1750_v54  ;;  %v1691_v57 = vmax.f32 %v1439_v55, 0.0 }
 0x1be   : > { %v1275_v58 = vpop.f32.mrf.mxu2 }
 0x1bf   : > { %1993 = vst.msk [vmem:[%s2973_s30 + $0x174] sm:$0xf] %vm1899_vm0, %v1871_v56  ;;  %v1812_v59 = vpack.c.bf16 %v1691_v57, %v1691_v57  ;;  %v1276_v60 = vadd.f32 %v3210_v48, %v1275_v58  ;;  %v1593_v61 = vpop.f32.mrf.mxu3  ;;  %v2307_v56 = vor.u32 %v2689_v43, %v2306_v40  ;;  %v2547_v57 = vor.u32 %v2749_v45, %v2546_v44 }
 0x1c0   : > { %v1127_v62 = vpop.f32.mrf.mxu0 }
 0x1c1   : > { %1934 = vst.msk [vmem:[%s2973_s30 + $0x88] sm:$0xf] %vm1899_vm0, %v1812_v59  ;;  %v1589_v63 = vadd.f32 %v1588_v24, %v1276_v60  ;;  %v1128_v0 = vadd.f32 %v3210_v48, %v1127_v62  ;;  %v1440_v1 = vpop.f32.mrf.mxu1  ;;  %v2551_v24 = vor.u32 %v2748_v13, %v2548_v14  ;;  %v2314_v14 = vld [vmem:[%s2880_s18 + $0x1c0] sm:$0xf] }
 0x1c3   : > { %v1751_v4 = vmax.f32 %v1589_v63, 0.0  ;;  %v1441_v5 = vadd.f32 %v1440_v1, %v1128_v0 }
 0x1c5   : > { %v1872_v11 = vpack.c.bf16 %v1751_v4, %v1751_v4  ;;  %v1692_v12 = vmax.f32 %v1441_v5, 0.0 }
 0x1c6   : > { %v1277_v15 = vpop.f32.mrf.mxu2 }
 0x1c7   : > { %1994 = vst.msk [vmem:[%s2973_s30 + $0x178] sm:$0xf] %vm1899_vm0, %v1872_v11  ;;  %v1813_v16 = vpack.c.bf16 %v1692_v12, %v1692_v12  ;;  %v1278_v17 = vadd.f32 %v3210_v48, %v1277_v15  ;;  %v1595_v21 = vpop.f32.mrf.mxu3 }
 0x1c8   : > { %v1130_v22 = vpop.f32.mrf.mxu0 }
 0x1c9   : > { %1935 = vst.msk [vmem:[%s2973_s30 + $0x8c] sm:$0xf] %vm1899_vm0, %v1813_v16  ;;  %v1591_v25 = vadd.f32 %v1590_v46, %v1278_v17  ;;  %v1131_v26 = vadd.f32 %v3210_v48, %v1130_v22  ;;  %v1443_v27 = vpop.f32.mrf.mxu1  ;;  %v2688_v46 = vld [vmem:[%s2880_s18 + $0x1b4] sm:$0xf]  ;;  %v2691_v17 = vld [vmem:[%s2880_s18 + $0x1c4] sm:$0xf0] }
 0x1ca   : > { %v2311_v60 = vor.u32 %v2688_v46, %v2308_v47  ;;  %v2316_v22 = vld [vmem:[%s2880_s18 + $0x1c8] sm:$0xf0] }
 0x1cb   : > { %v1752_v28 = vmax.f32 %v1591_v25, 0.0  ;;  %v1444_v29 = vadd.f32 %v1443_v27, %v1131_v26  ;;  %1169 = vmatmul.bf16.gmra.mxu0 %v2299_v19  ;;  %1319 = vmatmul.bf16.gmra.mxu2 %v2539_v20  ;;  %v2554_v19 = vld [vmem:[%s2880_s18 + $0x3a0] sm:$0xf]  ;;  %v2751_v20 = vld [vmem:[%s2880_s18 + $0x3a4] sm:$0xf0] }
 0x1cc   : > { %1482 = vmatmul.bf16.gmra.mxu1 %v2303_v23  ;;  %1637 = vmatmul.bf16.gmra.mxu3 %v2551_v24  ;;  %v2752_v25 = vld [vmem:[%s2880_s18 + $0x3b4] sm:$0xf]  ;;  %v2564_v26 = vld [vmem:[%s2880_s18 + $0x3b8] sm:$0xf0] }
 0x1cd   : > { %v1873_v30 = vpack.c.bf16 %v1752_v28, %v1752_v28  ;;  %v1693_v31 = vmax.f32 %v1444_v29, 0.0 }
 0x1ce   : > { %v1280_v32 = vpop.f32.mrf.mxu2 }
 0x1cf   : > { %1995 = vst.msk [vmem:[%s2973_s30 + $0x17c] sm:$0xf] %vm1899_vm0, %v1873_v30  ;;  %v1814_v33 = vpack.c.bf16 %v1693_v31, %v1693_v31  ;;  %v1281_v34 = vadd.f32 %v3210_v48, %v1280_v32  ;;  %v1598_v35 = vpop.f32.mrf.mxu3  ;;  %v2315_v30 = vor.u32 %v2691_v17, %v2314_v14  ;;  %v2555_v31 = vor.u32 %v2751_v20, %v2554_v19 }
 0x1d0   : > { %v1132_v36 = vpop.f32.mrf.mxu0 }
 0x1d1   : > { %1936 = vst.msk [vmem:[%s2973_s30 + $0x90] sm:$0xf] %vm1899_vm0, %v1814_v33  ;;  %v1594_v37 = vadd.f32 %v1593_v61, %v1281_v34  ;;  %v1133_v38 = vadd.f32 %v3210_v48, %v1132_v36  ;;  %v1445_v39 = vpop.f32.mrf.mxu1  ;;  %v2559_v61 = vor.u32 %v2750_v51, %v2556_v52  ;;  %v291_v52 = vld [vmem:[%s2880_s18 + $0x3c0] sm:$0x11] }
 0x1d3   : > { %v1753_v41 = vmax.f32 %v1594_v37, 0.0  ;;  %v1446_v42 = vadd.f32 %v1445_v39, %v1133_v38 }
 0x1d5   : > { %v1874_v49 = vpack.c.bf16 %v1753_v41, %v1753_v41  ;;  %v1694_v50 = vmax.f32 %v1446_v42, 0.0 }
 0x1d6   : > { %v1282_v53 = vpop.f32.mrf.mxu2 }
 0x1d7   : > { %1996 = vst.msk [vmem:[%s2973_s30 + $0x180] sm:$0xf] %vm1899_vm0, %v1874_v49  ;;  %v1815_v54 = vpack.c.bf16 %v1694_v50, %v1694_v50  ;;  %v1283_v55 = vadd.f32 %v3210_v48, %v1282_v53  ;;  %v1600_v58 = vpop.f32.mrf.mxu3 }
 0x1d8   : > { %v1135_v59 = vpop.f32.mrf.mxu0 }
 0x1d9   : > { %1937 = vst.msk [vmem:[%s2973_s30 + $0x94] sm:$0xf] %vm1899_vm0, %v1815_v54  ;;  %v1596_v62 = vadd.f32 %v1595_v21, %v1283_v55  ;;  %v1136_v63 = vadd.f32 %v3210_v48, %v1135_v59  ;;  %v1448_v0 = vpop.f32.mrf.mxu1  ;;  %v2690_v21 = vld [vmem:[%s2880_s18 + $0x1c4] sm:$0xf]  ;;  %v2322_v55 = vld [vmem:[%s2880_s18 + $0x1d0] sm:$0xf]  ;;  %v690_v59 = vunpack.c.h.b16 %v291_v52 }
 0x1da   : > { %v2319_v34 = vor.u32 %v2690_v21, %v2316_v22 }
 0x1db   : > { %v1754_v1 = vmax.f32 %v1596_v62, 0.0  ;;  %v1449_v3 = vadd.f32 %v1448_v0, %v1136_v63  ;;  %1174 = vmatmul.bf16.gmra.mxu0 %v2307_v56  ;;  %1324 = vmatmul.bf16.gmra.mxu2 %v2547_v57  ;;  %v2693_v56 = vld [vmem:[%s2880_s18 + $0x1d4] sm:$0xf0]  ;;  %v2562_v57 = vld [vmem:[%s2880_s18 + $0x3b0] sm:$0xf] }
 0x1dc   : > { %1487 = vmatmul.bf16.gmra.mxu1 %v2311_v60  ;;  %1642 = vmatmul.bf16.gmra.mxu3 %v2559_v61  ;;  %v2692_v62 = vld [vmem:[%s2880_s18 + $0x1d4] sm:$0xf]  ;;  %v2324_v63 = vld [vmem:[%s2880_s18 + $0x1d8] sm:$0xf0] }
 0x1dd   : > { %v1875_v4 = vpack.c.bf16 %v1754_v1, %v1754_v1  ;;  %v1695_v5 = vmax.f32 %v1449_v3, 0.0 }
 0x1de   : > { %v1285_v6 = vpop.f32.mrf.mxu2 }
 0x1df   : > { %1997 = vst.msk [vmem:[%s2973_s30 + $0x184] sm:$0xf] %vm1899_vm0, %v1875_v4  ;;  %v1816_v7 = vpack.c.bf16 %v1695_v5, %v1695_v5  ;;  %v1286_v8 = vadd.f32 %v3210_v48, %v1285_v6  ;;  %v1603_v9 = vpop.f32.mrf.mxu3  ;;  %v2323_v4 = vor.u32 %v2693_v56, %v2322_v55 }
 0x1e0   : > { %v1137_v10 = vpop.f32.mrf.mxu0 }
 0x1e1   : > { %1938 = vst.msk [vmem:[%s2973_s30 + $0x98] sm:$0xf] %vm1899_vm0, %v1816_v7  ;;  %v1599_v11 = vadd.f32 %v1598_v35, %v1286_v8  ;;  %v1138_v12 = vadd.f32 %v3210_v48, %v1137_v10  ;;  %v1450_v13 = vpop.f32.mrf.mxu1  ;;  %v2567_v35 = vor.u32 %v2752_v25, %v2564_v26  ;;  %v2327_v8 = vor.u32 %v2692_v62, %v2324_v63 }
 0x1e3   : > { %v1755_v15 = vmax.f32 %v1599_v11, 0.0  ;;  %v1451_v16 = vadd.f32 %v1450_v13, %v1138_v12 }
 0x1e5   : > { %v1876_v23 = vpack.c.bf16 %v1755_v15, %v1755_v15  ;;  %v1696_v24 = vmax.f32 %v1451_v16, 0.0 }
 0x1e6   : > { %v1287_v27 = vpop.f32.mrf.mxu2 }
 0x1e7   : > { %1998 = vst.msk [vmem:[%s2973_s30 + $0x188] sm:$0xf] %vm1899_vm0, %v1876_v23  ;;  %v1817_v28 = vpack.c.bf16 %v1696_v24, %v1696_v24  ;;  %v1288_v29 = vadd.f32 %v3210_v48, %v1287_v27  ;;  %v1605_v32 = vpop.f32.mrf.mxu3 }
 0x1e8   : > { %v1140_v33 = vpop.f32.mrf.mxu0 }
 0x1e9   : > { %1939 = vst.msk [vmem:[%s2973_s30 + $0x9c] sm:$0xf] %vm1899_vm0, %v1817_v28  ;;  %v1601_v36 = vadd.f32 %v1600_v58, %v1288_v29  ;;  %v1141_v37 = vadd.f32 %v3210_v48, %v1140_v33  ;;  %v1453_v38 = vpop.f32.mrf.mxu1  ;;  %v2753_v58 = vld [vmem:[%s2880_s18 + $0x3b4] sm:$0xf0]  ;;  %v689_v28 = vunpack.c.l.b16 %v291_v52 }
 0x1ea   : > { %v2563_v5 = vor.u32 %v2753_v58, %v2562_v57 }
 0x1eb   : > { %v1756_v39 = vmax.f32 %v1601_v36, 0.0  ;;  %v1454_v40 = vadd.f32 %v1453_v38, %v1141_v37  ;;  %1179 = vmatmul.bf16.gmra.mxu0 %v2315_v30  ;;  %1329 = vmatmul.bf16.gmra.mxu2 %v2555_v31  ;;  %v2694_v31 = vld [vmem:[%s2880_s18 + $0x1e4] sm:$0xf]  ;;  %v811_v36 = vpack.c.b16 %v689_v28, %v689_v28 }
 0x1ec   : > { %1492 = vmatmul.bf16.gmra.mxu1 %v2319_v34  ;;  %1647 = vmatmul.bf16.gmra.mxu3 %v2567_v35 }
 0x1ed   : > { %v1877_v41 = vpack.c.bf16 %v1756_v39, %v1756_v39  ;;  %v1697_v42 = vmax.f32 %v1454_v40, 0.0 }
 0x1ee   : > { %v1290_v43 = vpop.f32.mrf.mxu2 }
 0x1ef   : > { %1999 = vst.msk [vmem:[%s2973_s30 + $0x18c] sm:$0xf] %vm1899_vm0, %v1877_v41  ;;  %v1818_v44 = vpack.c.bf16 %v1697_v42, %v1697_v42  ;;  %v1291_v45 = vadd.f32 %v3210_v48, %v1290_v43  ;;  %v1608_v46 = vpop.f32.mrf.mxu3 }
 0x1f0   : > { %v1142_v47 = vpop.f32.mrf.mxu0 }
 0x1f1   : > { %1940 = vst.msk [vmem:[%s2973_s30 + $0xa0] sm:$0xf] %vm1899_vm0, %v1818_v44  ;;  %v1604_v49 = vadd.f32 %v1603_v9, %v1291_v45  ;;  %v1143_v50 = vadd.f32 %v3210_v48, %v1142_v47  ;;  %v1455_v51 = vpop.f32.mrf.mxu1  ;;  %v812_v9 = vpack.c.b16 %v690_v59, %v690_v59 }
 0x1f3   : > { %v1757_v53 = vmax.f32 %v1604_v49, 0.0  ;;  %v1456_v54 = vadd.f32 %v1455_v51, %v1143_v50 }
 0x1f5   : > { %v1878_v60 = vpack.c.bf16 %v1757_v53, %v1757_v53  ;;  %v1698_v61 = vmax.f32 %v1456_v54, 0.0 }
 0x1f6   : > { %v1292_v0 = vpop.f32.mrf.mxu2 }
 0x1f7   : > { %2000 = vst.msk [vmem:[%s2973_s30 + $0x190] sm:$0xf] %vm1899_vm0, %v1878_v60  ;;  %v1819_v1 = vpack.c.bf16 %v1698_v61, %v1698_v61  ;;  %v1293_v3 = vadd.f32 %v3210_v48, %v1292_v0  ;;  %v1610_v6 = vpop.f32.mrf.mxu3 }
 0x1f8   : > { %v1145_v7 = vpop.f32.mrf.mxu0 }
 0x1f9   : > { %1941 = vst.msk [vmem:[%s2973_s30 + $0xa4] sm:$0xf] %vm1899_vm0, %v1819_v1  ;;  %v1606_v10 = vadd.f32 %v1605_v32, %v1293_v3  ;;  %v1146_v11 = vadd.f32 %v3210_v48, %v1145_v7  ;;  %v1458_v12 = vpop.f32.mrf.mxu1  ;;  %v2332_v32 = vld [vmem:[%s2880_s18 + $0x1e8] sm:$0xf0] }
 0x1fa   : > { %v2335_v39 = vor.u32 %v2694_v31, %v2332_v32 }
 0x1fb   : > { %v1758_v13 = vmax.f32 %v1606_v10, 0.0  ;;  %v1459_v14 = vadd.f32 %v1458_v12, %v1146_v11  ;;  %1184 = vmatmul.bf16.gmra.mxu0 %v2323_v4  ;;  %1334 = vmatmul.bf16.gmra.mxu2 %v2563_v5 }
 0x1fc   : > { %1497 = vmatmul.bf16.gmra.mxu1 %v2327_v8  ;;  %1652 = vmatmul.bf16.gmra.mxu3 %v812_v9 }
 0x1fd   : > { %v1879_v15 = vpack.c.bf16 %v1758_v13, %v1758_v13  ;;  %v1699_v16 = vmax.f32 %v1459_v14, 0.0 }
 0x1fe   : > { %v1295_v17 = vpop.f32.mrf.mxu2 }
 0x1ff   : > { %2001 = vst.msk [vmem:[%s2973_s30 + $0x194] sm:$0xf] %vm1899_vm0, %v1879_v15  ;;  %v1820_v19 = vpack.c.bf16 %v1699_v16, %v1699_v16  ;;  %v1296_v20 = vadd.f32 %v3210_v48, %v1295_v17  ;;  %v1613_v21 = vpop.f32.mrf.mxu3 }
 0x200   : > { %v1147_v22 = vpop.f32.mrf.mxu0 }
 0x201   : > { %1942 = vst.msk [vmem:[%s2973_s30 + $0xa8] sm:$0xf] %vm1899_vm0, %v1820_v19  ;;  %v1609_v23 = vadd.f32 %v1608_v46, %v1296_v20  ;;  %v1148_v24 = vadd.f32 %v3210_v48, %v1147_v22  ;;  %v1460_v25 = vpop.f32.mrf.mxu1 }
 0x203   : > { %v1759_v26 = vmax.f32 %v1609_v23, 0.0  ;;  %v1461_v27 = vadd.f32 %v1460_v25, %v1148_v24 }
 0x205   : > { %v1880_v29 = vpack.c.bf16 %v1759_v26, %v1759_v26  ;;  %v1700_v30 = vmax.f32 %v1461_v27, 0.0 }
 0x206   : > { %v1297_v33 = vpop.f32.mrf.mxu2 }
 0x207   : > { %2002 = vst.msk [vmem:[%s2973_s30 + $0x198] sm:$0xf] %vm1899_vm0, %v1880_v29  ;;  %v1821_v34 = vpack.c.bf16 %v1700_v30, %v1700_v30  ;;  %v1298_v35 = vadd.f32 %v3210_v48, %v1297_v33  ;;  %v1615_v37 = vpop.f32.mrf.mxu3 }
 0x208   : > { %v1150_v38 = vpop.f32.mrf.mxu0 }
 0x209   : > { %1943 = vst.msk [vmem:[%s2973_s30 + $0xac] sm:$0xf] %vm1899_vm0, %v1821_v34  ;;  %v1611_v40 = vadd.f32 %v1610_v6, %v1298_v35  ;;  %v1151_v41 = vadd.f32 %v3210_v48, %v1150_v38  ;;  %v1463_v42 = vpop.f32.mrf.mxu1 }
 0x20b   : > { %v1760_v43 = vmax.f32 %v1611_v40, 0.0  ;;  %v1464_v44 = vadd.f32 %v1463_v42, %v1151_v41  ;;  %1339 = vmatmul.bf16.gmra.mxu2 %v811_v36  ;;  %v3441_v40 = vld [vmem:[%s3527_s2] ss:$0 sm:$0xff] }
 0x20c   : > { %1502 = vmatmul.bf16.gmra.mxu1 %v2335_v39 }
 0x20d   : > { %v1881_v45 = vpack.c.bf16 %v1760_v43, %v1760_v43  ;;  %v1701_v46 = vmax.f32 %v1464_v44, 0.0 }
 0x20e   : > { %v1300_v47 = vpop.f32.mrf.mxu2 }
 0x20f   : > { %2003 = vst.msk [vmem:[%s2973_s30 + $0x19c] sm:$0xf] %vm1899_vm0, %v1881_v45  ;;  %v1822_v49 = vpack.c.bf16 %v1701_v46, %v1701_v46  ;;  %v1301_v50 = vadd.f32 %v3210_v48, %v1300_v47  ;;  %v1618_v51 = vpop.f32.mrf.mxu3 }
 0x210   : > { %v1152_v52 = vpop.f32.mrf.mxu0 }
 0x211   : > { %1944 = vst.msk [vmem:[%s2973_s30 + $0xb0] sm:$0xf] %vm1899_vm0, %v1822_v49  ;;  %v1614_v53 = vadd.f32 %v1613_v21, %v1301_v50  ;;  %v1153_v54 = vadd.f32 %v3210_v48, %v1152_v52  ;;  %v1465_v55 = vpop.f32.mrf.mxu1 }
 0x213   : > { %v1761_v56 = vmax.f32 %v1614_v53, 0.0  ;;  %v1466_v57 = vadd.f32 %v1465_v55, %v1153_v54 }
 0x215   : > { %v1882_v58 = vpack.c.bf16 %v1761_v56, %v1761_v56  ;;  %v1702_v59 = vmax.f32 %v1466_v57, 0.0 }
 0x216   : > { %v1302_v60 = vpop.f32.mrf.mxu2 }
 0x217   : > { %2004 = vst.msk [vmem:[%s2973_s30 + $0x1a0] sm:$0xf] %vm1899_vm0, %v1882_v58  ;;  %v1823_v61 = vpack.c.bf16 %v1702_v59, %v1702_v59  ;;  %v1303_v62 = vadd.f32 %v3210_v48, %v1302_v60  ;;  %v1620_v63 = vpop.f32.mrf.mxu3 }
 0x218   : > { %v1155_v0 = vpop.f32.mrf.mxu0 }
 0x219   : > { %1945 = vst.msk [vmem:[%s2973_s30 + $0xb4] sm:$0xf] %vm1899_vm0, %v1823_v61  ;;  %v1616_v1 = vadd.f32 %v1615_v37, %v1303_v62  ;;  %v1156_v3 = vadd.f32 %v3210_v48, %v1155_v0  ;;  %v1468_v4 = vpop.f32.mrf.mxu1 }
 0x21b   : > { %v1762_v5 = vmax.f32 %v1616_v1, 0.0  ;;  %v1469_v6 = vadd.f32 %v1468_v4, %v1156_v3 }
 0x21d   : > { %v1883_v7 = vpack.c.bf16 %v1762_v5, %v1762_v5  ;;  %v1703_v8 = vmax.f32 %v1469_v6, 0.0 }
 0x21e   : > { %v1305_v9 = vpop.f32.mrf.mxu2 }
 0x21f   : > { %2005 = vst.msk [vmem:[%s2973_s30 + $0x1a4] sm:$0xf] %vm1899_vm0, %v1883_v7  ;;  %v1824_v10 = vpack.c.bf16 %v1703_v8, %v1703_v8  ;;  %v1306_v11 = vadd.f32 %v3210_v48, %v1305_v9  ;;  %v1623_v12 = vpop.f32.mrf.mxu3 }
 0x220   : > { %v1157_v13 = vpop.f32.mrf.mxu0 }
 0x221   : > { %1946 = vst.msk [vmem:[%s2973_s30 + $0xb8] sm:$0xf] %vm1899_vm0, %v1824_v10  ;;  %v1619_v14 = vadd.f32 %v1618_v51, %v1306_v11  ;;  %v1158_v15 = vadd.f32 %v3210_v48, %v1157_v13  ;;  %v1470_v16 = vpop.f32.mrf.mxu1 }
 0x223   : > { %v1763_v17 = vmax.f32 %v1619_v14, 0.0  ;;  %v1471_v19 = vadd.f32 %v1470_v16, %v1158_v15 }
 0x225   : > { %v1884_v20 = vpack.c.bf16 %v1763_v17, %v1763_v17  ;;  %v1704_v21 = vmax.f32 %v1471_v19, 0.0 }
 0x226   : > { %v1307_v22 = vpop.f32.mrf.mxu2 }
 0x227   : > { %2006 = vst.msk [vmem:[%s2973_s30 + $0x1a8] sm:$0xf] %vm1899_vm0, %v1884_v20  ;;  %v1825_v23 = vpack.c.bf16 %v1704_v21, %v1704_v21  ;;  %v1308_v24 = vadd.f32 %v3210_v48, %v1307_v22  ;;  %v1625_v25 = vpop.f32.mrf.mxu3 }
 0x228   : > { %v1160_v26 = vpop.f32.mrf.mxu0 }
 0x229   : > { %1947 = vst.msk [vmem:[%s2973_s30 + $0xbc] sm:$0xf] %vm1899_vm0, %v1825_v23  ;;  %v1621_v27 = vadd.f32 %v1620_v63, %v1308_v24  ;;  %v1161_v28 = vadd.f32 %v3210_v48, %v1160_v26  ;;  %v1473_v29 = vpop.f32.mrf.mxu1 }
 0x22b   : > { %v1764_v30 = vmax.f32 %v1621_v27, 0.0  ;;  %v1474_v31 = vadd.f32 %v1473_v29, %v1161_v28 }
 0x22d   : > { %v1885_v32 = vpack.c.bf16 %v1764_v30, %v1764_v30  ;;  %v1705_v33 = vmax.f32 %v1474_v31, 0.0 }
 0x22e   : > { %v1310_v34 = vpop.f32.mrf.mxu2 }
 0x22f   : > { %2007 = vst.msk [vmem:[%s2973_s30 + $0x1ac] sm:$0xf] %vm1899_vm0, %v1885_v32  ;;  %v1826_v35 = vpack.c.bf16 %v1705_v33, %v1705_v33  ;;  %v1311_v36 = vadd.f32 %v3210_v48, %v1310_v34  ;;  %v1628_v37 = vpop.f32.mrf.mxu3 }
 0x230   : > { %v1162_v38 = vpop.f32.mrf.mxu0 }
 0x231   : > { %1948 = vst.msk [vmem:[%s2973_s30 + $0xc0] sm:$0xf] %vm1899_vm0, %v1826_v35  ;;  %v1624_v39 = vadd.f32 %v1623_v12, %v1311_v36  ;;  %v1163_v41 = vadd.f32 %v3441_v40, %v1162_v38  ;;  %v1475_v42 = vpop.f32.mrf.mxu1 }
 0x233   : > { %v1765_v43 = vmax.f32 %v1624_v39, 0.0  ;;  %v1476_v44 = vadd.f32 %v1475_v42, %v1163_v41 }
 0x235   : > { %v1886_v45 = vpack.c.bf16 %v1765_v43, %v1765_v43  ;;  %v1706_v46 = vmax.f32 %v1476_v44, 0.0 }
 0x236   : > { %v1312_v48 = vpop.f32.mrf.mxu2 }
 0x237   : > { %2008 = vst.msk [vmem:[%s2973_s30 + $0x1b0] sm:$0xf] %vm1899_vm0, %v1886_v45  ;;  %v1827_v47 = vpack.c.bf16 %v1706_v46, %v1706_v46  ;;  %v1313_v49 = vadd.f32 %v3441_v40, %v1312_v48  ;;  %v1630_v50 = vpop.f32.mrf.mxu3 }
 0x238   : > { %v1165_v51 = vpop.f32.mrf.mxu0 }
 0x239   : > { %1949 = vst.msk [vmem:[%s2973_s30 + $0xc4] sm:$0xf] %vm1899_vm0, %v1827_v47  ;;  %v1626_v52 = vadd.f32 %v1625_v25, %v1313_v49  ;;  %v1166_v53 = vadd.f32 %v3441_v40, %v1165_v51  ;;  %v1478_v54 = vpop.f32.mrf.mxu1 }
 0x23b   : > { %v1766_v55 = vmax.f32 %v1626_v52, 0.0  ;;  %v1479_v56 = vadd.f32 %v1478_v54, %v1166_v53 }
 0x23d   : > { %v1887_v57 = vpack.c.bf16 %v1766_v55, %v1766_v55  ;;  %v1707_v58 = vmax.f32 %v1479_v56, 0.0 }
 0x23e   : > { %v1315_v59 = vpop.f32.mrf.mxu2 }
 0x23f   : > { %2009 = vst.msk [vmem:[%s2973_s30 + $0x1b4] sm:$0xf] %vm1899_vm0, %v1887_v57  ;;  %v1828_v60 = vpack.c.bf16 %v1707_v58, %v1707_v58  ;;  %v1316_v61 = vadd.f32 %v3441_v40, %v1315_v59  ;;  %v1633_v62 = vpop.f32.mrf.mxu3 }
 0x240   : > { %v1167_v63 = vpop.f32.mrf.mxu0 }
 0x241   : > { %1950 = vst.msk [vmem:[%s2973_s30 + $0xc8] sm:$0xf] %vm1899_vm0, %v1828_v60  ;;  %v1629_v0 = vadd.f32 %v1628_v37, %v1316_v61  ;;  %v1168_v1 = vadd.f32 %v3441_v40, %v1167_v63  ;;  %v1480_v3 = vpop.f32.mrf.mxu1 }
 0x243   : > { %v1767_v4 = vmax.f32 %v1629_v0, 0.0  ;;  %v1481_v5 = vadd.f32 %v1480_v3, %v1168_v1 }
 0x245   : > { %v1888_v6 = vpack.c.bf16 %v1767_v4, %v1767_v4  ;;  %v1708_v7 = vmax.f32 %v1481_v5, 0.0 }
 0x246   : > { %v1317_v8 = vpop.f32.mrf.mxu2 }
 0x247   : > { %2010 = vst.msk [vmem:[%s2973_s30 + $0x1b8] sm:$0xf] %vm1899_vm0, %v1888_v6  ;;  %v1829_v9 = vpack.c.bf16 %v1708_v7, %v1708_v7  ;;  %v1318_v10 = vadd.f32 %v3441_v40, %v1317_v8  ;;  %v1635_v11 = vpop.f32.mrf.mxu3 }
 0x248   : > { %v1170_v12 = vpop.f32.mrf.mxu0 }
 0x249   : > { %1951 = vst.msk [vmem:[%s2973_s30 + $0xcc] sm:$0xf] %vm1899_vm0, %v1829_v9  ;;  %v1631_v13 = vadd.f32 %v1630_v50, %v1318_v10  ;;  %v1171_v14 = vadd.f32 %v3441_v40, %v1170_v12  ;;  %v1483_v15 = vpop.f32.mrf.mxu1 }
 0x24b   : > { %v1768_v16 = vmax.f32 %v1631_v13, 0.0  ;;  %v1484_v17 = vadd.f32 %v1483_v15, %v1171_v14 }
 0x24d   : > { %v1889_v19 = vpack.c.bf16 %v1768_v16, %v1768_v16  ;;  %v1709_v20 = vmax.f32 %v1484_v17, 0.0 }
 0x24e   : > { %v1320_v21 = vpop.f32.mrf.mxu2 }
 0x24f   : > { %2011 = vst.msk [vmem:[%s2973_s30 + $0x1bc] sm:$0xf] %vm1899_vm0, %v1889_v19  ;;  %v1830_v22 = vpack.c.bf16 %v1709_v20, %v1709_v20  ;;  %v1321_v23 = vadd.f32 %v3441_v40, %v1320_v21  ;;  %v1638_v24 = vpop.f32.mrf.mxu3 }
 0x250   : > { %v1172_v25 = vpop.f32.mrf.mxu0 }
 0x251   : > { %1952 = vst.msk [vmem:[%s2973_s30 + $0xd0] sm:$0xf] %vm1899_vm0, %v1830_v22  ;;  %v1634_v26 = vadd.f32 %v1633_v62, %v1321_v23  ;;  %v1173_v27 = vadd.f32 %v3441_v40, %v1172_v25  ;;  %v1485_v28 = vpop.f32.mrf.mxu1 }
 0x253   : > { %v1769_v29 = vmax.f32 %v1634_v26, 0.0  ;;  %v1486_v30 = vadd.f32 %v1485_v28, %v1173_v27 }
 0x255   : > { %v1890_v31 = vpack.c.bf16 %v1769_v29, %v1769_v29  ;;  %v1710_v32 = vmax.f32 %v1486_v30, 0.0 }
 0x256   : > { %v1322_v33 = vpop.f32.mrf.mxu2 }
 0x257   : > { %2012 = vst.msk [vmem:[%s2973_s30 + $0x1c0] sm:$0xf] %vm1899_vm0, %v1890_v31  ;;  %v1831_v34 = vpack.c.bf16 %v1710_v32, %v1710_v32  ;;  %v1323_v35 = vadd.f32 %v3441_v40, %v1322_v33  ;;  %v1640_v36 = vpop.f32.mrf.mxu3 }
 0x258   : > { %v1175_v37 = vpop.f32.mrf.mxu0 }
 0x259   : > { %1953 = vst.msk [vmem:[%s2973_s30 + $0xd4] sm:$0xf] %vm1899_vm0, %v1831_v34  ;;  %v1636_v38 = vadd.f32 %v1635_v11, %v1323_v35  ;;  %v1176_v39 = vadd.f32 %v3441_v40, %v1175_v37  ;;  %v1488_v41 = vpop.f32.mrf.mxu1 }
 0x25b   : > { %v1770_v42 = vmax.f32 %v1636_v38, 0.0  ;;  %v1489_v43 = vadd.f32 %v1488_v41, %v1176_v39 }
 0x25d   : > { %v1891_v44 = vpack.c.bf16 %v1770_v42, %v1770_v42  ;;  %v1711_v45 = vmax.f32 %v1489_v43, 0.0 }
 0x25e   : > { %v1325_v46 = vpop.f32.mrf.mxu2 }
 0x25f   : > { %2013 = vst.msk [vmem:[%s2973_s30 + $0x1c4] sm:$0xf] %vm1899_vm0, %v1891_v44  ;;  %v1832_v48 = vpack.c.bf16 %v1711_v45, %v1711_v45  ;;  %v1326_v47 = vadd.f32 %v3441_v40, %v1325_v46  ;;  %v1643_v49 = vpop.f32.mrf.mxu3 }
 0x260   : > { %v1177_v50 = vpop.f32.mrf.mxu0 }
 0x261   : > { %1954 = vst.msk [vmem:[%s2973_s30 + $0xd8] sm:$0xf] %vm1899_vm0, %v1832_v48  ;;  %v1639_v51 = vadd.f32 %v1638_v24, %v1326_v47  ;;  %v1178_v52 = vadd.f32 %v3441_v40, %v1177_v50  ;;  %v1490_v53 = vpop.f32.mrf.mxu1 }
 0x263   : > { %v1771_v54 = vmax.f32 %v1639_v51, 0.0  ;;  %v1491_v55 = vadd.f32 %v1490_v53, %v1178_v52 }
 0x265   : > { %v1892_v56 = vpack.c.bf16 %v1771_v54, %v1771_v54  ;;  %v1712_v57 = vmax.f32 %v1491_v55, 0.0 }
 0x266   : > { %v1327_v58 = vpop.f32.mrf.mxu2 }
 0x267   : > { %2014 = vst.msk [vmem:[%s2973_s30 + $0x1c8] sm:$0xf] %vm1899_vm0, %v1892_v56  ;;  %v1833_v59 = vpack.c.bf16 %v1712_v57, %v1712_v57  ;;  %v1328_v60 = vadd.f32 %v3441_v40, %v1327_v58  ;;  %v1645_v61 = vpop.f32.mrf.mxu3 }
 0x268   : > { %v1180_v62 = vpop.f32.mrf.mxu0 }
 0x269   : > { %1955 = vst.msk [vmem:[%s2973_s30 + $0xdc] sm:$0xf] %vm1899_vm0, %v1833_v59  ;;  %v1641_v63 = vadd.f32 %v1640_v36, %v1328_v60  ;;  %v1181_v0 = vadd.f32 %v3441_v40, %v1180_v62  ;;  %v1493_v1 = vpop.f32.mrf.mxu1  ;;  %v1193_v59 = vadd.f32 %v3441_v40, %v2988_v18 }
 0x26b   : > { %v1772_v3 = vmax.f32 %v1641_v63, 0.0  ;;  %v1494_v4 = vadd.f32 %v1493_v1, %v1181_v0  ;;  %v2023_v63 = vld [vmem:[%s2973_s30 + $0x1e0] sm:$0x1] }
 0x26d   : > { %v1893_v5 = vpack.c.bf16 %v1772_v3, %v1772_v3  ;;  %v1713_v6 = vmax.f32 %v1494_v4, 0.0 }
 0x26e   : > { %v1330_v7 = vpop.f32.mrf.mxu2 }
 0x26f   : > { %2015 = vst.msk [vmem:[%s2973_s30 + $0x1cc] sm:$0xf] %vm1899_vm0, %v1893_v5  ;;  %v1834_v8 = vpack.c.bf16 %v1713_v6, %v1713_v6  ;;  %v1331_v9 = vadd.f32 %v3441_v40, %v1330_v7  ;;  %v1648_v10 = vpop.f32.mrf.mxu3 }
 0x270   : > { %v1182_v11 = vpop.f32.mrf.mxu0 }
 0x271   : > { %1956 = vst.msk [vmem:[%s2973_s30 + $0xe0] sm:$0xf] %vm1899_vm0, %v1834_v8  ;;  %v1644_v12 = vadd.f32 %v1643_v49, %v1331_v9  ;;  %v1183_v13 = vadd.f32 %v3441_v40, %v1182_v11  ;;  %v1495_v14 = vpop.f32.mrf.mxu1  ;;  %v1191_v49 = vadd.f32 %v3441_v40, %v2975_v2 }
 0x273   : > { %v1773_v15 = vmax.f32 %v1644_v12, 0.0  ;;  %v1496_v16 = vadd.f32 %v1495_v14, %v1183_v13 }
 0x275   : > { %v1894_v17 = vpack.c.bf16 %v1773_v15, %v1773_v15  ;;  %v1714_v19 = vmax.f32 %v1496_v16, 0.0 }
 0x276   : > { %v1332_v20 = vpop.f32.mrf.mxu2 }
 0x277   : > { %2016 = vst.msk [vmem:[%s2973_s30 + $0x1d0] sm:$0xf] %vm1899_vm0, %v1894_v17  ;;  %v1835_v21 = vpack.c.bf16 %v1714_v19, %v1714_v19  ;;  %v1333_v22 = vadd.f32 %v3441_v40, %v1332_v20  ;;  %v1650_v23 = vpop.f32.mrf.mxu3 }
 0x278   : > { %v1185_v24 = vpop.f32.mrf.mxu0 }
 0x279   : > { %1957 = vst.msk [vmem:[%s2973_s30 + $0xe4] sm:$0xf] %vm1899_vm0, %v1835_v21  ;;  %v1646_v25 = vadd.f32 %v1645_v61, %v1333_v22  ;;  %v1186_v26 = vadd.f32 %v3441_v40, %v1185_v24  ;;  %v1498_v27 = vpop.f32.mrf.mxu1 }
 0x27b   : > { %v1774_v28 = vmax.f32 %v1646_v25, 0.0  ;;  %v1499_v29 = vadd.f32 %v1498_v27, %v1186_v26 }
 0x27d   : > { %v1895_v30 = vpack.c.bf16 %v1774_v28, %v1774_v28  ;;  %v1715_v31 = vmax.f32 %v1499_v29, 0.0 }
 0x27e   : > { %v1335_v32 = vpop.f32.mrf.mxu2 }
 0x27f   : > { %2017 = vst.msk [vmem:[%s2973_s30 + $0x1d4] sm:$0xf] %vm1899_vm0, %v1895_v30  ;;  %v1836_v33 = vpack.c.bf16 %v1715_v31, %v1715_v31  ;;  %v1336_v34 = vadd.f32 %v3441_v40, %v1335_v32  ;;  %v1653_v35 = vpop.f32.mrf.mxu3 }
 0x280   : > { %v1187_v36 = vpop.f32.mrf.mxu0 }
 0x281   : > { %1958 = vst.msk [vmem:[%s2973_s30 + $0xe8] sm:$0xf] %vm1899_vm0, %v1836_v33  ;;  %v1649_v37 = vadd.f32 %v1648_v10, %v1336_v34  ;;  %v1188_v38 = vadd.f32 %v3441_v40, %v1187_v36  ;;  %v1500_v39 = vpop.f32.mrf.mxu1 }
 0x283   : > { %v1775_v41 = vmax.f32 %v1649_v37, 0.0  ;;  %v1501_v42 = vadd.f32 %v1500_v39, %v1188_v38 }
 0x285   : > { %v1896_v43 = vpack.c.bf16 %v1775_v41, %v1775_v41  ;;  %v1716_v44 = vmax.f32 %v1501_v42, 0.0 }
 0x286   : > { %v1337_v45 = vpop.f32.mrf.mxu2 }
 0x287   : > { %2018 = vst.msk [vmem:[%s2973_s30 + $0x1d8] sm:$0xf] %vm1899_vm0, %v1896_v43  ;;  %v1837_v46 = vpack.c.bf16 %v1716_v44, %v1716_v44  ;;  %v1338_v48 = vadd.f32 %v3441_v40, %v1337_v45  ;;  %v1655_v47 = vpop.f32.mrf.mxu3 }
 0x289   : > { %1959 = vst.msk [vmem:[%s2973_s30 + $0xec] sm:$0xf] %vm1899_vm0, %v1837_v46  ;;  %v1651_v50 = vadd.f32 %v1650_v23, %v1338_v48  ;;  %v1503_v51 = vpop.f32.mrf.mxu1 }
 0x28a   : > { %v1504_v52 = vadd.f32 %v1503_v51, %v1191_v49 }
 0x28b   : > { %v1776_v53 = vmax.f32 %v1651_v50, 0.0 }
 0x28c   : > { %v1717_v54 = vmax.f32 %v1504_v52, 0.0 }
 0x28d   : > { %v1897_v55 = vpack.c.bf16 %v1776_v53, %v1776_v53 }
 0x28e   : > { %v1838_v56 = vpack.c.bf16 %v1717_v54, %v1717_v54  ;;  %v1340_v57 = vpop.f32.mrf.mxu2 }
 0x28f   : > { %2019 = vst.msk [vmem:[%s2973_s30 + $0x1dc] sm:$0xf] %vm1899_vm0, %v1897_v55  ;;  %v1341_v58 = vadd.f32 %v3441_v40, %v1340_v57 }
 0x290   : > { %1960 = vst.msk [vmem:[%s2973_s30 + $0xf0] sm:$0xf] %vm1899_vm0, %v1838_v56 }
 0x291   : > { %v1654_v2 = vadd.f32 %v1653_v35, %v1341_v58  ;;  %v1505_v60 = vpop.f32.mrf.mxu1 }
 0x292   : > { %v1506_v61 = vadd.f32 %v1505_v60, %v1193_v59 }
 0x293   : > { %v1777_v62 = vmax.f32 %v1654_v2, 0.0 }
 0x294   : > { %v1718_v0 = vmax.f32 %v1506_v61, 0.0 }
 0x295   : > { %v1898_v1 = vpack.c.bf16 %v1777_v62, %v1777_v62 }
 0x296   : > { %v1839_v3 = vpack.c.bf16 %v1718_v0, %v1718_v0  ;;  %v1342_v4 = vpop.f32.mrf.mxu2 }
 0x297   : > { %v2024_v5 = vsel %vm2022_vm3, %v1898_v1, %v2023_v63 }
 0x298   : > { %2025 = vst [vmem:[%s2973_s30 + $0x1e0] sm:$0x1] %v2024_v5 }
 0x299   : > { %1961 = vst.msk [vmem:[%s2973_s30 + $0xf4] sm:$0xf] %vm1899_vm0, %v1839_v3 }
 0x29a PF: > { %s13_s12 = sadd.s32 1, %s2805_s12  }
 0x29b   : > { %p10_p4 = scmp.ge.s32.totalorder %s13_s12, 4  }
 0x29d   :  { %12 = sbr.rel (!%p10_p4) target bundleno = 1 (0x1), region = 62 }

// kernel: rainbow_forward.5
= control target key start
LH: loop header
LB: loop body
LE: loop exit
PB: predicated region body
PF: predicated region fallthrough
CT: control target
= control target key end

     0   :  { %s1607_s12 = smov 0   ;;  %s1909_s0 = inlined_call_operand.vmem [shape: bf16[2,196,512], index: 0, kind: input, shape index: {}]   ;;  %s1910_s1 = inlined_call_operand.vmem [shape: bf16[512,64], index: 1, kind: input, shape index: {}]   ;;  %s1911_s2 = inlined_call_operand.vmem [shape: f32[1,64], index: 2, kind: input, shape index: {}]   ;;  %s1912_s3 = inlined_call_operand.vmem [shape: bf16[2,196,64], index: 3, kind: output, shape index: {}]  }
   0x1 LB: > { %s1159_s13 = sadd.s32 4294967295, %s1585_s12   ;;  %p1163_p0 = scmp.ge.s32.totalorder %s1585_s12, 1  ;;  %s1585_s12 = sphi %s1607_s12, %s13_s12  }
   0x2   : > { %p137_p1 = scmp.lt.s32.totalorder %s1585_s12, 3 }
   0x4   : > { %p138_p2 = pnand %p1163_p0, %p137_p1 }
   0x5   : > { %p161_p3 = scmp.lt.s32.totalorder (!%p138_p2), %s1159_s13, 1 }
   0x6   : > { %141 = sbr.rel (%p138_p2) target bundleno = 378 (0x17a), region = 32 }
   0xb   : > { %v1543_v0 = vld [vmem:[%s1910_s1 + $0x38] sm:$0xff]  ;;  %v1542_v4 = vld [vmem:[%s1910_s1 + $0x30] sm:$0xff]  ;;  %v1541_v8 = vld [vmem:[%s1910_s1 + $0x28] sm:$0xff]  ;;  %s1914_s13 = smov (!%p161_p3, %s1159_s13), 1  ;;  %vm1077_vm0 = vcmask 519168   ;;  %vm1102_vm1 = vcmask 517120  }
   0xc   : > { %v1551_v1 = vld [vmem:[%s1910_s1 + $0x78] sm:$0xff]  ;;  %735 = vmatpush.bf16.msra.mxu0 %v1543_v0  ;;  %v1550_v5 = vld [vmem:[%s1910_s1 + $0x70] sm:$0xff]  ;;  %v1549_v9 = vld [vmem:[%s1910_s1 + $0x68] sm:$0xff]  ;;  %s1568_s6 = smul.u32 400, %s1914_s13 }
   0xd   : > { %v1559_v2 = vld [vmem:[%s1910_s1 + $0xb8] sm:$0xff]  ;;  %808 = vmatpush.bf16.msra.mxu1 %v1551_v1  ;;  %v1558_v6 = vld [vmem:[%s1910_s1 + $0xb0] sm:$0xff]  ;;  %v1557_v10 = vld [vmem:[%s1910_s1 + $0xa8] sm:$0xff]  ;;  %s1569_s7 = smul.u32 100, %s1914_s13 }
   0xe   : > { %v1567_v3 = vld [vmem:[%s1910_s1 + $0xf8] sm:$0xff]  ;;  %881 = vmatpush.bf16.msra.mxu2 %v1559_v2  ;;  %v1566_v7 = vld [vmem:[%s1910_s1 + $0xf0] sm:$0xff]  ;;  %v1565_v11 = vld [vmem:[%s1910_s1 + $0xe8] sm:$0xff]  ;;  %s1703_s19 = scalar_lea.vmem %s1909_s0, %s1568_s6 }
   0xf   : > { %954 = vmatpush.bf16.msra.mxu3 %v1567_v3  ;;  %v1540_v12 = vld [vmem:[%s1910_s1 + $0x20] sm:$0xff]  ;;  %v1539_v16 = vld [vmem:[%s1910_s1 + $0x18] sm:$0xff]  ;;  %v1538_v20 = vld [vmem:[%s1910_s1 + $0x10] sm:$0xff]  ;;  %s1811_s10 = scalar_lea.vmem %s1912_s3, %s1569_s7 }
  0x10   : > { %736 = vmatpush.bf16.msra.mxu0 %v1542_v4  ;;  %v1548_v13 = vld [vmem:[%s1910_s1 + $0x60] sm:$0xff]  ;;  %v1547_v17 = vld [vmem:[%s1910_s1 + $0x58] sm:$0xff]  ;;  %v1546_v21 = vld [vmem:[%s1910_s1 + $0x50] sm:$0xff] }
  0x11   : > { %809 = vmatpush.bf16.msra.mxu1 %v1550_v5  ;;  %v1556_v14 = vld [vmem:[%s1910_s1 + $0xa0] sm:$0xff]  ;;  %v1555_v18 = vld [vmem:[%s1910_s1 + $0x98] sm:$0xff]  ;;  %v1554_v22 = vld [vmem:[%s1910_s1 + $0x90] sm:$0xff] }
  0x12   : > { %882 = vmatpush.bf16.msra.mxu2 %v1558_v6  ;;  %v1564_v15 = vld [vmem:[%s1910_s1 + $0xe0] sm:$0xff]  ;;  %v1563_v19 = vld [vmem:[%s1910_s1 + $0xd8] sm:$0xff]  ;;  %v1562_v23 = vld [vmem:[%s1910_s1 + $0xd0] sm:$0xff] }
  0x13   : > { %955 = vmatpush.bf16.msra.mxu3 %v1566_v7  ;;  %v1537_v24 = vld [vmem:[%s1910_s1 + $0x8] sm:$0xff]  ;;  %v1536_v28 = vld [vmem:[%s1910_s1] sm:$0xff]  ;;  %v1490_v33 = vld [vmem:[%s1703_s19 + $0xc] sm:$0xf0] }
  0x14   : > { %737 = vmatpush.bf16.msra.mxu0 %v1541_v8  ;;  %v1545_v25 = vld [vmem:[%s1910_s1 + $0x48] sm:$0xff]  ;;  %v1544_v29 = vld [vmem:[%s1910_s1 + $0x40] sm:$0xff]  ;;  %v1170_v35 = vld [vmem:[%s1703_s19 + $0x10] sm:$0xf0] }
  0x15   : > { %810 = vmatpush.bf16.msra.mxu1 %v1549_v9  ;;  %v1553_v26 = vld [vmem:[%s1910_s1 + $0x88] sm:$0xff]  ;;  %v1552_v30 = vld [vmem:[%s1910_s1 + $0x80] sm:$0xff]  ;;  %v1491_v37 = vld [vmem:[%s1703_s19 + $0x14] sm:$0xf0] }
  0x16   : > { %883 = vmatpush.bf16.msra.mxu2 %v1557_v10  ;;  %v1561_v27 = vld [vmem:[%s1910_s1 + $0xc8] sm:$0xff]  ;;  %v1560_v31 = vld [vmem:[%s1910_s1 + $0xc0] sm:$0xff]  ;;  %v1178_v39 = vld [vmem:[%s1703_s19 + $0x18] sm:$0xf0] }
  0x17   : > { %956 = vmatpush.bf16.msra.mxu3 %v1565_v11  ;;  %v1168_v32 = vld [vmem:[%s1703_s19] sm:$0xf]  ;;  %v1488_v34 = vld [vmem:[%s1703_s19 + $0x4] sm:$0xf]  ;;  %v1176_v36 = vld [vmem:[%s1703_s19 + $0x8] sm:$0xf] }
  0x18   : > { %738 = vmatpush.bf16.msra.mxu0 %v1540_v12  ;;  %v1489_v38 = vld [vmem:[%s1703_s19 + $0xc] sm:$0xf]  ;;  %v1169_v40 = vor.u32 %v1490_v33, %v1168_v32  ;;  %v1173_v41 = vor.u32 %v1488_v34, %v1170_v35  ;;  %v1177_v42 = vor.u32 %v1491_v37, %v1176_v36  ;;  %v1184_v44 = vld [vmem:[%s1703_s19 + $0x20] sm:$0xf]  ;;  %v1494_v45 = vld [vmem:[%s1703_s19 + $0x2c] sm:$0xf0] }
  0x19   : > { %811 = vmatpush.bf16.msra.mxu1 %v1548_v13  ;;  %v1181_v43 = vor.u32 %v1489_v38, %v1178_v39  ;;  %v1492_v46 = vld [vmem:[%s1703_s19 + $0x24] sm:$0xf]  ;;  %v1186_v47 = vld [vmem:[%s1703_s19 + $0x30] sm:$0xf0]  ;;  %v1192_v48 = vld [vmem:[%s1703_s19 + $0x28] sm:$0xf]  ;;  %v1185_v52 = vor.u32 %v1494_v45, %v1184_v44 }
  0x1a   : > { %884 = vmatpush.bf16.msra.mxu2 %v1556_v14  ;;  %v1495_v49 = vld [vmem:[%s1703_s19 + $0x34] sm:$0xf0]  ;;  %v1493_v50 = vld [vmem:[%s1703_s19 + $0x2c] sm:$0xf]  ;;  %v1194_v51 = vld [vmem:[%s1703_s19 + $0x38] sm:$0xf0]  ;;  %v1189_v53 = vor.u32 %v1492_v46, %v1186_v47 }
  0x1b   : > { %957 = vmatpush.bf16.msra.mxu3 %v1564_v15  ;;  %v1193_v54 = vor.u32 %v1495_v49, %v1192_v48  ;;  %v1197_v55 = vor.u32 %v1493_v50, %v1194_v51  ;;  %v1200_v56 = vld [vmem:[%s1703_s19 + $0x40] sm:$0xf]  ;;  %v1498_v57 = vld [vmem:[%s1703_s19 + $0x4c] sm:$0xf0]  ;;  %v1496_v58 = vld [vmem:[%s1703_s19 + $0x44] sm:$0xf] }
  0x1c   : > { %739 = vmatpush.bf16.msra.mxu0 %v1539_v16  ;;  %v1202_v59 = vld [vmem:[%s1703_s19 + $0x50] sm:$0xf0]  ;;  %v1208_v60 = vld [vmem:[%s1703_s19 + $0x48] sm:$0xf]  ;;  %v1499_v61 = vld [vmem:[%s1703_s19 + $0x54] sm:$0xf0]  ;;  %v1201_v0 = vor.u32 %v1498_v57, %v1200_v56 }
  0x1d   : > { %812 = vmatpush.bf16.msra.mxu1 %v1547_v17  ;;  %v1497_v62 = vld [vmem:[%s1703_s19 + $0x4c] sm:$0xf]  ;;  %v1210_v63 = vld [vmem:[%s1703_s19 + $0x58] sm:$0xf0]  ;;  %v1205_v1 = vor.u32 %v1496_v58, %v1202_v59  ;;  %v1209_v2 = vor.u32 %v1499_v61, %v1208_v60  ;;  %v1216_v4 = vld [vmem:[%s1703_s19 + $0x60] sm:$0xf] }
  0x1e   : > { %885 = vmatpush.bf16.msra.mxu2 %v1555_v18  ;;  %v1213_v3 = vor.u32 %v1497_v62, %v1210_v63  ;;  %v1502_v5 = vld [vmem:[%s1703_s19 + $0x6c] sm:$0xf0]  ;;  %v1500_v6 = vld [vmem:[%s1703_s19 + $0x64] sm:$0xf]  ;;  %v1218_v7 = vld [vmem:[%s1703_s19 + $0x70] sm:$0xf0] }
  0x1f   : > { %958 = vmatpush.bf16.msra.mxu3 %v1563_v19  ;;  %v1224_v8 = vld [vmem:[%s1703_s19 + $0x68] sm:$0xf]  ;;  %v1503_v9 = vld [vmem:[%s1703_s19 + $0x74] sm:$0xf0]  ;;  %v1501_v10 = vld [vmem:[%s1703_s19 + $0x6c] sm:$0xf]  ;;  %v1217_v12 = vor.u32 %v1502_v5, %v1216_v4  ;;  %v1221_v13 = vor.u32 %v1500_v6, %v1218_v7 }
  0x20   : > { %740 = vmatpush.bf16.msra.mxu0 %v1538_v20  ;;  %v1226_v11 = vld [vmem:[%s1703_s19 + $0x78] sm:$0xf0]  ;;  %v1225_v14 = vor.u32 %v1503_v9, %v1224_v8  ;;  %v1232_v16 = vld [vmem:[%s1703_s19 + $0x80] sm:$0xf]  ;;  %v1506_v17 = vld [vmem:[%s1703_s19 + $0x8c] sm:$0xf0] }
  0x21   : > { %813 = vmatpush.bf16.msra.mxu1 %v1546_v21  ;;  %v1229_v15 = vor.u32 %v1501_v10, %v1226_v11  ;;  %v1504_v18 = vld [vmem:[%s1703_s19 + $0x84] sm:$0xf]  ;;  %v1234_v19 = vld [vmem:[%s1703_s19 + $0x90] sm:$0xf0]  ;;  %v1240_v20 = vld [vmem:[%s1703_s19 + $0x88] sm:$0xf] }
  0x22   : > { %886 = vmatpush.bf16.msra.mxu2 %v1554_v22  ;;  %v1507_v21 = vld [vmem:[%s1703_s19 + $0x94] sm:$0xf0]  ;;  %v1505_v22 = vld [vmem:[%s1703_s19 + $0x8c] sm:$0xf]  ;;  %v1256_v32 = vld [vmem:[%s1703_s19 + $0xa8] sm:$0xf] }
  0x23   : > { %959 = vmatpush.bf16.msra.mxu3 %v1562_v23  ;;  %v1242_v23 = vld [vmem:[%s1703_s19 + $0x98] sm:$0xf0]  ;;  %v1511_v33 = vld [vmem:[%s1703_s19 + $0xb4] sm:$0xf0]  ;;  %v1509_v34 = vld [vmem:[%s1703_s19 + $0xac] sm:$0xf] }
  0x24   : > { %741 = vmatpush.bf16.msra.mxu0 %v1537_v24  ;;  %v1233_v24 = vor.u32 %v1506_v17, %v1232_v16  ;;  %v1258_v35 = vld [vmem:[%s1703_s19 + $0xb8] sm:$0xf0]  ;;  %v1257_v38 = vor.u32 %v1511_v33, %v1256_v32  ;;  %v1272_v44 = vld [vmem:[%s1703_s19 + $0xc8] sm:$0xf]  ;;  %v1515_v45 = vld [vmem:[%s1703_s19 + $0xd4] sm:$0xf0] }
  0x25   : > { %814 = vmatpush.bf16.msra.mxu1 %v1545_v25  ;;  %v1237_v25 = vor.u32 %v1504_v18, %v1234_v19  ;;  %v1261_v39 = vor.u32 %v1509_v34, %v1258_v35  ;;  %v1513_v46 = vld [vmem:[%s1703_s19 + $0xcc] sm:$0xf]  ;;  %v1274_v47 = vld [vmem:[%s1703_s19 + $0xd8] sm:$0xf0]  ;;  %v1273_v50 = vor.u32 %v1515_v45, %v1272_v44  ;;  %v1288_v56 = vld [vmem:[%s1703_s19 + $0xe8] sm:$0xf] }
  0x26   : > { %887 = vmatpush.bf16.msra.mxu2 %v1553_v26  ;;  %v1241_v26 = vor.u32 %v1507_v21, %v1240_v20  ;;  %v1277_v51 = vor.u32 %v1513_v46, %v1274_v47  ;;  %v1519_v57 = vld [vmem:[%s1703_s19 + $0xf4] sm:$0xf0]  ;;  %v1517_v58 = vld [vmem:[%s1703_s19 + $0xec] sm:$0xf]  ;;  %v1290_v59 = vld [vmem:[%s1703_s19 + $0xf8] sm:$0xf0] }
  0x27   : > { %960 = vmatpush.bf16.msra.mxu3 %v1561_v27  ;;  %v1245_v27 = vor.u32 %v1505_v22, %v1242_v23  ;;  %v1289_v62 = vor.u32 %v1519_v57, %v1288_v56  ;;  %v1293_v63 = vor.u32 %v1517_v58, %v1290_v59  ;;  %v1298_v4 = vld [vmem:[%s1703_s19 + $0x110] sm:$0xf0]  ;;  %v1304_v5 = vld [vmem:[%s1703_s19 + $0x108] sm:$0xf]  ;;  %v1523_v6 = vld [vmem:[%s1703_s19 + $0x114] sm:$0xf0] }
  0x28   : > { %742 = vmatpush.bf16.msra.mxu0 %v1536_v28  ;;  %v1248_v28 = vld [vmem:[%s1703_s19 + $0xa0] sm:$0xf]  ;;  %v1521_v7 = vld [vmem:[%s1703_s19 + $0x10c] sm:$0xf]  ;;  %v1306_v8 = vld [vmem:[%s1703_s19 + $0x118] sm:$0xf0] }
  0x29   : > { %815 = vmatpush.bf16.msra.mxu1 %v1544_v29  ;;  %v1510_v29 = vld [vmem:[%s1703_s19 + $0xac] sm:$0xf0]  ;;  %v1322_v32 = vld [vmem:[%s1703_s19 + $0x138] sm:$0xf0]  ;;  %v1328_v56 = vld [vmem:[%s1703_s19 + $0x140] sm:$0xf] }
  0x2a   : > { %888 = vmatpush.bf16.msra.mxu2 %v1552_v30  ;;  %v1508_v30 = vld [vmem:[%s1703_s19 + $0xa4] sm:$0xf]  ;;  %v1249_v36 = vor.u32 %v1510_v29, %v1248_v28  ;;  %v1314_v28 = vld [vmem:[%s1703_s19 + $0x130] sm:$0xf0]  ;;  %v1320_v29 = vld [vmem:[%s1703_s19 + $0x128] sm:$0xf] }
  0x2b   : > { %961 = vmatpush.bf16.msra.mxu3 %v1560_v31  ;;  %743 = vmatmul.bf16.vlgmr.msra.gmra.mxu0 %v1169_v40  ;;  %v1250_v31 = vld [vmem:[%s1703_s19 + $0xb0] sm:$0xf0]  ;;  %v1264_v40 = vld [vmem:[%s1703_s19 + $0xc0] sm:$0xf]  ;;  %v1530_v57 = vld [vmem:[%s1703_s19 + $0x14c] sm:$0xf0] }
  0x2c   : > { %816 = vmatmul.bf16.vlgmr.msra.gmra.mxu1 %v1173_v41  ;;  %v1253_v37 = vor.u32 %v1508_v30, %v1250_v31  ;;  %v1514_v41 = vld [vmem:[%s1703_s19 + $0xcc] sm:$0xf0]  ;;  %v1527_v30 = vld [vmem:[%s1703_s19 + $0x134] sm:$0xf0]  ;;  %v1525_v31 = vld [vmem:[%s1703_s19 + $0x12c] sm:$0xf] }
  0x2d   : > { %889 = vmatmul.bf16.vlgmr.msra.gmra.mxu2 %v1177_v42  ;;  %v1512_v42 = vld [vmem:[%s1703_s19 + $0xc4] sm:$0xf]  ;;  %v1265_v48 = vor.u32 %v1514_v41, %v1264_v40 }
  0x2e   : > { %962 = vmatmul.bf16.vlgmr.msra.gmra.mxu3 %v1181_v43  ;;  %v1266_v43 = vld [vmem:[%s1703_s19 + $0xd0] sm:$0xf0]  ;;  %v1528_v58 = vld [vmem:[%s1703_s19 + $0x144] sm:$0xf] }
  0x2f   : > { %v1269_v49 = vor.u32 %v1512_v42, %v1266_v43  ;;  %v1321_v42 = vor.u32 %v1527_v30, %v1320_v29  ;;  %v1325_v43 = vor.u32 %v1525_v31, %v1322_v32  ;;  %v1346_v29 = vld [vmem:[%s1703_s19 + $0x170] sm:$0xf0]  ;;  %v1352_v30 = vld [vmem:[%s1703_s19 + $0x168] sm:$0xf]  ;;  %v1535_v31 = vld [vmem:[%s1703_s19 + $0x174] sm:$0xf0] }
  0x30   : > { %v1533_v32 = vld [vmem:[%s1703_s19 + $0x16c] sm:$0xf] }
  0x3b   : > { %748 = vmatmul.bf16.gmra.mxu0 %v1185_v52  ;;  %v1280_v52 = vld [vmem:[%s1703_s19 + $0xe0] sm:$0xf] }
  0x3c   : > { %821 = vmatmul.bf16.gmra.mxu1 %v1189_v53  ;;  %v1518_v53 = vld [vmem:[%s1703_s19 + $0xec] sm:$0xf0] }
  0x3d   : > { %894 = vmatmul.bf16.gmra.mxu2 %v1193_v54  ;;  %v1516_v54 = vld [vmem:[%s1703_s19 + $0xe4] sm:$0xf]  ;;  %v1281_v60 = vor.u32 %v1518_v53, %v1280_v52 }
  0x3e   : > { %967 = vmatmul.bf16.gmra.mxu3 %v1197_v55  ;;  %v1282_v55 = vld [vmem:[%s1703_s19 + $0xf0] sm:$0xf0] }
  0x3f   : > { %v1285_v61 = vor.u32 %v1516_v54, %v1282_v55 }
  0x4b   : > { %753 = vmatmul.bf16.gmra.mxu0 %v1201_v0  ;;  %v1790_v0 = vld [vmem:[%s1911_s2] ss:$0 sm:$0xff] }
  0x4c   : > { %826 = vmatmul.bf16.gmra.mxu1 %v1205_v1  ;;  %v1296_v1 = vld [vmem:[%s1703_s19 + $0x100] sm:$0xf] }
  0x4d   : > { %899 = vmatmul.bf16.gmra.mxu2 %v1209_v2  ;;  %v1522_v2 = vld [vmem:[%s1703_s19 + $0x10c] sm:$0xf0] }
  0x4e   : > { %972 = vmatmul.bf16.gmra.mxu3 %v1213_v3  ;;  %v1520_v3 = vld [vmem:[%s1703_s19 + $0x104] sm:$0xf]  ;;  %v1297_v9 = vor.u32 %v1522_v2, %v1296_v1  ;;  %v1338_v1 = vld [vmem:[%s1703_s19 + $0x158] sm:$0xf0] }
  0x4f   : > { %v1301_v10 = vor.u32 %v1520_v3, %v1298_v4 }
  0x5b   : > { %758 = vmatmul.bf16.gmra.mxu0 %v1217_v12 }
  0x5c   : > { %831 = vmatmul.bf16.gmra.mxu1 %v1221_v13  ;;  %v1305_v13 = vor.u32 %v1523_v6, %v1304_v5  ;;  %v1329_v6 = vor.u32 %v1530_v57, %v1328_v56  ;;  %v220_v56 = vld [vmem:[%s1703_s19 + $0x188] sm:$0x33] }
  0x5d   : > { %904 = vmatmul.bf16.gmra.mxu2 %v1225_v14  ;;  %v1309_v14 = vor.u32 %v1521_v7, %v1306_v8 }
  0x5e   : > { %977 = vmatmul.bf16.gmra.mxu3 %v1229_v15 }
  0x6b   : > { %763 = vmatmul.bf16.gmra.mxu0 %v1233_v24  ;;  %v1312_v24 = vld [vmem:[%s1703_s19 + $0x120] sm:$0xf] }
  0x6c   : > { %836 = vmatmul.bf16.gmra.mxu1 %v1237_v25  ;;  %v1526_v25 = vld [vmem:[%s1703_s19 + $0x12c] sm:$0xf0] }
  0x6d   : > { %909 = vmatmul.bf16.gmra.mxu2 %v1241_v26  ;;  %v1524_v26 = vld [vmem:[%s1703_s19 + $0x124] sm:$0xf] }
  0x6e   : > { %982 = vmatmul.bf16.gmra.mxu3 %v1245_v27 }
  0x7b   : > { %768 = vmatmul.bf16.gmra.mxu0 %v1249_v36 }
  0x7c   : > { %841 = vmatmul.bf16.gmra.mxu1 %v1253_v37  ;;  %v1313_v37 = vor.u32 %v1526_v25, %v1312_v24  ;;  %v1344_v25 = vld [vmem:[%s1703_s19 + $0x160] sm:$0xf] }
  0x7d   : > { %914 = vmatmul.bf16.gmra.mxu2 %v1257_v38  ;;  %v1317_v38 = vor.u32 %v1524_v26, %v1314_v28  ;;  %v1534_v26 = vld [vmem:[%s1703_s19 + $0x16c] sm:$0xf0] }
  0x7e   : > { %987 = vmatmul.bf16.gmra.mxu3 %v1261_v39 }
  0x8b   : > { %773 = vmatmul.bf16.gmra.mxu0 %v1265_v48 }
  0x8c   : > { %846 = vmatmul.bf16.gmra.mxu1 %v1269_v49 }
  0x8d   : > { %919 = vmatmul.bf16.gmra.mxu2 %v1273_v50 }
  0x8e   : > { %992 = vmatmul.bf16.gmra.mxu3 %v1277_v51 }
  0x9b   : > { %778 = vmatmul.bf16.gmra.mxu0 %v1281_v60  ;;  %v1330_v60 = vld [vmem:[%s1703_s19 + $0x150] sm:$0xf0] }
  0x9c   : > { %851 = vmatmul.bf16.gmra.mxu1 %v1285_v61  ;;  %v1336_v61 = vld [vmem:[%s1703_s19 + $0x148] sm:$0xf]  ;;  %v1333_v7 = vor.u32 %v1528_v58, %v1330_v60 }
  0x9d   : > { %924 = vmatmul.bf16.gmra.mxu2 %v1289_v62  ;;  %v1531_v62 = vld [vmem:[%s1703_s19 + $0x154] sm:$0xf0] }
  0x9e   : > { %997 = vmatmul.bf16.gmra.mxu3 %v1293_v63  ;;  %v1529_v63 = vld [vmem:[%s1703_s19 + $0x14c] sm:$0xf] }
  0xa8   : > { %v744_v11 = vpop.f32.mrf.mxu0 }
  0xa9   : > { %v817_v12 = vpop.f32.mrf.mxu1  ;;  %v745_v15 = vadd.f32 %v1790_v0, %v744_v11  ;;  %v1337_v11 = vor.u32 %v1531_v62, %v1336_v61  ;;  %v437_v62 = vunpack.c.l.b16 %v220_v56 }
  0xab   : > { %783 = vmatmul.bf16.gmra.mxu0 %v1297_v9  ;;  %v818_v16 = vadd.f32 %v817_v12, %v745_v15  ;;  %v1341_v12 = vor.u32 %v1529_v63, %v1338_v1  ;;  %v438_v63 = vunpack.c.h.b16 %v220_v56 }
  0xac   : > { %856 = vmatmul.bf16.gmra.mxu1 %v1301_v10 }
  0xad   : > { %929 = vmatmul.bf16.gmra.mxu2 %v1305_v13 }
  0xae   : > { %1002 = vmatmul.bf16.gmra.mxu3 %v1309_v14 }
  0xb0   : > { %v890_v17 = vpop.f32.mrf.mxu2  ;;  %v746_v20 = vpop.f32.mrf.mxu0 }
  0xb1   : > { %v963_v18 = vpop.f32.mrf.mxu3  ;;  %v891_v19 = vadd.f32 %v890_v17, %v818_v16  ;;  %v819_v21 = vpop.f32.mrf.mxu1  ;;  %v747_v23 = vadd.f32 %v1790_v0, %v746_v20 }
  0xb3   : > { %v964_v22 = vadd.f32 %v963_v18, %v891_v19  ;;  %v820_v34 = vadd.f32 %v819_v21, %v747_v23 }
  0xb5   : > { %v1027_v27 = vmax.f32 %v964_v22, 0.0 }
  0xb7   : > { %v1052_v33 = vpack.c.bf16 %v1027_v27, %v1027_v27  ;;  %v1532_v27 = vld [vmem:[%s1703_s19 + $0x164] sm:$0xf] }
  0xb8   : > { %v892_v35 = vpop.f32.mrf.mxu2  ;;  %v749_v40 = vpop.f32.mrf.mxu0 }
  0xb9   : > { %v965_v36 = vpop.f32.mrf.mxu3  ;;  %1078 = vst.msk [vmem:[%s1811_s10] sm:$0xf] %vm1077_vm0, %v1052_v33  ;;  %v893_v39 = vadd.f32 %v892_v35, %v820_v34  ;;  %v822_v41 = vpop.f32.mrf.mxu1  ;;  %v750_v44 = vadd.f32 %v1790_v0, %v749_v40  ;;  %v1354_v33 = vld [vmem:[%s1703_s19 + $0x178] sm:$0xf0] }
  0xbb   : > { %v966_v45 = vadd.f32 %v965_v36, %v893_v39  ;;  %788 = vmatmul.bf16.gmra.mxu0 %v1313_v37  ;;  %v823_v47 = vadd.f32 %v822_v41, %v750_v44  ;;  %v1349_v39 = vor.u32 %v1532_v27, %v1346_v29  ;;  %v1357_v44 = vor.u32 %v1533_v32, %v1354_v33 }
  0xbc   : > { %861 = vmatmul.bf16.gmra.mxu1 %v1317_v38  ;;  %v1345_v38 = vor.u32 %v1534_v26, %v1344_v25 }
  0xbd   : > { %v1028_v46 = vmax.f32 %v966_v45, 0.0  ;;  %934 = vmatmul.bf16.gmra.mxu2 %v1321_v42 }
  0xbe   : > { %1007 = vmatmul.bf16.gmra.mxu3 %v1325_v43  ;;  %v1353_v43 = vor.u32 %v1535_v31, %v1352_v30 }
  0xbf   : > { %v1053_v48 = vpack.c.bf16 %v1028_v46, %v1028_v46 }
  0xc0   : > { %v895_v49 = vpop.f32.mrf.mxu2  ;;  %v751_v52 = vpop.f32.mrf.mxu0 }
  0xc1   : > { %v968_v50 = vpop.f32.mrf.mxu3  ;;  %1079 = vst.msk [vmem:[%s1811_s10 + $0x4] sm:$0xf] %vm1077_vm0, %v1053_v48  ;;  %v896_v51 = vadd.f32 %v895_v49, %v823_v47  ;;  %v824_v53 = vpop.f32.mrf.mxu1  ;;  %v752_v55 = vadd.f32 %v1790_v0, %v751_v52 }
  0xc3   : > { %v969_v54 = vadd.f32 %v968_v50, %v896_v51  ;;  %v825_v3 = vadd.f32 %v824_v53, %v752_v55  ;;  %v219_v55 = vld [vmem:[%s1703_s19 + $0x180] sm:$0x33] }
  0xc4   : > { %v436_v60 = vunpack.c.h.b16 %v219_v55 }
  0xc5   : > { %v1029_v59 = vmax.f32 %v969_v54, 0.0 }
  0xc7   : > { %v1054_v2 = vpack.c.bf16 %v1029_v59, %v1029_v59  ;;  %v435_v59 = vunpack.c.l.b16 %v219_v55 }
  0xc8   : > { %v897_v4 = vpop.f32.mrf.mxu2  ;;  %v754_v9 = vpop.f32.mrf.mxu0 }
  0xc9   : > { %v970_v5 = vpop.f32.mrf.mxu3  ;;  %1080 = vst.msk [vmem:[%s1811_s10 + $0x8] sm:$0xf] %vm1077_vm0, %v1054_v2  ;;  %v898_v8 = vadd.f32 %v897_v4, %v825_v3  ;;  %v827_v10 = vpop.f32.mrf.mxu1  ;;  %v755_v13 = vadd.f32 %v1790_v0, %v754_v9 }
  0xcb   : > { %v971_v14 = vadd.f32 %v970_v5, %v898_v8  ;;  %793 = vmatmul.bf16.gmra.mxu0 %v1329_v6  ;;  %v828_v16 = vadd.f32 %v827_v10, %v755_v13  ;;  %v487_v5 = vpack.c.b16 %v435_v59, %v435_v59  ;;  %v488_v6 = vpack.c.b16 %v436_v60, %v436_v60 }
  0xcc   : > { %866 = vmatmul.bf16.gmra.mxu1 %v1333_v7  ;;  %v489_v10 = vpack.c.b16 %v437_v62, %v437_v62 }
  0xcd   : > { %v1030_v15 = vmax.f32 %v971_v14, 0.0  ;;  %939 = vmatmul.bf16.gmra.mxu2 %v1337_v11  ;;  %v490_v11 = vpack.c.b16 %v438_v63, %v438_v63 }
  0xce   : > { %1012 = vmatmul.bf16.gmra.mxu3 %v1341_v12 }
  0xcf   : > { %v1055_v17 = vpack.c.bf16 %v1030_v15, %v1030_v15 }
  0xd0   : > { %v900_v18 = vpop.f32.mrf.mxu2  ;;  %v756_v21 = vpop.f32.mrf.mxu0 }
  0xd1   : > { %v973_v19 = vpop.f32.mrf.mxu3  ;;  %1081 = vst.msk [vmem:[%s1811_s10 + $0xc] sm:$0xf] %vm1077_vm0, %v1055_v17  ;;  %v901_v20 = vadd.f32 %v900_v18, %v828_v16  ;;  %v829_v22 = vpop.f32.mrf.mxu1  ;;  %v757_v24 = vadd.f32 %v1790_v0, %v756_v21 }
  0xd3   : > { %v974_v23 = vadd.f32 %v973_v19, %v901_v20  ;;  %v830_v35 = vadd.f32 %v829_v22, %v757_v24 }
  0xd5   : > { %v1031_v28 = vmax.f32 %v974_v23, 0.0 }
  0xd7   : > { %v1056_v34 = vpack.c.bf16 %v1031_v28, %v1031_v28 }
  0xd8   : > { %v902_v36 = vpop.f32.mrf.mxu2  ;;  %v759_v41 = vpop.f32.mrf.mxu0 }
  0xd9   : > { %v975_v37 = vpop.f32.mrf.mxu3  ;;  %1082 = vst.msk [vmem:[%s1811_s10 + $0x10] sm:$0xf] %vm1077_vm0, %v1056_v34  ;;  %v903_v40 = vadd.f32 %v902_v36, %v830_v35  ;;  %v832_v42 = vpop.f32.mrf.mxu1  ;;  %v760_v45 = vadd.f32 %v1790_v0, %v759_v41 }
  0xdb   : > { %v976_v46 = vadd.f32 %v975_v37, %v903_v40  ;;  %798 = vmatmul.bf16.gmra.mxu0 %v1345_v38  ;;  %v833_v48 = vadd.f32 %v832_v42, %v760_v45 }
  0xdc   : > { %871 = vmatmul.bf16.gmra.mxu1 %v1349_v39 }
  0xdd   : > { %v1032_v47 = vmax.f32 %v976_v46, 0.0  ;;  %944 = vmatmul.bf16.gmra.mxu2 %v1353_v43 }
  0xde   : > { %1017 = vmatmul.bf16.gmra.mxu3 %v1357_v44 }
  0xdf   : > { %v1057_v49 = vpack.c.bf16 %v1032_v47, %v1032_v47 }
  0xe0   : > { %v905_v50 = vpop.f32.mrf.mxu2  ;;  %v761_v53 = vpop.f32.mrf.mxu0 }
  0xe1   : > { %v978_v51 = vpop.f32.mrf.mxu3  ;;  %1083 = vst.msk [vmem:[%s1811_s10 + $0x14] sm:$0xf] %vm1077_vm0, %v1057_v49  ;;  %v906_v52 = vadd.f32 %v905_v50, %v833_v48  ;;  %v834_v54 = vpop.f32.mrf.mxu1  ;;  %v762_v58 = vadd.f32 %v1790_v0, %v761_v53 }
  0xe3   : > { %v979_v57 = vadd.f32 %v978_v51, %v906_v52  ;;  %v835_v2 = vadd.f32 %v834_v54, %v762_v58 }
  0xe5   : > { %v1033_v61 = vmax.f32 %v979_v57, 0.0 }
  0xe7   : > { %v1058_v1 = vpack.c.bf16 %v1033_v61, %v1033_v61 }
  0xe8   : > { %v907_v3 = vpop.f32.mrf.mxu2  ;;  %v764_v8 = vpop.f32.mrf.mxu0 }
  0xe9   : > { %v980_v4 = vpop.f32.mrf.mxu3  ;;  %1084 = vst.msk [vmem:[%s1811_s10 + $0x18] sm:$0xf] %vm1077_vm0, %v1058_v1  ;;  %v908_v7 = vadd.f32 %v907_v3, %v835_v2  ;;  %v837_v9 = vpop.f32.mrf.mxu1  ;;  %v765_v12 = vadd.f32 %v1790_v0, %v764_v8 }
  0xeb   : > { %v981_v13 = vadd.f32 %v980_v4, %v908_v7  ;;  %803 = vmatmul.bf16.gmra.mxu0 %v487_v5  ;;  %v838_v15 = vadd.f32 %v837_v9, %v765_v12 }
  0xec   : > { %876 = vmatmul.bf16.gmra.mxu1 %v488_v6 }
  0xed   : > { %v1034_v14 = vmax.f32 %v981_v13, 0.0  ;;  %949 = vmatmul.bf16.gmra.mxu2 %v489_v10 }
  0xee   : > { %1022 = vmatmul.bf16.gmra.mxu3 %v490_v11 }
  0xef   : > { %v1059_v16 = vpack.c.bf16 %v1034_v14, %v1034_v14 }
  0xf0   : > { %v910_v17 = vpop.f32.mrf.mxu2  ;;  %v766_v20 = vpop.f32.mrf.mxu0 }
  0xf1   : > { %v983_v18 = vpop.f32.mrf.mxu3  ;;  %1085 = vst.msk [vmem:[%s1811_s10 + $0x1c] sm:$0xf] %vm1077_vm0, %v1059_v16  ;;  %v911_v19 = vadd.f32 %v910_v17, %v838_v15  ;;  %v839_v21 = vpop.f32.mrf.mxu1  ;;  %v767_v23 = vadd.f32 %v1790_v0, %v766_v20 }
  0xf3   : > { %v984_v22 = vadd.f32 %v983_v18, %v911_v19  ;;  %v840_v26 = vadd.f32 %v839_v21, %v767_v23 }
  0xf5   : > { %v1035_v24 = vmax.f32 %v984_v22, 0.0 }
  0xf7   : > { %v1060_v25 = vpack.c.bf16 %v1035_v24, %v1035_v24 }
  0xf8   : > { %v912_v27 = vpop.f32.mrf.mxu2  ;;  %v769_v30 = vpop.f32.mrf.mxu0 }
  0xf9   : > { %v985_v28 = vpop.f32.mrf.mxu3  ;;  %1086 = vst.msk [vmem:[%s1811_s10 + $0x20] sm:$0xf] %vm1077_vm0, %v1060_v25  ;;  %v913_v29 = vadd.f32 %v912_v27, %v840_v26  ;;  %v842_v31 = vpop.f32.mrf.mxu1  ;;  %v770_v32 = vadd.f32 %v1790_v0, %v769_v30 }
  0xfb   : > { %v986_v33 = vadd.f32 %v985_v28, %v913_v29  ;;  %v843_v35 = vadd.f32 %v842_v31, %v770_v32 }
  0xfd   : > { %v1036_v34 = vmax.f32 %v986_v33, 0.0 }
  0xff   : > { %v1061_v36 = vpack.c.bf16 %v1036_v34, %v1036_v34 }
 0x100   : > { %v915_v37 = vpop.f32.mrf.mxu2  ;;  %v771_v40 = vpop.f32.mrf.mxu0 }
 0x101   : > { %v988_v38 = vpop.f32.mrf.mxu3  ;;  %1087 = vst.msk [vmem:[%s1811_s10 + $0x24] sm:$0xf] %vm1077_vm0, %v1061_v36  ;;  %v916_v39 = vadd.f32 %v915_v37, %v843_v35  ;;  %v844_v41 = vpop.f32.mrf.mxu1  ;;  %v772_v43 = vadd.f32 %v1790_v0, %v771_v40 }
 0x103   : > { %v989_v42 = vadd.f32 %v988_v38, %v916_v39  ;;  %v845_v46 = vadd.f32 %v844_v41, %v772_v43 }
 0x105   : > { %v1037_v44 = vmax.f32 %v989_v42, 0.0 }
 0x107   : > { %v1062_v45 = vpack.c.bf16 %v1037_v44, %v1037_v44 }
 0x108   : > { %v917_v47 = vpop.f32.mrf.mxu2  ;;  %v774_v50 = vpop.f32.mrf.mxu0 }
 0x109   : > { %v990_v48 = vpop.f32.mrf.mxu3  ;;  %1088 = vst.msk [vmem:[%s1811_s10 + $0x28] sm:$0xf] %vm1077_vm0, %v1062_v45  ;;  %v918_v49 = vadd.f32 %v917_v47, %v845_v46  ;;  %v847_v51 = vpop.f32.mrf.mxu1  ;;  %v775_v52 = vadd.f32 %v1790_v0, %v774_v50 }
 0x10b   : > { %v991_v53 = vadd.f32 %v990_v48, %v918_v49  ;;  %v848_v55 = vadd.f32 %v847_v51, %v775_v52 }
 0x10d   : > { %v1038_v54 = vmax.f32 %v991_v53, 0.0 }
 0x10f   : > { %v1063_v56 = vpack.c.bf16 %v1038_v54, %v1038_v54 }
 0x110   : > { %v920_v57 = vpop.f32.mrf.mxu2  ;;  %v776_v60 = vpop.f32.mrf.mxu0 }
 0x111   : > { %v993_v58 = vpop.f32.mrf.mxu3  ;;  %1089 = vst.msk [vmem:[%s1811_s10 + $0x2c] sm:$0xf] %vm1077_vm0, %v1063_v56  ;;  %v921_v59 = vadd.f32 %v920_v57, %v848_v55  ;;  %v849_v61 = vpop.f32.mrf.mxu1  ;;  %v777_v63 = vadd.f32 %v1790_v0, %v776_v60 }
 0x113   : > { %v994_v62 = vadd.f32 %v993_v58, %v921_v59  ;;  %v850_v3 = vadd.f32 %v849_v61, %v777_v63 }
 0x115   : > { %v1039_v1 = vmax.f32 %v994_v62, 0.0 }
 0x117   : > { %v1064_v2 = vpack.c.bf16 %v1039_v1, %v1039_v1 }
 0x118   : > { %v922_v4 = vpop.f32.mrf.mxu2  ;;  %v779_v7 = vpop.f32.mrf.mxu0 }
 0x119   : > { %v995_v5 = vpop.f32.mrf.mxu3  ;;  %1090 = vst.msk [vmem:[%s1811_s10 + $0x30] sm:$0xf] %vm1077_vm0, %v1064_v2  ;;  %v923_v6 = vadd.f32 %v922_v4, %v850_v3  ;;  %v852_v8 = vpop.f32.mrf.mxu1  ;;  %v780_v9 = vadd.f32 %v1790_v0, %v779_v7 }
 0x11b   : > { %v996_v10 = vadd.f32 %v995_v5, %v923_v6  ;;  %v853_v12 = vadd.f32 %v852_v8, %v780_v9 }
 0x11d   : > { %v1040_v11 = vmax.f32 %v996_v10, 0.0 }
 0x11f   : > { %v1065_v13 = vpack.c.bf16 %v1040_v11, %v1040_v11 }
 0x120   : > { %v925_v14 = vpop.f32.mrf.mxu2  ;;  %v781_v17 = vpop.f32.mrf.mxu0 }
 0x121   : > { %v998_v15 = vpop.f32.mrf.mxu3  ;;  %1091 = vst.msk [vmem:[%s1811_s10 + $0x34] sm:$0xf] %vm1077_vm0, %v1065_v13  ;;  %v926_v16 = vadd.f32 %v925_v14, %v853_v12  ;;  %v854_v18 = vpop.f32.mrf.mxu1  ;;  %v782_v20 = vadd.f32 %v1790_v0, %v781_v17 }
 0x123   : > { %v999_v19 = vadd.f32 %v998_v15, %v926_v16  ;;  %v855_v23 = vadd.f32 %v854_v18, %v782_v20 }
 0x125   : > { %v1041_v21 = vmax.f32 %v999_v19, 0.0 }
 0x127   : > { %v1066_v22 = vpack.c.bf16 %v1041_v21, %v1041_v21 }
 0x128   : > { %v927_v24 = vpop.f32.mrf.mxu2  ;;  %v784_v27 = vpop.f32.mrf.mxu0 }
 0x129   : > { %v1000_v25 = vpop.f32.mrf.mxu3  ;;  %1092 = vst.msk [vmem:[%s1811_s10 + $0x38] sm:$0xf] %vm1077_vm0, %v1066_v22  ;;  %v928_v26 = vadd.f32 %v927_v24, %v855_v23  ;;  %v857_v28 = vpop.f32.mrf.mxu1  ;;  %v785_v29 = vadd.f32 %v1790_v0, %v784_v27 }
 0x12b   : > { %v1001_v30 = vadd.f32 %v1000_v25, %v928_v26  ;;  %v858_v32 = vadd.f32 %v857_v28, %v785_v29 }
 0x12d   : > { %v1042_v31 = vmax.f32 %v1001_v30, 0.0 }
 0x12f   : > { %v1067_v33 = vpack.c.bf16 %v1042_v31, %v1042_v31 }
 0x130   : > { %v930_v34 = vpop.f32.mrf.mxu2  ;;  %v786_v37 = vpop.f32.mrf.mxu0 }
 0x131   : > { %v1003_v35 = vpop.f32.mrf.mxu3  ;;  %1093 = vst.msk [vmem:[%s1811_s10 + $0x3c] sm:$0xf] %vm1077_vm0, %v1067_v33  ;;  %v931_v36 = vadd.f32 %v930_v34, %v858_v32  ;;  %v859_v38 = vpop.f32.mrf.mxu1  ;;  %v787_v40 = vadd.f32 %v1790_v0, %v786_v37 }
 0x133   : > { %v1004_v39 = vadd.f32 %v1003_v35, %v931_v36  ;;  %v860_v43 = vadd.f32 %v859_v38, %v787_v40 }
 0x135   : > { %v1043_v41 = vmax.f32 %v1004_v39, 0.0 }
 0x137   : > { %v1068_v42 = vpack.c.bf16 %v1043_v41, %v1043_v41 }
 0x138   : > { %v932_v44 = vpop.f32.mrf.mxu2  ;;  %v789_v47 = vpop.f32.mrf.mxu0 }
 0x139   : > { %v1005_v45 = vpop.f32.mrf.mxu3  ;;  %1094 = vst.msk [vmem:[%s1811_s10 + $0x40] sm:$0xf] %vm1077_vm0, %v1068_v42  ;;  %v933_v46 = vadd.f32 %v932_v44, %v860_v43  ;;  %v862_v48 = vpop.f32.mrf.mxu1  ;;  %v790_v49 = vadd.f32 %v1790_v0, %v789_v47 }
 0x13b   : > { %v1006_v50 = vadd.f32 %v1005_v45, %v933_v46  ;;  %v863_v52 = vadd.f32 %v862_v48, %v790_v49 }
 0x13d   : > { %v1044_v51 = vmax.f32 %v1006_v50, 0.0 }
 0x13f   : > { %v1069_v53 = vpack.c.bf16 %v1044_v51, %v1044_v51 }
 0x140   : > { %v935_v54 = vpop.f32.mrf.mxu2  ;;  %v791_v57 = vpop.f32.mrf.mxu0 }
 0x141   : > { %v1008_v55 = vpop.f32.mrf.mxu3  ;;  %1095 = vst.msk [vmem:[%s1811_s10 + $0x44] sm:$0xf] %vm1077_vm0, %v1069_v53  ;;  %v936_v56 = vadd.f32 %v935_v54, %v863_v52  ;;  %v864_v58 = vpop.f32.mrf.mxu1  ;;  %v792_v60 = vadd.f32 %v1790_v0, %v791_v57 }
 0x143   : > { %v1009_v59 = vadd.f32 %v1008_v55, %v936_v56  ;;  %v865_v63 = vadd.f32 %v864_v58, %v792_v60 }
 0x145   : > { %v1045_v61 = vmax.f32 %v1009_v59, 0.0 }
 0x147   : > { %v1070_v62 = vpack.c.bf16 %v1045_v61, %v1045_v61 }
 0x148   : > { %v937_v1 = vpop.f32.mrf.mxu2  ;;  %v794_v4 = vpop.f32.mrf.mxu0 }
 0x149   : > { %v1010_v2 = vpop.f32.mrf.mxu3  ;;  %1096 = vst.msk [vmem:[%s1811_s10 + $0x48] sm:$0xf] %vm1077_vm0, %v1070_v62  ;;  %v938_v3 = vadd.f32 %v937_v1, %v865_v63  ;;  %v867_v5 = vpop.f32.mrf.mxu1  ;;  %v795_v6 = vadd.f32 %v1790_v0, %v794_v4 }
 0x14b   : > { %v1011_v7 = vadd.f32 %v1010_v2, %v938_v3  ;;  %v868_v9 = vadd.f32 %v867_v5, %v795_v6 }
 0x14d   : > { %v1046_v8 = vmax.f32 %v1011_v7, 0.0 }
 0x14f   : > { %v1071_v10 = vpack.c.bf16 %v1046_v8, %v1046_v8 }
 0x150   : > { %v940_v11 = vpop.f32.mrf.mxu2  ;;  %v796_v14 = vpop.f32.mrf.mxu0 }
 0x151   : > { %v1013_v12 = vpop.f32.mrf.mxu3  ;;  %1097 = vst.msk [vmem:[%s1811_s10 + $0x4c] sm:$0xf] %vm1077_vm0, %v1071_v10  ;;  %v941_v13 = vadd.f32 %v940_v11, %v868_v9  ;;  %v869_v15 = vpop.f32.mrf.mxu1  ;;  %v797_v17 = vadd.f32 %v1790_v0, %v796_v14 }
 0x153   : > { %v1014_v16 = vadd.f32 %v1013_v12, %v941_v13  ;;  %v870_v20 = vadd.f32 %v869_v15, %v797_v17 }
 0x155   : > { %v1047_v18 = vmax.f32 %v1014_v16, 0.0 }
 0x157   : > { %v1072_v19 = vpack.c.bf16 %v1047_v18, %v1047_v18 }
 0x158   : > { %v942_v21 = vpop.f32.mrf.mxu2  ;;  %v799_v24 = vpop.f32.mrf.mxu0 }
 0x159   : > { %v1015_v22 = vpop.f32.mrf.mxu3  ;;  %1098 = vst.msk [vmem:[%s1811_s10 + $0x50] sm:$0xf] %vm1077_vm0, %v1072_v19  ;;  %v943_v23 = vadd.f32 %v942_v21, %v870_v20  ;;  %v872_v25 = vpop.f32.mrf.mxu1  ;;  %v800_v26 = vadd.f32 %v1790_v0, %v799_v24 }
 0x15b   : > { %v1016_v27 = vadd.f32 %v1015_v22, %v943_v23  ;;  %v873_v29 = vadd.f32 %v872_v25, %v800_v26 }
 0x15d   : > { %v1048_v28 = vmax.f32 %v1016_v27, 0.0 }
 0x15f   : > { %v1073_v30 = vpack.c.bf16 %v1048_v28, %v1048_v28 }
 0x160   : > { %v945_v31 = vpop.f32.mrf.mxu2  ;;  %v801_v34 = vpop.f32.mrf.mxu0 }
 0x161   : > { %v1018_v32 = vpop.f32.mrf.mxu3  ;;  %1099 = vst.msk [vmem:[%s1811_s10 + $0x54] sm:$0xf] %vm1077_vm0, %v1073_v30  ;;  %v946_v33 = vadd.f32 %v945_v31, %v873_v29  ;;  %v874_v35 = vpop.f32.mrf.mxu1  ;;  %v802_v37 = vadd.f32 %v1790_v0, %v801_v34 }
 0x163   : > { %v1019_v36 = vadd.f32 %v1018_v32, %v946_v33  ;;  %v875_v40 = vadd.f32 %v874_v35, %v802_v37 }
 0x165   : > { %v1049_v38 = vmax.f32 %v1019_v36, 0.0 }
 0x167   : > { %v1074_v39 = vpack.c.bf16 %v1049_v38, %v1049_v38 }
 0x168   : > { %v947_v41 = vpop.f32.mrf.mxu2  ;;  %v804_v44 = vpop.f32.mrf.mxu0 }
 0x169   : > { %v1020_v42 = vpop.f32.mrf.mxu3  ;;  %1100 = vst.msk [vmem:[%s1811_s10 + $0x58] sm:$0xf] %vm1077_vm0, %v1074_v39  ;;  %v948_v43 = vadd.f32 %v947_v41, %v875_v40  ;;  %v877_v45 = vpop.f32.mrf.mxu1  ;;  %v805_v46 = vadd.f32 %v1790_v0, %v804_v44 }
 0x16b   : > { %v1021_v47 = vadd.f32 %v1020_v42, %v948_v43  ;;  %v878_v49 = vadd.f32 %v877_v45, %v805_v46 }
 0x16d   : > { %v1050_v48 = vmax.f32 %v1021_v47, 0.0 }
 0x16f   : > { %v1075_v50 = vpack.c.bf16 %v1050_v48, %v1050_v48 }
 0x170   : > { %v950_v51 = vpop.f32.mrf.mxu2  ;;  %v806_v54 = vpop.f32.mrf.mxu0 }
 0x171   : > { %v1023_v52 = vpop.f32.mrf.mxu3  ;;  %1101 = vst.msk [vmem:[%s1811_s10 + $0x5c] sm:$0xf] %vm1077_vm0, %v1075_v50  ;;  %v951_v53 = vadd.f32 %v950_v51, %v878_v49  ;;  %v879_v55 = vpop.f32.mrf.mxu1 }
 0x173   : > { %v1024_v56 = vadd.f32 %v1023_v52, %v951_v53 }
 0x175   : > { %v1051_v57 = vmax.f32 %v1024_v56, 0.0 }
 0x177   : > { %v1076_v58 = vpack.c.bf16 %v1051_v57, %v1051_v57 }
 0x178   : > { %v952_v59 = vpop.f32.mrf.mxu2 }
 0x179   : > { %v1025_v60 = vpop.f32.mrf.mxu3  ;;  %1103 = vst.msk [vmem:[%s1811_s10 + $0x60] sm:$0x3] %vm1102_vm1, %v1076_v58 }
 0x17a PF: > { %s13_s12 = sadd.s32 1, %s1585_s12  }
 0x17b   : > { %p10_p4 = scmp.ge.s32.totalorder %s13_s12, 4  }
 0x17d   :  { %12 = sbr.rel (!%p10_p4) target bundleno = 1 (0x1), region = 62 }

// kernel: rainbow_forward.6
= control target key start
LH: loop header
LB: loop body
LE: loop exit
PB: predicated region body
PF: predicated region fallthrough
CT: control target
= control target key end

     0   :  { %s1032_s12 = smov 0   ;;  %s1207_s0 = inlined_call_operand.vmem [shape: bf16[2,36,576], index: 0, kind: input, shape index: {}]   ;;  %s1208_s1 = inlined_call_operand.vmem [shape: bf16[576,64], index: 1, kind: input, shape index: {}]   ;;  %s1209_s2 = inlined_call_operand.vmem [shape: f32[1,64], index: 2, kind: input, shape index: {}]   ;;  %s1210_s3 = inlined_call_operand.vmem [shape: bf16[2,36,64], index: 3, kind: output, shape index: {}]  }
   0x1 LB: > { %s743_s13 = sadd.s32 4294967295, %s1010_s12   ;;  %p747_p0 = scmp.ge.s32.totalorder %s1010_s12, 1  ;;  %s1010_s12 = sphi %s1032_s12, %s13_s12  }
   0x2   : > { %p137_p1 = scmp.lt.s32.totalorder %s1010_s12, 3 }
   0x4   : > { %p138_p2 = pnand %p747_p0, %p137_p1 }
   0x5   : > { %p161_p3 = scmp.lt.s32.totalorder (!%p138_p2), %s743_s13, 1 }
   0x6   : > { %141 = sbr.rel (%p138_p2) target bundleno = 246 (0xf6), region = 32 }
   0xb   : > { %v956_v0 = vld [vmem:[%s1208_s1 + $0x38] sm:$0xff]  ;;  %v955_v1 = vld [vmem:[%s1208_s1 + $0x30] sm:$0xff]  ;;  %v954_v6 = vld [vmem:[%s1208_s1 + $0x28] sm:$0xff]  ;;  %s1212_s13 = smov (!%p161_p3, %s743_s13), 1  ;;  %vm546_vm0 = vcmask 523264   ;;  %vm681_vm1 = vcmask 519168  }
   0xc   : > { %985 = vmatpush.bf16.msra.mxu1 %v956_v0  ;;  %556 = vmatpush.bf16.msra.mxu0 %v956_v0  ;;  %v972_v2 = vld [vmem:[%s1208_s1 + $0xb8] sm:$0xff]  ;;  %v971_v4 = vld [vmem:[%s1208_s1 + $0xb0] sm:$0xff]  ;;  %v970_v7 = vld [vmem:[%s1208_s1 + $0xa8] sm:$0xff]  ;;  %s993_s21 = smul.u32 100, %s1212_s13  ;;  %vm686_vm2 = vcmask 517120  }
   0xd   : > { %v980_v3 = vld [vmem:[%s1208_s1 + $0xf8] sm:$0xff]  ;;  %602 = vmatpush.bf16.msra.mxu2 %v972_v2  ;;  %v979_v5 = vld [vmem:[%s1208_s1 + $0xf0] sm:$0xff]  ;;  %v978_v8 = vld [vmem:[%s1208_s1 + $0xe8] sm:$0xff]  ;;  %s994_s17 = smul.u32 20, %s1212_s13 }
   0xe   : > { %625 = vmatpush.bf16.msra.mxu3 %v980_v3  ;;  %v953_v9 = vld [vmem:[%s1208_s1 + $0x20] sm:$0xff]  ;;  %v952_v12 = vld [vmem:[%s1208_s1 + $0x18] sm:$0xff]  ;;  %v951_v15 = vld [vmem:[%s1208_s1 + $0x10] sm:$0xff]  ;;  %s1107_s30 = scalar_lea.vmem %s1207_s0, %s993_s21 }
   0xf   : > { %v969_v10 = vld [vmem:[%s1208_s1 + $0xa0] sm:$0xff]  ;;  %v968_v13 = vld [vmem:[%s1208_s1 + $0x98] sm:$0xff]  ;;  %v967_v16 = vld [vmem:[%s1208_s1 + $0x90] sm:$0xff]  ;;  %s1193_s20 = scalar_lea.vmem %s1210_s3, %s994_s17 }
  0x10   : > { %986 = vmatpush.bf16.msra.mxu1 %v955_v1  ;;  %557 = vmatpush.bf16.msra.mxu0 %v955_v1  ;;  %v977_v11 = vld [vmem:[%s1208_s1 + $0xe0] sm:$0xff]  ;;  %v976_v14 = vld [vmem:[%s1208_s1 + $0xd8] sm:$0xff]  ;;  %v975_v17 = vld [vmem:[%s1208_s1 + $0xd0] sm:$0xff] }
  0x11   : > { %603 = vmatpush.bf16.msra.mxu2 %v971_v4  ;;  %v950_v18 = vld [vmem:[%s1208_s1 + $0x8] sm:$0xff]  ;;  %v949_v21 = vld [vmem:[%s1208_s1] sm:$0xff]  ;;  %v946_v23 = vld [vmem:[%s1107_s30 + $0x38] sm:$0xf0] }
  0x12   : > { %626 = vmatpush.bf16.msra.mxu3 %v979_v5  ;;  %v966_v19 = vld [vmem:[%s1208_s1 + $0x88] sm:$0xff]  ;;  %v752_v24 = vld [vmem:[%s1107_s30] sm:$0xf]  ;;  %v941_v25 = vld [vmem:[%s1107_s30 + $0x10] sm:$0xf0] }
  0x13   : > { %v974_v20 = vld [vmem:[%s1208_s1 + $0xc8] sm:$0xff]  ;;  %v964_v26 = vld [vmem:[%s1208_s1 + $0x78] sm:$0xff]  ;;  %v965_v28 = vld [vmem:[%s1208_s1 + $0x80] sm:$0xff]  ;;  %v753_v32 = vor.u32 %v941_v25, %v752_v24 }
  0x14   : > { %987 = vmatpush.bf16.msra.mxu1 %v954_v6  ;;  %558 = vmatpush.bf16.msra.mxu0 %v954_v6  ;;  %v772_v22 = vld [vmem:[%s1107_s30 + $0x28] sm:$0xf]  ;;  %v984_v27 = vld [vmem:[%s1208_s1 + $0x118] sm:$0xff]  ;;  %v973_v29 = vld [vmem:[%s1208_s1 + $0xc0] sm:$0xff] }
  0x15   : > { %604 = vmatpush.bf16.msra.mxu2 %v970_v7  ;;  %v760_v30 = vld [vmem:[%s1107_s30 + $0x8] sm:$0xf]  ;;  %v773_v31 = vor.u32 %v946_v23, %v772_v22  ;;  %v942_v33 = vld [vmem:[%s1107_s30 + $0x18] sm:$0xf0]  ;;  %v940_v34 = vld [vmem:[%s1107_s30 + $0xc] sm:$0xf] }
  0x16   : > { %627 = vmatpush.bf16.msra.mxu3 %v978_v8  ;;  %v762_v35 = vld [vmem:[%s1107_s30 + $0x1c] sm:$0xf0]  ;;  %v963_v36 = vld [vmem:[%s1208_s1 + $0x70] sm:$0xff]  ;;  %v761_v38 = vor.u32 %v942_v33, %v760_v30  ;;  %v962_v40 = vld [vmem:[%s1208_s1 + $0x68] sm:$0xff] }
  0x17   : > { %v983_v37 = vld [vmem:[%s1208_s1 + $0x110] sm:$0xff]  ;;  %v765_v39 = vor.u32 %v940_v34, %v762_v35  ;;  %v982_v41 = vld [vmem:[%s1208_s1 + $0x108] sm:$0xff]  ;;  %v961_v43 = vld [vmem:[%s1208_s1 + $0x60] sm:$0xff] }
  0x18   : > { %988 = vmatpush.bf16.msra.mxu1 %v953_v9  ;;  %559 = vmatpush.bf16.msra.mxu0 %v953_v9  ;;  %v184_v42 = vld [vmem:[%s1107_s30 + $0x50] sm:$0x33]  ;;  %v981_v44 = vld [vmem:[%s1208_s1 + $0x100] sm:$0xff]  ;;  %v960_v48 = vld [vmem:[%s1208_s1 + $0x58] sm:$0xff] }
  0x19   : > { %605 = vmatpush.bf16.msra.mxu2 %v969_v10  ;;  %v298_v45 = vunpack.c.l.b16 %v184_v42  ;;  %v768_v46 = vld [vmem:[%s1107_s30 + $0x10] sm:$0xf]  ;;  %v943_v47 = vld [vmem:[%s1107_s30 + $0x20] sm:$0xf0]  ;;  %v945_v53 = vld [vmem:[%s1107_s30 + $0x34] sm:$0xf] }
  0x1a   : > { %628 = vmatpush.bf16.msra.mxu3 %v977_v11  ;;  %v780_v49 = vld [vmem:[%s1107_s30 + $0x30] sm:$0xf]  ;;  %v769_v51 = vor.u32 %v943_v47, %v768_v46  ;;  %v947_v52 = vld [vmem:[%s1107_s30 + $0x40] sm:$0xf0]  ;;  %v782_v54 = vld [vmem:[%s1107_s30 + $0x44] sm:$0xf0] }
  0x1b   : > { %v313_v50 = vpack.c.b16 %v298_v45, %v298_v45  ;;  %v959_v55 = vld [vmem:[%s1208_s1 + $0x50] sm:$0xff]  ;;  %v781_v56 = vor.u32 %v947_v52, %v780_v49  ;;  %v785_v57 = vor.u32 %v945_v53, %v782_v54  ;;  %v958_v58 = vld [vmem:[%s1208_s1 + $0x48] sm:$0xff]  ;;  %v957_v59 = vld [vmem:[%s1208_s1 + $0x40] sm:$0xff] }
  0x1c   : > { %989 = vmatpush.bf16.msra.mxu1 %v952_v12  ;;  %560 = vmatpush.bf16.msra.mxu0 %v952_v12  ;;  %v939_v60 = vld [vmem:[%s1107_s30 + $0x4] sm:$0xf]  ;;  %v185_v61 = vld [vmem:[%s1107_s30 + $0x58] sm:$0x33]  ;;  %v948_v0 = vld [vmem:[%s1107_s30 + $0x48] sm:$0xf0] }
  0x1d   : > { %606 = vmatpush.bf16.msra.mxu2 %v968_v13  ;;  %v754_v62 = vld [vmem:[%s1107_s30 + $0x14] sm:$0xf0]  ;;  %v300_v1 = vunpack.c.l.b16 %v185_v61  ;;  %v301_v2 = vunpack.c.h.b16 %v185_v61  ;;  %v186_v7 = vld [vmem:[%s1107_s30 + $0x60] sm:$0x3]  ;;  %v944_v9 = vld [vmem:[%s1107_s30 + $0x2c] sm:$0xf]  ;;  %v299_v13 = vunpack.c.h.b16 %v184_v42 }
  0x1e   : > { %629 = vmatpush.bf16.msra.mxu3 %v976_v14  ;;  %v788_v63 = vld [vmem:[%s1107_s30 + $0x38] sm:$0xf]  ;;  %v757_v3 = vor.u32 %v939_v60, %v754_v62  ;;  %v302_v8 = vunpack.c.l.b16 %v186_v7  ;;  %v774_v10 = vld [vmem:[%s1107_s30 + $0x3c] sm:$0xf0] }
  0x1f   : > { %v789_v4 = vor.u32 %v948_v0, %v788_v63  ;;  %v315_v5 = vpack.c.b16 %v300_v1, %v300_v1  ;;  %v316_v6 = vpack.c.b16 %v301_v2, %v301_v2  ;;  %v777_v11 = vor.u32 %v944_v9, %v774_v10 }
  0x20   : > { %990 = vmatpush.bf16.msra.mxu1 %v951_v15  ;;  %561 = vmatpush.bf16.msra.mxu0 %v951_v15  ;;  %v317_v12 = vpack.c.b16 %v302_v8, %v302_v8  ;;  %v314_v14 = vpack.c.b16 %v299_v13, %v299_v13 }
  0x21   : > { %607 = vmatpush.bf16.msra.mxu2 %v967_v16 }
  0x22   : > { %630 = vmatpush.bf16.msra.mxu3 %v975_v17 }
  0x24   : > { %991 = vmatpush.bf16.msra.mxu1 %v950_v18  ;;  %562 = vmatpush.bf16.msra.mxu0 %v950_v18 }
  0x25   : > { %608 = vmatpush.bf16.msra.mxu2 %v966_v19 }
  0x26   : > { %631 = vmatpush.bf16.msra.mxu3 %v974_v20 }
  0x28   : > { %992 = vmatpush.bf16.msra.mxu1 %v949_v21  ;;  %563 = vmatpush.bf16.msra.mxu0 %v949_v21 }
  0x29   : > { %609 = vmatpush.bf16.msra.mxu2 %v965_v28 }
  0x2a   : > { %632 = vmatpush.bf16.msra.mxu3 %v973_v29  ;;  %v1003_v29 = vld [vmem:[%s1209_s2] ss:$0 sm:$0xff] }
  0x2b   : > { %569 = vmatmul.bf16.vlgmr.msra.gmra.mxu1 %v773_v31  ;;  %564 = vmatmul.bf16.vlgmr.msra.gmra.mxu0 %v753_v32 }
  0x2c   : > { %579 = vmatpush.bf16.msrb.mxu1 %v964_v26  ;;  %652 = vmatpush.bf16.msrb.mxu0 %v984_v27 }
  0x2d   : > { %610 = vmatmul.bf16.vlgmr.msra.gmra.mxu2 %v761_v38  ;;  %633 = vmatmul.bf16.vlgmr.msra.gmra.mxu3 %v765_v39 }
  0x30   : > { %580 = vmatpush.bf16.msrb.mxu1 %v963_v36  ;;  %653 = vmatpush.bf16.msrb.mxu0 %v983_v37 }
  0x34   : > { %581 = vmatpush.bf16.msrb.mxu1 %v962_v40  ;;  %654 = vmatpush.bf16.msrb.mxu0 %v982_v41 }
  0x38   : > { %582 = vmatpush.bf16.msrb.mxu1 %v961_v43  ;;  %655 = vmatpush.bf16.msrb.mxu0 %v981_v44 }
  0x3b   : > { %574 = vmatmul.bf16.gmra.mxu1 %v313_v50  ;;  %934 = vmatmul.msk.bf16.vlgmr.msrb.gmra.mxu0 %vm546_vm0, %v769_v51 }
  0x3c   : > { %583 = vmatpush.bf16.msrb.mxu1 %v960_v48 }
  0x3d   : > { %615 = vmatmul.bf16.gmra.mxu2 %v781_v56  ;;  %638 = vmatmul.bf16.gmra.mxu3 %v785_v57 }
  0x40   : > { %584 = vmatpush.bf16.msrb.mxu1 %v959_v55 }
  0x44   : > { %585 = vmatpush.bf16.msrb.mxu1 %v958_v58 }
  0x48   : > { %586 = vmatpush.bf16.msrb.mxu1 %v957_v59 }
  0x4b   : > { %587 = vmatmul.bf16.vlgmr.msrb.gmra.mxu1 %v757_v3  ;;  %935 = vmatmul.msk.bf16.gmra.mxu0 %vm546_vm0, %v789_v4 }
  0x4d   : > { %620 = vmatmul.bf16.gmra.mxu2 %v315_v5  ;;  %643 = vmatmul.bf16.gmra.mxu3 %v316_v6 }
  0x5b   : > { %592 = vmatmul.bf16.gmra.mxu1 %v777_v11  ;;  %936 = vmatmul.msk.bf16.gmra.mxu0 %vm546_vm0, %v317_v12 }
  0x6b   : > { %597 = vmatmul.bf16.gmra.mxu1 %v314_v14 }
  0xa8   : > { %v570_v15 = vpop.f32.mrf.mxu1  ;;  %v565_v16 = vpop.f32.mrf.mxu0 }
  0xa9   : > { %v566_v30 = vadd.f32 %v1003_v29, %v565_v16  ;;  %v571_v49 = vadd.f32 %v1003_v29, %v570_v15 }
  0xb0   : > { %v572_v17 = vpop.f32.mrf.mxu1  ;;  %v567_v18 = vpop.f32.mrf.mxu0 }
  0xb1   : > { %v611_v19 = vpop.f32.mrf.mxu2  ;;  %v634_v20 = vpop.f32.mrf.mxu3  ;;  %v568_v38 = vadd.f32 %v1003_v29, %v567_v18  ;;  %v573_v60 = vadd.f32 %v1003_v29, %v572_v17 }
  0xb8   : > { %v575_v21 = vpop.f32.mrf.mxu1  ;;  %v657_v22 = vpop.f32.mrf.mxu0 }
  0xb9   : > { %v613_v23 = vpop.f32.mrf.mxu2  ;;  %v636_v24 = vpop.f32.mrf.mxu3  ;;  %v576_v5 = vadd.f32 %v1003_v29, %v575_v21 }
  0xc0   : > { %v577_v25 = vpop.f32.mrf.mxu1  ;;  %v659_v26 = vpop.f32.mrf.mxu0 }
  0xc1   : > { %v616_v27 = vpop.f32.mrf.mxu2  ;;  %v639_v28 = vpop.f32.mrf.mxu3 }
  0xc8   : > { %v588_v31 = vpop.f32.mrf.mxu1  ;;  %v662_v32 = vpop.f32.mrf.mxu0 }
  0xc9   : > { %v589_v33 = vadd.f32 %v588_v31, %v566_v30  ;;  %v618_v34 = vpop.f32.mrf.mxu2  ;;  %v641_v35 = vpop.f32.mrf.mxu3 }
  0xcb   : > { %v612_v36 = vadd.f32 %v611_v19, %v589_v33 }
  0xcd   : > { %v635_v37 = vadd.f32 %v634_v20, %v612_v36 }
  0xcf   : > { %v658_v39 = vadd.f32 %v657_v22, %v635_v37 }
  0xd0   : > { %v590_v40 = vpop.f32.mrf.mxu1  ;;  %v664_v41 = vpop.f32.mrf.mxu0 }
  0xd1   : > { %v671_v42 = vmax.f32 %v658_v39, 0.0  ;;  %v591_v43 = vadd.f32 %v590_v40, %v568_v38  ;;  %v621_v44 = vpop.f32.mrf.mxu2  ;;  %v644_v45 = vpop.f32.mrf.mxu3 }
  0xd3   : > { %v676_v46 = vpack.c.bf16 %v671_v42, %v671_v42  ;;  %v614_v47 = vadd.f32 %v613_v23, %v591_v43 }
  0xd5   : > { %682 = vst.msk [vmem:[%s1193_s20] sm:$0xf] %vm681_vm1, %v676_v46  ;;  %v637_v48 = vadd.f32 %v636_v24, %v614_v47 }
  0xd7   : > { %v660_v50 = vadd.f32 %v659_v26, %v637_v48 }
  0xd8   : > { %v593_v51 = vpop.f32.mrf.mxu1  ;;  %v667_v52 = vpop.f32.mrf.mxu0 }
  0xd9   : > { %v672_v53 = vmax.f32 %v660_v50, 0.0  ;;  %v594_v54 = vadd.f32 %v593_v51, %v571_v49  ;;  %v623_v55 = vpop.f32.mrf.mxu2  ;;  %v646_v56 = vpop.f32.mrf.mxu3 }
  0xdb   : > { %v677_v57 = vpack.c.bf16 %v672_v53, %v672_v53  ;;  %v617_v58 = vadd.f32 %v616_v27, %v594_v54 }
  0xdd   : > { %683 = vst.msk [vmem:[%s1193_s20 + $0x4] sm:$0xf] %vm681_vm1, %v677_v57  ;;  %v640_v59 = vadd.f32 %v639_v28, %v617_v58 }
  0xdf   : > { %v663_v61 = vadd.f32 %v662_v32, %v640_v59 }
  0xe0   : > { %v595_v62 = vpop.f32.mrf.mxu1  ;;  %v669_v63 = vpop.f32.mrf.mxu0 }
  0xe1   : > { %v673_v0 = vmax.f32 %v663_v61, 0.0  ;;  %v596_v1 = vadd.f32 %v595_v62, %v573_v60 }
  0xe3   : > { %v678_v2 = vpack.c.bf16 %v673_v0, %v673_v0  ;;  %v619_v3 = vadd.f32 %v618_v34, %v596_v1 }
  0xe5   : > { %684 = vst.msk [vmem:[%s1193_s20 + $0x8] sm:$0xf] %vm681_vm1, %v678_v2  ;;  %v642_v4 = vadd.f32 %v641_v35, %v619_v3 }
  0xe7   : > { %v665_v6 = vadd.f32 %v664_v41, %v642_v4 }
  0xe8   : > { %v598_v7 = vpop.f32.mrf.mxu1 }
  0xe9   : > { %v674_v8 = vmax.f32 %v665_v6, 0.0  ;;  %v599_v9 = vadd.f32 %v598_v7, %v576_v5 }
  0xeb   : > { %v679_v10 = vpack.c.bf16 %v674_v8, %v674_v8  ;;  %v622_v11 = vadd.f32 %v621_v44, %v599_v9 }
  0xed   : > { %685 = vst.msk [vmem:[%s1193_s20 + $0xc] sm:$0xf] %vm681_vm1, %v679_v10  ;;  %v645_v12 = vadd.f32 %v644_v45, %v622_v11 }
  0xef   : > { %v668_v13 = vadd.f32 %v667_v52, %v645_v12 }
  0xf0   : > { %v600_v14 = vpop.f32.mrf.mxu1 }
  0xf1   : > { %v675_v15 = vmax.f32 %v668_v13, 0.0 }
  0xf3   : > { %v680_v16 = vpack.c.bf16 %v675_v15, %v675_v15 }
  0xf5   : > { %687 = vst.msk [vmem:[%s1193_s20 + $0x10] sm:$0x3] %vm686_vm2, %v680_v16 }
  0xf6 PF: > { %s13_s12 = sadd.s32 1, %s1010_s12  }
  0xf7   : > { %p10_p4 = scmp.ge.s32.totalorder %s13_s12, 4  }
  0xf9   :  { %12 = sbr.rel (!%p10_p4) target bundleno = 1 (0x1), region = 62 }

// kernel: rainbow_forward.7
= control target key start
LH: loop header
LB: loop body
LE: loop exit
PB: predicated region body
PF: predicated region fallthrough
CT: control target
= control target key end

     0   :  { %vm6094_vm0 = vcmask 409600   ;;  %s14987_s1 = inlined_call_operand.vmem [shape: bf16[2304,512], index: 1, kind: input, shape index: {}]   ;;  %s14988_s0 = inlined_call_operand.vmem [shape: bf16[8,2304], index: 0, kind: input, shape index: {}]   ;;  %s14989_s2 = inlined_call_operand.vmem [shape: f32[1,512], index: 2, kind: input, shape index: {}]   ;;  %s14990_s3 = inlined_call_operand.vmem [shape: bf16[256,128], index: 3, kind: input, shape index: {}]   ;;  %s14991_s4 = inlined_call_operand.vmem [shape: f32[1,128], index: 4, kind: input, shape index: {}]   ;;  %s14992_s5 = inlined_call_operand.vmem [shape: bf16[256,1408], index: 5, kind: input, shape index: {}]   ;;  %s14993_s6 = inlined_call_operand.vmem [shape: f32[1,1408], index: 6, kind: input, shape index: {}]   ;;  %s14994_s7 = inlined_call_operand.vmem [shape: f32[2,11,51], index: 7, kind: output, shape index: {}]  }
   0x1   :  { %v6285_v0 = vld [vmem:[%s14987_s1 + $0xe0] sm:$0xf]  ;;  %v9273_v1 = vld [vmem:[%s14987_s1 + $0xec] sm:$0xf0] }
   0x2   :  { %v6413_v2 = vld [vmem:[%s14987_s1 + $0x1e0] sm:$0xf]  ;;  %v6286_v3 = vor.u32 %v9273_v1, %v6285_v0  ;;  %v9305_v4 = vld [vmem:[%s14987_s1 + $0x1ec] sm:$0xf0] }
   0x3   :  { %v6541_v5 = vld [vmem:[%s14987_s1 + $0x2e0] sm:$0xf]  ;;  %v9337_v6 = vld [vmem:[%s14987_s1 + $0x2ec] sm:$0xf0]  ;;  %v6414_v7 = vor.u32 %v9305_v4, %v6413_v2 }
   0x4   :  { %v6542_v8 = vor.u32 %v9337_v6, %v6541_v5  ;;  %v6669_v9 = vld [vmem:[%s14987_s1 + $0x3e0] sm:$0xf]  ;;  %v9369_v10 = vld [vmem:[%s14987_s1 + $0x3ec] sm:$0xf0]  ;;  %3564 = vmatpush.bf16.msra.mxu0 %v6286_v3 }
   0x5   :  { %v6269_v11 = vld [vmem:[%s14987_s1 + $0xc0] sm:$0xf]  ;;  %v6670_v12 = vor.u32 %v9369_v10, %v6669_v9  ;;  %v9269_v13 = vld [vmem:[%s14987_s1 + $0xcc] sm:$0xf0]  ;;  %3577 = vmatpush.bf16.msra.mxu1 %v6414_v7 }
   0x6   :  { %v6397_v14 = vld [vmem:[%s14987_s1 + $0x1c0] sm:$0xf]  ;;  %v9301_v15 = vld [vmem:[%s14987_s1 + $0x1cc] sm:$0xf0]  ;;  %3590 = vmatpush.bf16.msra.mxu2 %v6542_v8  ;;  %v6270_v16 = vor.u32 %v9269_v13, %v6269_v11 }
   0x7   :  { %v6398_v17 = vor.u32 %v9301_v15, %v6397_v14  ;;  %v6525_v18 = vld [vmem:[%s14987_s1 + $0x2c0] sm:$0xf]  ;;  %v9333_v19 = vld [vmem:[%s14987_s1 + $0x2cc] sm:$0xf0]  ;;  %3603 = vmatpush.bf16.msra.mxu3 %v6670_v12 }
   0x8   :  { %v6653_v20 = vld [vmem:[%s14987_s1 + $0x3c0] sm:$0xf]  ;;  %v6526_v21 = vor.u32 %v9333_v19, %v6525_v18  ;;  %v9365_v22 = vld [vmem:[%s14987_s1 + $0x3cc] sm:$0xf0]  ;;  %3565 = vmatpush.bf16.msra.mxu0 %v6270_v16 }
   0x9   :  { %v6253_v23 = vld [vmem:[%s14987_s1 + $0xa0] sm:$0xf]  ;;  %v9265_v24 = vld [vmem:[%s14987_s1 + $0xac] sm:$0xf0]  ;;  %v6654_v25 = vor.u32 %v9365_v22, %v6653_v20  ;;  %3578 = vmatpush.bf16.msra.mxu1 %v6398_v17 }
   0xa   :  { %v6381_v26 = vld [vmem:[%s14987_s1 + $0x1a0] sm:$0xf]  ;;  %v9297_v27 = vld [vmem:[%s14987_s1 + $0x1ac] sm:$0xf0]  ;;  %v6254_v29 = vor.u32 %v9265_v24, %v6253_v23  ;;  %3591 = vmatpush.bf16.msra.mxu2 %v6526_v21 }
   0xb   :  { %v6509_v28 = vld [vmem:[%s14987_s1 + $0x2a0] sm:$0xf]  ;;  %v9329_v30 = vld [vmem:[%s14987_s1 + $0x2ac] sm:$0xf0]  ;;  %v6382_v33 = vor.u32 %v9297_v27, %v6381_v26  ;;  %3604 = vmatpush.bf16.msra.mxu3 %v6654_v25 }
   0xc   :  { %v6637_v31 = vld [vmem:[%s14987_s1 + $0x3a0] sm:$0xf]  ;;  %v9361_v32 = vld [vmem:[%s14987_s1 + $0x3ac] sm:$0xf0]  ;;  %v6510_v34 = vor.u32 %v9329_v30, %v6509_v28  ;;  %3566 = vmatpush.bf16.msra.mxu0 %v6254_v29 }
   0xd   :  { %v6237_v35 = vld [vmem:[%s14987_s1 + $0x80] sm:$0xf]  ;;  %v9261_v36 = vld [vmem:[%s14987_s1 + $0x8c] sm:$0xf0]  ;;  %v6638_v38 = vor.u32 %v9361_v32, %v6637_v31  ;;  %3579 = vmatpush.bf16.msra.mxu1 %v6382_v33 }
   0xe   :  { %v6365_v37 = vld [vmem:[%s14987_s1 + $0x180] sm:$0xf]  ;;  %v9293_v39 = vld [vmem:[%s14987_s1 + $0x18c] sm:$0xf0]  ;;  %v6238_v44 = vor.u32 %v9261_v36, %v6237_v35  ;;  %3592 = vmatpush.bf16.msra.mxu2 %v6510_v34 }
   0xf   :  { %v6493_v40 = vld [vmem:[%s14987_s1 + $0x280] sm:$0xf]  ;;  %v9325_v41 = vld [vmem:[%s14987_s1 + $0x28c] sm:$0xf0]  ;;  %v6366_v45 = vor.u32 %v9293_v39, %v6365_v37  ;;  %3605 = vmatpush.bf16.msra.mxu3 %v6638_v38 }
  0x10   :  { %v6621_v42 = vld [vmem:[%s14987_s1 + $0x380] sm:$0xf]  ;;  %v9357_v43 = vld [vmem:[%s14987_s1 + $0x38c] sm:$0xf0]  ;;  %v6494_v46 = vor.u32 %v9325_v41, %v6493_v40  ;;  %3567 = vmatpush.bf16.msra.mxu0 %v6238_v44 }
  0x11   :  { %v6221_v47 = vld [vmem:[%s14987_s1 + $0x60] sm:$0xf]  ;;  %v9257_v48 = vld [vmem:[%s14987_s1 + $0x6c] sm:$0xf0]  ;;  %v6622_v50 = vor.u32 %v9357_v43, %v6621_v42  ;;  %3580 = vmatpush.bf16.msra.mxu1 %v6366_v45 }
  0x12   :  { %v6349_v49 = vld [vmem:[%s14987_s1 + $0x160] sm:$0xf]  ;;  %v9289_v51 = vld [vmem:[%s14987_s1 + $0x16c] sm:$0xf0]  ;;  %v6222_v56 = vor.u32 %v9257_v48, %v6221_v47  ;;  %3593 = vmatpush.bf16.msra.mxu2 %v6494_v46 }
  0x13   :  { %v6477_v52 = vld [vmem:[%s14987_s1 + $0x260] sm:$0xf]  ;;  %v9321_v53 = vld [vmem:[%s14987_s1 + $0x26c] sm:$0xf0]  ;;  %v6350_v57 = vor.u32 %v9289_v51, %v6349_v49  ;;  %3606 = vmatpush.bf16.msra.mxu3 %v6622_v50 }
  0x14   :  { %v6605_v54 = vld [vmem:[%s14987_s1 + $0x360] sm:$0xf]  ;;  %v9353_v55 = vld [vmem:[%s14987_s1 + $0x36c] sm:$0xf0]  ;;  %v6478_v58 = vor.u32 %v9321_v53, %v6477_v52  ;;  %3568 = vmatpush.bf16.msra.mxu0 %v6222_v56 }
  0x15   :  { %v6205_v59 = vld [vmem:[%s14987_s1 + $0x40] sm:$0xf]  ;;  %v9253_v60 = vld [vmem:[%s14987_s1 + $0x4c] sm:$0xf0]  ;;  %v6606_v62 = vor.u32 %v9353_v55, %v6605_v54  ;;  %3581 = vmatpush.bf16.msra.mxu1 %v6350_v57 }
  0x16   :  { %v6333_v61 = vld [vmem:[%s14987_s1 + $0x140] sm:$0xf]  ;;  %v9285_v63 = vld [vmem:[%s14987_s1 + $0x14c] sm:$0xf0]  ;;  %v6206_v4 = vor.u32 %v9253_v60, %v6205_v59  ;;  %3594 = vmatpush.bf16.msra.mxu2 %v6478_v58 }
  0x17   :  { %v6461_v0 = vld [vmem:[%s14987_s1 + $0x240] sm:$0xf]  ;;  %v9317_v1 = vld [vmem:[%s14987_s1 + $0x24c] sm:$0xf0]  ;;  %v6334_v5 = vor.u32 %v9285_v63, %v6333_v61  ;;  %3607 = vmatpush.bf16.msra.mxu3 %v6606_v62 }
  0x18   :  { %v6589_v2 = vld [vmem:[%s14987_s1 + $0x340] sm:$0xf]  ;;  %v9349_v3 = vld [vmem:[%s14987_s1 + $0x34c] sm:$0xf0]  ;;  %v6462_v6 = vor.u32 %v9317_v1, %v6461_v0  ;;  %3569 = vmatpush.bf16.msra.mxu0 %v6206_v4 }
  0x19   :  { %v6189_v7 = vld [vmem:[%s14987_s1 + $0x20] sm:$0xf]  ;;  %v9249_v8 = vld [vmem:[%s14987_s1 + $0x2c] sm:$0xf0]  ;;  %v6590_v10 = vor.u32 %v9349_v3, %v6589_v2  ;;  %3582 = vmatpush.bf16.msra.mxu1 %v6334_v5  ;;  %v27_v2 = vld [vmem:[%s14988_s0 + $0x8] sm:$0xff] }
  0x1a   :  { %v6317_v9 = vld [vmem:[%s14987_s1 + $0x120] sm:$0xf]  ;;  %v9281_v11 = vld [vmem:[%s14987_s1 + $0x12c] sm:$0xf0]  ;;  %v6190_v16 = vor.u32 %v9249_v8, %v6189_v7  ;;  %3595 = vmatpush.bf16.msra.mxu2 %v6462_v6  ;;  %v632_v8 = vunpack.c.l.b16 %v27_v2 }
  0x1b   :  { %v6445_v12 = vld [vmem:[%s14987_s1 + $0x220] sm:$0xf]  ;;  %v9313_v13 = vld [vmem:[%s14987_s1 + $0x22c] sm:$0xf0]  ;;  %v6318_v19 = vor.u32 %v9281_v11, %v6317_v9  ;;  %3608 = vmatpush.bf16.msra.mxu3 %v6590_v10  ;;  %v633_v10 = vunpack.c.h.b16 %v27_v2 }
  0x1c   :  { %v6573_v14 = vld [vmem:[%s14987_s1 + $0x320] sm:$0xf]  ;;  %v9345_v15 = vld [vmem:[%s14987_s1 + $0x32c] sm:$0xf0]  ;;  %v6446_v20 = vor.u32 %v9313_v13, %v6445_v12  ;;  %3570 = vmatpush.bf16.msra.mxu0 %v6190_v16 }
  0x1d   :  { %v6173_v17 = vld [vmem:[%s14987_s1] sm:$0xf]  ;;  %v9245_v18 = vld [vmem:[%s14987_s1 + $0xc] sm:$0xf0]  ;;  %v6574_v24 = vor.u32 %v9345_v15, %v6573_v14  ;;  %3583 = vmatpush.bf16.msra.mxu1 %v6318_v19 }
  0x1e   :  { %v6301_v21 = vld [vmem:[%s14987_s1 + $0x100] sm:$0xf]  ;;  %v9277_v22 = vld [vmem:[%s14987_s1 + $0x10c] sm:$0xf0]  ;;  %v6174_v31 = vor.u32 %v9245_v18, %v6173_v17  ;;  %3596 = vmatpush.bf16.msra.mxu2 %v6446_v20  ;;  %v10349_v18 = vpack.c.b16 %v632_v8, %v632_v8  ;;  %v10353_v20 = vpack.c.b16 %v633_v10, %v633_v10 }
  0x1f   :  { %v6429_v23 = vld [vmem:[%s14987_s1 + $0x200] sm:$0xf]  ;;  %v9309_v25 = vld [vmem:[%s14987_s1 + $0x20c] sm:$0xf0]  ;;  %v6302_v35 = vor.u32 %v9277_v22, %v6301_v21  ;;  %3609 = vmatpush.bf16.msra.mxu3 %v6574_v24 }
  0x20   :  { %v6557_v26 = vld [vmem:[%s14987_s1 + $0x300] sm:$0xf]  ;;  %v9341_v27 = vld [vmem:[%s14987_s1 + $0x30c] sm:$0xf0]  ;;  %v6430_v36 = vor.u32 %v9309_v25, %v6429_v23  ;;  %3571 = vmatpush.bf16.msra.mxu0 %v6174_v31 }
  0x21   :  { %v6797_v28 = vld [vmem:[%s14987_s1 + $0x4e0] sm:$0xf]  ;;  %v9401_v29 = vld [vmem:[%s14987_s1 + $0x4ec] sm:$0xf0]  ;;  %v6558_v39 = vor.u32 %v9341_v27, %v6557_v26  ;;  %3584 = vmatpush.bf16.msra.mxu1 %v6302_v35 }
  0x22   :  { %v6925_v30 = vld [vmem:[%s14987_s1 + $0x5e0] sm:$0xf]  ;;  %v9433_v32 = vld [vmem:[%s14987_s1 + $0x5ec] sm:$0xf0]  ;;  %v6798_v40 = vor.u32 %v9401_v29, %v6797_v28  ;;  %3597 = vmatpush.bf16.msra.mxu2 %v6430_v36 }
  0x23   :  { %v7053_v33 = vld [vmem:[%s14987_s1 + $0x6e0] sm:$0xf]  ;;  %v9465_v34 = vld [vmem:[%s14987_s1 + $0x6ec] sm:$0xf0]  ;;  %v6926_v41 = vor.u32 %v9433_v32, %v6925_v30  ;;  %3610 = vmatpush.bf16.msra.mxu3 %v6558_v39 }
  0x24   :  { %v7181_v37 = vld [vmem:[%s14987_s1 + $0x7e0] sm:$0xf]  ;;  %v9497_v38 = vld [vmem:[%s14987_s1 + $0x7ec] sm:$0xf0]  ;;  %v7054_v42 = vor.u32 %v9465_v34, %v7053_v33  ;;  %3616 = vmatpush.bf16.msrb.mxu0 %v6798_v40 }
  0x25   :  { %v6781_v43 = vld [vmem:[%s14987_s1 + $0x4c0] sm:$0xf]  ;;  %v9397_v44 = vld [vmem:[%s14987_s1 + $0x4cc] sm:$0xf0]  ;;  %v7182_v46 = vor.u32 %v9497_v38, %v7181_v37  ;;  %3629 = vmatpush.bf16.msrb.mxu1 %v6926_v41  ;;  %3598 = vmatmul.bf16.vlgmr.msra.gmra.mxu2 %v10349_v18 }
  0x26   :  { %v6909_v45 = vld [vmem:[%s14987_s1 + $0x5c0] sm:$0xf]  ;;  %v9429_v47 = vld [vmem:[%s14987_s1 + $0x5cc] sm:$0xf0]  ;;  %v6782_v52 = vor.u32 %v9397_v44, %v6781_v43  ;;  %3642 = vmatpush.bf16.msrb.mxu2 %v7054_v42  ;;  %3611 = vmatmul.bf16.vlgmr.msra.gmra.mxu3 %v10353_v20 }
  0x27   :  { %v7037_v48 = vld [vmem:[%s14987_s1 + $0x6c0] sm:$0xf]  ;;  %v9461_v49 = vld [vmem:[%s14987_s1 + $0x6cc] sm:$0xf0]  ;;  %v6910_v54 = vor.u32 %v9429_v47, %v6909_v45  ;;  %3655 = vmatpush.bf16.msrb.mxu3 %v7182_v46 }
  0x28   :  { %v7165_v50 = vld [vmem:[%s14987_s1 + $0x7c0] sm:$0xf]  ;;  %v9493_v51 = vld [vmem:[%s14987_s1 + $0x7cc] sm:$0xf0]  ;;  %v7038_v55 = vor.u32 %v9461_v49, %v7037_v48  ;;  %3617 = vmatpush.bf16.msrb.mxu0 %v6782_v52 }
  0x29   :  { %v6765_v53 = vld [vmem:[%s14987_s1 + $0x4a0] sm:$0xf]  ;;  %v9393_v56 = vld [vmem:[%s14987_s1 + $0x4ac] sm:$0xf0]  ;;  %v7166_v59 = vor.u32 %v9493_v51, %v7165_v50  ;;  %3630 = vmatpush.bf16.msrb.mxu1 %v6910_v54 }
  0x2a   :  { %v6893_v57 = vld [vmem:[%s14987_s1 + $0x5a0] sm:$0xf]  ;;  %v9425_v58 = vld [vmem:[%s14987_s1 + $0x5ac] sm:$0xf0]  ;;  %v6766_v0 = vor.u32 %v9393_v56, %v6765_v53  ;;  %3643 = vmatpush.bf16.msrb.mxu2 %v7038_v55 }
  0x2b   :  { %v7021_v60 = vld [vmem:[%s14987_s1 + $0x6a0] sm:$0xf]  ;;  %v9457_v61 = vld [vmem:[%s14987_s1 + $0x6ac] sm:$0xf0]  ;;  %v6894_v1 = vor.u32 %v9425_v58, %v6893_v57  ;;  %3656 = vmatpush.bf16.msrb.mxu3 %v7166_v59 }
  0x2c   :  { %v7149_v62 = vld [vmem:[%s14987_s1 + $0x7a0] sm:$0xf]  ;;  %v9489_v63 = vld [vmem:[%s14987_s1 + $0x7ac] sm:$0xf0]  ;;  %v7022_v4 = vor.u32 %v9457_v61, %v7021_v60  ;;  %3618 = vmatpush.bf16.msrb.mxu0 %v6766_v0 }
  0x2d   :  { %v26_v3 = vld [vmem:[%s14988_s0] sm:$0xff]  ;;  %v9389_v6 = vld [vmem:[%s14987_s1 + $0x48c] sm:$0xf0]  ;;  %v7150_v11 = vor.u32 %v9489_v63, %v7149_v62  ;;  %3631 = vmatpush.bf16.msrb.mxu1 %v6894_v1 }
  0x2e   :  { %v6749_v5 = vld [vmem:[%s14987_s1 + $0x480] sm:$0xf]  ;;  %v630_v9 = vunpack.c.l.b16 %v26_v3  ;;  %v9421_v12 = vld [vmem:[%s14987_s1 + $0x58c] sm:$0xf0]  ;;  %v631_v15 = vunpack.c.h.b16 %v26_v3  ;;  %3644 = vmatpush.bf16.msrb.mxu2 %v7022_v4  ;;  %v29_v3 = vld [vmem:[%s14988_s0 + $0x18] sm:$0xff] }
  0x2f   :  { %v6877_v7 = vld [vmem:[%s14987_s1 + $0x580] sm:$0xf]  ;;  %v9453_v14 = vld [vmem:[%s14987_s1 + $0x68c] sm:$0xf0]  ;;  %v6750_v21 = vor.u32 %v9389_v6, %v6749_v5  ;;  %3657 = vmatpush.bf16.msrb.mxu3 %v7150_v11 }
  0x30   :  { %v7005_v13 = vld [vmem:[%s14987_s1 + $0x680] sm:$0xf]  ;;  %v9485_v17 = vld [vmem:[%s14987_s1 + $0x78c] sm:$0xf0]  ;;  %v10351_v19 = vpack.c.b16 %v630_v9, %v630_v9  ;;  %v10355_v22 = vpack.c.b16 %v631_v15, %v631_v15  ;;  %v6878_v23 = vor.u32 %v9421_v12, %v6877_v7  ;;  %v636_v15 = vunpack.c.l.b16 %v29_v3 }
  0x31   :  { %v7133_v16 = vld [vmem:[%s14987_s1 + $0x780] sm:$0xf]  ;;  %v7006_v24 = vor.u32 %v9453_v14, %v7005_v13  ;;  %v9385_v26 = vld [vmem:[%s14987_s1 + $0x46c] sm:$0xf0]  ;;  %3619 = vmatpush.bf16.msrb.mxu0 %v6750_v21 }
  0x32   :  { %v6733_v25 = vld [vmem:[%s14987_s1 + $0x460] sm:$0xf]  ;;  %v7134_v28 = vor.u32 %v9485_v17, %v7133_v16  ;;  %v9417_v29 = vld [vmem:[%s14987_s1 + $0x56c] sm:$0xf0]  ;;  %3572 = vmatmul.bf16.vlgmr.msra.gmra.mxu0 %v10351_v19  ;;  %3585 = vmatmul.bf16.vlgmr.msra.gmra.mxu1 %v10355_v22 }
  0x33   :  { %v6861_v27 = vld [vmem:[%s14987_s1 + $0x560] sm:$0xf]  ;;  %v9449_v31 = vld [vmem:[%s14987_s1 + $0x66c] sm:$0xf0]  ;;  %v6734_v34 = vor.u32 %v9385_v26, %v6733_v25  ;;  %3632 = vmatpush.bf16.msrb.mxu1 %v6878_v23  ;;  %3645 = vmatpush.bf16.msrb.mxu2 %v7006_v24  ;;  %v637_v25 = vunpack.c.h.b16 %v29_v3 }
  0x34   :  { %v6989_v30 = vld [vmem:[%s14987_s1 + $0x660] sm:$0xf]  ;;  %v9481_v33 = vld [vmem:[%s14987_s1 + $0x76c] sm:$0xf0]  ;;  %v6862_v35 = vor.u32 %v9417_v29, %v6861_v27  ;;  %3658 = vmatpush.bf16.msrb.mxu3 %v7134_v28 }
  0x35   :  { %v7117_v32 = vld [vmem:[%s14987_s1 + $0x760] sm:$0xf]  ;;  %v6990_v36 = vor.u32 %v9449_v31, %v6989_v30  ;;  %v9381_v38 = vld [vmem:[%s14987_s1 + $0x44c] sm:$0xf0]  ;;  %3620 = vmatpush.bf16.msrb.mxu0 %v6734_v34 }
  0x36   :  { %v6717_v37 = vld [vmem:[%s14987_s1 + $0x440] sm:$0xf]  ;;  %v7118_v40 = vor.u32 %v9481_v33, %v7117_v32  ;;  %v9413_v41 = vld [vmem:[%s14987_s1 + $0x54c] sm:$0xf0] }
  0x37   :  { %v6845_v39 = vld [vmem:[%s14987_s1 + $0x540] sm:$0xf]  ;;  %v9445_v43 = vld [vmem:[%s14987_s1 + $0x64c] sm:$0xf0]  ;;  %v6718_v46 = vor.u32 %v9381_v38, %v6717_v37  ;;  %3633 = vmatpush.bf16.msrb.mxu1 %v6862_v35  ;;  %3646 = vmatpush.bf16.msrb.mxu2 %v6990_v36  ;;  %v10505_v38 = vpack.c.b16 %v636_v15, %v636_v15 }
  0x38   :  { %v6973_v42 = vld [vmem:[%s14987_s1 + $0x640] sm:$0xf]  ;;  %v9477_v45 = vld [vmem:[%s14987_s1 + $0x74c] sm:$0xf0]  ;;  %v6846_v47 = vor.u32 %v9413_v41, %v6845_v39  ;;  %3659 = vmatpush.bf16.msrb.mxu3 %v7118_v40 }
  0x39   :  { %v7101_v44 = vld [vmem:[%s14987_s1 + $0x740] sm:$0xf]  ;;  %v6974_v48 = vor.u32 %v9445_v43, %v6973_v42  ;;  %v9377_v50 = vld [vmem:[%s14987_s1 + $0x42c] sm:$0xf0]  ;;  %3621 = vmatpush.bf16.msrb.mxu0 %v6718_v46  ;;  %v10515_v42 = vpack.c.b16 %v637_v25, %v637_v25 }
  0x3a   :  { %v6701_v49 = vld [vmem:[%s14987_s1 + $0x420] sm:$0xf]  ;;  %v7102_v52 = vor.u32 %v9477_v45, %v7101_v44  ;;  %v9409_v53 = vld [vmem:[%s14987_s1 + $0x52c] sm:$0xf0] }
  0x3b   :  { %v6829_v51 = vld [vmem:[%s14987_s1 + $0x520] sm:$0xf]  ;;  %v9441_v55 = vld [vmem:[%s14987_s1 + $0x62c] sm:$0xf0]  ;;  %v6702_v59 = vor.u32 %v9377_v50, %v6701_v49  ;;  %3634 = vmatpush.bf16.msrb.mxu1 %v6846_v47  ;;  %3647 = vmatpush.bf16.msrb.mxu2 %v6974_v48 }
  0x3c   :  { %v6957_v54 = vld [vmem:[%s14987_s1 + $0x620] sm:$0xf]  ;;  %v9473_v57 = vld [vmem:[%s14987_s1 + $0x72c] sm:$0xf0]  ;;  %v6830_v63 = vor.u32 %v9409_v53, %v6829_v51  ;;  %3660 = vmatpush.bf16.msrb.mxu3 %v7102_v52 }
  0x3d   :  { %v7085_v56 = vld [vmem:[%s14987_s1 + $0x720] sm:$0xf]  ;;  %v9373_v60 = vld [vmem:[%s14987_s1 + $0x40c] sm:$0xf0]  ;;  %v6958_v0 = vor.u32 %v9441_v55, %v6957_v54  ;;  %3622 = vmatpush.bf16.msrb.mxu0 %v6702_v59 }
  0x3e   :  { %v6685_v58 = vld [vmem:[%s14987_s1 + $0x400] sm:$0xf]  ;;  %v9405_v62 = vld [vmem:[%s14987_s1 + $0x50c] sm:$0xf0]  ;;  %v7086_v4 = vor.u32 %v9473_v57, %v7085_v56 }
  0x3f   :  { %v6813_v61 = vld [vmem:[%s14987_s1 + $0x500] sm:$0xf]  ;;  %v9437_v2 = vld [vmem:[%s14987_s1 + $0x60c] sm:$0xf0]  ;;  %v6686_v11 = vor.u32 %v9373_v60, %v6685_v58  ;;  %3635 = vmatpush.bf16.msrb.mxu1 %v6830_v63  ;;  %3648 = vmatpush.bf16.msrb.mxu2 %v6958_v0 }
  0x40   :  { %v6941_v1 = vld [vmem:[%s14987_s1 + $0x600] sm:$0xf]  ;;  %v9469_v6 = vld [vmem:[%s14987_s1 + $0x70c] sm:$0xf0]  ;;  %v6814_v16 = vor.u32 %v9405_v62, %v6813_v61  ;;  %3661 = vmatpush.bf16.msrb.mxu3 %v7086_v4 }
  0x41   :  { %v7069_v5 = vld [vmem:[%s14987_s1 + $0x700] sm:$0xf]  ;;  %v28_v7 = vld [vmem:[%s14988_s0 + $0x10] sm:$0xff]  ;;  %v6942_v17 = vor.u32 %v9437_v2, %v6941_v1  ;;  %3623 = vmatpush.bf16.msrb.mxu0 %v6686_v11 }
  0x42   :  { %v7309_v8 = vld [vmem:[%s14987_s1 + $0x8e0] sm:$0xf]  ;;  %v9529_v9 = vld [vmem:[%s14987_s1 + $0x8ec] sm:$0xf0]  ;;  %v634_v24 = vunpack.c.l.b16 %v28_v7  ;;  %v7070_v26 = vor.u32 %v9469_v6, %v7069_v5  ;;  %v635_v28 = vunpack.c.h.b16 %v28_v7 }
  0x43   :  { %v7437_v10 = vld [vmem:[%s14987_s1 + $0x9e0] sm:$0xf]  ;;  %v9561_v12 = vld [vmem:[%s14987_s1 + $0x9ec] sm:$0xf0]  ;;  %v7310_v27 = vor.u32 %v9529_v9, %v7309_v8  ;;  %3636 = vmatpush.bf16.msrb.mxu1 %v6814_v16  ;;  %3649 = vmatpush.bf16.msrb.mxu2 %v6942_v17 }
  0x44   :  { %v7565_v13 = vld [vmem:[%s14987_s1 + $0xae0] sm:$0xf]  ;;  %v9593_v14 = vld [vmem:[%s14987_s1 + $0xaec] sm:$0xf0]  ;;  %v7438_v29 = vor.u32 %v9561_v12, %v7437_v10  ;;  %v10513_v41 = vpack.c.b16 %v634_v24, %v634_v24  ;;  %3662 = vmatpush.bf16.msrb.mxu3 %v7070_v26  ;;  %v10517_v44 = vpack.c.b16 %v635_v28, %v635_v28 }
  0x45   :  { %v7693_v21 = vld [vmem:[%s14987_s1 + $0xbe0] sm:$0xf]  ;;  %v9625_v23 = vld [vmem:[%s14987_s1 + $0xbec] sm:$0xf0]  ;;  %v7566_v30 = vor.u32 %v9593_v14, %v7565_v13  ;;  %3668 = vmatpush.bf16.msra.mxu0 %v7310_v27 }
  0x46   :  { %v7293_v31 = vld [vmem:[%s14987_s1 + $0x8c0] sm:$0xf]  ;;  %v9525_v32 = vld [vmem:[%s14987_s1 + $0x8cc] sm:$0xf0]  ;;  %v7694_v34 = vor.u32 %v9625_v23, %v7693_v21  ;;  %3650 = vmatmul.bf16.vlgmr.msrb.gmra.mxu2 %v10505_v38  ;;  %3624 = vmatmul.bf16.vlgmr.msrb.gmra.mxu0 %v10513_v41 }
  0x47   :  { %v7421_v33 = vld [vmem:[%s14987_s1 + $0x9c0] sm:$0xf]  ;;  %v9557_v35 = vld [vmem:[%s14987_s1 + $0x9cc] sm:$0xf0]  ;;  %v7294_v43 = vor.u32 %v9525_v32, %v7293_v31  ;;  %3681 = vmatpush.bf16.msra.mxu1 %v7438_v29  ;;  %3694 = vmatpush.bf16.msra.mxu2 %v7566_v30 }
  0x48   :  { %v7549_v36 = vld [vmem:[%s14987_s1 + $0xac0] sm:$0xf]  ;;  %v9589_v37 = vld [vmem:[%s14987_s1 + $0xacc] sm:$0xf0]  ;;  %v7422_v45 = vor.u32 %v9557_v35, %v7421_v33  ;;  %3707 = vmatpush.bf16.msra.mxu3 %v7694_v34  ;;  %3637 = vmatmul.bf16.vlgmr.msrb.gmra.mxu1 %v10517_v44 }
  0x49   :  { %v7677_v39 = vld [vmem:[%s14987_s1 + $0xbc0] sm:$0xf]  ;;  %v9621_v40 = vld [vmem:[%s14987_s1 + $0xbcc] sm:$0xf0]  ;;  %v7550_v46 = vor.u32 %v9589_v37, %v7549_v36  ;;  %3663 = vmatmul.bf16.vlgmr.msrb.gmra.mxu3 %v10515_v42  ;;  %3669 = vmatpush.bf16.msra.mxu0 %v7294_v43 }
  0x4a   :  { %v7277_v47 = vld [vmem:[%s14987_s1 + $0x8a0] sm:$0xf]  ;;  %v9521_v48 = vld [vmem:[%s14987_s1 + $0x8ac] sm:$0xf0]  ;;  %v7678_v50 = vor.u32 %v9621_v40, %v7677_v39 }
  0x4b   :  { %v7405_v49 = vld [vmem:[%s14987_s1 + $0x9a0] sm:$0xf]  ;;  %v9553_v51 = vld [vmem:[%s14987_s1 + $0x9ac] sm:$0xf0]  ;;  %v7278_v56 = vor.u32 %v9521_v48, %v7277_v47  ;;  %3682 = vmatpush.bf16.msra.mxu1 %v7422_v45  ;;  %3695 = vmatpush.bf16.msra.mxu2 %v7550_v46 }
  0x4c   :  { %v7533_v52 = vld [vmem:[%s14987_s1 + $0xaa0] sm:$0xf]  ;;  %v9585_v53 = vld [vmem:[%s14987_s1 + $0xaac] sm:$0xf0]  ;;  %v7406_v57 = vor.u32 %v9553_v51, %v7405_v49  ;;  %3708 = vmatpush.bf16.msra.mxu3 %v7678_v50 }
  0x4d   :  { %v7661_v54 = vld [vmem:[%s14987_s1 + $0xba0] sm:$0xf]  ;;  %v9617_v55 = vld [vmem:[%s14987_s1 + $0xbac] sm:$0xf0]  ;;  %v7534_v58 = vor.u32 %v9585_v53, %v7533_v52  ;;  %3670 = vmatpush.bf16.msra.mxu0 %v7278_v56 }
  0x4e   :  { %v7261_v59 = vld [vmem:[%s14987_s1 + $0x880] sm:$0xf]  ;;  %v9517_v60 = vld [vmem:[%s14987_s1 + $0x88c] sm:$0xf0]  ;;  %v7662_v62 = vor.u32 %v9617_v55, %v7661_v54 }
  0x4f   :  { %v7389_v61 = vld [vmem:[%s14987_s1 + $0x980] sm:$0xf]  ;;  %v9549_v63 = vld [vmem:[%s14987_s1 + $0x98c] sm:$0xf0]  ;;  %v7262_v4 = vor.u32 %v9517_v60, %v7261_v59  ;;  %3683 = vmatpush.bf16.msra.mxu1 %v7406_v57  ;;  %3696 = vmatpush.bf16.msra.mxu2 %v7534_v58 }
  0x50   :  { %v7517_v0 = vld [vmem:[%s14987_s1 + $0xa80] sm:$0xf]  ;;  %v9581_v1 = vld [vmem:[%s14987_s1 + $0xa8c] sm:$0xf0]  ;;  %v7390_v5 = vor.u32 %v9549_v63, %v7389_v61  ;;  %3709 = vmatpush.bf16.msra.mxu3 %v7662_v62  ;;  %v31_v61 = vld [vmem:[%s14988_s0 + $0x28] sm:$0xff] }
  0x51   :  { %v7645_v2 = vld [vmem:[%s14987_s1 + $0xb80] sm:$0xf]  ;;  %v9613_v3 = vld [vmem:[%s14987_s1 + $0xb8c] sm:$0xf0]  ;;  %v7518_v6 = vor.u32 %v9581_v1, %v7517_v0  ;;  %3671 = vmatpush.bf16.msra.mxu0 %v7262_v4 }
  0x52   :  { %v7245_v7 = vld [vmem:[%s14987_s1 + $0x860] sm:$0xf]  ;;  %v9513_v8 = vld [vmem:[%s14987_s1 + $0x86c] sm:$0xf0]  ;;  %v7646_v10 = vor.u32 %v9613_v3, %v7645_v2 }
  0x53   :  { %v7373_v9 = vld [vmem:[%s14987_s1 + $0x960] sm:$0xf]  ;;  %v9545_v11 = vld [vmem:[%s14987_s1 + $0x96c] sm:$0xf0]  ;;  %v7246_v16 = vor.u32 %v9513_v8, %v7245_v7  ;;  %3684 = vmatpush.bf16.msra.mxu1 %v7390_v5  ;;  %3697 = vmatpush.bf16.msra.mxu2 %v7518_v6 }
  0x54   :  { %v7501_v12 = vld [vmem:[%s14987_s1 + $0xa60] sm:$0xf]  ;;  %v9577_v13 = vld [vmem:[%s14987_s1 + $0xa6c] sm:$0xf0]  ;;  %v7374_v17 = vor.u32 %v9545_v11, %v7373_v9  ;;  %3710 = vmatpush.bf16.msra.mxu3 %v7646_v10  ;;  %v640_v10 = vunpack.c.l.b16 %v31_v61 }
  0x55   :  { %v7629_v14 = vld [vmem:[%s14987_s1 + $0xb60] sm:$0xf]  ;;  %v9609_v15 = vld [vmem:[%s14987_s1 + $0xb6c] sm:$0xf0]  ;;  %v7502_v21 = vor.u32 %v9577_v13, %v7501_v12  ;;  %3672 = vmatpush.bf16.msra.mxu0 %v7246_v16 }
  0x56   :  { %v7229_v23 = vld [vmem:[%s14987_s1 + $0x840] sm:$0xf]  ;;  %v9509_v24 = vld [vmem:[%s14987_s1 + $0x84c] sm:$0xf0]  ;;  %v7630_v26 = vor.u32 %v9609_v15, %v7629_v14  ;;  %v641_v14 = vunpack.c.h.b16 %v31_v61 }
  0x57   :  { %v7357_v25 = vld [vmem:[%s14987_s1 + $0x940] sm:$0xf]  ;;  %v9541_v27 = vld [vmem:[%s14987_s1 + $0x94c] sm:$0xf0]  ;;  %v7230_v32 = vor.u32 %v9509_v24, %v7229_v23  ;;  %3685 = vmatpush.bf16.msra.mxu1 %v7374_v17  ;;  %3698 = vmatpush.bf16.msra.mxu2 %v7502_v21 }
  0x58   :  { %v7485_v28 = vld [vmem:[%s14987_s1 + $0xa40] sm:$0xf]  ;;  %v9573_v29 = vld [vmem:[%s14987_s1 + $0xa4c] sm:$0xf0]  ;;  %v7358_v33 = vor.u32 %v9541_v27, %v7357_v25  ;;  %3711 = vmatpush.bf16.msra.mxu3 %v7630_v26 }
  0x59   :  { %v7613_v30 = vld [vmem:[%s14987_s1 + $0xb40] sm:$0xf]  ;;  %v9605_v31 = vld [vmem:[%s14987_s1 + $0xb4c] sm:$0xf0]  ;;  %v7486_v34 = vor.u32 %v9573_v29, %v7485_v28  ;;  %3673 = vmatpush.bf16.msra.mxu0 %v7230_v32  ;;  %v10717_v29 = vpack.c.b16 %v640_v10, %v640_v10 }
  0x5a   :  { %v7213_v35 = vld [vmem:[%s14987_s1 + $0x820] sm:$0xf]  ;;  %v9505_v36 = vld [vmem:[%s14987_s1 + $0x82c] sm:$0xf0]  ;;  %v7614_v39 = vor.u32 %v9605_v31, %v7613_v30 }
  0x5b   :  { %v7341_v37 = vld [vmem:[%s14987_s1 + $0x920] sm:$0xf]  ;;  %v9537_v40 = vld [vmem:[%s14987_s1 + $0x92c] sm:$0xf0]  ;;  %v7214_v49 = vor.u32 %v9505_v36, %v7213_v35  ;;  %3686 = vmatpush.bf16.msra.mxu1 %v7358_v33  ;;  %3699 = vmatpush.bf16.msra.mxu2 %v7486_v34  ;;  %v10727_v33 = vpack.c.b16 %v641_v14, %v641_v14 }
  0x5c   :  { %v7469_v43 = vld [vmem:[%s14987_s1 + $0xa20] sm:$0xf]  ;;  %v9569_v45 = vld [vmem:[%s14987_s1 + $0xa2c] sm:$0xf0]  ;;  %v7342_v53 = vor.u32 %v9537_v40, %v7341_v37  ;;  %3712 = vmatpush.bf16.msra.mxu3 %v7614_v39 }
  0x5d   :  { %v7597_v46 = vld [vmem:[%s14987_s1 + $0xb20] sm:$0xf]  ;;  %v9601_v47 = vld [vmem:[%s14987_s1 + $0xb2c] sm:$0xf0]  ;;  %v7470_v54 = vor.u32 %v9569_v45, %v7469_v43  ;;  %3674 = vmatpush.bf16.msra.mxu0 %v7214_v49 }
  0x5e   :  { %v7197_v48 = vld [vmem:[%s14987_s1 + $0x800] sm:$0xf]  ;;  %v9501_v50 = vld [vmem:[%s14987_s1 + $0x80c] sm:$0xf0]  ;;  %v7598_v58 = vor.u32 %v9601_v47, %v7597_v46 }
  0x5f   :  { %v7325_v51 = vld [vmem:[%s14987_s1 + $0x900] sm:$0xf]  ;;  %v9533_v52 = vld [vmem:[%s14987_s1 + $0x90c] sm:$0xf0]  ;;  %v7198_v1 = vor.u32 %v9501_v50, %v7197_v48  ;;  %3687 = vmatpush.bf16.msra.mxu1 %v7342_v53  ;;  %3700 = vmatpush.bf16.msra.mxu2 %v7470_v54 }
  0x60   :  { %v7453_v55 = vld [vmem:[%s14987_s1 + $0xa00] sm:$0xf]  ;;  %v9565_v56 = vld [vmem:[%s14987_s1 + $0xa0c] sm:$0xf0]  ;;  %v7326_v6 = vor.u32 %v9533_v52, %v7325_v51  ;;  %3713 = vmatpush.bf16.msra.mxu3 %v7598_v58 }
  0x61   :  { %v30_v57 = vld [vmem:[%s14988_s0 + $0x20] sm:$0xff]  ;;  %v9597_v60 = vld [vmem:[%s14987_s1 + $0xb0c] sm:$0xf0]  ;;  %v7454_v7 = vor.u32 %v9565_v56, %v7453_v55  ;;  %3675 = vmatpush.bf16.msra.mxu0 %v7198_v1 }
  0x62   :  { %v7581_v59 = vld [vmem:[%s14987_s1 + $0xb00] sm:$0xf]  ;;  %v9657_v63 = vld [vmem:[%s14987_s1 + $0xcec] sm:$0xf0]  ;;  %v638_v5 = vunpack.c.l.b16 %v30_v57  ;;  %v639_v11 = vunpack.c.h.b16 %v30_v57 }
  0x63   :  { %v7821_v62 = vld [vmem:[%s14987_s1 + $0xce0] sm:$0xf]  ;;  %v9689_v2 = vld [vmem:[%s14987_s1 + $0xdec] sm:$0xf0]  ;;  %v7582_v12 = vor.u32 %v9597_v60, %v7581_v59  ;;  %3688 = vmatpush.bf16.msra.mxu1 %v7326_v6  ;;  %3701 = vmatpush.bf16.msra.mxu2 %v7454_v7 }
  0x64   :  { %v7949_v0 = vld [vmem:[%s14987_s1 + $0xde0] sm:$0xf]  ;;  %v9721_v4 = vld [vmem:[%s14987_s1 + $0xeec] sm:$0xf0]  ;;  %v7822_v13 = vor.u32 %v9657_v63, %v7821_v62  ;;  %v10706_v25 = vpack.c.b16 %v638_v5, %v638_v5  ;;  %v10719_v30 = vpack.c.b16 %v639_v11, %v639_v11 }
  0x65   :  { %v8077_v3 = vld [vmem:[%s14987_s1 + $0xee0] sm:$0xf]  ;;  %v9753_v9 = vld [vmem:[%s14987_s1 + $0xfec] sm:$0xf0]  ;;  %v7950_v15 = vor.u32 %v9689_v2, %v7949_v0  ;;  %3714 = vmatpush.bf16.msra.mxu3 %v7582_v12 }
  0x66   :  { %v8205_v8 = vld [vmem:[%s14987_s1 + $0xfe0] sm:$0xf]  ;;  %v8078_v16 = vor.u32 %v9721_v4, %v8077_v3  ;;  %v9653_v21 = vld [vmem:[%s14987_s1 + $0xccc] sm:$0xf0]  ;;  %3720 = vmatpush.bf16.msrb.mxu0 %v7822_v13  ;;  %3702 = vmatmul.bf16.vlgmr.msra.gmra.mxu2 %v10717_v29 }
  0x67   :  { %v7805_v17 = vld [vmem:[%s14987_s1 + $0xcc0] sm:$0xf]  ;;  %v8206_v24 = vor.u32 %v9753_v9, %v8205_v8  ;;  %v9685_v26 = vld [vmem:[%s14987_s1 + $0xdcc] sm:$0xf0]  ;;  %3733 = vmatpush.bf16.msrb.mxu1 %v7950_v15  ;;  %3676 = vmatmul.bf16.vlgmr.msra.gmra.mxu0 %v10706_v25 }
  0x68   :  { %v7933_v23 = vld [vmem:[%s14987_s1 + $0xdc0] sm:$0xf]  ;;  %v9717_v28 = vld [vmem:[%s14987_s1 + $0xecc] sm:$0xf0]  ;;  %v7806_v34 = vor.u32 %v9653_v21, %v7805_v17  ;;  %3746 = vmatpush.bf16.msrb.mxu2 %v8078_v16  ;;  %3689 = vmatmul.bf16.vlgmr.msra.gmra.mxu1 %v10719_v30 }
  0x69   :  { %v8061_v27 = vld [vmem:[%s14987_s1 + $0xec0] sm:$0xf]  ;;  %v9749_v32 = vld [vmem:[%s14987_s1 + $0xfcc] sm:$0xf0]  ;;  %v7934_v35 = vor.u32 %v9685_v26, %v7933_v23  ;;  %3759 = vmatpush.bf16.msrb.mxu3 %v8206_v24 }
  0x6a   :  { %v8189_v31 = vld [vmem:[%s14987_s1 + $0xfc0] sm:$0xf]  ;;  %v8062_v36 = vor.u32 %v9717_v28, %v8061_v27  ;;  %v9649_v39 = vld [vmem:[%s14987_s1 + $0xcac] sm:$0xf0]  ;;  %3715 = vmatmul.bf16.vlgmr.msra.gmra.mxu3 %v10727_v33  ;;  %3721 = vmatpush.bf16.msrb.mxu0 %v7806_v34 }
  0x6b   :  { %v7789_v37 = vld [vmem:[%s14987_s1 + $0xca0] sm:$0xf]  ;;  %v8190_v43 = vor.u32 %v9749_v32, %v8189_v31  ;;  %v9681_v45 = vld [vmem:[%s14987_s1 + $0xdac] sm:$0xf0]  ;;  %3734 = vmatpush.bf16.msrb.mxu1 %v7934_v35 }
  0x6c   :  { %v7917_v40 = vld [vmem:[%s14987_s1 + $0xda0] sm:$0xf]  ;;  %v9713_v47 = vld [vmem:[%s14987_s1 + $0xeac] sm:$0xf0]  ;;  %v7790_v50 = vor.u32 %v9649_v39, %v7789_v37  ;;  %3747 = vmatpush.bf16.msrb.mxu2 %v8062_v36 }
  0x6d   :  { %v8045_v46 = vld [vmem:[%s14987_s1 + $0xea0] sm:$0xf]  ;;  %v9745_v49 = vld [vmem:[%s14987_s1 + $0xfac] sm:$0xf0]  ;;  %v7918_v51 = vor.u32 %v9681_v45, %v7917_v40  ;;  %3760 = vmatpush.bf16.msrb.mxu3 %v8190_v43 }
  0x6e   :  { %v8173_v48 = vld [vmem:[%s14987_s1 + $0xfa0] sm:$0xf]  ;;  %v8046_v52 = vor.u32 %v9713_v47, %v8045_v46  ;;  %v9645_v54 = vld [vmem:[%s14987_s1 + $0xc8c] sm:$0xf0]  ;;  %3722 = vmatpush.bf16.msrb.mxu0 %v7790_v50 }
  0x6f   :  { %v7773_v53 = vld [vmem:[%s14987_s1 + $0xc80] sm:$0xf]  ;;  %v8174_v56 = vor.u32 %v9745_v49, %v8173_v48  ;;  %v9677_v57 = vld [vmem:[%s14987_s1 + $0xd8c] sm:$0xf0]  ;;  %3735 = vmatpush.bf16.msrb.mxu1 %v7918_v51 }
  0x70   :  { %v7901_v55 = vld [vmem:[%s14987_s1 + $0xd80] sm:$0xf]  ;;  %v9709_v59 = vld [vmem:[%s14987_s1 + $0xe8c] sm:$0xf0]  ;;  %v7774_v62 = vor.u32 %v9645_v54, %v7773_v53  ;;  %3748 = vmatpush.bf16.msrb.mxu2 %v8046_v52 }
  0x71   :  { %v8029_v58 = vld [vmem:[%s14987_s1 + $0xe80] sm:$0xf]  ;;  %v9741_v61 = vld [vmem:[%s14987_s1 + $0xf8c] sm:$0xf0]  ;;  %v7902_v63 = vor.u32 %v9677_v57, %v7901_v55  ;;  %3761 = vmatpush.bf16.msrb.mxu3 %v8174_v56 }
  0x72   :  { %v8157_v60 = vld [vmem:[%s14987_s1 + $0xf80] sm:$0xf]  ;;  %v8030_v0 = vor.u32 %v9709_v59, %v8029_v58  ;;  %v9641_v2 = vld [vmem:[%s14987_s1 + $0xc6c] sm:$0xf0]  ;;  %3723 = vmatpush.bf16.msrb.mxu0 %v7774_v62  ;;  %v33_v59 = vld [vmem:[%s14988_s0 + $0x38] sm:$0xff] }
  0x73   :  { %v7757_v1 = vld [vmem:[%s14987_s1 + $0xc60] sm:$0xf]  ;;  %v8158_v4 = vor.u32 %v9741_v61, %v8157_v60  ;;  %v9673_v5 = vld [vmem:[%s14987_s1 + $0xd6c] sm:$0xf0]  ;;  %3736 = vmatpush.bf16.msrb.mxu1 %v7902_v63 }
  0x74   :  { %v7885_v3 = vld [vmem:[%s14987_s1 + $0xd60] sm:$0xf]  ;;  %v9705_v7 = vld [vmem:[%s14987_s1 + $0xe6c] sm:$0xf0]  ;;  %v7758_v10 = vor.u32 %v9641_v2, %v7757_v1  ;;  %3749 = vmatpush.bf16.msrb.mxu2 %v8030_v0  ;;  %v9271_v1 = vld [vmem:[%s14987_s1 + $0xe4] sm:$0xf] }
  0x75   :  { %v8013_v6 = vld [vmem:[%s14987_s1 + $0xe60] sm:$0xf]  ;;  %v9737_v9 = vld [vmem:[%s14987_s1 + $0xf6c] sm:$0xf0]  ;;  %v7886_v11 = vor.u32 %v9673_v5, %v7885_v3  ;;  %3762 = vmatpush.bf16.msrb.mxu3 %v8158_v4  ;;  %v6287_v2 = vld [vmem:[%s14987_s1 + $0xf0] sm:$0xf0] }
  0x76   :  { %v8141_v8 = vld [vmem:[%s14987_s1 + $0xf60] sm:$0xf]  ;;  %v8014_v12 = vor.u32 %v9705_v7, %v8013_v6  ;;  %v9637_v14 = vld [vmem:[%s14987_s1 + $0xc4c] sm:$0xf0]  ;;  %3724 = vmatpush.bf16.msrb.mxu0 %v7758_v10  ;;  %v9303_v6 = vld [vmem:[%s14987_s1 + $0x1e4] sm:$0xf] }
  0x77   :  { %v7741_v13 = vld [vmem:[%s14987_s1 + $0xc40] sm:$0xf]  ;;  %v8142_v16 = vor.u32 %v9737_v9, %v8141_v8  ;;  %v9669_v17 = vld [vmem:[%s14987_s1 + $0xd4c] sm:$0xf0]  ;;  %3737 = vmatpush.bf16.msrb.mxu1 %v7886_v11  ;;  %v6415_v7 = vld [vmem:[%s14987_s1 + $0x1f0] sm:$0xf0]  ;;  %v644_v8 = vunpack.c.l.b16 %v33_v59 }
  0x78   :  { %v7869_v15 = vld [vmem:[%s14987_s1 + $0xd40] sm:$0xf]  ;;  %v9701_v23 = vld [vmem:[%s14987_s1 + $0xe4c] sm:$0xf0]  ;;  %v7742_v27 = vor.u32 %v9637_v14, %v7741_v13  ;;  %3750 = vmatpush.bf16.msrb.mxu2 %v8014_v12  ;;  %v645_v12 = vunpack.c.h.b16 %v33_v59  ;;  %v6290_v14 = vor.u32 %v9271_v1, %v6287_v2 }
  0x79   :  { %v7997_v21 = vld [vmem:[%s14987_s1 + $0xe40] sm:$0xf]  ;;  %v9733_v26 = vld [vmem:[%s14987_s1 + $0xf4c] sm:$0xf0]  ;;  %v7870_v28 = vor.u32 %v9669_v17, %v7869_v15  ;;  %3763 = vmatpush.bf16.msrb.mxu3 %v8142_v16 }
  0x7a   :  { %v8125_v24 = vld [vmem:[%s14987_s1 + $0xf40] sm:$0xf]  ;;  %v7998_v31 = vor.u32 %v9701_v23, %v7997_v21  ;;  %v9633_v34 = vld [vmem:[%s14987_s1 + $0xc2c] sm:$0xf0]  ;;  %3725 = vmatpush.bf16.msrb.mxu0 %v7742_v27  ;;  %v6418_v21 = vor.u32 %v9303_v6, %v6415_v7  ;;  %v6271_v27 = vld [vmem:[%s14987_s1 + $0xd0] sm:$0xf0] }
  0x7b   :  { %v7725_v32 = vld [vmem:[%s14987_s1 + $0xc20] sm:$0xf]  ;;  %v8126_v36 = vor.u32 %v9733_v26, %v8125_v24  ;;  %v9665_v37 = vld [vmem:[%s14987_s1 + $0xd2c] sm:$0xf0]  ;;  %3738 = vmatpush.bf16.msrb.mxu1 %v7870_v28  ;;  %v9267_v26 = vld [vmem:[%s14987_s1 + $0xc4] sm:$0xf]  ;;  %v10927_v28 = vpack.c.b16 %v644_v8, %v644_v8 }
  0x7c   :  { %v7853_v35 = vld [vmem:[%s14987_s1 + $0xd20] sm:$0xf]  ;;  %v9697_v40 = vld [vmem:[%s14987_s1 + $0xe2c] sm:$0xf0]  ;;  %v7726_v47 = vor.u32 %v9633_v34, %v7725_v32  ;;  %3751 = vmatpush.bf16.msrb.mxu2 %v7998_v31  ;;  %v9299_v32 = vld [vmem:[%s14987_s1 + $0x1c4] sm:$0xf] }
  0x7d   :  { %v7981_v39 = vld [vmem:[%s14987_s1 + $0xe20] sm:$0xf]  ;;  %v9729_v45 = vld [vmem:[%s14987_s1 + $0xf2c] sm:$0xf0]  ;;  %v7854_v51 = vor.u32 %v9665_v37, %v7853_v35  ;;  %3764 = vmatpush.bf16.msrb.mxu3 %v8126_v36  ;;  %v6399_v34 = vld [vmem:[%s14987_s1 + $0x1d0] sm:$0xf0]  ;;  %v10937_v35 = vpack.c.b16 %v645_v12, %v645_v12 }
  0x7e   :  { %v8109_v43 = vld [vmem:[%s14987_s1 + $0xf20] sm:$0xf]  ;;  %v9629_v48 = vld [vmem:[%s14987_s1 + $0xc0c] sm:$0xf0]  ;;  %v7982_v52 = vor.u32 %v9697_v40, %v7981_v39  ;;  %3726 = vmatpush.bf16.msrb.mxu0 %v7726_v47  ;;  %v6274_v39 = vor.u32 %v9267_v26, %v6271_v27  ;;  %v9255_v8 = vld [vmem:[%s14987_s1 + $0x64] sm:$0xf] }
  0x7f   :  { %v7709_v46 = vld [vmem:[%s14987_s1 + $0xc00] sm:$0xf]  ;;  %v9661_v50 = vld [vmem:[%s14987_s1 + $0xd0c] sm:$0xf0]  ;;  %v8110_v56 = vor.u32 %v9729_v45, %v8109_v43  ;;  %3739 = vmatpush.bf16.msrb.mxu1 %v7854_v51  ;;  %v6383_v51 = vld [vmem:[%s14987_s1 + $0x1b0] sm:$0xf0] }
  0x80   :  { %v7837_v49 = vld [vmem:[%s14987_s1 + $0xd00] sm:$0xf]  ;;  %v9693_v54 = vld [vmem:[%s14987_s1 + $0xe0c] sm:$0xf0]  ;;  %v7710_v63 = vor.u32 %v9629_v48, %v7709_v46  ;;  %3752 = vmatpush.bf16.msrb.mxu2 %v7982_v52  ;;  %v6402_v46 = vor.u32 %v9299_v32, %v6399_v34  ;;  %v9263_v48 = vld [vmem:[%s14987_s1 + $0xa4] sm:$0xf] }
  0x81   :  { %v7965_v53 = vld [vmem:[%s14987_s1 + $0xe00] sm:$0xf]  ;;  %v32_v55 = vld [vmem:[%s14988_s0 + $0x30] sm:$0xff]  ;;  %v7838_v4 = vor.u32 %v9661_v50, %v7837_v49  ;;  %3765 = vmatpush.bf16.msrb.mxu3 %v8110_v56  ;;  %v9295_v50 = vld [vmem:[%s14987_s1 + $0x1a4] sm:$0xf] }
  0x82   :  { %v8093_v57 = vld [vmem:[%s14987_s1 + $0xf00] sm:$0xf]  ;;  %v9725_v58 = vld [vmem:[%s14987_s1 + $0xf0c] sm:$0xf0]  ;;  %v642_v3 = vunpack.c.l.b16 %v32_v55  ;;  %v7966_v5 = vor.u32 %v9693_v54, %v7965_v53  ;;  %v643_v9 = vunpack.c.h.b16 %v32_v55  ;;  %3727 = vmatpush.bf16.msrb.mxu0 %v7710_v63  ;;  %v6255_v49 = vld [vmem:[%s14987_s1 + $0xb0] sm:$0xf0] }
  0x83   :  { %v8333_v60 = vld [vmem:[%s14987_s1 + $0x10e0] sm:$0xf]  ;;  %v9785_v61 = vld [vmem:[%s14987_s1 + $0x10ec] sm:$0xf0]  ;;  %v8094_v10 = vor.u32 %v9725_v58, %v8093_v57  ;;  %3740 = vmatpush.bf16.msrb.mxu1 %v7838_v4  ;;  %v6258_v54 = vor.u32 %v9263_v48, %v6255_v49  ;;  %v6386_v58 = vor.u32 %v9295_v50, %v6383_v51  ;;  %v6367_v63 = vld [vmem:[%s14987_s1 + $0x190] sm:$0xf0] }
  0x84   :  { %v8461_v62 = vld [vmem:[%s14987_s1 + $0x11e0] sm:$0xf]  ;;  %v9817_v0 = vld [vmem:[%s14987_s1 + $0x11ec] sm:$0xf0]  ;;  %v8334_v11 = vor.u32 %v9785_v61, %v8333_v60  ;;  %v10916_v23 = vpack.c.b16 %v642_v3, %v642_v3  ;;  %3753 = vmatpush.bf16.msrb.mxu2 %v7966_v5  ;;  %v10929_v31 = vpack.c.b16 %v643_v9, %v643_v9  ;;  %v9259_v60 = vld [vmem:[%s14987_s1 + $0x84] sm:$0xf] }
  0x85   :  { %v8462_v13 = vor.u32 %v9817_v0, %v8461_v62  ;;  %v8317_v15 = vld [vmem:[%s14987_s1 + $0x10c0] sm:$0xf]  ;;  %v9781_v16 = vld [vmem:[%s14987_s1 + $0x10cc] sm:$0xf0]  ;;  %3766 = vmatpush.bf16.msrb.mxu3 %v8094_v10  ;;  %v6239_v61 = vld [vmem:[%s14987_s1 + $0x90] sm:$0xf0] }
  0x86   :  { %v8445_v17 = vld [vmem:[%s14987_s1 + $0x11c0] sm:$0xf]  ;;  %v9813_v24 = vld [vmem:[%s14987_s1 + $0x11cc] sm:$0xf0]  ;;  %3772 = vmatpush.bf16.msra.mxu0 %v8334_v11  ;;  %v8318_v36 = vor.u32 %v9781_v16, %v8317_v15  ;;  %3741 = vmatmul.bf16.vlgmr.msrb.gmra.mxu1 %v10929_v31  ;;  %v9291_v62 = vld [vmem:[%s14987_s1 + $0x184] sm:$0xf]  ;;  %v6242_v2 = vor.u32 %v9259_v60, %v6239_v61 }
  0x87   :  { %3785 = vmatpush.bf16.msra.mxu1 %v8462_v13  ;;  %v8446_v37 = vor.u32 %v9813_v24, %v8445_v17  ;;  %v8301_v40 = vld [vmem:[%s14987_s1 + $0x10a0] sm:$0xf]  ;;  %v9777_v43 = vld [vmem:[%s14987_s1 + $0x10ac] sm:$0xf0]  ;;  %3728 = vmatmul.bf16.vlgmr.msrb.gmra.mxu0 %v10916_v23  ;;  %v6370_v6 = vor.u32 %v9291_v62, %v6367_v63  ;;  %v6223_v9 = vld [vmem:[%s14987_s1 + $0x70] sm:$0xf0] }
  0x88   :  { %3798 = vmatpush.bf16.msra.mxu2 %v6290_v14  ;;  %v8429_v45 = vld [vmem:[%s14987_s1 + $0x11a0] sm:$0xf]  ;;  %v9809_v47 = vld [vmem:[%s14987_s1 + $0x11ac] sm:$0xf0]  ;;  %3767 = vmatmul.bf16.vlgmr.msrb.gmra.mxu3 %v10937_v35  ;;  %v8302_v52 = vor.u32 %v9777_v43, %v8301_v40  ;;  %v9287_v10 = vld [vmem:[%s14987_s1 + $0x164] sm:$0xf]  ;;  %v6226_v14 = vor.u32 %v9255_v8, %v6223_v9 }
  0x89   :  { %3811 = vmatpush.bf16.msra.mxu3 %v6418_v21  ;;  %3754 = vmatmul.bf16.vlgmr.msrb.gmra.mxu2 %v10927_v28  ;;  %v8430_v53 = vor.u32 %v9809_v47, %v8429_v45  ;;  %v8285_v55 = vld [vmem:[%s14987_s1 + $0x1080] sm:$0xf]  ;;  %v9773_v56 = vld [vmem:[%s14987_s1 + $0x108c] sm:$0xf0]  ;;  %v6351_v11 = vld [vmem:[%s14987_s1 + $0x170] sm:$0xf0] }
  0x8a   :  { %3773 = vmatpush.bf16.msra.mxu0 %v8318_v36  ;;  %v8413_v57 = vld [vmem:[%s14987_s1 + $0x1180] sm:$0xf]  ;;  %v9805_v59 = vld [vmem:[%s14987_s1 + $0x118c] sm:$0xf0]  ;;  %v8286_v0 = vor.u32 %v9773_v56, %v8285_v55  ;;  %v6354_v21 = vor.u32 %v9287_v10, %v6351_v11  ;;  %v9251_v26 = vld [vmem:[%s14987_s1 + $0x44] sm:$0xf] }
  0x8b   :  { %3786 = vmatpush.bf16.msra.mxu1 %v8446_v37  ;;  %v8414_v1 = vor.u32 %v9805_v59, %v8413_v57  ;;  %v8269_v3 = vld [vmem:[%s14987_s1 + $0x1060] sm:$0xf]  ;;  %v9769_v4 = vld [vmem:[%s14987_s1 + $0x106c] sm:$0xf0]  ;;  %v6207_v27 = vld [vmem:[%s14987_s1 + $0x50] sm:$0xf0] }
  0x8c   :  { %3799 = vmatpush.bf16.msra.mxu2 %v6274_v39  ;;  %v8397_v5 = vld [vmem:[%s14987_s1 + $0x1160] sm:$0xf]  ;;  %v9801_v7 = vld [vmem:[%s14987_s1 + $0x116c] sm:$0xf0]  ;;  %v8270_v12 = vor.u32 %v9769_v4, %v8269_v3  ;;  %v9283_v32 = vld [vmem:[%s14987_s1 + $0x144] sm:$0xf]  ;;  %v6210_v39 = vor.u32 %v9251_v26, %v6207_v27 }
  0x8d   :  { %3812 = vmatpush.bf16.msra.mxu3 %v6402_v46  ;;  %v8398_v13 = vor.u32 %v9801_v7, %v8397_v5  ;;  %v8253_v15 = vld [vmem:[%s14987_s1 + $0x1040] sm:$0xf]  ;;  %v9765_v16 = vld [vmem:[%s14987_s1 + $0x104c] sm:$0xf0]  ;;  %v6335_v34 = vld [vmem:[%s14987_s1 + $0x150] sm:$0xf0] }
  0x8e   :  { %3774 = vmatpush.bf16.msra.mxu0 %v8302_v52  ;;  %v8381_v17 = vld [vmem:[%s14987_s1 + $0x1140] sm:$0xf]  ;;  %v9797_v24 = vld [vmem:[%s14987_s1 + $0x114c] sm:$0xf0]  ;;  %v8254_v36 = vor.u32 %v9765_v16, %v8253_v15  ;;  %v6338_v46 = vor.u32 %v9283_v32, %v6335_v34  ;;  %v9247_v48 = vld [vmem:[%s14987_s1 + $0x24] sm:$0xf] }
  0x8f   :  { %3787 = vmatpush.bf16.msra.mxu1 %v8430_v53  ;;  %v8382_v37 = vor.u32 %v9797_v24, %v8381_v17  ;;  %v8237_v40 = vld [vmem:[%s14987_s1 + $0x1020] sm:$0xf]  ;;  %v9761_v43 = vld [vmem:[%s14987_s1 + $0x102c] sm:$0xf0]  ;;  %v6191_v49 = vld [vmem:[%s14987_s1 + $0x30] sm:$0xf0] }
  0x90   :  { %3800 = vmatpush.bf16.msra.mxu2 %v6258_v54  ;;  %v8365_v45 = vld [vmem:[%s14987_s1 + $0x1120] sm:$0xf]  ;;  %v9793_v47 = vld [vmem:[%s14987_s1 + $0x112c] sm:$0xf0]  ;;  %v9279_v50 = vld [vmem:[%s14987_s1 + $0x124] sm:$0xf]  ;;  %v8238_v52 = vor.u32 %v9761_v43, %v8237_v40  ;;  %v6194_v57 = vor.u32 %v9247_v48, %v6191_v49 }
  0x91   :  { %3813 = vmatpush.bf16.msra.mxu3 %v6386_v58  ;;  %v6319_v51 = vld [vmem:[%s14987_s1 + $0x130] sm:$0xf0]  ;;  %v8221_v53 = vld [vmem:[%s14987_s1 + $0x1000] sm:$0xf]  ;;  %v9757_v54 = vld [vmem:[%s14987_s1 + $0x100c] sm:$0xf0]  ;;  %v8366_v56 = vor.u32 %v9793_v47, %v8365_v45 }
  0x92   :  { %3775 = vmatpush.bf16.msra.mxu0 %v8286_v0  ;;  %v8349_v55 = vld [vmem:[%s14987_s1 + $0x1100] sm:$0xf]  ;;  %v9789_v58 = vld [vmem:[%s14987_s1 + $0x110c] sm:$0xf0]  ;;  %v9243_v59 = vld [vmem:[%s14987_s1 + $0x4] sm:$0xf]  ;;  %v6322_v61 = vor.u32 %v9279_v50, %v6319_v51  ;;  %v8222_v4 = vor.u32 %v9757_v54, %v8221_v53 }
  0x93   :  { %3788 = vmatpush.bf16.msra.mxu1 %v8414_v1  ;;  %v34_v60 = vld [vmem:[%s14988_s0 + $0x40] sm:$0xff]  ;;  %v6175_v62 = vld [vmem:[%s14987_s1 + $0x10] sm:$0xf0]  ;;  %v8350_v9 = vor.u32 %v9789_v58, %v8349_v55 }
  0x94   :  { %3801 = vmatpush.bf16.msra.mxu2 %v6242_v2  ;;  %v9275_v63 = vld [vmem:[%s14987_s1 + $0x104] sm:$0xf]  ;;  %v6303_v0 = vld [vmem:[%s14987_s1 + $0x110] sm:$0xf0]  ;;  %v646_v8 = vunpack.c.l.b16 %v34_v60  ;;  %v6178_v10 = vor.u32 %v9243_v59, %v6175_v62 }
  0x95   :  { %3814 = vmatpush.bf16.msra.mxu3 %v6370_v6  ;;  %v9335_v1 = vld [vmem:[%s14987_s1 + $0x2e4] sm:$0xf]  ;;  %v6543_v2 = vld [vmem:[%s14987_s1 + $0x2f0] sm:$0xf0] }
  0x96   :  { %3776 = vmatpush.bf16.msra.mxu0 %v8270_v12  ;;  %v9367_v3 = vld [vmem:[%s14987_s1 + $0x3e4] sm:$0xf]  ;;  %v6671_v5 = vld [vmem:[%s14987_s1 + $0x3f0] sm:$0xf0]  ;;  %v6546_v15 = vor.u32 %v9335_v1, %v6543_v2  ;;  %v11123_v32 = vpack.c.b16 %v646_v8, %v646_v8 }
  0x97   :  { %3789 = vmatpush.bf16.msra.mxu1 %v8398_v13  ;;  %v9399_v6 = vld [vmem:[%s14987_s1 + $0x4e4] sm:$0xf]  ;;  %v6799_v7 = vld [vmem:[%s14987_s1 + $0x4f0] sm:$0xf0]  ;;  %v647_v13 = vunpack.c.h.b16 %v34_v60  ;;  %v6674_v16 = vor.u32 %v9367_v3, %v6671_v5 }
  0x98   :  { %3802 = vmatpush.bf16.msra.mxu2 %v6226_v14  ;;  %v9431_v11 = vld [vmem:[%s14987_s1 + $0x5e4] sm:$0xf]  ;;  %v6927_v12 = vld [vmem:[%s14987_s1 + $0x5f0] sm:$0xf0]  ;;  %v6306_v14 = vor.u32 %v9275_v63, %v6303_v0  ;;  %v6802_v17 = vor.u32 %v9399_v6, %v6799_v7 }
  0x99   :  { %3815 = vmatpush.bf16.msra.mxu3 %v6354_v21  ;;  %v9331_v21 = vld [vmem:[%s14987_s1 + $0x2c4] sm:$0xf]  ;;  %v6527_v24 = vld [vmem:[%s14987_s1 + $0x2d0] sm:$0xf0]  ;;  %v6930_v27 = vor.u32 %v9431_v11, %v6927_v12 }
  0x9a   :  { %3777 = vmatpush.bf16.msra.mxu0 %v8254_v36  ;;  %v9363_v26 = vld [vmem:[%s14987_s1 + $0x3c4] sm:$0xf]  ;;  %v6655_v34 = vld [vmem:[%s14987_s1 + $0x3d0] sm:$0xf0]  ;;  %v6530_v45 = vor.u32 %v9331_v21, %v6527_v24 }
  0x9b   :  { %3790 = vmatpush.bf16.msra.mxu1 %v8382_v37  ;;  %v9395_v36 = vld [vmem:[%s14987_s1 + $0x4c4] sm:$0xf]  ;;  %v6783_v37 = vld [vmem:[%s14987_s1 + $0x4d0] sm:$0xf0] }
  0x9c   :  { %3803 = vmatpush.bf16.msra.mxu2 %v6210_v39  ;;  %v11134_v39 = vpack.c.b16 %v647_v13, %v647_v13  ;;  %v9427_v40 = vld [vmem:[%s14987_s1 + $0x5c4] sm:$0xf]  ;;  %v6911_v43 = vld [vmem:[%s14987_s1 + $0x5d0] sm:$0xf0]  ;;  %v6786_v47 = vor.u32 %v9395_v36, %v6783_v37 }
  0x9d   :  { %3816 = vmatpush.bf16.msra.mxu3 %v6338_v46  ;;  %v6658_v46 = vor.u32 %v9363_v26, %v6655_v34  ;;  %v9327_v48 = vld [vmem:[%s14987_s1 + $0x2a4] sm:$0xf]  ;;  %v6511_v49 = vld [vmem:[%s14987_s1 + $0x2b0] sm:$0xf0]  ;;  %v6914_v51 = vor.u32 %v9427_v40, %v6911_v43 }
  0x9e   :  { %3778 = vmatpush.bf16.msra.mxu0 %v8238_v52  ;;  %v9359_v50 = vld [vmem:[%s14987_s1 + $0x3a4] sm:$0xf]  ;;  %v6639_v52 = vld [vmem:[%s14987_s1 + $0x3b0] sm:$0xf0] }
  0x9f   :  { %3791 = vmatpush.bf16.msra.mxu1 %v8366_v56  ;;  %v9391_v53 = vld [vmem:[%s14987_s1 + $0x4a4] sm:$0xf]  ;;  %v6767_v54 = vld [vmem:[%s14987_s1 + $0x4b0] sm:$0xf0]  ;;  %v6642_v58 = vor.u32 %v9359_v50, %v6639_v52 }
  0xa0   :  { %3804 = vmatpush.bf16.msra.mxu2 %v6194_v57  ;;  %v9423_v55 = vld [vmem:[%s14987_s1 + $0x5a4] sm:$0xf]  ;;  %v6895_v56 = vld [vmem:[%s14987_s1 + $0x5b0] sm:$0xf0]  ;;  %v6514_v57 = vor.u32 %v9327_v48, %v6511_v49  ;;  %v6770_v59 = vor.u32 %v9391_v53, %v6767_v54 }
  0xa1   :  { %3817 = vmatpush.bf16.msra.mxu3 %v6322_v61  ;;  %v9323_v60 = vld [vmem:[%s14987_s1 + $0x284] sm:$0xf]  ;;  %v6495_v61 = vld [vmem:[%s14987_s1 + $0x290] sm:$0xf0]  ;;  %v6898_v63 = vor.u32 %v9423_v55, %v6895_v56 }
  0xa2   :  { %3779 = vmatpush.bf16.msra.mxu0 %v8222_v4  ;;  %v9355_v62 = vld [vmem:[%s14987_s1 + $0x384] sm:$0xf]  ;;  %v6623_v0 = vld [vmem:[%s14987_s1 + $0x390] sm:$0xf0]  ;;  %v6498_v5 = vor.u32 %v9323_v60, %v6495_v61 }
  0xa3   :  { %3792 = vmatpush.bf16.msra.mxu1 %v8350_v9  ;;  %v9387_v1 = vld [vmem:[%s14987_s1 + $0x484] sm:$0xf]  ;;  %v6751_v2 = vld [vmem:[%s14987_s1 + $0x490] sm:$0xf0]  ;;  %v6626_v7 = vor.u32 %v9355_v62, %v6623_v0 }
  0xa4   :  { %3805 = vmatpush.bf16.msra.mxu2 %v6178_v10  ;;  %v9419_v3 = vld [vmem:[%s14987_s1 + $0x584] sm:$0xf]  ;;  %v6879_v4 = vld [vmem:[%s14987_s1 + $0x590] sm:$0xf0]  ;;  %v6754_v8 = vor.u32 %v9387_v1, %v6751_v2 }
  0xa5   :  { %3818 = vmatpush.bf16.msra.mxu3 %v6306_v14  ;;  %3780 = vmatmul.bf16.vlgmr.msra.gmra.mxu0 %v11123_v32  ;;  %v9319_v6 = vld [vmem:[%s14987_s1 + $0x264] sm:$0xf]  ;;  %v6479_v9 = vld [vmem:[%s14987_s1 + $0x270] sm:$0xf0]  ;;  %v6882_v12 = vor.u32 %v9419_v3, %v6879_v4 }
  0xa6   :  { %3824 = vmatpush.bf16.msrb.mxu0 %v6546_v15  ;;  %3793 = vmatmul.bf16.vlgmr.msra.gmra.mxu1 %v11134_v39  ;;  %v9351_v10 = vld [vmem:[%s14987_s1 + $0x364] sm:$0xf]  ;;  %v6607_v11 = vld [vmem:[%s14987_s1 + $0x370] sm:$0xf0]  ;;  %v611_v15 = vld [vmem:[%s14989_s2] sm:$0xf]  ;;  %v6482_v21 = vor.u32 %v9319_v6, %v6479_v9 }
  0xa7   :  { %3837 = vmatpush.bf16.msrb.mxu1 %v6674_v16  ;;  %3806 = vmatmul.bf16.vlgmr.msra.gmra.mxu2 %v10351_v19  ;;  %v9383_v13 = vld [vmem:[%s14987_s1 + $0x464] sm:$0xf]  ;;  %v6735_v14 = vld [vmem:[%s14987_s1 + $0x470] sm:$0xf0]  ;;  %v6610_v26 = vor.u32 %v9351_v10, %v6607_v11  ;;  %v613_v37 = vperm.slane %v611_v15, 0 }
  0xa8   :  { %3850 = vmatpush.bf16.msrb.mxu2 %v6802_v17  ;;  %3819 = vmatmul.bf16.vlgmr.msra.gmra.mxu3 %v10355_v22  ;;  %v9415_v16 = vld [vmem:[%s14987_s1 + $0x564] sm:$0xf]  ;;  %v6863_v17 = vld [vmem:[%s14987_s1 + $0x570] sm:$0xf0]  ;;  %v3599_v9 = vpop.f32.mrf.mxu2 }
  0xa9   :  { %3863 = vmatpush.bf16.msrb.mxu3 %v6930_v27  ;;  %v9315_v24 = vld [vmem:[%s14987_s1 + $0x244] sm:$0xf]  ;;  %v6738_v27 = vor.u32 %v9383_v13, %v6735_v14  ;;  %v6463_v34 = vld [vmem:[%s14987_s1 + $0x250] sm:$0xf0]  ;;  %v6866_v40 = vor.u32 %v9415_v16, %v6863_v17  ;;  %v3612_v15 = vpop.f32.mrf.mxu3 }
  0xaa   :  { %3825 = vmatpush.bf16.msrb.mxu0 %v6530_v45  ;;  %v9347_v36 = vld [vmem:[%s14987_s1 + $0x344] sm:$0xf]  ;;  %v6591_v43 = vld [vmem:[%s14987_s1 + $0x350] sm:$0xf0]  ;;  %v6466_v49 = vor.u32 %v9315_v24, %v6463_v34 }
  0xab   :  { %3838 = vmatpush.bf16.msrb.mxu1 %v6658_v46  ;;  %v9379_v45 = vld [vmem:[%s14987_s1 + $0x444] sm:$0xf]  ;;  %v6719_v46 = vld [vmem:[%s14987_s1 + $0x450] sm:$0xf0] }
  0xac   :  { %3851 = vmatpush.bf16.msrb.mxu2 %v6786_v47  ;;  %v9411_v47 = vld [vmem:[%s14987_s1 + $0x544] sm:$0xf]  ;;  %v6847_v48 = vld [vmem:[%s14987_s1 + $0x550] sm:$0xf0]  ;;  %v6722_v52 = vor.u32 %v9379_v45, %v6719_v46 }
  0xad   :  { %3864 = vmatpush.bf16.msrb.mxu3 %v6914_v51  ;;  %v6594_v51 = vor.u32 %v9347_v36, %v6591_v43  ;;  %v9311_v53 = vld [vmem:[%s14987_s1 + $0x224] sm:$0xf]  ;;  %v6447_v54 = vld [vmem:[%s14987_s1 + $0x230] sm:$0xf0] }
  0xae   :  { %3826 = vmatpush.bf16.msrb.mxu0 %v6514_v57  ;;  %v9343_v55 = vld [vmem:[%s14987_s1 + $0x324] sm:$0xf]  ;;  %v6703_v61 = vld [vmem:[%s14987_s1 + $0x430] sm:$0xf0]  ;;  %v6450_v1 = vor.u32 %v9311_v53, %v6447_v54 }
  0xaf   :  { %3839 = vmatpush.bf16.msrb.mxu1 %v6642_v58  ;;  %v3573_v50 = vpop.f32.mrf.mxu0  ;;  %v3586_v57 = vpop.f32.mrf.mxu1  ;;  %v6850_v58 = vor.u32 %v9411_v47, %v6847_v48  ;;  %v9375_v60 = vld [vmem:[%s14987_s1 + $0x424] sm:$0xf]  ;;  %v6431_v3 = vld [vmem:[%s14987_s1 + $0x210] sm:$0xf0] }
  0xb0   :  { %3852 = vmatpush.bf16.msrb.mxu2 %v6770_v59  ;;  %v3574_v56 = vadd.f32 %v3573_v50, %v613_v37  ;;  %v6575_v59 = vld [vmem:[%s14987_s1 + $0x330] sm:$0xf0]  ;;  %v9407_v62 = vld [vmem:[%s14987_s1 + $0x524] sm:$0xf] }
  0xb1   :  { %3865 = vmatpush.bf16.msrb.mxu3 %v6898_v63  ;;  %v6831_v63 = vld [vmem:[%s14987_s1 + $0x530] sm:$0xf0]  ;;  %v9307_v2 = vld [vmem:[%s14987_s1 + $0x204] sm:$0xf]  ;;  %v6578_v4 = vor.u32 %v9343_v55, %v6575_v59 }
  0xb2   :  { %3827 = vmatpush.bf16.msrb.mxu0 %v6498_v5  ;;  %v3587_v0 = vadd.f32 %v3586_v57, %v3574_v56  ;;  %v6706_v5 = vor.u32 %v9375_v60, %v6703_v61  ;;  %v9339_v6 = vld [vmem:[%s14987_s1 + $0x304] sm:$0xf]  ;;  %v6834_v10 = vor.u32 %v9407_v62, %v6831_v63  ;;  %v6687_v11 = vld [vmem:[%s14987_s1 + $0x410] sm:$0xf0]  ;;  %v6434_v24 = vor.u32 %v9307_v2, %v6431_v3  ;;  %v3601_v61 = vpop.f32.mrf.mxu2  ;;  %v3614_v63 = vpop.f32.mrf.mxu3 }
  0xb3   :  { %3840 = vmatpush.bf16.msrb.mxu1 %v6626_v7  ;;  %v6559_v7 = vld [vmem:[%s14987_s1 + $0x310] sm:$0xf0]  ;;  %v9463_v16 = vld [vmem:[%s14987_s1 + $0x6e4] sm:$0xf] }
  0xb4   :  { %3853 = vmatpush.bf16.msrb.mxu2 %v6754_v8  ;;  %v9371_v8 = vld [vmem:[%s14987_s1 + $0x404] sm:$0xf]  ;;  %v6815_v13 = vld [vmem:[%s14987_s1 + $0x510] sm:$0xf0]  ;;  %v3600_v14 = vadd.f32 %v3599_v9, %v3587_v0 }
  0xb5   :  { %3866 = vmatpush.bf16.msrb.mxu3 %v6882_v12  ;;  %v9403_v12 = vld [vmem:[%s14987_s1 + $0x504] sm:$0xf]  ;;  %v7055_v17 = vld [vmem:[%s14987_s1 + $0x6f0] sm:$0xf0]  ;;  %v6690_v43 = vor.u32 %v9371_v8, %v6687_v11 }
  0xb6   :  { %3828 = vmatpush.bf16.msrb.mxu0 %v6482_v21  ;;  %v9495_v21 = vld [vmem:[%s14987_s1 + $0x7e4] sm:$0xf]  ;;  %v7311_v34 = vld [vmem:[%s14987_s1 + $0x8f0] sm:$0xf0]  ;;  %v11311_v36 = vadd.f32 %v3612_v15, %v3600_v14  ;;  %v6818_v48 = vor.u32 %v9403_v12, %v6815_v13 }
  0xb7   :  { %3841 = vmatpush.bf16.msrb.mxu1 %v6610_v26  ;;  %v7183_v26 = vld [vmem:[%s14987_s1 + $0x7f0] sm:$0xf0]  ;;  %v3575_v37 = vpop.f32.mrf.mxu0  ;;  %v9559_v45 = vld [vmem:[%s14987_s1 + $0x9e4] sm:$0xf]  ;;  %v3588_v47 = vpop.f32.mrf.mxu1 }
  0xb8   :  { %3854 = vmatpush.bf16.msrb.mxu2 %v6738_v27  ;;  %v9527_v27 = vld [vmem:[%s14987_s1 + $0x8e4] sm:$0xf]  ;;  %v7439_v46 = vld [vmem:[%s14987_s1 + $0x9f0] sm:$0xf0]  ;;  %v7186_v50 = vor.u32 %v9495_v21, %v7183_v26 }
  0xb9   :  { %3867 = vmatpush.bf16.msrb.mxu3 %v6866_v40  ;;  %v6562_v40 = vor.u32 %v9339_v6, %v6559_v7  ;;  %v7039_v53 = vld [vmem:[%s14987_s1 + $0x6d0] sm:$0xf0]  ;;  %v9491_v54 = vld [vmem:[%s14987_s1 + $0x7c4] sm:$0xf]  ;;  %v7442_v55 = vor.u32 %v9559_v45, %v7439_v46 }
  0xba   :  { %3829 = vmatpush.bf16.msrb.mxu0 %v6466_v49  ;;  %v7058_v49 = vor.u32 %v9463_v16, %v7055_v17  ;;  %v7167_v56 = vld [vmem:[%s14987_s1 + $0x7d0] sm:$0xf0]  ;;  %v9523_v57 = vld [vmem:[%s14987_s1 + $0x8c4] sm:$0xf] }
  0xbb   :  { %3842 = vmatpush.bf16.msrb.mxu1 %v6594_v51  ;;  %v7314_v51 = vor.u32 %v9527_v27, %v7311_v34  ;;  %v9555_v59 = vld [vmem:[%s14987_s1 + $0x9c4] sm:$0xf]  ;;  %v7423_v60 = vld [vmem:[%s14987_s1 + $0x9d0] sm:$0xf0]  ;;  %v7170_v0 = vor.u32 %v9491_v54, %v7167_v56 }
  0xbc   :  { %3855 = vmatpush.bf16.msrb.mxu2 %v6722_v52  ;;  %v9459_v52 = vld [vmem:[%s14987_s1 + $0x6c4] sm:$0xf]  ;;  %v7023_v3 = vld [vmem:[%s14987_s1 + $0x6b0] sm:$0xf0] }
  0xbd   :  { %3868 = vmatpush.bf16.msrb.mxu3 %v6850_v58  ;;  %v7295_v58 = vld [vmem:[%s14987_s1 + $0x8d0] sm:$0xf0]  ;;  %v7042_v62 = vor.u32 %v9459_v52, %v7039_v53  ;;  %v9455_v2 = vld [vmem:[%s14987_s1 + $0x6a4] sm:$0xf] }
  0xbe   :  { %3830 = vmatpush.bf16.msrb.mxu0 %v6450_v1  ;;  %v7298_v1 = vor.u32 %v9523_v57, %v7295_v58  ;;  %v7151_v6 = vld [vmem:[%s14987_s1 + $0x7b0] sm:$0xf0]  ;;  %v9519_v7 = vld [vmem:[%s14987_s1 + $0x8a4] sm:$0xf]  ;;  %v7026_v11 = vor.u32 %v9455_v2, %v7023_v3 }
  0xbf   :  { %3843 = vmatpush.bf16.msrb.mxu1 %v6578_v4  ;;  %v9487_v4 = vld [vmem:[%s14987_s1 + $0x7a4] sm:$0xf]  ;;  %v7279_v8 = vld [vmem:[%s14987_s1 + $0x8b0] sm:$0xf0] }
  0xc0   :  { %3856 = vmatpush.bf16.msrb.mxu2 %v6706_v5  ;;  %v7426_v5 = vor.u32 %v9555_v59, %v7423_v60  ;;  %v9551_v9 = vld [vmem:[%s14987_s1 + $0x9a4] sm:$0xf]  ;;  %v7154_v12 = vor.u32 %v9487_v4, %v7151_v6  ;;  %v7282_v13 = vor.u32 %v9519_v7, %v7279_v8  ;;  %v7007_v15 = vld [vmem:[%s14987_s1 + $0x690] sm:$0xf0] }
  0xc1   :  { %3869 = vmatpush.bf16.msrb.mxu3 %v6834_v10  ;;  %v7407_v10 = vld [vmem:[%s14987_s1 + $0x9b0] sm:$0xf0]  ;;  %v9451_v14 = vld [vmem:[%s14987_s1 + $0x684] sm:$0xf] }
  0xc2   :  { %3831 = vmatpush.bf16.msrb.mxu0 %v6434_v24  ;;  %v9483_v16 = vld [vmem:[%s14987_s1 + $0x784] sm:$0xf]  ;;  %v7410_v17 = vor.u32 %v9551_v9, %v7407_v10  ;;  %v7135_v21 = vld [vmem:[%s14987_s1 + $0x790] sm:$0xf0]  ;;  %v7010_v37 = vor.u32 %v9451_v14, %v7007_v15 }
  0xc3   :  { %3844 = vmatpush.bf16.msrb.mxu1 %v6562_v40  ;;  %v9515_v24 = vld [vmem:[%s14987_s1 + $0x884] sm:$0xf]  ;;  %v7263_v26 = vld [vmem:[%s14987_s1 + $0x890] sm:$0xf0]  ;;  %v3625_v40 = vpop.f32.mrf.mxu0 }
  0xc4   :  { %3857 = vmatpush.bf16.msrb.mxu2 %v6690_v43  ;;  %v9547_v27 = vld [vmem:[%s14987_s1 + $0x984] sm:$0xf]  ;;  %v7391_v34 = vld [vmem:[%s14987_s1 + $0x990] sm:$0xf0]  ;;  %v7138_v43 = vor.u32 %v9483_v16, %v7135_v21  ;;  %v7266_v45 = vor.u32 %v9515_v24, %v7263_v26 }
  0xc5   :  { %3870 = vmatpush.bf16.msrb.mxu3 %v6818_v48  ;;  %3832 = vmatmul.bf16.vlgmr.msrb.gmra.mxu0 %v10349_v18  ;;  %v9447_v46 = vld [vmem:[%s14987_s1 + $0x664] sm:$0xf]  ;;  %v6991_v47 = vld [vmem:[%s14987_s1 + $0x670] sm:$0xf0] }
  0xc6   :  { %3876 = vmatpush.bf16.msra.mxu0 %v7058_v49  ;;  %3845 = vmatmul.bf16.vlgmr.msrb.gmra.mxu1 %v10353_v20  ;;  %v9479_v48 = vld [vmem:[%s14987_s1 + $0x764] sm:$0xf]  ;;  %v3626_v49 = vadd.f32 %v3625_v40, %v11311_v36  ;;  %v7119_v52 = vld [vmem:[%s14987_s1 + $0x770] sm:$0xf0]  ;;  %v6994_v57 = vor.u32 %v9447_v46, %v6991_v47 }
  0xc7   :  { %3889 = vmatpush.bf16.msra.mxu1 %v7186_v50  ;;  %3858 = vmatmul.bf16.vlgmr.msrb.gmra.mxu2 %v10513_v41  ;;  %v3638_v50 = vpop.f32.mrf.mxu1  ;;  %v9511_v53 = vld [vmem:[%s14987_s1 + $0x864] sm:$0xf]  ;;  %v7247_v54 = vld [vmem:[%s14987_s1 + $0x870] sm:$0xf0]  ;;  %v7122_v58 = vor.u32 %v9479_v48, %v7119_v52 }
  0xc8   :  { %3902 = vmatpush.bf16.msra.mxu2 %v7314_v51  ;;  %3871 = vmatmul.bf16.vlgmr.msrb.gmra.mxu3 %v10517_v44  ;;  %v7394_v51 = vor.u32 %v9547_v27, %v7391_v34  ;;  %v7375_v36 = vld [vmem:[%s14987_s1 + $0x970] sm:$0xf0]  ;;  %v3639_v56 = vadd.f32 %v3638_v50, %v3626_v49  ;;  %v7250_v59 = vor.u32 %v9511_v53, %v7247_v54  ;;  %v9443_v60 = vld [vmem:[%s14987_s1 + $0x644] sm:$0xf] }
  0xc9   :  { %3915 = vmatpush.bf16.msra.mxu3 %v7442_v55  ;;  %v9543_v55 = vld [vmem:[%s14987_s1 + $0x964] sm:$0xf]  ;;  %v6975_v61 = vld [vmem:[%s14987_s1 + $0x650] sm:$0xf0]  ;;  %v3651_v63 = vpop.f32.mrf.mxu2 }
  0xca   :  { %3877 = vmatpush.bf16.msra.mxu0 %v7042_v62  ;;  %v9475_v62 = vld [vmem:[%s14987_s1 + $0x744] sm:$0xf]  ;;  %v7231_v3 = vld [vmem:[%s14987_s1 + $0x850] sm:$0xf0]  ;;  %v3652_v4 = vadd.f32 %v3651_v63, %v3639_v56  ;;  %v6978_v8 = vor.u32 %v9443_v60, %v6975_v61 }
  0xcb   :  { %3890 = vmatpush.bf16.msra.mxu1 %v7170_v0  ;;  %v7378_v0 = vor.u32 %v9543_v55, %v7375_v36  ;;  %v9507_v2 = vld [vmem:[%s14987_s1 + $0x844] sm:$0xf]  ;;  %v7359_v7 = vld [vmem:[%s14987_s1 + $0x950] sm:$0xf0]  ;;  %v3627_v10 = vpop.f32.mrf.mxu0 }
  0xcc   :  { %3903 = vmatpush.bf16.msra.mxu2 %v7298_v1  ;;  %v7103_v1 = vld [vmem:[%s14987_s1 + $0x750] sm:$0xf0]  ;;  %v9539_v6 = vld [vmem:[%s14987_s1 + $0x944] sm:$0xf] }
  0xcd   :  { %3916 = vmatpush.bf16.msra.mxu3 %v7426_v5  ;;  %v3664_v5 = vpop.f32.mrf.mxu3  ;;  %v6959_v14 = vld [vmem:[%s14987_s1 + $0x630] sm:$0xf0]  ;;  %v9471_v15 = vld [vmem:[%s14987_s1 + $0x724] sm:$0xf] }
  0xce   :  { %3878 = vmatpush.bf16.msra.mxu0 %v7026_v11  ;;  %v11444_v9 = vadd.f32 %v3664_v5, %v3652_v4  ;;  %v7106_v11 = vor.u32 %v9475_v62, %v7103_v1  ;;  %v7087_v21 = vld [vmem:[%s14987_s1 + $0x730] sm:$0xf0]  ;;  %v9503_v24 = vld [vmem:[%s14987_s1 + $0x824] sm:$0xf] }
  0xcf   :  { %3891 = vmatpush.bf16.msra.mxu1 %v7154_v12  ;;  %v7234_v12 = vor.u32 %v9507_v2, %v7231_v3  ;;  %v3640_v16 = vpop.f32.mrf.mxu1  ;;  %v7215_v26 = vld [vmem:[%s14987_s1 + $0x830] sm:$0xf0]  ;;  %v9535_v27 = vld [vmem:[%s14987_s1 + $0x924] sm:$0xf] }
  0xd0   :  { %3904 = vmatpush.bf16.msra.mxu2 %v7282_v13  ;;  %v9439_v13 = vld [vmem:[%s14987_s1 + $0x624] sm:$0xf]  ;;  %v7343_v34 = vld [vmem:[%s14987_s1 + $0x930] sm:$0xf0]  ;;  %v7218_v46 = vor.u32 %v9503_v24, %v7215_v26 }
  0xd1   :  { %3917 = vmatpush.bf16.msra.mxu3 %v7410_v17  ;;  %v7362_v17 = vor.u32 %v9539_v6, %v7359_v7  ;;  %v9435_v40 = vld [vmem:[%s14987_s1 + $0x604] sm:$0xf]  ;;  %v7071_v48 = vld [vmem:[%s14987_s1 + $0x710] sm:$0xf0]  ;;  %v3653_v50 = vpop.f32.mrf.mxu2 }
  0xd2   :  { %3879 = vmatpush.bf16.msra.mxu0 %v7010_v37  ;;  %v6962_v37 = vor.u32 %v9439_v13, %v6959_v14  ;;  %v9467_v47 = vld [vmem:[%s14987_s1 + $0x704] sm:$0xf]  ;;  %v7199_v52 = vld [vmem:[%s14987_s1 + $0x810] sm:$0xf0] }
  0xd3   :  { %3892 = vmatpush.bf16.msra.mxu1 %v7138_v43  ;;  %v6943_v43 = vld [vmem:[%s14987_s1 + $0x610] sm:$0xf0]  ;;  %v9499_v49 = vld [vmem:[%s14987_s1 + $0x804] sm:$0xf]  ;;  %v7074_v62 = vor.u32 %v9467_v47, %v7071_v48 }
  0xd4   :  { %3905 = vmatpush.bf16.msra.mxu2 %v7266_v45  ;;  %v7090_v45 = vor.u32 %v9471_v15, %v7087_v21  ;;  %v9531_v53 = vld [vmem:[%s14987_s1 + $0x904] sm:$0xf]  ;;  %v7327_v54 = vld [vmem:[%s14987_s1 + $0x910] sm:$0xf0]  ;;  %v7202_v63 = vor.u32 %v9499_v49, %v7199_v52 }
  0xd5   :  { %3918 = vmatpush.bf16.msra.mxu3 %v7394_v51  ;;  %v7346_v51 = vor.u32 %v9535_v27, %v7343_v34  ;;  %v3666_v55 = vpop.f32.mrf.mxu3  ;;  %v9591_v36 = vld [vmem:[%s14987_s1 + $0xae4] sm:$0xf]  ;;  %v7567_v56 = vld [vmem:[%s14987_s1 + $0xaf0] sm:$0xf0]  ;;  %v7330_v2 = vor.u32 %v9531_v53, %v7327_v54 }
  0xd6   :  { %3880 = vmatpush.bf16.msra.mxu0 %v6994_v57  ;;  %v9623_v57 = vld [vmem:[%s14987_s1 + $0xbe4] sm:$0xf]  ;;  %v7823_v61 = vld [vmem:[%s14987_s1 + $0xcf0] sm:$0xf0]  ;;  %v7570_v3 = vor.u32 %v9591_v36, %v7567_v56 }
  0xd7   :  { %3893 = vmatpush.bf16.msra.mxu1 %v7122_v58  ;;  %v6946_v58 = vor.u32 %v9435_v40, %v6943_v43  ;;  %v9655_v60 = vld [vmem:[%s14987_s1 + $0xce4] sm:$0xf]  ;;  %v7951_v1 = vld [vmem:[%s14987_s1 + $0xdf0] sm:$0xf0] }
  0xd8   :  { %3906 = vmatpush.bf16.msra.mxu2 %v7250_v59  ;;  %v7695_v59 = vld [vmem:[%s14987_s1 + $0xbf0] sm:$0xf0]  ;;  %v7826_v5 = vor.u32 %v9655_v60, %v7823_v61  ;;  %v9587_v6 = vld [vmem:[%s14987_s1 + $0xac4] sm:$0xf] }
  0xd9   :  { %3919 = vmatpush.bf16.msra.mxu3 %v7378_v0  ;;  %v9687_v0 = vld [vmem:[%s14987_s1 + $0xde4] sm:$0xf]  ;;  %v7698_v4 = vor.u32 %v9623_v57, %v7695_v59  ;;  %v7551_v7 = vld [vmem:[%s14987_s1 + $0xad0] sm:$0xf0] }
  0xda   :  { %3881 = vmatpush.bf16.msra.mxu0 %v6978_v8  ;;  %v9619_v8 = vld [vmem:[%s14987_s1 + $0xbc4] sm:$0xf]  ;;  %v7954_v10 = vor.u32 %v9687_v0, %v7951_v1  ;;  %v7807_v13 = vld [vmem:[%s14987_s1 + $0xcd0] sm:$0xf0]  ;;  %v7554_v16 = vor.u32 %v9587_v6, %v7551_v7 }
  0xdb   :  { %3894 = vmatpush.bf16.msra.mxu1 %v7106_v11  ;;  %v7679_v11 = vld [vmem:[%s14987_s1 + $0xbd0] sm:$0xf0]  ;;  %v9683_v14 = vld [vmem:[%s14987_s1 + $0xdc4] sm:$0xf] }
  0xdc   :  { %3907 = vmatpush.bf16.msra.mxu2 %v7234_v12  ;;  %v9651_v12 = vld [vmem:[%s14987_s1 + $0xcc4] sm:$0xf]  ;;  %v7935_v15 = vld [vmem:[%s14987_s1 + $0xdd0] sm:$0xf0] }
  0xdd   :  { %3920 = vmatpush.bf16.msra.mxu3 %v7362_v17  ;;  %v7682_v17 = vor.u32 %v9619_v8, %v7679_v11  ;;  %v7810_v21 = vor.u32 %v9651_v12, %v7807_v13  ;;  %v9583_v24 = vld [vmem:[%s14987_s1 + $0xaa4] sm:$0xf]  ;;  %v7535_v26 = vld [vmem:[%s14987_s1 + $0xab0] sm:$0xf0]  ;;  %v7938_v34 = vor.u32 %v9683_v14, %v7935_v15 }
  0xde   :  { %3882 = vmatpush.bf16.msra.mxu0 %v6962_v37  ;;  %v9615_v27 = vld [vmem:[%s14987_s1 + $0xba4] sm:$0xf]  ;;  %v7663_v37 = vld [vmem:[%s14987_s1 + $0xbb0] sm:$0xf0]  ;;  %v7538_v47 = vor.u32 %v9583_v24, %v7535_v26 }
  0xdf   :  { %3895 = vmatpush.bf16.msra.mxu1 %v7090_v45  ;;  %v9647_v40 = vld [vmem:[%s14987_s1 + $0xca4] sm:$0xf]  ;;  %v7791_v43 = vld [vmem:[%s14987_s1 + $0xcb0] sm:$0xf0]  ;;  %v7666_v48 = vor.u32 %v9615_v27, %v7663_v37 }
  0xe0   :  { %3908 = vmatpush.bf16.msra.mxu2 %v7218_v46  ;;  %v9679_v45 = vld [vmem:[%s14987_s1 + $0xda4] sm:$0xf]  ;;  %v7919_v46 = vld [vmem:[%s14987_s1 + $0xdb0] sm:$0xf0]  ;;  %v7794_v49 = vor.u32 %v9647_v40, %v7791_v43 }
  0xe1   :  { %3921 = vmatpush.bf16.msra.mxu3 %v7346_v51  ;;  %v9579_v50 = vld [vmem:[%s14987_s1 + $0xa84] sm:$0xf]  ;;  %v7519_v51 = vld [vmem:[%s14987_s1 + $0xa90] sm:$0xf0]  ;;  %v7922_v53 = vor.u32 %v9679_v45, %v7919_v46 }
  0xe2   :  { %3883 = vmatpush.bf16.msra.mxu0 %v6946_v58  ;;  %v9611_v52 = vld [vmem:[%s14987_s1 + $0xb84] sm:$0xf]  ;;  %v7647_v54 = vld [vmem:[%s14987_s1 + $0xb90] sm:$0xf0]  ;;  %v7522_v60 = vor.u32 %v9579_v50, %v7519_v51 }
  0xe3   :  { %3896 = vmatpush.bf16.msra.mxu1 %v7074_v62  ;;  %v9643_v55 = vld [vmem:[%s14987_s1 + $0xc84] sm:$0xf]  ;;  %v7775_v36 = vld [vmem:[%s14987_s1 + $0xc90] sm:$0xf0]  ;;  %v7650_v62 = vor.u32 %v9611_v52, %v7647_v54 }
  0xe4   :  { %3909 = vmatpush.bf16.msra.mxu2 %v7202_v63  ;;  %v3677_v56 = vpop.f32.mrf.mxu0  ;;  %v9675_v57 = vld [vmem:[%s14987_s1 + $0xd84] sm:$0xf]  ;;  %v7903_v58 = vld [vmem:[%s14987_s1 + $0xd90] sm:$0xf0]  ;;  %v7778_v63 = vor.u32 %v9643_v55, %v7775_v36 }
  0xe5   :  { %3922 = vmatpush.bf16.msra.mxu3 %v7330_v2  ;;  %3884 = vmatmul.bf16.vlgmr.msra.gmra.mxu0 %v10505_v38  ;;  %v3678_v59 = vadd.f32 %v3677_v56, %v11444_v9  ;;  %v3690_v61 = vpop.f32.mrf.mxu1  ;;  %v9575_v0 = vld [vmem:[%s14987_s1 + $0xa64] sm:$0xf]  ;;  %v7503_v1 = vld [vmem:[%s14987_s1 + $0xa70] sm:$0xf0]  ;;  %v7906_v9 = vor.u32 %v9675_v57, %v7903_v58 }
  0xe6   :  { %3928 = vmatpush.bf16.msrb.mxu0 %v7570_v3  ;;  %3897 = vmatmul.bf16.vlgmr.msra.gmra.mxu1 %v10515_v42  ;;  %v9607_v2 = vld [vmem:[%s14987_s1 + $0xb64] sm:$0xf]  ;;  %v7759_v6 = vld [vmem:[%s14987_s1 + $0xc70] sm:$0xf0] }
  0xe7   :  { %3941 = vmatpush.bf16.msrb.mxu1 %v7698_v4  ;;  %3910 = vmatmul.bf16.vlgmr.msra.gmra.mxu2 %v10706_v25  ;;  %v3691_v3 = vadd.f32 %v3690_v61, %v3678_v59  ;;  %v7631_v4 = vld [vmem:[%s14987_s1 + $0xb70] sm:$0xf0]  ;;  %v9671_v7 = vld [vmem:[%s14987_s1 + $0xd64] sm:$0xf] }
  0xe8   :  { %3954 = vmatpush.bf16.msrb.mxu2 %v7826_v5  ;;  %3923 = vmatmul.bf16.vlgmr.msra.gmra.mxu3 %v10719_v30  ;;  %v9639_v5 = vld [vmem:[%s14987_s1 + $0xc64] sm:$0xf]  ;;  %v7887_v8 = vld [vmem:[%s14987_s1 + $0xd70] sm:$0xf0]  ;;  %v7634_v11 = vor.u32 %v9607_v2, %v7631_v4 }
  0xe9   :  { %3967 = vmatpush.bf16.msrb.mxu3 %v7954_v10  ;;  %v7506_v10 = vor.u32 %v9575_v0, %v7503_v1  ;;  %v7762_v12 = vor.u32 %v9639_v5, %v7759_v6  ;;  %v9571_v13 = vld [vmem:[%s14987_s1 + $0xa44] sm:$0xf]  ;;  %v7487_v14 = vld [vmem:[%s14987_s1 + $0xa50] sm:$0xf0] }
  0xea   :  { %3929 = vmatpush.bf16.msrb.mxu0 %v7554_v16  ;;  %v9603_v15 = vld [vmem:[%s14987_s1 + $0xb44] sm:$0xf]  ;;  %v7890_v16 = vor.u32 %v9671_v7, %v7887_v8  ;;  %v7743_v26 = vld [vmem:[%s14987_s1 + $0xc50] sm:$0xf0]  ;;  %v7490_v45 = vor.u32 %v9571_v13, %v7487_v14 }
  0xeb   :  { %3942 = vmatpush.bf16.msrb.mxu1 %v7682_v17  ;;  %v3703_v17 = vpop.f32.mrf.mxu2  ;;  %v9635_v24 = vld [vmem:[%s14987_s1 + $0xc44] sm:$0xf]  ;;  %v7871_v40 = vld [vmem:[%s14987_s1 + $0xd50] sm:$0xf0] }
  0xec   :  { %3955 = vmatpush.bf16.msrb.mxu2 %v7810_v21  ;;  %v7615_v21 = vld [vmem:[%s14987_s1 + $0xb50] sm:$0xf0]  ;;  %v3704_v27 = vadd.f32 %v3703_v17, %v3691_v3  ;;  %v9667_v37 = vld [vmem:[%s14987_s1 + $0xd44] sm:$0xf]  ;;  %v3679_v43 = vpop.f32.mrf.mxu0 }
  0xed   :  { %3968 = vmatpush.bf16.msrb.mxu3 %v7938_v34  ;;  %v3716_v34 = vpop.f32.mrf.mxu3  ;;  %v3692_v46 = vpop.f32.mrf.mxu1  ;;  %v9567_v50 = vld [vmem:[%s14987_s1 + $0xa24] sm:$0xf]  ;;  %v7471_v51 = vld [vmem:[%s14987_s1 + $0xa30] sm:$0xf0] }
  0xee   :  { %3930 = vmatpush.bf16.msrb.mxu0 %v7538_v47  ;;  %v11643_v47 = vadd.f32 %v3716_v34, %v3704_v27  ;;  %v9599_v52 = vld [vmem:[%s14987_s1 + $0xb24] sm:$0xf]  ;;  %v7599_v54 = vld [vmem:[%s14987_s1 + $0xb30] sm:$0xf0]  ;;  %v7474_v58 = vor.u32 %v9567_v50, %v7471_v51 }
  0xef   :  { %3943 = vmatpush.bf16.msrb.mxu1 %v7666_v48  ;;  %v7618_v48 = vor.u32 %v9603_v15, %v7615_v21  ;;  %v9631_v55 = vld [vmem:[%s14987_s1 + $0xc24] sm:$0xf]  ;;  %v7727_v36 = vld [vmem:[%s14987_s1 + $0xc30] sm:$0xf0]  ;;  %v7602_v61 = vor.u32 %v9599_v52, %v7599_v54 }
  0xf0   :  { %3956 = vmatpush.bf16.msrb.mxu2 %v7794_v49  ;;  %v7746_v49 = vor.u32 %v9635_v24, %v7743_v26  ;;  %v9663_v56 = vld [vmem:[%s14987_s1 + $0xd24] sm:$0xf]  ;;  %v7855_v57 = vld [vmem:[%s14987_s1 + $0xd30] sm:$0xf0] }
  0xf1   :  { %3969 = vmatpush.bf16.msrb.mxu3 %v7922_v53  ;;  %v7874_v53 = vor.u32 %v9667_v37, %v7871_v40  ;;  %v9563_v59 = vld [vmem:[%s14987_s1 + $0xa04] sm:$0xf]  ;;  %v7583_v0 = vld [vmem:[%s14987_s1 + $0xb10] sm:$0xf0]  ;;  %v7858_v2 = vor.u32 %v9663_v56, %v7855_v57 }
  0xf2   :  { %3931 = vmatpush.bf16.msrb.mxu0 %v7522_v60  ;;  %v7455_v60 = vld [vmem:[%s14987_s1 + $0xa10] sm:$0xf0]  ;;  %v9627_v1 = vld [vmem:[%s14987_s1 + $0xc04] sm:$0xf] }
  0xf3   :  { %3944 = vmatpush.bf16.msrb.mxu1 %v7650_v62  ;;  %v7730_v62 = vor.u32 %v9631_v55, %v7727_v36  ;;  %v9659_v3 = vld [vmem:[%s14987_s1 + $0xd04] sm:$0xf]  ;;  %v7839_v4 = vld [vmem:[%s14987_s1 + $0xd10] sm:$0xf0]  ;;  %v3705_v5 = vpop.f32.mrf.mxu2 }
  0xf4   :  { %3957 = vmatpush.bf16.msrb.mxu2 %v7778_v63  ;;  %v9595_v63 = vld [vmem:[%s14987_s1 + $0xb04] sm:$0xf]  ;;  %v8079_v7 = vld [vmem:[%s14987_s1 + $0xef0] sm:$0xf0]  ;;  %v7842_v24 = vor.u32 %v9659_v3, %v7839_v4 }
  0xf5   :  { %3970 = vmatpush.bf16.msrb.mxu3 %v7906_v9  ;;  %v7711_v9 = vld [vmem:[%s14987_s1 + $0xc10] sm:$0xf0]  ;;  %v9719_v6 = vld [vmem:[%s14987_s1 + $0xee4] sm:$0xf]  ;;  %v7586_v15 = vor.u32 %v9595_v63, %v7583_v0 }
  0xf6   :  { %3932 = vmatpush.bf16.msrb.mxu0 %v7506_v10  ;;  %v9751_v8 = vld [vmem:[%s14987_s1 + $0xfe4] sm:$0xf]  ;;  %v3718_v10 = vpop.f32.mrf.mxu3  ;;  %v8335_v14 = vld [vmem:[%s14987_s1 + $0x10f0] sm:$0xf0]  ;;  %v8082_v26 = vor.u32 %v9719_v6, %v8079_v7 }
  0xf7   :  { %3945 = vmatpush.bf16.msrb.mxu1 %v7634_v11  ;;  %v7458_v11 = vor.u32 %v9563_v59, %v7455_v60  ;;  %v9783_v13 = vld [vmem:[%s14987_s1 + $0x10e4] sm:$0xf]  ;;  %v8463_v21 = vld [vmem:[%s14987_s1 + $0x11f0] sm:$0xf0] }
  0xf8   :  { %3958 = vmatpush.bf16.msrb.mxu2 %v7762_v12  ;;  %v8207_v12 = vld [vmem:[%s14987_s1 + $0xff0] sm:$0xf0]  ;;  %v9815_v17 = vld [vmem:[%s14987_s1 + $0x11e4] sm:$0xf]  ;;  %v8338_v34 = vor.u32 %v9783_v13, %v8335_v14 }
  0xf9   :  { %3971 = vmatpush.bf16.msrb.mxu3 %v7890_v16  ;;  %v7714_v16 = vor.u32 %v9627_v1, %v7711_v9  ;;  %v8210_v27 = vor.u32 %v9751_v8, %v8207_v12  ;;  %v9715_v37 = vld [vmem:[%s14987_s1 + $0xec4] sm:$0xf]  ;;  %v8063_v40 = vld [vmem:[%s14987_s1 + $0xed0] sm:$0xf0] }
  0xfa   :  { %3933 = vmatpush.bf16.msrb.mxu0 %v7490_v45  ;;  %v9747_v43 = vld [vmem:[%s14987_s1 + $0xfc4] sm:$0xf]  ;;  %v8466_v45 = vor.u32 %v9815_v17, %v8463_v21  ;;  %v8191_v46 = vld [vmem:[%s14987_s1 + $0xfd0] sm:$0xf0]  ;;  %v8066_v52 = vor.u32 %v9715_v37, %v8063_v40 }
  0xfb   :  { %3946 = vmatpush.bf16.msrb.mxu1 %v7618_v48  ;;  %v9779_v48 = vld [vmem:[%s14987_s1 + $0x10c4] sm:$0xf]  ;;  %v8447_v51 = vld [vmem:[%s14987_s1 + $0x11d0] sm:$0xf0] }
  0xfc   :  { %3959 = vmatpush.bf16.msrb.mxu2 %v7746_v49  ;;  %v8319_v49 = vld [vmem:[%s14987_s1 + $0x10d0] sm:$0xf0]  ;;  %v9811_v50 = vld [vmem:[%s14987_s1 + $0x11c4] sm:$0xf] }
  0xfd   :  { %3972 = vmatpush.bf16.msrb.mxu3 %v7874_v53  ;;  %v8194_v53 = vor.u32 %v9747_v43, %v8191_v46  ;;  %v8322_v54 = vor.u32 %v9779_v48, %v8319_v49  ;;  %v9711_v55 = vld [vmem:[%s14987_s1 + $0xea4] sm:$0xf]  ;;  %v8047_v36 = vld [vmem:[%s14987_s1 + $0xeb0] sm:$0xf0]  ;;  %v8450_v57 = vor.u32 %v9811_v50, %v8447_v51 }
  0xfe   :  { %3934 = vmatpush.bf16.msrb.mxu0 %v7474_v58  ;;  %v9743_v56 = vld [vmem:[%s14987_s1 + $0xfa4] sm:$0xf]  ;;  %v8175_v58 = vld [vmem:[%s14987_s1 + $0xfb0] sm:$0xf0]  ;;  %v8050_v63 = vor.u32 %v9711_v55, %v8047_v36 }
  0xff   :  { %3947 = vmatpush.bf16.msrb.mxu1 %v7602_v61  ;;  %v9775_v59 = vld [vmem:[%s14987_s1 + $0x10a4] sm:$0xf]  ;;  %v8303_v60 = vld [vmem:[%s14987_s1 + $0x10b0] sm:$0xf0]  ;;  %v8178_v0 = vor.u32 %v9743_v56, %v8175_v58 }
 0x100   :  { %3960 = vmatpush.bf16.msrb.mxu2 %v7730_v62  ;;  %v9807_v61 = vld [vmem:[%s14987_s1 + $0x11a4] sm:$0xf]  ;;  %v8431_v62 = vld [vmem:[%s14987_s1 + $0x11b0] sm:$0xf0]  ;;  %v8306_v1 = vor.u32 %v9775_v59, %v8303_v60 }
 0x101   :  { %3973 = vmatpush.bf16.msrb.mxu3 %v7858_v2  ;;  %v9707_v2 = vld [vmem:[%s14987_s1 + $0xe84] sm:$0xf]  ;;  %v8031_v9 = vld [vmem:[%s14987_s1 + $0xe90] sm:$0xf0]  ;;  %v8434_v4 = vor.u32 %v9807_v61, %v8431_v62 }
 0x102   :  { %3935 = vmatpush.bf16.msrb.mxu0 %v7458_v11  ;;  %v9739_v3 = vld [vmem:[%s14987_s1 + $0xf84] sm:$0xf]  ;;  %v8159_v5 = vld [vmem:[%s14987_s1 + $0xf90] sm:$0xf0]  ;;  %v8034_v13 = vor.u32 %v9707_v2, %v8031_v9 }
 0x103   :  { %3948 = vmatpush.bf16.msrb.mxu1 %v7586_v15  ;;  %v9771_v6 = vld [vmem:[%s14987_s1 + $0x1084] sm:$0xf]  ;;  %v8287_v7 = vld [vmem:[%s14987_s1 + $0x1090] sm:$0xf0]  ;;  %v3742_v14 = vpop.f32.mrf.mxu1  ;;  %v8162_v15 = vor.u32 %v9739_v3, %v8159_v5 }
 0x104   :  { %3961 = vmatpush.bf16.msrb.mxu2 %v7714_v16  ;;  %v3729_v8 = vpop.f32.mrf.mxu0  ;;  %v9803_v10 = vld [vmem:[%s14987_s1 + $0x1184] sm:$0xf]  ;;  %v8415_v11 = vld [vmem:[%s14987_s1 + $0x1190] sm:$0xf0]  ;;  %v8290_v16 = vor.u32 %v9771_v6, %v8287_v7 }
 0x105   :  { %3974 = vmatpush.bf16.msrb.mxu3 %v7842_v24  ;;  %3936 = vmatmul.bf16.vlgmr.msrb.gmra.mxu0 %v10717_v29  ;;  %v3730_v12 = vadd.f32 %v3729_v8, %v11643_v47  ;;  %v9703_v17 = vld [vmem:[%s14987_s1 + $0xe64] sm:$0xf]  ;;  %v8015_v21 = vld [vmem:[%s14987_s1 + $0xe70] sm:$0xf0]  ;;  %v8418_v47 = vor.u32 %v9803_v10, %v8415_v11 }
 0x106   :  { %3980 = vmatpush.bf16.msra.mxu0 %v8082_v26  ;;  %3949 = vmatmul.bf16.vlgmr.msrb.gmra.mxu1 %v10727_v33  ;;  %v9735_v24 = vld [vmem:[%s14987_s1 + $0xf64] sm:$0xf]  ;;  %v8271_v37 = vld [vmem:[%s14987_s1 + $0x1070] sm:$0xf0] }
 0x107   :  { %3993 = vmatpush.bf16.msra.mxu1 %v8210_v27  ;;  %3962 = vmatmul.bf16.vlgmr.msrb.gmra.mxu2 %v10916_v23  ;;  %v3743_v26 = vadd.f32 %v3742_v14, %v3730_v12  ;;  %v8143_v27 = vld [vmem:[%s14987_s1 + $0xf70] sm:$0xf0]  ;;  %v9799_v40 = vld [vmem:[%s14987_s1 + $0x1164] sm:$0xf] }
 0x108   :  { %4006 = vmatpush.bf16.msra.mxu2 %v8338_v34  ;;  %3975 = vmatmul.bf16.vlgmr.msrb.gmra.mxu3 %v10929_v31  ;;  %v9767_v34 = vld [vmem:[%s14987_s1 + $0x1064] sm:$0xf]  ;;  %v8399_v43 = vld [vmem:[%s14987_s1 + $0x1170] sm:$0xf0]  ;;  %v8146_v46 = vor.u32 %v9735_v24, %v8143_v27 }
 0x109   :  { %4019 = vmatpush.bf16.msra.mxu3 %v8466_v45  ;;  %v8018_v45 = vor.u32 %v9703_v17, %v8015_v21  ;;  %v8274_v48 = vor.u32 %v9767_v34, %v8271_v37  ;;  %v9699_v49 = vld [vmem:[%s14987_s1 + $0xe44] sm:$0xf]  ;;  %v7999_v50 = vld [vmem:[%s14987_s1 + $0xe50] sm:$0xf0]  ;;  %v6293_v37 = vld [vmem:[%s14987_s1 + $0xe8] sm:$0xf] }
 0x10a   :  { %3981 = vmatpush.bf16.msra.mxu0 %v8066_v52  ;;  %v9731_v51 = vld [vmem:[%s14987_s1 + $0xf44] sm:$0xf]  ;;  %v8402_v52 = vor.u32 %v9799_v40, %v8399_v43  ;;  %v8255_v36 = vld [vmem:[%s14987_s1 + $0x1050] sm:$0xf0]  ;;  %v8002_v61 = vor.u32 %v9699_v49, %v7999_v50  ;;  %v9274_v40 = vld [vmem:[%s14987_s1 + $0xf4] sm:$0xf0] }
 0x10b   :  { %3994 = vmatpush.bf16.msra.mxu1 %v8194_v53  ;;  %v9763_v55 = vld [vmem:[%s14987_s1 + $0x1044] sm:$0xf]  ;;  %v8383_v59 = vld [vmem:[%s14987_s1 + $0x1150] sm:$0xf0]  ;;  %v3744_v62 = vpop.f32.mrf.mxu1  ;;  %v6421_v43 = vld [vmem:[%s14987_s1 + $0x1e8] sm:$0xf] }
 0x10c   :  { %4007 = vmatpush.bf16.msra.mxu2 %v8322_v54  ;;  %v3755_v53 = vpop.f32.mrf.mxu2  ;;  %v8127_v54 = vld [vmem:[%s14987_s1 + $0xf50] sm:$0xf0]  ;;  %v9795_v58 = vld [vmem:[%s14987_s1 + $0x1144] sm:$0xf]  ;;  %v3731_v60 = vpop.f32.mrf.mxu0  ;;  %v6549_v49 = vld [vmem:[%s14987_s1 + $0x2e8] sm:$0xf] }
 0x10d   :  { %4020 = vmatpush.bf16.msra.mxu3 %v8450_v57  ;;  %v3756_v56 = vadd.f32 %v3755_v53, %v3743_v26  ;;  %v3768_v57 = vpop.f32.mrf.mxu3  ;;  %v9695_v2 = vld [vmem:[%s14987_s1 + $0xe24] sm:$0xf]  ;;  %v7983_v9 = vld [vmem:[%s14987_s1 + $0xe30] sm:$0xf0]  ;;  %v9338_v50 = vld [vmem:[%s14987_s1 + $0x2f4] sm:$0xf0] }
 0x10e   :  { %3982 = vmatpush.bf16.msra.mxu0 %v8050_v63  ;;  %v9727_v3 = vld [vmem:[%s14987_s1 + $0xf24] sm:$0xf]  ;;  %v8111_v5 = vld [vmem:[%s14987_s1 + $0xf30] sm:$0xf0]  ;;  %v7986_v11 = vor.u32 %v9695_v2, %v7983_v9  ;;  %v6677_v53 = vld [vmem:[%s14987_s1 + $0x3e8] sm:$0xf] }
 0x10f   :  { %3995 = vmatpush.bf16.msra.mxu1 %v8178_v0  ;;  %v11842_v63 = vadd.f32 %v3768_v57, %v3756_v56  ;;  %v8130_v0 = vor.u32 %v9731_v51, %v8127_v54  ;;  %v9759_v6 = vld [vmem:[%s14987_s1 + $0x1024] sm:$0xf]  ;;  %v8239_v7 = vld [vmem:[%s14987_s1 + $0x1030] sm:$0xf0]  ;;  %v8114_v14 = vor.u32 %v9727_v3, %v8111_v5  ;;  %v9370_v54 = vld [vmem:[%s14987_s1 + $0x3f4] sm:$0xf0]  ;;  %v6550_v57 = vor.u32 %v9338_v50, %v6549_v49 }
 0x110   :  { %4008 = vmatpush.bf16.msra.mxu2 %v8306_v1  ;;  %v8258_v1 = vor.u32 %v9763_v55, %v8255_v36  ;;  %v9791_v8 = vld [vmem:[%s14987_s1 + $0x1124] sm:$0xf]  ;;  %v8367_v10 = vld [vmem:[%s14987_s1 + $0x1130] sm:$0xf0]  ;;  %v6294_v36 = vor.u32 %v9274_v40, %v6293_v37  ;;  %v6405_v60 = vld [vmem:[%s14987_s1 + $0x1c8] sm:$0xf] }
 0x111   :  { %4021 = vmatpush.bf16.msra.mxu3 %v8434_v4  ;;  %v8386_v4 = vor.u32 %v9795_v58, %v8383_v59  ;;  %v9691_v12 = vld [vmem:[%s14987_s1 + $0xe04] sm:$0xf]  ;;  %v8095_v17 = vld [vmem:[%s14987_s1 + $0xf10] sm:$0xf0]  ;;  %v8370_v24 = vor.u32 %v9791_v8, %v8367_v10  ;;  %v6277_v58 = vld [vmem:[%s14987_s1 + $0xc8] sm:$0xf] }
 0x112   :  { %3983 = vmatpush.bf16.msra.mxu0 %v8034_v13  ;;  %v7967_v13 = vld [vmem:[%s14987_s1 + $0xe10] sm:$0xf0]  ;;  %v9755_v21 = vld [vmem:[%s14987_s1 + $0x1004] sm:$0xf]  ;;  %v9270_v59 = vld [vmem:[%s14987_s1 + $0xd4] sm:$0xf0] }
 0x113   :  { %3996 = vmatpush.bf16.msra.mxu1 %v8162_v15  ;;  %v8242_v15 = vor.u32 %v9759_v6, %v8239_v7  ;;  %v9787_v26 = vld [vmem:[%s14987_s1 + $0x1104] sm:$0xf]  ;;  %v8351_v27 = vld [vmem:[%s14987_s1 + $0x1110] sm:$0xf0]  ;;  %v9302_v62 = vld [vmem:[%s14987_s1 + $0x1d4] sm:$0xf0]  ;;  %v6278_v3 = vor.u32 %v9270_v59, %v6277_v58 }
 0x114   :  { %4009 = vmatpush.bf16.msra.mxu2 %v8290_v16  ;;  %v9723_v16 = vld [vmem:[%s14987_s1 + $0xf04] sm:$0xf]  ;;  %v3757_v34 = vpop.f32.mrf.mxu2  ;;  %v8354_v55 = vor.u32 %v9787_v26, %v8351_v27  ;;  %v6661_v2 = vld [vmem:[%s14987_s1 + $0x3c8] sm:$0xf]  ;;  %v9366_v9 = vld [vmem:[%s14987_s1 + $0x3d4] sm:$0xf0] }
 0x115   :  { %4022 = vmatpush.bf16.msra.mxu3 %v8418_v47  ;;  %v8223_v47 = vld [vmem:[%s14987_s1 + $0x1010] sm:$0xf0]  ;;  %v8098_v51 = vor.u32 %v9723_v16, %v8095_v17  ;;  %v6261_v6 = vld [vmem:[%s14987_s1 + $0xa8] sm:$0xf]  ;;  %v9266_v7 = vld [vmem:[%s14987_s1 + $0xb4] sm:$0xf0]  ;;  %v6662_v10 = vor.u32 %v9366_v9, %v6661_v2 }
 0x116   :  { %3984 = vmatpush.bf16.msra.mxu0 %v8018_v45  ;;  %v3770_v45 = vpop.f32.mrf.mxu3  ;;  %v6389_v8 = vld [vmem:[%s14987_s1 + $0x1a8] sm:$0xf]  ;;  %v6262_v16 = vor.u32 %v9266_v7, %v6261_v6  ;;  %v9294_v34 = vld [vmem:[%s14987_s1 + $0x194] sm:$0xf0] }
 0x117   :  { %3997 = vmatpush.bf16.msra.mxu1 %v8146_v46  ;;  %v7970_v46 = vor.u32 %v9691_v12, %v7967_v13  ;;  %v6517_v12 = vld [vmem:[%s14987_s1 + $0x2a8] sm:$0xf]  ;;  %v9330_v13 = vld [vmem:[%s14987_s1 + $0x2b4] sm:$0xf0] }
 0x118   :  { %4010 = vmatpush.bf16.msra.mxu2 %v8274_v48  ;;  %v9306_v48 = vld [vmem:[%s14987_s1 + $0x1f4] sm:$0xf0]  ;;  %v6373_v26 = vld [vmem:[%s14987_s1 + $0x188] sm:$0xf] }
 0x119   :  { %4023 = vmatpush.bf16.msra.mxu3 %v8402_v52  ;;  %v8226_v52 = vor.u32 %v9755_v21, %v8223_v47  ;;  %v6422_v56 = vor.u32 %v9306_v48, %v6421_v43  ;;  %v6518_v21 = vor.u32 %v9330_v13, %v6517_v12  ;;  %v9262_v47 = vld [vmem:[%s14987_s1 + $0x94] sm:$0xf0]  ;;  %v6501_v37 = vld [vmem:[%s14987_s1 + $0x288] sm:$0xf] }
 0x11a   :  { %3985 = vmatpush.bf16.msra.mxu0 %v8002_v61  ;;  %v6678_v61 = vor.u32 %v9370_v54, %v6677_v53  ;;  %v9326_v40 = vld [vmem:[%s14987_s1 + $0x294] sm:$0xf0]  ;;  %v6629_v45 = vld [vmem:[%s14987_s1 + $0x388] sm:$0xf] }
 0x11b   :  { %3998 = vmatpush.bf16.msra.mxu1 %v8130_v0  ;;  %v6533_v0 = vld [vmem:[%s14987_s1 + $0x2c8] sm:$0xf]  ;;  %v9258_v54 = vld [vmem:[%s14987_s1 + $0x74] sm:$0xf0] }
 0x11c   :  { %4011 = vmatpush.bf16.msra.mxu2 %v8258_v1  ;;  %v9334_v1 = vld [vmem:[%s14987_s1 + $0x2d4] sm:$0xf0]  ;;  %v6229_v53 = vld [vmem:[%s14987_s1 + $0x68] sm:$0xf] }
 0x11d   :  { %4024 = vmatpush.bf16.msra.mxu3 %v8386_v4  ;;  %v6406_v4 = vor.u32 %v9302_v62, %v6405_v60  ;;  %v6534_v5 = vor.u32 %v9334_v1, %v6533_v0  ;;  %v9322_v58 = vld [vmem:[%s14987_s1 + $0x274] sm:$0xf0]  ;;  %v6613_v59 = vld [vmem:[%s14987_s1 + $0x368] sm:$0xf]  ;;  %v6230_v0 = vor.u32 %v9258_v54, %v6229_v53 }
 0x11e   :  { %3986 = vmatpush.bf16.msra.mxu0 %v7986_v11  ;;  %v9298_v11 = vld [vmem:[%s14987_s1 + $0x1b4] sm:$0xf0]  ;;  %v6213_v9 = vld [vmem:[%s14987_s1 + $0x48] sm:$0xf] }
 0x11f   :  { %3999 = vmatpush.bf16.msra.mxu1 %v8114_v14  ;;  %v6645_v14 = vld [vmem:[%s14987_s1 + $0x3a8] sm:$0xf]  ;;  %v6390_v17 = vor.u32 %v9298_v11, %v6389_v8  ;;  %v9354_v60 = vld [vmem:[%s14987_s1 + $0x374] sm:$0xf0] }
 0x120   :  { %4012 = vmatpush.bf16.msra.mxu2 %v8242_v15  ;;  %v9362_v15 = vld [vmem:[%s14987_s1 + $0x3b4] sm:$0xf0]  ;;  %v6469_v7 = vld [vmem:[%s14987_s1 + $0x248] sm:$0xf] }
 0x121   :  { %4025 = vmatpush.bf16.msra.mxu3 %v8370_v24  ;;  %v6245_v24 = vld [vmem:[%s14987_s1 + $0x88] sm:$0xf]  ;;  %v6646_v27 = vor.u32 %v9362_v15, %v6645_v14  ;;  %v9286_v6 = vld [vmem:[%s14987_s1 + $0x154] sm:$0xf0] }
 0x122   :  { %3987 = vmatpush.bf16.msra.mxu0 %v7970_v46  ;;  %v3781_v43 = vpop.f32.mrf.mxu0  ;;  %v9358_v46 = vld [vmem:[%s14987_s1 + $0x394] sm:$0xf0]  ;;  %v6246_v49 = vor.u32 %v9262_v47, %v6245_v24  ;;  %v6597_v11 = vld [vmem:[%s14987_s1 + $0x348] sm:$0xf] }
 0x123   :  { %4000 = vmatpush.bf16.msra.mxu1 %v8098_v51  ;;  %v3782_v48 = vadd.f32 %v3781_v43, %v11842_v63  ;;  %v3794_v50 = vpop.f32.mrf.mxu1  ;;  %v6374_v51 = vor.u32 %v9294_v34, %v6373_v26  ;;  %v6630_v63 = vor.u32 %v9358_v46, %v6629_v45  ;;  %v9318_v8 = vld [vmem:[%s14987_s1 + $0x254] sm:$0xf0]  ;;  %v6197_v47 = vld [vmem:[%s14987_s1 + $0x28] sm:$0xf] }
 0x124   :  { %4013 = vmatpush.bf16.msra.mxu2 %v8226_v52  ;;  %v6502_v52 = vor.u32 %v9326_v40, %v6501_v37  ;;  %v9350_v12 = vld [vmem:[%s14987_s1 + $0x354] sm:$0xf0]  ;;  %v6470_v24 = vor.u32 %v9318_v8, %v6469_v7  ;;  %v6453_v43 = vld [vmem:[%s14987_s1 + $0x228] sm:$0xf] }
 0x125   :  { %4026 = vmatpush.bf16.msra.mxu3 %v8354_v55  ;;  %3988 = vmatmul.bf16.vlgmr.msra.gmra.mxu0 %v10927_v28  ;;  %v6357_v55 = vld [vmem:[%s14987_s1 + $0x168] sm:$0xf]  ;;  %v9250_v26 = vld [vmem:[%s14987_s1 + $0x34] sm:$0xf0]  ;;  %v6598_v37 = vor.u32 %v9350_v12, %v6597_v11 }
 0x126   :  { %4032 = vmatpush.bf16.msrb.mxu0 %v6294_v36  ;;  %4001 = vmatmul.bf16.vlgmr.msra.gmra.mxu1 %v10937_v35  ;;  %v12002_v36 = vadd.f32 %v3794_v50, %v3782_v48  ;;  %v9282_v40 = vld [vmem:[%s14987_s1 + $0x134] sm:$0xf0]  ;;  %v6581_v46 = vld [vmem:[%s14987_s1 + $0x328] sm:$0xf] }
 0x127   :  { %4045 = vmatpush.bf16.msrb.mxu1 %v6422_v56  ;;  %4014 = vmatmul.bf16.vlgmr.msra.gmra.mxu2 %v11123_v32  ;;  %v9290_v56 = vld [vmem:[%s14987_s1 + $0x174] sm:$0xf0]  ;;  %v6181_v50 = vld [vmem:[%s14987_s1 + $0x8] sm:$0xf] }
 0x128   :  { %4058 = vmatpush.bf16.msrb.mxu2 %v6550_v57  ;;  %4027 = vmatmul.bf16.vlgmr.msra.gmra.mxu3 %v11134_v39  ;;  %v6485_v57 = vld [vmem:[%s14987_s1 + $0x268] sm:$0xf]  ;;  %v6358_v1 = vor.u32 %v9290_v56, %v6357_v55  ;;  %v9314_v45 = vld [vmem:[%s14987_s1 + $0x234] sm:$0xf0] }
 0x129   :  { %4071 = vmatpush.bf16.msrb.mxu3 %v6678_v61  ;;  %v10012_v61 = vld [vmem:[%s14989_s2] sm:$0xf]  ;;  %v6486_v2 = vor.u32 %v9322_v58, %v6485_v57  ;;  %v9346_v48 = vld [vmem:[%s14987_s1 + $0x334] sm:$0xf0]  ;;  %v6454_v53 = vor.u32 %v9314_v45, %v6453_v43  ;;  %v6309_v54 = vld [vmem:[%s14987_s1 + $0x108] sm:$0xf] }
 0x12a   :  { %4033 = vmatpush.bf16.msrb.mxu0 %v6278_v3  ;;  %v614_v62 = vperm.slane %v10012_v61, 1  ;;  %v9254_v3 = vld [vmem:[%s14987_s1 + $0x54] sm:$0xf0]  ;;  %v3783_v15 = vpop.f32.mrf.mxu0  ;;  %v6582_v56 = vor.u32 %v9346_v48, %v6581_v46  ;;  %v6565_v58 = vld [vmem:[%s14987_s1 + $0x308] sm:$0xf] }
 0x12b   :  { %4046 = vmatpush.bf16.msrb.mxu1 %v6406_v4  ;;  %v6341_v4 = vld [vmem:[%s14987_s1 + $0x148] sm:$0xf]  ;;  %v3820_v14 = vpop.f32.mrf.mxu3  ;;  %v9278_v55 = vld [vmem:[%s14987_s1 + $0x114] sm:$0xf0] }
 0x12c   :  { %4059 = vmatpush.bf16.msrb.mxu2 %v6534_v5  ;;  %v6614_v5 = vor.u32 %v9354_v60, %v6613_v59  ;;  %v9310_v57 = vld [vmem:[%s14987_s1 + $0x214] sm:$0xf0]  ;;  %v6805_v61 = vld [vmem:[%s14987_s1 + $0x4e8] sm:$0xf] }
 0x12d   :  { %4072 = vmatpush.bf16.msrb.mxu3 %v6662_v10  ;;  %v3807_v10 = vpop.f32.mrf.mxu2  ;;  %v9342_v59 = vld [vmem:[%s14987_s1 + $0x314] sm:$0xf0]  ;;  %v7189_v7 = vld [vmem:[%s14987_s1 + $0x7e8] sm:$0xf] }
 0x12e   :  { %4034 = vmatpush.bf16.msrb.mxu0 %v6262_v16  ;;  %v3808_v13 = vadd.f32 %v3807_v10, %v614_v62  ;;  %v6214_v16 = vor.u32 %v9254_v3, %v6213_v9  ;;  %v9402_v62 = vld [vmem:[%s14987_s1 + $0x4f4] sm:$0xf0]  ;;  %v7061_v3 = vld [vmem:[%s14987_s1 + $0x6e8] sm:$0xf]  ;;  %v6566_v10 = vor.u32 %v9342_v59, %v6565_v58 }
 0x12f   :  { %4047 = vmatpush.bf16.msrb.mxu1 %v6390_v17  ;;  %v3796_v17 = vpop.f32.mrf.mxu1  ;;  %v9434_v9 = vld [vmem:[%s14987_s1 + $0x5f4] sm:$0xf0]  ;;  %v6806_v11 = vor.u32 %v9402_v62, %v6805_v61  ;;  %v6773_v45 = vld [vmem:[%s14987_s1 + $0x4a8] sm:$0xf] }
 0x130   :  { %4060 = vmatpush.bf16.msrb.mxu2 %v6518_v21  ;;  %v6342_v21 = vor.u32 %v9286_v6, %v6341_v4  ;;  %v12055_v34 = vadd.f32 %v3820_v14, %v3808_v13  ;;  %v9466_v4 = vld [vmem:[%s14987_s1 + $0x6f4] sm:$0xf0]  ;;  %v6789_v14 = vld [vmem:[%s14987_s1 + $0x4c8] sm:$0xf] }
 0x131   :  { %4073 = vmatpush.bf16.msrb.mxu3 %v6646_v27  ;;  %v6325_v27 = vld [vmem:[%s14987_s1 + $0x128] sm:$0xf]  ;;  %v9498_v8 = vld [vmem:[%s14987_s1 + $0x7f4] sm:$0xf0]  ;;  %v7062_v13 = vor.u32 %v9466_v4, %v7061_v3 }
 0x132   :  { %4035 = vmatpush.bf16.msrb.mxu0 %v6246_v49  ;;  %v6198_v49 = vor.u32 %v9250_v26, %v6197_v47  ;;  %v9398_v15 = vld [vmem:[%s14987_s1 + $0x4d4] sm:$0xf0]  ;;  %v7190_v17 = vor.u32 %v9498_v8, %v7189_v7  ;;  %v7173_v26 = vld [vmem:[%s14987_s1 + $0x7c8] sm:$0xf] }
 0x133   :  { %4048 = vmatpush.bf16.msrb.mxu1 %v6374_v51  ;;  %v9246_v51 = vld [vmem:[%s14987_s1 + $0x14] sm:$0xf0]  ;;  %v6901_v48 = vld [vmem:[%s14987_s1 + $0x5a8] sm:$0xf] }
 0x134   :  { %4061 = vmatpush.bf16.msrb.mxu2 %v6502_v52  ;;  %v6326_v52 = vor.u32 %v9282_v40, %v6325_v27  ;;  %v9462_v47 = vld [vmem:[%s14987_s1 + $0x6d4] sm:$0xf0]  ;;  %v6885_v59 = vld [vmem:[%s14987_s1 + $0x588] sm:$0xf] }
 0x135   :  { %4074 = vmatpush.bf16.msrb.mxu3 %v6630_v63  ;;  %v6437_v63 = vld [vmem:[%s14987_s1 + $0x208] sm:$0xf]  ;;  %v3809_v60 = vpop.f32.mrf.mxu2  ;;  %v9494_v27 = vld [vmem:[%s14987_s1 + $0x7d4] sm:$0xf0] }
 0x136   :  { %4036 = vmatpush.bf16.msrb.mxu0 %v6230_v0  ;;  %v6933_v0 = vld [vmem:[%s14987_s1 + $0x5e8] sm:$0xf]  ;;  %v6438_v6 = vor.u32 %v9310_v57, %v6437_v63  ;;  %v9394_v46 = vld [vmem:[%s14987_s1 + $0x4b4] sm:$0xf0] }
 0x137   :  { %4049 = vmatpush.bf16.msrb.mxu1 %v6358_v1  ;;  %v3822_v1 = vpop.f32.mrf.mxu3  ;;  %v6934_v12 = vor.u32 %v9434_v9, %v6933_v0  ;;  %v6757_v57 = vld [vmem:[%s14987_s1 + $0x488] sm:$0xf]  ;;  %v9390_v58 = vld [vmem:[%s14987_s1 + $0x494] sm:$0xf0] }
 0x138   :  { %4062 = vmatpush.bf16.msrb.mxu2 %v6486_v2  ;;  %v6182_v2 = vor.u32 %v9246_v51, %v6181_v50  ;;  %v9426_v50 = vld [vmem:[%s14987_s1 + $0x5b4] sm:$0xf0]  ;;  %v7029_v51 = vld [vmem:[%s14987_s1 + $0x6a8] sm:$0xf]  ;;  %v6758_v9 = vor.u32 %v9390_v58, %v6757_v57 }
 0x139   :  { %4075 = vmatpush.bf16.msrb.mxu3 %v6614_v5  ;;  %v6310_v5 = vor.u32 %v9278_v55, %v6309_v54  ;;  %v9490_v54 = vld [vmem:[%s14987_s1 + $0x7b4] sm:$0xf0]  ;;  %v6774_v55 = vor.u32 %v9394_v46, %v6773_v45  ;;  %v6902_v63 = vor.u32 %v9426_v50, %v6901_v48  ;;  %v7013_v62 = vld [vmem:[%s14987_s1 + $0x688] sm:$0xf] }
 0x13a   :  { %4037 = vmatpush.bf16.msrb.mxu0 %v6214_v16  ;;  %v6917_v16 = vld [vmem:[%s14987_s1 + $0x5c8] sm:$0xf]  ;;  %v9422_v61 = vld [vmem:[%s14987_s1 + $0x594] sm:$0xf0] }
 0x13b   :  { %4050 = vmatpush.bf16.msrb.mxu1 %v6342_v21  ;;  %v9430_v21 = vld [vmem:[%s14987_s1 + $0x5d4] sm:$0xf0]  ;;  %v7141_v1 = vld [vmem:[%s14987_s1 + $0x788] sm:$0xf]  ;;  %v6886_v4 = vor.u32 %v9422_v61, %v6885_v59 }
 0x13c   :  { %4063 = vmatpush.bf16.msrb.mxu2 %v6470_v24  ;;  %v7045_v24 = vld [vmem:[%s14987_s1 + $0x6c8] sm:$0xf]  ;;  %v6918_v40 = vor.u32 %v9430_v21, %v6917_v16  ;;  %v9454_v0 = vld [vmem:[%s14987_s1 + $0x694] sm:$0xf0] }
 0x13d   :  { %4076 = vmatpush.bf16.msrb.mxu3 %v6598_v37  ;;  %v6790_v37 = vor.u32 %v9398_v15, %v6789_v14  ;;  %v7046_v43 = vor.u32 %v9462_v47, %v7045_v24  ;;  %v9386_v7 = vld [vmem:[%s14987_s1 + $0x474] sm:$0xf0]  ;;  %v6869_v8 = vld [vmem:[%s14987_s1 + $0x568] sm:$0xf] }
 0x13e   :  { %4038 = vmatpush.bf16.msrb.mxu0 %v6198_v49  ;;  %v7174_v49 = vor.u32 %v9494_v27, %v7173_v26  ;;  %v6997_v14 = vld [vmem:[%s14987_s1 + $0x668] sm:$0xf]  ;;  %v9450_v15 = vld [vmem:[%s14987_s1 + $0x674] sm:$0xf0] }
 0x13f   :  { %4051 = vmatpush.bf16.msrb.mxu1 %v6326_v52  ;;  %v9458_v52 = vld [vmem:[%s14987_s1 + $0x6b4] sm:$0xf0]  ;;  %v7125_v16 = vld [vmem:[%s14987_s1 + $0x768] sm:$0xf]  ;;  %v6998_v47 = vor.u32 %v9450_v15, %v6997_v14 }
 0x140   :  { %4064 = vmatpush.bf16.msrb.mxu2 %v6454_v53  ;;  %v7157_v53 = vld [vmem:[%s14987_s1 + $0x7a8] sm:$0xf]  ;;  %v9382_v27 = vld [vmem:[%s14987_s1 + $0x454] sm:$0xf0] }
 0x141   :  { %4077 = vmatpush.bf16.msrb.mxu3 %v6582_v56  ;;  %v7030_v56 = vor.u32 %v9458_v52, %v7029_v51  ;;  %v7158_v60 = vor.u32 %v9490_v54, %v7157_v53  ;;  %v6725_v26 = vld [vmem:[%s14987_s1 + $0x448] sm:$0xf]  ;;  %v9414_v45 = vld [vmem:[%s14987_s1 + $0x554] sm:$0xf0] }
 0x142   :  { %4039 = vmatpush.bf16.msrb.mxu0 %v6182_v2  ;;  %v9486_v2 = vld [vmem:[%s14987_s1 + $0x794] sm:$0xf0]  ;;  %v3833_v3 = vpop.f32.mrf.mxu0  ;;  %v6981_v46 = vld [vmem:[%s14987_s1 + $0x648] sm:$0xf]  ;;  %v6726_v53 = vor.u32 %v9382_v27, %v6725_v26 }
 0x143   :  { %4052 = vmatpush.bf16.msrb.mxu1 %v6310_v5  ;;  %v7014_v5 = vor.u32 %v9454_v0, %v7013_v62  ;;  %v9446_v48 = vld [vmem:[%s14987_s1 + $0x654] sm:$0xf0]  ;;  %v7109_v51 = vld [vmem:[%s14987_s1 + $0x748] sm:$0xf] }
 0x144   :  { %4065 = vmatpush.bf16.msrb.mxu2 %v6438_v6  ;;  %v6741_v6 = vld [vmem:[%s14987_s1 + $0x468] sm:$0xf]  ;;  %v9478_v52 = vld [vmem:[%s14987_s1 + $0x754] sm:$0xf0] }
 0x145   :  { %4078 = vmatpush.bf16.msrb.mxu3 %v6566_v10  ;;  %4040 = vmatmul.bf16.vlgmr.msrb.gmra.mxu0 %v10351_v19  ;;  %v3834_v10 = vadd.f32 %v3833_v3, %v12055_v34  ;;  %v9482_v34 = vld [vmem:[%s14987_s1 + $0x774] sm:$0xf0]  ;;  %v6742_v21 = vor.u32 %v9386_v7, %v6741_v6  ;;  %v6709_v57 = vld [vmem:[%s14987_s1 + $0x428] sm:$0xf]  ;;  %v7110_v61 = vor.u32 %v9478_v52, %v7109_v51 }
 0x146   :  { %4084 = vmatpush.bf16.msra.mxu0 %v6806_v11  ;;  %4053 = vmatmul.bf16.vlgmr.msrb.gmra.mxu1 %v10355_v22  ;;  %v3846_v11 = vpop.f32.mrf.mxu1  ;;  %v9378_v58 = vld [vmem:[%s14987_s1 + $0x434] sm:$0xf0]  ;;  %v6837_v59 = vld [vmem:[%s14987_s1 + $0x528] sm:$0xf] }
 0x147   :  { %4097 = vmatpush.bf16.msra.mxu1 %v6934_v12  ;;  %4066 = vmatmul.bf16.vlgmr.msrb.gmra.mxu2 %v10349_v18  ;;  %v7142_v12 = vor.u32 %v9486_v2, %v7141_v1  ;;  %v9410_v62 = vld [vmem:[%s14987_s1 + $0x534] sm:$0xf0]  ;;  %v6965_v0 = vld [vmem:[%s14987_s1 + $0x628] sm:$0xf]  ;;  %v6710_v3 = vor.u32 %v9378_v58, %v6709_v57 }
 0x148   :  { %4110 = vmatpush.bf16.msra.mxu2 %v7062_v13  ;;  %4079 = vmatmul.bf16.vlgmr.msrb.gmra.mxu3 %v10353_v20  ;;  %v9418_v13 = vld [vmem:[%s14987_s1 + $0x574] sm:$0xf0]  ;;  %v7093_v2 = vld [vmem:[%s14987_s1 + $0x728] sm:$0xf]  ;;  %v6838_v6 = vor.u32 %v9410_v62, %v6837_v59 }
 0x149   :  { %4123 = vmatpush.bf16.msra.mxu3 %v7190_v17  ;;  %v3847_v17 = vadd.f32 %v3846_v11, %v3834_v10  ;;  %v6870_v24 = vor.u32 %v9418_v13, %v6869_v8  ;;  %v9442_v1 = vld [vmem:[%s14987_s1 + $0x634] sm:$0xf0]  ;;  %v6821_v8 = vld [vmem:[%s14987_s1 + $0x508] sm:$0xf] }
 0x14a   :  { %4085 = vmatpush.bf16.msra.mxu0 %v6790_v37  ;;  %v6853_v37 = vld [vmem:[%s14987_s1 + $0x548] sm:$0xf]  ;;  %v6966_v7 = vor.u32 %v9442_v1, %v6965_v0  ;;  %v9406_v10 = vld [vmem:[%s14987_s1 + $0x514] sm:$0xf0] }
 0x14b   :  { %4098 = vmatpush.bf16.msra.mxu1 %v6918_v40  ;;  %v3859_v40 = vpop.f32.mrf.mxu2  ;;  %v3872_v50 = vpop.f32.mrf.mxu3  ;;  %v6949_v11 = vld [vmem:[%s14987_s1 + $0x608] sm:$0xf]  ;;  %v9438_v14 = vld [vmem:[%s14987_s1 + $0x614] sm:$0xf0] }
 0x14c   :  { %4111 = vmatpush.bf16.msra.mxu2 %v7046_v43  ;;  %v7126_v43 = vor.u32 %v9482_v34, %v7125_v16  ;;  %v7077_v15 = vld [vmem:[%s14987_s1 + $0x708] sm:$0xf]  ;;  %v9470_v16 = vld [vmem:[%s14987_s1 + $0x714] sm:$0xf0] }
 0x14d   :  { %4124 = vmatpush.bf16.msra.mxu3 %v7174_v49  ;;  %v3860_v49 = vadd.f32 %v3859_v40, %v3847_v17  ;;  %v7317_v17 = vld [vmem:[%s14987_s1 + $0x8e8] sm:$0xf]  ;;  %v9562_v26 = vld [vmem:[%s14987_s1 + $0x9f4] sm:$0xf0]  ;;  %v6822_v40 = vor.u32 %v9406_v10, %v6821_v8 }
 0x14e   :  { %4086 = vmatpush.bf16.msra.mxu0 %v6774_v55  ;;  %v3835_v55 = vpop.f32.mrf.mxu0  ;;  %v7573_v27 = vld [vmem:[%s14987_s1 + $0xae8] sm:$0xf]  ;;  %v9590_v58 = vld [vmem:[%s14987_s1 + $0xad4] sm:$0xf0] }
 0x14f   :  { %4099 = vmatpush.bf16.msra.mxu1 %v6902_v63  ;;  %v12245_v54 = vadd.f32 %v3872_v50, %v3860_v49  ;;  %v6854_v63 = vor.u32 %v9414_v45, %v6853_v37  ;;  %v9594_v37 = vld [vmem:[%s14987_s1 + $0xaf4] sm:$0xf0]  ;;  %v7701_v45 = vld [vmem:[%s14987_s1 + $0xbe8] sm:$0xf] }
 0x150   :  { %4112 = vmatpush.bf16.msra.mxu2 %v7030_v56  ;;  %v6982_v56 = vor.u32 %v9446_v48, %v6981_v46  ;;  %v9626_v46 = vld [vmem:[%s14987_s1 + $0xbf4] sm:$0xf0]  ;;  %v7078_v48 = vor.u32 %v9470_v16, %v7077_v15  ;;  %v7574_v51 = vor.u32 %v9594_v37, %v7573_v27  ;;  %v7301_v52 = vld [vmem:[%s14987_s1 + $0x8c8] sm:$0xf] }
 0x151   :  { %4125 = vmatpush.bf16.msra.mxu3 %v7158_v60  ;;  %v3848_v60 = vpop.f32.mrf.mxu1  ;;  %v7429_v55 = vld [vmem:[%s14987_s1 + $0x9c8] sm:$0xf]  ;;  %v9618_v8 = vld [vmem:[%s14987_s1 + $0xbb4] sm:$0xf0] }
 0x152   :  { %4087 = vmatpush.bf16.msra.mxu0 %v6758_v9  ;;  %v9474_v9 = vld [vmem:[%s14987_s1 + $0x734] sm:$0xf0]  ;;  %v7557_v57 = vld [vmem:[%s14987_s1 + $0xac8] sm:$0xf] }
 0x153   :  { %4100 = vmatpush.bf16.msra.mxu1 %v6886_v4  ;;  %v6693_v4 = vld [vmem:[%s14987_s1 + $0x408] sm:$0xf]  ;;  %v7094_v13 = vor.u32 %v9474_v9, %v7093_v2  ;;  %v3874_v34 = vpop.f32.mrf.mxu3  ;;  %v9622_v60 = vld [vmem:[%s14987_s1 + $0xbd4] sm:$0xf0]  ;;  %v7558_v0 = vor.u32 %v9590_v58, %v7557_v57 }
 0x154   :  { %4113 = vmatpush.bf16.msra.mxu2 %v7014_v5  ;;  %v9374_v5 = vld [vmem:[%s14987_s1 + $0x414] sm:$0xf0]  ;;  %v7685_v59 = vld [vmem:[%s14987_s1 + $0xbc8] sm:$0xf] }
 0x155   :  { %4126 = vmatpush.bf16.msra.mxu3 %v7142_v12  ;;  %v3861_v12 = vpop.f32.mrf.mxu2  ;;  %v7285_v1 = vld [vmem:[%s14987_s1 + $0x8a8] sm:$0xf]  ;;  %v9522_v2 = vld [vmem:[%s14987_s1 + $0x8b4] sm:$0xf0] }
 0x156   :  { %4088 = vmatpush.bf16.msra.mxu0 %v6742_v21  ;;  %v9530_v21 = vld [vmem:[%s14987_s1 + $0x8f4] sm:$0xf0]  ;;  %v7413_v9 = vld [vmem:[%s14987_s1 + $0x9a8] sm:$0xf]  ;;  %v7286_v10 = vor.u32 %v9522_v2, %v7285_v1 }
 0x157   :  { %4101 = vmatpush.bf16.msra.mxu1 %v6870_v24  ;;  %v7445_v24 = vld [vmem:[%s14987_s1 + $0x9e8] sm:$0xf]  ;;  %v7318_v49 = vor.u32 %v9530_v21, %v7317_v17  ;;  %v9550_v34 = vld [vmem:[%s14987_s1 + $0x994] sm:$0xf0] }
 0x158   :  { %4114 = vmatpush.bf16.msra.mxu2 %v6998_v47  ;;  %v6694_v47 = vor.u32 %v9374_v5, %v6693_v4  ;;  %v7446_v50 = vor.u32 %v9562_v26, %v7445_v24  ;;  %v9554_v4 = vld [vmem:[%s14987_s1 + $0x9b4] sm:$0xf0]  ;;  %v7541_v5 = vld [vmem:[%s14987_s1 + $0xaa8] sm:$0xf] }
 0x159   :  { %4127 = vmatpush.bf16.msra.mxu3 %v7126_v43  ;;  %v6950_v43 = vor.u32 %v9438_v14, %v6949_v11  ;;  %v7414_v11 = vor.u32 %v9554_v4, %v7413_v9  ;;  %v9518_v14 = vld [vmem:[%s14987_s1 + $0x894] sm:$0xf0]  ;;  %v7397_v15 = vld [vmem:[%s14987_s1 + $0x988] sm:$0xf] }
 0x15a   :  { %4089 = vmatpush.bf16.msra.mxu0 %v6726_v53  ;;  %v9526_v53 = vld [vmem:[%s14987_s1 + $0x8d4] sm:$0xf0]  ;;  %v7525_v17 = vld [vmem:[%s14987_s1 + $0xa88] sm:$0xf] }
 0x15b   :  { %4102 = vmatpush.bf16.msra.mxu1 %v6854_v63  ;;  %v7702_v63 = vor.u32 %v9626_v46, %v7701_v45  ;;  %v9582_v21 = vld [vmem:[%s14987_s1 + $0xa94] sm:$0xf0]  ;;  %v7253_v46 = vld [vmem:[%s14987_s1 + $0x868] sm:$0xf] }
 0x15c   :  { %4115 = vmatpush.bf16.msra.mxu2 %v6982_v56  ;;  %v9558_v56 = vld [vmem:[%s14987_s1 + $0x9d4] sm:$0xf0]  ;;  %v7526_v45 = vor.u32 %v9582_v21, %v7525_v17  ;;  %v7493_v2 = vld [vmem:[%s14987_s1 + $0xa48] sm:$0xf] }
 0x15d   :  { %4128 = vmatpush.bf16.msra.mxu3 %v7110_v61  ;;  %v7302_v61 = vor.u32 %v9526_v53, %v7301_v52  ;;  %v7430_v62 = vor.u32 %v9558_v56, %v7429_v55  ;;  %v9614_v26 = vld [vmem:[%s14987_s1 + $0xb94] sm:$0xf0]  ;;  %v7509_v52 = vld [vmem:[%s14987_s1 + $0xa68] sm:$0xf] }
 0x15e   :  { %4090 = vmatpush.bf16.msra.mxu0 %v6710_v3  ;;  %v7686_v3 = vor.u32 %v9622_v60, %v7685_v59  ;;  %v9578_v53 = vld [vmem:[%s14987_s1 + $0xa74] sm:$0xf0]  ;;  %v7637_v55 = vld [vmem:[%s14987_s1 + $0xb68] sm:$0xf] }
 0x15f   :  { %4103 = vmatpush.bf16.msra.mxu1 %v6838_v6  ;;  %v9586_v6 = vld [vmem:[%s14987_s1 + $0xab4] sm:$0xf0]  ;;  %v7510_v58 = vor.u32 %v9578_v53, %v7509_v52  ;;  %v7237_v59 = vld [vmem:[%s14987_s1 + $0x848] sm:$0xf] }
 0x160   :  { %4116 = vmatpush.bf16.msra.mxu2 %v6966_v7  ;;  %v7669_v7 = vld [vmem:[%s14987_s1 + $0xba8] sm:$0xf]  ;;  %v7542_v12 = vor.u32 %v9586_v6, %v7541_v5  ;;  %v9510_v60 = vld [vmem:[%s14987_s1 + $0x854] sm:$0xf0] }
 0x161   :  { %4129 = vmatpush.bf16.msra.mxu3 %v7094_v13  ;;  %v7269_v13 = vld [vmem:[%s14987_s1 + $0x888] sm:$0xf]  ;;  %v7670_v16 = vor.u32 %v9618_v8, %v7669_v7  ;;  %v9542_v1 = vld [vmem:[%s14987_s1 + $0x954] sm:$0xf0]  ;;  %v7238_v8 = vor.u32 %v9510_v60, %v7237_v59 }
 0x162   :  { %4091 = vmatpush.bf16.msra.mxu0 %v6694_v47  ;;  %v3885_v24 = vpop.f32.mrf.mxu0  ;;  %v7653_v47 = vld [vmem:[%s14987_s1 + $0xb88] sm:$0xf]  ;;  %v7270_v37 = vor.u32 %v9518_v14, %v7269_v13  ;;  %v9574_v9 = vld [vmem:[%s14987_s1 + $0xa54] sm:$0xf0] }
 0x163   :  { %4104 = vmatpush.bf16.msra.mxu1 %v6822_v40  ;;  %v3886_v27 = vadd.f32 %v3885_v24, %v12245_v54  ;;  %v3898_v40 = vpop.f32.mrf.mxu1  ;;  %v7654_v54 = vor.u32 %v9614_v26, %v7653_v47  ;;  %v7621_v5 = vld [vmem:[%s14987_s1 + $0xb48] sm:$0xf]  ;;  %v9606_v6 = vld [vmem:[%s14987_s1 + $0xb54] sm:$0xf0]  ;;  %v7494_v13 = vor.u32 %v9574_v9, %v7493_v2 }
 0x164   :  { %4117 = vmatpush.bf16.msra.mxu2 %v6950_v43  ;;  %v7398_v43 = vor.u32 %v9550_v34, %v7397_v15  ;;  %v7221_v14 = vld [vmem:[%s14987_s1 + $0x828] sm:$0xf]  ;;  %v9506_v15 = vld [vmem:[%s14987_s1 + $0x834] sm:$0xf0]  ;;  %v7622_v34 = vor.u32 %v9606_v6, %v7621_v5 }
 0x165   :  { %4130 = vmatpush.bf16.msra.mxu3 %v7078_v48  ;;  %4092 = vmatmul.bf16.vlgmr.msra.gmra.mxu0 %v10513_v41  ;;  %v9514_v48 = vld [vmem:[%s14987_s1 + $0x874] sm:$0xf0]  ;;  %v7477_v21 = vld [vmem:[%s14987_s1 + $0xa28] sm:$0xf] }
 0x166   :  { %4136 = vmatpush.bf16.msrb.mxu0 %v7318_v49  ;;  %4105 = vmatmul.bf16.vlgmr.msra.gmra.mxu1 %v10517_v44  ;;  %v7381_v49 = vld [vmem:[%s14987_s1 + $0x968] sm:$0xf]  ;;  %v7254_v56 = vor.u32 %v9514_v48, %v7253_v46  ;;  %v9538_v17 = vld [vmem:[%s14987_s1 + $0x934] sm:$0xf0] }
 0x167   :  { %4149 = vmatpush.bf16.msrb.mxu1 %v7446_v50  ;;  %4118 = vmatmul.bf16.vlgmr.msra.gmra.mxu2 %v10505_v38  ;;  %v3899_v50 = vadd.f32 %v3898_v40, %v3886_v27  ;;  %v9570_v24 = vld [vmem:[%s14987_s1 + $0xa34] sm:$0xf0]  ;;  %v7605_v47 = vld [vmem:[%s14987_s1 + $0xb28] sm:$0xf]  ;;  %v7222_v27 = vor.u32 %v9506_v15, %v7221_v14 }
 0x168   :  { %4162 = vmatpush.bf16.msrb.mxu2 %v7574_v51  ;;  %4131 = vmatmul.bf16.vlgmr.msra.gmra.mxu3 %v10515_v42  ;;  %v9546_v51 = vld [vmem:[%s14987_s1 + $0x974] sm:$0xf0]  ;;  %v7333_v46 = vld [vmem:[%s14987_s1 + $0x908] sm:$0xf] }
 0x169   :  { %4175 = vmatpush.bf16.msrb.mxu3 %v7702_v63  ;;  %v9610_v63 = vld [vmem:[%s14987_s1 + $0xb74] sm:$0xf0]  ;;  %v7382_v57 = vor.u32 %v9546_v51, %v7381_v49  ;;  %v7461_v49 = vld [vmem:[%s14987_s1 + $0xa08] sm:$0xf] }
 0x16a   :  { %4137 = vmatpush.bf16.msrb.mxu0 %v7302_v61  ;;  %v7365_v61 = vld [vmem:[%s14987_s1 + $0x948] sm:$0xf]  ;;  %v3887_v7 = vpop.f32.mrf.mxu0  ;;  %v9602_v26 = vld [vmem:[%s14987_s1 + $0xb34] sm:$0xf0] }
 0x16b   :  { %4150 = vmatpush.bf16.msrb.mxu1 %v7430_v62  ;;  %v7638_v62 = vor.u32 %v9610_v63, %v7637_v55  ;;  %v3924_v4 = vpop.f32.mrf.mxu3  ;;  %v9502_v40 = vld [vmem:[%s14987_s1 + $0x814] sm:$0xf0]  ;;  %v7589_v51 = vld [vmem:[%s14987_s1 + $0xb08] sm:$0xf] }
 0x16c   :  { %4163 = vmatpush.bf16.msrb.mxu2 %v7558_v0  ;;  %v3911_v0 = vpop.f32.mrf.mxu2  ;;  %v9534_v48 = vld [vmem:[%s14987_s1 + $0x914] sm:$0xf0]  ;;  %v7829_v55 = vld [vmem:[%s14987_s1 + $0xce8] sm:$0xf] }
 0x16d   :  { %4176 = vmatpush.bf16.msrb.mxu3 %v7686_v3  ;;  %v3912_v3 = vadd.f32 %v3911_v0, %v3899_v50  ;;  %v9566_v50 = vld [vmem:[%s14987_s1 + $0xa14] sm:$0xf0]  ;;  %v8085_v60 = vld [vmem:[%s14987_s1 + $0xee8] sm:$0xf] }
 0x16e   :  { %4138 = vmatpush.bf16.msrb.mxu0 %v7286_v10  ;;  %v3900_v10 = vpop.f32.mrf.mxu1  ;;  %v9598_v52 = vld [vmem:[%s14987_s1 + $0xb14] sm:$0xf0]  ;;  %v7462_v0 = vor.u32 %v9566_v50, %v7461_v49  ;;  %v7813_v6 = vld [vmem:[%s14987_s1 + $0xcc8] sm:$0xf] }
 0x16f   :  { %4151 = vmatpush.bf16.msrb.mxu1 %v7414_v11  ;;  %v12444_v11 = vadd.f32 %v3924_v4, %v3912_v3  ;;  %v9658_v63 = vld [vmem:[%s14987_s1 + $0xcf4] sm:$0xf0]  ;;  %v7590_v9 = vor.u32 %v9598_v52, %v7589_v51  ;;  %v8197_v15 = vld [vmem:[%s14987_s1 + $0xfc8] sm:$0xf] }
 0x170   :  { %4164 = vmatpush.bf16.msrb.mxu2 %v7542_v12  ;;  %v7366_v12 = vor.u32 %v9542_v1, %v7365_v61  ;;  %v9690_v59 = vld [vmem:[%s14987_s1 + $0xdf4] sm:$0xf0]  ;;  %v8213_v1 = vld [vmem:[%s14987_s1 + $0xfe8] sm:$0xf]  ;;  %v7830_v3 = vor.u32 %v9658_v63, %v7829_v55 }
 0x171   :  { %4177 = vmatpush.bf16.msrb.mxu3 %v7670_v16  ;;  %v7349_v16 = vld [vmem:[%s14987_s1 + $0x928] sm:$0xf]  ;;  %v9722_v61 = vld [vmem:[%s14987_s1 + $0xef4] sm:$0xf0] }
 0x172   :  { %4139 = vmatpush.bf16.msrb.mxu0 %v7270_v37  ;;  %v7205_v37 = vld [vmem:[%s14987_s1 + $0x808] sm:$0xf]  ;;  %v9754_v2 = vld [vmem:[%s14987_s1 + $0xff4] sm:$0xf0]  ;;  %v8086_v5 = vor.u32 %v9722_v61, %v8085_v60 }
 0x173   :  { %4152 = vmatpush.bf16.msrb.mxu1 %v7398_v43  ;;  %v7350_v43 = vor.u32 %v9538_v17, %v7349_v16  ;;  %v9654_v7 = vld [vmem:[%s14987_s1 + $0xcd4] sm:$0xf0]  ;;  %v8214_v10 = vor.u32 %v9754_v2, %v8213_v1  ;;  %v7781_v50 = vld [vmem:[%s14987_s1 + $0xc88] sm:$0xf] }
 0x174   :  { %4165 = vmatpush.bf16.msrb.mxu2 %v7526_v45  ;;  %v7478_v45 = vor.u32 %v9570_v24, %v7477_v21  ;;  %v3913_v53 = vpop.f32.mrf.mxu2  ;;  %v9718_v14 = vld [vmem:[%s14987_s1 + $0xed4] sm:$0xf0]  ;;  %v7797_v24 = vld [vmem:[%s14987_s1 + $0xca8] sm:$0xf] }
 0x175   :  { %4178 = vmatpush.bf16.msrb.mxu3 %v7654_v54  ;;  %v7606_v54 = vor.u32 %v9602_v26, %v7605_v47  ;;  %v9750_v16 = vld [vmem:[%s14987_s1 + $0xfd4] sm:$0xf0]  ;;  %v7925_v26 = vld [vmem:[%s14987_s1 + $0xda8] sm:$0xf] }
 0x176   :  { %4140 = vmatpush.bf16.msrb.mxu0 %v7254_v56  ;;  %v7957_v56 = vld [vmem:[%s14987_s1 + $0xde8] sm:$0xf]  ;;  %v9650_v47 = vld [vmem:[%s14987_s1 + $0xcb4] sm:$0xf0] }
 0x177   :  { %4153 = vmatpush.bf16.msrb.mxu1 %v7382_v57  ;;  %v3926_v57 = vpop.f32.mrf.mxu3  ;;  %v7958_v4 = vor.u32 %v9690_v59, %v7957_v56  ;;  %v9646_v51 = vld [vmem:[%s14987_s1 + $0xc94] sm:$0xf0]  ;;  %v7909_v52 = vld [vmem:[%s14987_s1 + $0xd88] sm:$0xf] }
 0x178   :  { %4166 = vmatpush.bf16.msrb.mxu2 %v7510_v58  ;;  %v7206_v58 = vor.u32 %v9502_v40, %v7205_v37  ;;  %v9682_v37 = vld [vmem:[%s14987_s1 + $0xdb4] sm:$0xf0]  ;;  %v8053_v40 = vld [vmem:[%s14987_s1 + $0xea8] sm:$0xf]  ;;  %v7782_v61 = vor.u32 %v9646_v51, %v7781_v50 }
 0x179   :  { %4179 = vmatpush.bf16.msrb.mxu3 %v7638_v62  ;;  %v7334_v62 = vor.u32 %v9534_v48, %v7333_v46  ;;  %v9746_v46 = vld [vmem:[%s14987_s1 + $0xfb4] sm:$0xf0]  ;;  %v7798_v48 = vor.u32 %v9650_v47, %v7797_v24  ;;  %v7926_v49 = vor.u32 %v9682_v37, %v7925_v26  ;;  %v8037_v63 = vld [vmem:[%s14987_s1 + $0xe88] sm:$0xf] }
 0x17a   :  { %4141 = vmatpush.bf16.msrb.mxu0 %v7238_v8  ;;  %v7941_v8 = vld [vmem:[%s14987_s1 + $0xdc8] sm:$0xf]  ;;  %v9678_v55 = vld [vmem:[%s14987_s1 + $0xd94] sm:$0xf0] }
 0x17b   :  { %4154 = vmatpush.bf16.msrb.mxu1 %v7366_v12  ;;  %v9686_v12 = vld [vmem:[%s14987_s1 + $0xdd4] sm:$0xf0]  ;;  %v7765_v2 = vld [vmem:[%s14987_s1 + $0xc68] sm:$0xf] }
 0x17c   :  { %4167 = vmatpush.bf16.msrb.mxu2 %v7494_v13  ;;  %v8069_v13 = vld [vmem:[%s14987_s1 + $0xec8] sm:$0xf]  ;;  %v7942_v17 = vor.u32 %v9686_v12, %v7941_v8  ;;  %v9710_v56 = vld [vmem:[%s14987_s1 + $0xe94] sm:$0xf0] }
 0x17d   :  { %4180 = vmatpush.bf16.msrb.mxu3 %v7622_v34  ;;  %v7814_v34 = vor.u32 %v9654_v7, %v7813_v6  ;;  %v8070_v21 = vor.u32 %v9718_v14, %v8069_v13  ;;  %v9742_v59 = vld [vmem:[%s14987_s1 + $0xf94] sm:$0xf0]  ;;  %v8038_v1 = vor.u32 %v9710_v56, %v8037_v63  ;;  %v8021_v6 = vld [vmem:[%s14987_s1 + $0xe68] sm:$0xf] }
 0x17e   :  { %4142 = vmatpush.bf16.msrb.mxu0 %v7222_v27  ;;  %v8198_v27 = vor.u32 %v9750_v16, %v8197_v15  ;;  %v9706_v7 = vld [vmem:[%s14987_s1 + $0xe74] sm:$0xf0]  ;;  %v8149_v8 = vld [vmem:[%s14987_s1 + $0xf68] sm:$0xf] }
 0x17f   :  { %4155 = vmatpush.bf16.msrb.mxu1 %v7350_v43  ;;  %v9714_v43 = vld [vmem:[%s14987_s1 + $0xeb4] sm:$0xf0]  ;;  %v8022_v14 = vor.u32 %v9706_v7, %v8021_v6  ;;  %v7749_v15 = vld [vmem:[%s14987_s1 + $0xc48] sm:$0xf] }
 0x180   :  { %4168 = vmatpush.bf16.msrb.mxu2 %v7478_v45  ;;  %v8181_v45 = vld [vmem:[%s14987_s1 + $0xfa8] sm:$0xf]  ;;  %v9638_v16 = vld [vmem:[%s14987_s1 + $0xc54] sm:$0xf0] }
 0x181   :  { %4181 = vmatpush.bf16.msrb.mxu3 %v7606_v54  ;;  %v8054_v54 = vor.u32 %v9714_v43, %v8053_v40  ;;  %v8182_v53 = vor.u32 %v9746_v46, %v8181_v45  ;;  %v9670_v24 = vld [vmem:[%s14987_s1 + $0xd54] sm:$0xf0]  ;;  %v8005_v47 = vld [vmem:[%s14987_s1 + $0xe48] sm:$0xf]  ;;  %v7750_v46 = vor.u32 %v9638_v16, %v7749_v15  ;;  %v9272_v16 = vld [vmem:[%s14987_s1 + $0xec] sm:$0xf] }
 0x182   :  { %4143 = vmatpush.bf16.msrb.mxu0 %v7206_v58  ;;  %v3937_v57 = vpop.f32.mrf.mxu0  ;;  %v8165_v58 = vld [vmem:[%s14987_s1 + $0xf88] sm:$0xf]  ;;  %v9702_v26 = vld [vmem:[%s14987_s1 + $0xe54] sm:$0xf0] }
 0x183   :  { %4156 = vmatpush.bf16.msrb.mxu1 %v7334_v62  ;;  %v3938_v60 = vadd.f32 %v3937_v57, %v12444_v11  ;;  %v3950_v62 = vpop.f32.mrf.mxu1  ;;  %v8166_v11 = vor.u32 %v9742_v59, %v8165_v58  ;;  %v8133_v40 = vld [vmem:[%s14987_s1 + $0xf48] sm:$0xf]  ;;  %v9734_v43 = vld [vmem:[%s14987_s1 + $0xf54] sm:$0xf0]  ;;  %v8006_v50 = vor.u32 %v9702_v26, %v8005_v47  ;;  %v6423_v47 = vld [vmem:[%s14987_s1 + $0x1f8] sm:$0xf0] }
 0x184   :  { %4169 = vmatpush.bf16.msrb.mxu2 %v7462_v0  ;;  %v7910_v0 = vor.u32 %v9678_v55, %v7909_v52  ;;  %v7733_v51 = vld [vmem:[%s14987_s1 + $0xc28] sm:$0xf]  ;;  %v9634_v52 = vld [vmem:[%s14987_s1 + $0xc34] sm:$0xf0]  ;;  %v8134_v55 = vor.u32 %v9734_v43, %v8133_v40 }
 0x185   :  { %4182 = vmatpush.bf16.msrb.mxu3 %v7590_v9  ;;  %4144 = vmatmul.bf16.vlgmr.msrb.gmra.mxu0 %v10706_v25  ;;  %v9642_v9 = vld [vmem:[%s14987_s1 + $0xc74] sm:$0xf0]  ;;  %v7989_v56 = vld [vmem:[%s14987_s1 + $0xe28] sm:$0xf] }
 0x186   :  { %4188 = vmatpush.bf16.msra.mxu0 %v7830_v3  ;;  %4157 = vmatmul.bf16.vlgmr.msrb.gmra.mxu1 %v10719_v30  ;;  %v7893_v3 = vld [vmem:[%s14987_s1 + $0xd68] sm:$0xf]  ;;  %v7766_v12 = vor.u32 %v9642_v9, %v7765_v2  ;;  %v9666_v63 = vld [vmem:[%s14987_s1 + $0xd34] sm:$0xf0] }
 0x187   :  { %4201 = vmatpush.bf16.msra.mxu1 %v7958_v4  ;;  %4170 = vmatmul.bf16.vlgmr.msrb.gmra.mxu2 %v10717_v29  ;;  %v3951_v4 = vadd.f32 %v3950_v62, %v3938_v60  ;;  %v9698_v57 = vld [vmem:[%s14987_s1 + $0xe34] sm:$0xf0]  ;;  %v8117_v58 = vld [vmem:[%s14987_s1 + $0xf28] sm:$0xf]  ;;  %v7734_v60 = vor.u32 %v9634_v52, %v7733_v51  ;;  %v6279_v51 = vld [vmem:[%s14987_s1 + $0xd8] sm:$0xf0] }
 0x188   :  { %4214 = vmatpush.bf16.msra.mxu2 %v8086_v5  ;;  %4183 = vmatmul.bf16.vlgmr.msrb.gmra.mxu3 %v10727_v33  ;;  %v9674_v5 = vld [vmem:[%s14987_s1 + $0xd74] sm:$0xf0]  ;;  %v7845_v2 = vld [vmem:[%s14987_s1 + $0xd08] sm:$0xf]  ;;  %v9300_v52 = vld [vmem:[%s14987_s1 + $0x1cc] sm:$0xf] }
 0x189   :  { %4227 = vmatpush.bf16.msra.mxu3 %v8214_v10  ;;  %v9738_v10 = vld [vmem:[%s14987_s1 + $0xf74] sm:$0xf0]  ;;  %v7894_v13 = vor.u32 %v9674_v5, %v7893_v3  ;;  %v7973_v3 = vld [vmem:[%s14987_s1 + $0xe08] sm:$0xf] }
 0x18a   :  { %4189 = vmatpush.bf16.msra.mxu0 %v7814_v34  ;;  %v7877_v34 = vld [vmem:[%s14987_s1 + $0xd48] sm:$0xf]  ;;  %v3939_v45 = vpop.f32.mrf.mxu0  ;;  %v9730_v59 = vld [vmem:[%s14987_s1 + $0xf34] sm:$0xf0] }
 0x18b   :  { %4202 = vmatpush.bf16.msra.mxu1 %v7942_v17  ;;  %v8150_v17 = vor.u32 %v9738_v10, %v8149_v8  ;;  %v3976_v37 = vpop.f32.mrf.mxu3  ;;  %v9630_v62 = vld [vmem:[%s14987_s1 + $0xc14] sm:$0xf0]  ;;  %v8101_v5 = vld [vmem:[%s14987_s1 + $0xf08] sm:$0xf] }
 0x18c   :  { %4215 = vmatpush.bf16.msra.mxu2 %v8070_v21  ;;  %v3963_v21 = vpop.f32.mrf.mxu2  ;;  %v9662_v9 = vld [vmem:[%s14987_s1 + $0xd14] sm:$0xf0]  ;;  %v8341_v8 = vld [vmem:[%s14987_s1 + $0x10e8] sm:$0xf] }
 0x18d   :  { %4228 = vmatpush.bf16.msra.mxu3 %v8198_v27  ;;  %v3964_v27 = vadd.f32 %v3963_v21, %v3951_v4  ;;  %v9694_v4 = vld [vmem:[%s14987_s1 + $0xe14] sm:$0xf0]  ;;  %v8325_v43 = vld [vmem:[%s14987_s1 + $0x10c8] sm:$0xf] }
 0x18e   :  { %4190 = vmatpush.bf16.msra.mxu0 %v7798_v48  ;;  %v3952_v48 = vpop.f32.mrf.mxu1  ;;  %v9726_v6 = vld [vmem:[%s14987_s1 + $0xf14] sm:$0xf0]  ;;  %v7974_v21 = vor.u32 %v9694_v4, %v7973_v3  ;;  %v8293_v4 = vld [vmem:[%s14987_s1 + $0x1088] sm:$0xf] }
 0x18f   :  { %4203 = vmatpush.bf16.msra.mxu1 %v7926_v49  ;;  %v12643_v49 = vadd.f32 %v3976_v37, %v3964_v27  ;;  %v9786_v10 = vld [vmem:[%s14987_s1 + $0x10f4] sm:$0xf0]  ;;  %v8102_v26 = vor.u32 %v9726_v6, %v8101_v5  ;;  %v8421_v6 = vld [vmem:[%s14987_s1 + $0x1188] sm:$0xf] }
 0x190   :  { %4216 = vmatpush.bf16.msra.mxu2 %v8054_v54  ;;  %v7878_v54 = vor.u32 %v9670_v24, %v7877_v34  ;;  %v9818_v15 = vld [vmem:[%s14987_s1 + $0x11f4] sm:$0xf0]  ;;  %v6295_v34 = vld [vmem:[%s14987_s1 + $0xf8] sm:$0xf0]  ;;  %v9304_v24 = vld [vmem:[%s14987_s1 + $0x1ec] sm:$0xf]  ;;  %v8342_v27 = vor.u32 %v9786_v10, %v8341_v8 }
 0x191   :  { %4229 = vmatpush.bf16.msra.mxu3 %v8182_v53  ;;  %v7861_v53 = vld [vmem:[%s14987_s1 + $0xd28] sm:$0xf]  ;;  %v6298_v40 = vor.u32 %v9272_v16, %v6295_v34  ;;  %v9782_v45 = vld [vmem:[%s14987_s1 + $0x10d4] sm:$0xf0]  ;;  %v6426_v48 = vor.u32 %v9304_v24, %v6423_v47  ;;  %v9260_v10 = vld [vmem:[%s14987_s1 + $0x8c] sm:$0xf] }
 0x192   :  { %4191 = vmatpush.bf16.msra.mxu0 %v7782_v61  ;;  %v7717_v61 = vld [vmem:[%s14987_s1 + $0xc08] sm:$0xf]  ;;  %v9774_v5 = vld [vmem:[%s14987_s1 + $0x1094] sm:$0xf0] }
 0x193   :  { %4204 = vmatpush.bf16.msra.mxu1 %v7910_v0  ;;  %v7862_v0 = vor.u32 %v9666_v63, %v7861_v53  ;;  %v6407_v53 = vld [vmem:[%s14987_s1 + $0x1d8] sm:$0xf0]  ;;  %v9806_v8 = vld [vmem:[%s14987_s1 + $0x1194] sm:$0xf0]  ;;  %v8294_v34 = vor.u32 %v9774_v5, %v8293_v4  ;;  %v8277_v47 = vld [vmem:[%s14987_s1 + $0x1068] sm:$0xf] }
 0x194   :  { %4217 = vmatpush.bf16.msra.mxu2 %v8038_v1  ;;  %v7990_v1 = vor.u32 %v9698_v57, %v7989_v56  ;;  %v3965_v7 = vpop.f32.mrf.mxu2  ;;  %v8309_v57 = vld [vmem:[%s14987_s1 + $0x10a8] sm:$0xf] }
 0x195   :  { %4230 = vmatpush.bf16.msra.mxu3 %v8166_v11  ;;  %v8118_v11 = vor.u32 %v9730_v59, %v8117_v58  ;;  %v9778_v58 = vld [vmem:[%s14987_s1 + $0x10b4] sm:$0xf0]  ;;  %v8437_v59 = vld [vmem:[%s14987_s1 + $0x11a8] sm:$0xf] }
 0x196   :  { %4192 = vmatpush.bf16.msra.mxu0 %v7766_v12  ;;  %v8469_v12 = vld [vmem:[%s14987_s1 + $0x11e8] sm:$0xf] }
 0x197   :  { %4205 = vmatpush.bf16.msra.mxu1 %v7894_v13  ;;  %v3978_v13 = vpop.f32.mrf.mxu3  ;;  %v8470_v37 = vor.u32 %v9818_v15, %v8469_v12  ;;  %v6247_v12 = vld [vmem:[%s14987_s1 + $0x98] sm:$0xf0]  ;;  %v8245_v5 = vld [vmem:[%s14987_s1 + $0x1028] sm:$0xf] }
 0x198   :  { %4218 = vmatpush.bf16.msra.mxu2 %v8022_v14  ;;  %v7718_v14 = vor.u32 %v9630_v62, %v7717_v61  ;;  %v9810_v61 = vld [vmem:[%s14987_s1 + $0x11b4] sm:$0xf0]  ;;  %v9264_v62 = vld [vmem:[%s14987_s1 + $0xac] sm:$0xf]  ;;  %v6375_v15 = vld [vmem:[%s14987_s1 + $0x198] sm:$0xf0]  ;;  %v6250_v24 = vor.u32 %v9260_v10, %v6247_v12 }
 0x199   :  { %4231 = vmatpush.bf16.msra.mxu3 %v8150_v17  ;;  %v7846_v17 = vor.u32 %v9662_v9, %v7845_v2  ;;  %v6391_v2 = vld [vmem:[%s14987_s1 + $0x1b8] sm:$0xf0]  ;;  %v8310_v9 = vor.u32 %v9778_v58, %v8309_v57  ;;  %v8438_v3 = vor.u32 %v9810_v61, %v8437_v59  ;;  %v9798_v57 = vld [vmem:[%s14987_s1 + $0x1154] sm:$0xf0]  ;;  %v9252_v58 = vld [vmem:[%s14987_s1 + $0x4c] sm:$0xf] }
 0x19a   :  { %4193 = vmatpush.bf16.msra.mxu0 %v7750_v46  ;;  %v8453_v46 = vld [vmem:[%s14987_s1 + $0x11c8] sm:$0xf]  ;;  %v6215_v59 = vld [vmem:[%s14987_s1 + $0x58] sm:$0xf0]  ;;  %v9794_v10 = vld [vmem:[%s14987_s1 + $0x1134] sm:$0xf0] }
 0x19b   :  { %4206 = vmatpush.bf16.msra.mxu1 %v7878_v54  ;;  %v9814_v54 = vld [vmem:[%s14987_s1 + $0x11d4] sm:$0xf0]  ;;  %v6218_v4 = vor.u32 %v9252_v58, %v6215_v59  ;;  %v9248_v12 = vld [vmem:[%s14987_s1 + $0x2c] sm:$0xf] }
 0x19c   :  { %4219 = vmatpush.bf16.msra.mxu2 %v8006_v50  ;;  %v9268_v50 = vld [vmem:[%s14987_s1 + $0xcc] sm:$0xf]  ;;  %v8454_v63 = vor.u32 %v9814_v54, %v8453_v46 }
 0x19d   :  { %4232 = vmatpush.bf16.msra.mxu3 %v8134_v55  ;;  %v8326_v55 = vor.u32 %v9782_v45, %v8325_v43  ;;  %v6282_v56 = vor.u32 %v9268_v50, %v6279_v51  ;;  %v9256_v43 = vld [vmem:[%s14987_s1 + $0x6c] sm:$0xf]  ;;  %v6231_v45 = vld [vmem:[%s14987_s1 + $0x78] sm:$0xf0] }
 0x19e   :  { %4194 = vmatpush.bf16.msra.mxu0 %v7734_v60  ;;  %v6410_v60 = vor.u32 %v9300_v52, %v6407_v53  ;;  %v9288_v46 = vld [vmem:[%s14987_s1 + $0x16c] sm:$0xf]  ;;  %v6234_v51 = vor.u32 %v9256_v43, %v6231_v45  ;;  %v8261_v52 = vld [vmem:[%s14987_s1 + $0x1048] sm:$0xf]  ;;  %v9766_v53 = vld [vmem:[%s14987_s1 + $0x1054] sm:$0xf0] }
 0x19f   :  { %4207 = vmatpush.bf16.msra.mxu1 %v7862_v0  ;;  %v6263_v0 = vld [vmem:[%s14987_s1 + $0xb8] sm:$0xf0]  ;;  %v9276_v45 = vld [vmem:[%s14987_s1 + $0x10c] sm:$0xf] }
 0x1a0   :  { %4220 = vmatpush.bf16.msra.mxu2 %v7990_v1  ;;  %v9296_v1 = vld [vmem:[%s14987_s1 + $0x1ac] sm:$0xf]  ;;  %v6183_v43 = vld [vmem:[%s14987_s1 + $0x18] sm:$0xf0] }
 0x1a1   :  { %4233 = vmatpush.bf16.msra.mxu3 %v8118_v11  ;;  %v6266_v11 = vor.u32 %v9264_v62, %v6263_v0  ;;  %v6394_v7 = vor.u32 %v9296_v1, %v6391_v2  ;;  %v9284_v62 = vld [vmem:[%s14987_s1 + $0x14c] sm:$0xf]  ;;  %v6343_v0 = vld [vmem:[%s14987_s1 + $0x158] sm:$0xf0]  ;;  %v8262_v2 = vor.u32 %v9766_v53, %v8261_v52 }
 0x1a2   :  { %4195 = vmatpush.bf16.msra.mxu0 %v7718_v14  ;;  %v3989_v13 = vpop.f32.mrf.mxu0  ;;  %v9292_v14 = vld [vmem:[%s14987_s1 + $0x18c] sm:$0xf] }
 0x1a3   :  { %4208 = vmatpush.bf16.msra.mxu1 %v7846_v17  ;;  %v3990_v16 = vadd.f32 %v3989_v13, %v12643_v49  ;;  %v4002_v17 = vpop.f32.mrf.mxu1  ;;  %v6378_v49 = vor.u32 %v9292_v14, %v6375_v15  ;;  %v6199_v13 = vld [vmem:[%s14987_s1 + $0x38] sm:$0xf0]  ;;  %v4500_v14 = vmax.f32 %v12002_v36, 0.0  ;;  %v9432_v59 = vld [vmem:[%s14987_s1 + $0x5ec] sm:$0xf] }
 0x1a4   :  { %4221 = vmatpush.bf16.msra.mxu2 %v7974_v21  ;;  %v8422_v21 = vor.u32 %v9806_v8, %v8421_v6  ;;  %v9762_v6 = vld [vmem:[%s14987_s1 + $0x1034] sm:$0xf0]  ;;  %v6346_v8 = vor.u32 %v9284_v62, %v6343_v0 }
 0x1a5   :  { %4234 = vmatpush.bf16.msra.mxu3 %v8102_v26  ;;  %4196 = vmatmul.bf16.vlgmr.msra.gmra.mxu0 %v10916_v23  ;;  %v9770_v26 = vld [vmem:[%s14987_s1 + $0x1074] sm:$0xf0] }
 0x1a6   :  { %4240 = vmatpush.bf16.msrb.mxu0 %v8342_v27  ;;  %4209 = vmatmul.bf16.vlgmr.msra.gmra.mxu1 %v10929_v31  ;;  %v8405_v27 = vld [vmem:[%s14987_s1 + $0x1168] sm:$0xf]  ;;  %v8278_v54 = vor.u32 %v9770_v26, %v8277_v47  ;;  %v6202_v26 = vor.u32 %v9248_v12, %v6199_v13 }
 0x1a7   :  { %4253 = vmatpush.bf16.msrb.mxu1 %v8470_v37  ;;  %4222 = vmatmul.bf16.vlgmr.msra.gmra.mxu2 %v10927_v28  ;;  %v4003_v37 = vadd.f32 %v4002_v17, %v3990_v16  ;;  %v9280_v16 = vld [vmem:[%s14987_s1 + $0x12c] sm:$0xf]  ;;  %v8246_v17 = vor.u32 %v9762_v6, %v8245_v5  ;;  %v6791_v6 = vld [vmem:[%s14987_s1 + $0x4d8] sm:$0xf0] }
 0x1a8   :  { %4266 = vmatpush.bf16.msrb.mxu2 %v6298_v40  ;;  %4235 = vmatmul.bf16.vlgmr.msra.gmra.mxu3 %v10937_v35  ;;  %v9802_v40 = vld [vmem:[%s14987_s1 + $0x1174] sm:$0xf0]  ;;  %v9396_v5 = vld [vmem:[%s14987_s1 + $0x4cc] sm:$0xf] }
 0x1a9   :  { %4279 = vmatpush.bf16.msrb.mxu3 %v6426_v48  ;;  %v6359_v48 = vld [vmem:[%s14987_s1 + $0x178] sm:$0xf0]  ;;  %v8406_v50 = vor.u32 %v9802_v40, %v8405_v27  ;;  %v8357_v27 = vld [vmem:[%s14987_s1 + $0x1108] sm:$0xf]  ;;  %v6794_v13 = vor.u32 %v9396_v5, %v6791_v6 }
 0x1aa   :  { %4241 = vmatpush.bf16.msrb.mxu0 %v8326_v55  ;;  %v8389_v55 = vld [vmem:[%s14987_s1 + $0x1148] sm:$0xf]  ;;  %v3991_v1 = vpop.f32.mrf.mxu0 }
 0x1ab   :  { %4254 = vmatpush.bf16.msrb.mxu1 %v8454_v63  ;;  %v6362_v63 = vor.u32 %v9288_v46, %v6359_v48  ;;  %v4028_v61 = vpop.f32.mrf.mxu3  ;;  %v6311_v46 = vld [vmem:[%s14987_s1 + $0x118] sm:$0xf0] }
 0x1ac   :  { %4267 = vmatpush.bf16.msrb.mxu2 %v6282_v56  ;;  %v4015_v56 = vpop.f32.mrf.mxu2 }
 0x1ad   :  { %4280 = vmatpush.bf16.msrb.mxu3 %v6410_v60  ;;  %v4016_v60 = vadd.f32 %v4015_v56, %v4003_v37  ;;  %v9244_v37 = vld [vmem:[%s14987_s1 + $0xc] sm:$0xf]  ;;  %v6807_v56 = vld [vmem:[%s14987_s1 + $0x4f8] sm:$0xf0] }
 0x1ae   :  { %4242 = vmatpush.bf16.msrb.mxu0 %v8310_v9  ;;  %v4004_v9 = vpop.f32.mrf.mxu1  ;;  %v6186_v58 = vor.u32 %v9244_v37, %v6183_v43  ;;  %v6503_v43 = vld [vmem:[%s14987_s1 + $0x298] sm:$0xf0] }
 0x1af   :  { %4255 = vmatpush.bf16.msrb.mxu1 %v8438_v3  ;;  %v4029_v3 = vadd.f32 %v4028_v61, %v4016_v60  ;;  %v6935_v60 = vld [vmem:[%s14987_s1 + $0x5f8] sm:$0xf0]  ;;  %v6314_v61 = vor.u32 %v9276_v45, %v6311_v46  ;;  %v10013_v45 = vld [vmem:[%s14989_s2] sm:$0xf] }
 0x1b0   :  { %4268 = vmatpush.bf16.msrb.mxu2 %v6266_v11  ;;  %v8390_v11 = vor.u32 %v9798_v57, %v8389_v55  ;;  %v6679_v55 = vld [vmem:[%s14987_s1 + $0x3f8] sm:$0xf0]  ;;  %v615_v46 = vperm.slane %v10013_v45, 2 }
 0x1b1   :  { %4281 = vmatpush.bf16.msrb.mxu3 %v6394_v7  ;;  %v8373_v7 = vld [vmem:[%s14987_s1 + $0x1128] sm:$0xf]  ;;  %v4501_v15 = vmax.f32 %v4029_v3, 0.0  ;;  %v6535_v9 = vld [vmem:[%s14987_s1 + $0x2d8] sm:$0xf0] }
 0x1b2   :  { %4243 = vmatpush.bf16.msrb.mxu0 %v8294_v34  ;;  %v6327_v34 = vld [vmem:[%s14987_s1 + $0x138] sm:$0xf0]  ;;  %v8374_v47 = vor.u32 %v9794_v10, %v8373_v7  ;;  %v9364_v3 = vld [vmem:[%s14987_s1 + $0x3cc] sm:$0xf] }
 0x1b3   :  { %4256 = vmatpush.bf16.msrb.mxu1 %v8422_v21  ;;  %v8229_v21 = vld [vmem:[%s14987_s1 + $0x1008] sm:$0xf]  ;;  %v12873_v36 = vpack.c.bf16 %v4501_v15, %v4500_v14  ;;  %v6330_v40 = vor.u32 %v9280_v16, %v6327_v34  ;;  %v4030_v52 = vpop.f32.mrf.mxu3  ;;  %v9428_v7 = vld [vmem:[%s14987_s1 + $0x5cc] sm:$0xf]  ;;  %v6519_v15 = vld [vmem:[%s14987_s1 + $0x2b8] sm:$0xf0] }
 0x1b4   :  { %4269 = vmatpush.bf16.msrb.mxu2 %v6250_v24  ;;  %v9758_v24 = vld [vmem:[%s14987_s1 + $0x1014] sm:$0xf0]  ;;  %v4017_v48 = vpop.f32.mrf.mxu2  ;;  %v9328_v14 = vld [vmem:[%s14987_s1 + $0x2ac] sm:$0xf]  ;;  %v6887_v52 = vld [vmem:[%s14987_s1 + $0x598] sm:$0xf0] }
 0x1b5   :  { %4282 = vmatpush.bf16.msrb.mxu3 %v6378_v49  ;;  %v9790_v49 = vld [vmem:[%s14987_s1 + $0x1114] sm:$0xf0]  ;;  %v8230_v53 = vor.u32 %v9758_v24, %v8229_v21  ;;  %v9360_v16 = vld [vmem:[%s14987_s1 + $0x3ac] sm:$0xf]  ;;  %v6775_v24 = vld [vmem:[%s14987_s1 + $0x4b8] sm:$0xf0] }
 0x1b6   :  { %4244 = vmatpush.bf16.msrb.mxu0 %v8278_v54  ;;  %v9336_v54 = vld [vmem:[%s14987_s1 + $0x2ec] sm:$0xf]  ;;  %v8358_v57 = vor.u32 %v9790_v49, %v8357_v27  ;;  %v6522_v27 = vor.u32 %v9328_v14, %v6519_v15  ;;  %v6599_v14 = vld [vmem:[%s14987_s1 + $0x358] sm:$0xf0] }
 0x1b7   :  { %4257 = vmatpush.bf16.msrb.mxu1 %v8406_v50  ;;  %v6551_v50 = vld [vmem:[%s14987_s1 + $0x2f8] sm:$0xf0]  ;;  %v9392_v21 = vld [vmem:[%s14987_s1 + $0x4ac] sm:$0xf] }
 0x1b8   :  { %4270 = vmatpush.bf16.msrb.mxu2 %v6234_v51  ;;  %v9368_v51 = vld [vmem:[%s14987_s1 + $0x3ec] sm:$0xf]  ;;  %v6554_v62 = vor.u32 %v9336_v54, %v6551_v50  ;;  %v6759_v50 = vld [vmem:[%s14987_s1 + $0x498] sm:$0xf0] }
 0x1b9   :  { %4283 = vmatpush.bf16.msrb.mxu3 %v6362_v63  ;;  %v9400_v63 = vld [vmem:[%s14987_s1 + $0x4ec] sm:$0xf]  ;;  %v6682_v0 = vor.u32 %v9368_v51, %v6679_v55 }
 0x1ba   :  { %4245 = vmatpush.bf16.msrb.mxu0 %v8262_v2  ;;  %v6810_v1 = vor.u32 %v9400_v63, %v6807_v56  ;;  %v9332_v2 = vld [vmem:[%s14987_s1 + $0x2cc] sm:$0xf] }
 0x1bb   :  { %4258 = vmatpush.bf16.msrb.mxu1 %v8390_v11  ;;  %v6938_v11 = vor.u32 %v9432_v59, %v6935_v60  ;;  %v6538_v10 = vor.u32 %v9332_v2, %v6535_v9  ;;  %v9324_v49 = vld [vmem:[%s14987_s1 + $0x28c] sm:$0xf]  ;;  %v6743_v2 = vld [vmem:[%s14987_s1 + $0x478] sm:$0xf0] }
 0x1bc   :  { %4271 = vmatpush.bf16.msrb.mxu2 %v6218_v4  ;;  %v6663_v4 = vld [vmem:[%s14987_s1 + $0x3d8] sm:$0xf0]  ;;  %v9388_v54 = vld [vmem:[%s14987_s1 + $0x48c] sm:$0xf] }
 0x1bd   :  { %4284 = vmatpush.bf16.msrb.mxu3 %v6346_v8  ;;  %v6919_v8 = vld [vmem:[%s14987_s1 + $0x5d8] sm:$0xf0]  ;;  %v6666_v12 = vor.u32 %v9364_v3, %v6663_v4  ;;  %v9420_v51 = vld [vmem:[%s14987_s1 + $0x58c] sm:$0xf]  ;;  %v6762_v56 = vor.u32 %v9388_v54, %v6759_v50 }
 0x1be   :  { %4246 = vmatpush.bf16.msrb.mxu0 %v8246_v17  ;;  %v6922_v34 = vor.u32 %v9428_v7, %v6919_v8  ;;  %v6647_v17 = vld [vmem:[%s14987_s1 + $0x3b8] sm:$0xf0]  ;;  %v9352_v59 = vld [vmem:[%s14987_s1 + $0x36c] sm:$0xf] }
 0x1bf   :  { %4259 = vmatpush.bf16.msrb.mxu1 %v8374_v47  ;;  %v9424_v47 = vld [vmem:[%s14987_s1 + $0x5ac] sm:$0xf]  ;;  %v6650_v37 = vor.u32 %v9360_v16, %v6647_v17  ;;  %v6871_v3 = vld [vmem:[%s14987_s1 + $0x578] sm:$0xf0] }
 0x1c0   :  { %4272 = vmatpush.bf16.msrb.mxu2 %v6202_v26  ;;  %v6903_v26 = vld [vmem:[%s14987_s1 + $0x5b8] sm:$0xf0]  ;;  %v9416_v9 = vld [vmem:[%s14987_s1 + $0x56c] sm:$0xf] }
 0x1c1   :  { %4285 = vmatpush.bf16.msrb.mxu3 %v6330_v40  ;;  %v6778_v40 = vor.u32 %v9392_v21, %v6775_v24  ;;  %v6906_v48 = vor.u32 %v9424_v47, %v6903_v26  ;;  %v9316_v7 = vld [vmem:[%s14987_s1 + $0x24c] sm:$0xf]  ;;  %v6471_v8 = vld [vmem:[%s14987_s1 + $0x258] sm:$0xf0] }
 0x1c2   :  { %4247 = vmatpush.bf16.msrb.mxu0 %v8230_v53  ;;  %v6506_v53 = vor.u32 %v9324_v49, %v6503_v43  ;;  %v4041_v55 = vpop.f32.mrf.mxu0  ;;  %v9380_v15 = vld [vmem:[%s14987_s1 + $0x44c] sm:$0xf]  ;;  %v6727_v16 = vld [vmem:[%s14987_s1 + $0x458] sm:$0xf0]  ;;  %v6474_v47 = vor.u32 %v9316_v7, %v6471_v8 }
 0x1c3   :  { %4260 = vmatpush.bf16.msrb.mxu1 %v8358_v57  ;;  %v9320_v57 = vld [vmem:[%s14987_s1 + $0x26c] sm:$0xf]  ;;  %v4042_v60 = vadd.f32 %v4041_v55, %v615_v46  ;;  %v6855_v24 = vld [vmem:[%s14987_s1 + $0x558] sm:$0xf0] }
 0x1c4   :  { %4273 = vmatpush.bf16.msrb.mxu2 %v6186_v58  ;;  %v6487_v58 = vld [vmem:[%s14987_s1 + $0x278] sm:$0xf0]  ;;  %v9412_v21 = vld [vmem:[%s14987_s1 + $0x54c] sm:$0xf] }
 0x1c5   :  { %4286 = vmatpush.bf16.msrb.mxu3 %v6314_v61  ;;  %4248 = vmatmul.bf16.vlgmr.msrb.gmra.mxu0 %v11123_v32  ;;  %v4054_v61 = vpop.f32.mrf.mxu1  ;;  %v6490_v4 = vor.u32 %v9320_v57, %v6487_v58  ;;  %v6455_v43 = vld [vmem:[%s14987_s1 + $0x238] sm:$0xf0]  ;;  %v6858_v46 = vor.u32 %v9412_v21, %v6855_v24  ;;  %v9408_v50 = vld [vmem:[%s14987_s1 + $0x52c] sm:$0xf] }
 0x1c6   :  { %4292 = vmatpush.bf16.msra.mxu0 %v6554_v62  ;;  %4261 = vmatmul.bf16.vlgmr.msrb.gmra.mxu1 %v11134_v39  ;;  %v6890_v62 = vor.u32 %v9420_v51, %v6887_v52  ;;  %v6711_v54 = vld [vmem:[%s14987_s1 + $0x438] sm:$0xf0]  ;;  %v9340_v57 = vld [vmem:[%s14987_s1 + $0x30c] sm:$0xf] }
 0x1c7   :  { %4305 = vmatpush.bf16.msra.mxu1 %v6682_v0  ;;  %4274 = vmatmul.bf16.vlgmr.msrb.gmra.mxu2 %v10351_v19  ;;  %v9356_v19 = vld [vmem:[%s14987_s1 + $0x38c] sm:$0xf]  ;;  %v6615_v0 = vld [vmem:[%s14987_s1 + $0x378] sm:$0xf0] }
 0x1c8   :  { %4318 = vmatpush.bf16.msra.mxu2 %v6810_v1  ;;  %4287 = vmatmul.bf16.vlgmr.msrb.gmra.mxu3 %v10355_v22  ;;  %v6631_v22 = vld [vmem:[%s14987_s1 + $0x398] sm:$0xf0]  ;;  %v9384_v1 = vld [vmem:[%s14987_s1 + $0x46c] sm:$0xf]  ;;  %v6618_v5 = vor.u32 %v9352_v59, %v6615_v0 }
 0x1c9   :  { %4331 = vmatpush.bf16.msra.mxu3 %v6938_v11  ;;  %v6634_v63 = vor.u32 %v9356_v19, %v6631_v22  ;;  %v4055_v11 = vadd.f32 %v4054_v61, %v4042_v60  ;;  %v6746_v6 = vor.u32 %v9384_v1, %v6743_v2  ;;  %v9344_v19 = vld [vmem:[%s14987_s1 + $0x32c] sm:$0xf]  ;;  %v6839_v51 = vld [vmem:[%s14987_s1 + $0x538] sm:$0xf0] }
 0x1ca   :  { %4293 = vmatpush.bf16.msra.mxu0 %v6538_v10  ;;  %v9348_v10 = vld [vmem:[%s14987_s1 + $0x34c] sm:$0xf]  ;;  %v6439_v55 = vld [vmem:[%s14987_s1 + $0x218] sm:$0xf0]  ;;  %v6842_v61 = vor.u32 %v9408_v50, %v6839_v51 }
 0x1cb   :  { %4306 = vmatpush.bf16.msra.mxu1 %v6666_v12  ;;  %v4067_v12 = vpop.f32.mrf.mxu2  ;;  %v4080_v17 = vpop.f32.mrf.mxu3  ;;  %v6602_v49 = vor.u32 %v9348_v10, %v6599_v14  ;;  %v9376_v22 = vld [vmem:[%s14987_s1 + $0x42c] sm:$0xf]  ;;  %v6567_v58 = vld [vmem:[%s14987_s1 + $0x318] sm:$0xf0] }
 0x1cc   :  { %4319 = vmatpush.bf16.msra.mxu2 %v6794_v13  ;;  %v6874_v13 = vor.u32 %v9416_v9, %v6871_v3  ;;  %v9372_v59 = vld [vmem:[%s14987_s1 + $0x40c] sm:$0xf]  ;;  %v6823_v1 = vld [vmem:[%s14987_s1 + $0x518] sm:$0xf0]  ;;  %v6570_v8 = vor.u32 %v9340_v57, %v6567_v58 }
 0x1cd   :  { %4332 = vmatpush.bf16.msra.mxu3 %v6922_v34  ;;  %v4068_v34 = vadd.f32 %v4067_v12, %v4055_v11  ;;  %v4056_v45 = vpop.f32.mrf.mxu1  ;;  %v9404_v0 = vld [vmem:[%s14987_s1 + $0x50c] sm:$0xf]  ;;  %v7063_v3 = vld [vmem:[%s14987_s1 + $0x6f8] sm:$0xf0] }
 0x1ce   :  { %4294 = vmatpush.bf16.msra.mxu0 %v6522_v27  ;;  %v4043_v27 = vpop.f32.mrf.mxu0  ;;  %v9464_v9 = vld [vmem:[%s14987_s1 + $0x6ec] sm:$0xf]  ;;  %v7319_v7 = vld [vmem:[%s14987_s1 + $0x8f8] sm:$0xf0]  ;;  %v6826_v14 = vor.u32 %v9404_v0, %v6823_v1 }
 0x1cf   :  { %4307 = vmatpush.bf16.msra.mxu1 %v6650_v37  ;;  %v13044_v26 = vadd.f32 %v4080_v17, %v4068_v34  ;;  %v6730_v37 = vor.u32 %v9380_v15, %v6727_v16  ;;  %v9496_v11 = vld [vmem:[%s14987_s1 + $0x7ec] sm:$0xf]  ;;  %v7066_v15 = vor.u32 %v9464_v9, %v7063_v3  ;;  %v7047_v21 = vld [vmem:[%s14987_s1 + $0x6d8] sm:$0xf0] }
 0x1d0   :  { %4320 = vmatpush.bf16.msra.mxu2 %v6778_v40  ;;  %v9312_v40 = vld [vmem:[%s14987_s1 + $0x22c] sm:$0xf]  ;;  %v7175_v27 = vld [vmem:[%s14987_s1 + $0x7d8] sm:$0xf0] }
 0x1d1   :  { %4333 = vmatpush.bf16.msra.mxu3 %v6906_v48  ;;  %v6583_v48 = vld [vmem:[%s14987_s1 + $0x338] sm:$0xf0]  ;;  %v6458_v52 = vor.u32 %v9312_v40, %v6455_v43  ;;  %v9560_v12 = vld [vmem:[%s14987_s1 + $0x9ec] sm:$0xf] }
 0x1d2   :  { %4295 = vmatpush.bf16.msra.mxu0 %v6506_v53  ;;  %v9308_v53 = vld [vmem:[%s14987_s1 + $0x20c] sm:$0xf]  ;;  %v7431_v43 = vld [vmem:[%s14987_s1 + $0x9d8] sm:$0xf0] }
 0x1d3   :  { %4308 = vmatpush.bf16.msra.mxu1 %v6634_v63  ;;  %v6586_v63 = vor.u32 %v9344_v19, %v6583_v48  ;;  %v4069_v60 = vpop.f32.mrf.mxu2  ;;  %v4082_v2 = vpop.f32.mrf.mxu3  ;;  %v9460_v17 = vld [vmem:[%s14987_s1 + $0x6cc] sm:$0xf]  ;;  %v7159_v51 = vld [vmem:[%s14987_s1 + $0x7b8] sm:$0xf0] }
 0x1d4   :  { %4321 = vmatpush.bf16.msra.mxu2 %v6762_v56  ;;  %v6714_v56 = vor.u32 %v9376_v22, %v6711_v54  ;;  %v9492_v24 = vld [vmem:[%s14987_s1 + $0x7cc] sm:$0xf]  ;;  %v7050_v19 = vor.u32 %v9460_v17, %v7047_v21  ;;  %v7031_v22 = vld [vmem:[%s14987_s1 + $0x6b8] sm:$0xf0] }
 0x1d5   :  { %4334 = vmatpush.bf16.msra.mxu3 %v6890_v62  ;;  %v6695_v62 = vld [vmem:[%s14987_s1 + $0x418] sm:$0xf0]  ;;  %v9556_v40 = vld [vmem:[%s14987_s1 + $0x9cc] sm:$0xf]  ;;  %v7178_v45 = vor.u32 %v9492_v24, %v7175_v27 }
 0x1d6   :  { %4296 = vmatpush.bf16.msra.mxu0 %v6490_v4  ;;  %v6442_v4 = vor.u32 %v9308_v53, %v6439_v55  ;;  %v6698_v10 = vor.u32 %v9372_v59, %v6695_v62  ;;  %v9456_v48 = vld [vmem:[%s14987_s1 + $0x6ac] sm:$0xf]  ;;  %v7434_v50 = vor.u32 %v9556_v40, %v7431_v43  ;;  %v7287_v53 = vld [vmem:[%s14987_s1 + $0x8b8] sm:$0xf0] }
 0x1d7   :  { %4309 = vmatpush.bf16.msra.mxu1 %v6618_v5  ;;  %v7191_v5 = vld [vmem:[%s14987_s1 + $0x7f8] sm:$0xf0]  ;;  %v9488_v54 = vld [vmem:[%s14987_s1 + $0x7ac] sm:$0xf] }
 0x1d8   :  { %4322 = vmatpush.bf16.msra.mxu2 %v6746_v6  ;;  %v9528_v6 = vld [vmem:[%s14987_s1 + $0x8ec] sm:$0xf]  ;;  %v7194_v16 = vor.u32 %v9496_v11, %v7191_v5  ;;  %v7015_v59 = vld [vmem:[%s14987_s1 + $0x698] sm:$0xf0] }
 0x1d9   :  { %4335 = vmatpush.bf16.msra.mxu3 %v6874_v13  ;;  %v7447_v13 = vld [vmem:[%s14987_s1 + $0x9f8] sm:$0xf0]  ;;  %v7322_v34 = vor.u32 %v9528_v6, %v7319_v7  ;;  %v9552_v55 = vld [vmem:[%s14987_s1 + $0x9ac] sm:$0xf] }
 0x1da   :  { %4297 = vmatpush.bf16.msra.mxu0 %v6474_v47  ;;  %v7450_v47 = vor.u32 %v9560_v12, %v7447_v13  ;;  %v9452_v58 = vld [vmem:[%s14987_s1 + $0x68c] sm:$0xf]  ;;  %v7399_v0 = vld [vmem:[%s14987_s1 + $0x998] sm:$0xf0] }
 0x1db   :  { %4310 = vmatpush.bf16.msra.mxu1 %v6602_v49  ;;  %v9524_v49 = vld [vmem:[%s14987_s1 + $0x8cc] sm:$0xf]  ;;  %v7018_v1 = vor.u32 %v9452_v58, %v7015_v59  ;;  %v7255_v13 = vld [vmem:[%s14987_s1 + $0x878] sm:$0xf0] }
 0x1dc   :  { %4323 = vmatpush.bf16.msra.mxu2 %v6730_v37  ;;  %v7303_v37 = vld [vmem:[%s14987_s1 + $0x8d8] sm:$0xf0]  ;;  %v9516_v60 = vld [vmem:[%s14987_s1 + $0x88c] sm:$0xf] }
 0x1dd   :  { %4336 = vmatpush.bf16.msra.mxu3 %v6858_v46  ;;  %v7306_v46 = vor.u32 %v9524_v49, %v7303_v37  ;;  %v9548_v62 = vld [vmem:[%s14987_s1 + $0x98c] sm:$0xf]  ;;  %v6983_v24 = vld [vmem:[%s14987_s1 + $0x658] sm:$0xf0] }
 0x1de   :  { %4298 = vmatpush.bf16.msra.mxu0 %v6458_v52  ;;  %v9520_v52 = vld [vmem:[%s14987_s1 + $0x8ac] sm:$0xf]  ;;  %v7111_v37 = vld [vmem:[%s14987_s1 + $0x758] sm:$0xf0] }
 0x1df   :  { %4311 = vmatpush.bf16.msra.mxu1 %v6586_v63  ;;  %v7034_v63 = vor.u32 %v9456_v48, %v7031_v22  ;;  %v7290_v57 = vor.u32 %v9520_v52, %v7287_v53  ;;  %v9448_v11 = vld [vmem:[%s14987_s1 + $0x66c] sm:$0xf]  ;;  %v7239_v43 = vld [vmem:[%s14987_s1 + $0x858] sm:$0xf0] }
 0x1e0   :  { %4324 = vmatpush.bf16.msra.mxu2 %v6714_v56  ;;  %v7162_v56 = vor.u32 %v9488_v54, %v7159_v51  ;;  %v9480_v5 = vld [vmem:[%s14987_s1 + $0x76c] sm:$0xf]  ;;  %v7367_v48 = vld [vmem:[%s14987_s1 + $0x958] sm:$0xf0] }
 0x1e1   :  { %4337 = vmatpush.bf16.msra.mxu3 %v6842_v61  ;;  %v7271_v61 = vld [vmem:[%s14987_s1 + $0x898] sm:$0xf0]  ;;  %v9512_v12 = vld [vmem:[%s14987_s1 + $0x86c] sm:$0xf] }
 0x1e2   :  { %4299 = vmatpush.bf16.msra.mxu0 %v6442_v4  ;;  %v4093_v2 = vpop.f32.mrf.mxu0  ;;  %v7274_v3 = vor.u32 %v9516_v60, %v7271_v61  ;;  %v6999_v4 = vld [vmem:[%s14987_s1 + $0x678] sm:$0xf0]  ;;  %v7258_v17 = vor.u32 %v9512_v12, %v7255_v13  ;;  %v9444_v21 = vld [vmem:[%s14987_s1 + $0x64c] sm:$0xf] }
 0x1e3   :  { %4312 = vmatpush.bf16.msra.mxu1 %v6570_v8  ;;  %v4094_v6 = vadd.f32 %v4093_v2, %v13044_v26  ;;  %v4106_v7 = vpop.f32.mrf.mxu1  ;;  %v7402_v8 = vor.u32 %v9548_v62, %v7399_v0  ;;  %v7383_v26 = vld [vmem:[%s14987_s1 + $0x978] sm:$0xf0]  ;;  %v9508_v40 = vld [vmem:[%s14987_s1 + $0x84c] sm:$0xf]  ;;  %v6986_v22 = vor.u32 %v9444_v21, %v6983_v24 }
 0x1e4   :  { %4325 = vmatpush.bf16.msra.mxu2 %v6698_v10  ;;  %v7127_v10 = vld [vmem:[%s14987_s1 + $0x778] sm:$0xf0]  ;;  %v7242_v52 = vor.u32 %v9508_v40, %v7239_v43  ;;  %v9440_v53 = vld [vmem:[%s14987_s1 + $0x62c] sm:$0xf] }
 0x1e5   :  { %4338 = vmatpush.bf16.msra.mxu3 %v6826_v14  ;;  %4300 = vmatmul.bf16.vlgmr.msra.gmra.mxu0 %v10349_v18  ;;  %v9484_v18 = vld [vmem:[%s14987_s1 + $0x78c] sm:$0xf]  ;;  %v7223_v59 = vld [vmem:[%s14987_s1 + $0x838] sm:$0xf0] }
 0x1e6   :  { %4344 = vmatpush.bf16.msrb.mxu0 %v7066_v15  ;;  %4313 = vmatmul.bf16.vlgmr.msra.gmra.mxu1 %v10353_v20  ;;  %v7143_v20 = vld [vmem:[%s14987_s1 + $0x798] sm:$0xf0]  ;;  %v9544_v14 = vld [vmem:[%s14987_s1 + $0x96c] sm:$0xf]  ;;  %v4107_v15 = vadd.f32 %v4106_v7, %v4094_v6 }
 0x1e7   :  { %4357 = vmatpush.bf16.msrb.mxu1 %v7194_v16  ;;  %4326 = vmatmul.bf16.vlgmr.msra.gmra.mxu2 %v10513_v41  ;;  %v7415_v41 = vld [vmem:[%s14987_s1 + $0x9b8] sm:$0xf0]  ;;  %v7146_v9 = vor.u32 %v9484_v18, %v7143_v20  ;;  %v7002_v16 = vor.u32 %v9448_v11, %v6999_v4  ;;  %v7386_v49 = vor.u32 %v9544_v14, %v7383_v26  ;;  %v9504_v58 = vld [vmem:[%s14987_s1 + $0x82c] sm:$0xf] }
 0x1e8   :  { %4370 = vmatpush.bf16.msrb.mxu2 %v7322_v34  ;;  %4339 = vmatmul.bf16.vlgmr.msra.gmra.mxu3 %v10517_v44  ;;  %v7418_v44 = vor.u32 %v9552_v55, %v7415_v41  ;;  %v7130_v34 = vor.u32 %v9480_v5, %v7127_v10  ;;  %v6967_v55 = vld [vmem:[%s14987_s1 + $0x638] sm:$0xf0]  ;;  %v9472_v41 = vld [vmem:[%s14987_s1 + $0x72c] sm:$0xf]  ;;  %v7226_v0 = vor.u32 %v9504_v58, %v7223_v59 }
 0x1e9   :  { %4383 = vmatpush.bf16.msrb.mxu3 %v7450_v47  ;;  %v9476_v47 = vld [vmem:[%s14987_s1 + $0x74c] sm:$0xf]  ;;  %v6970_v20 = vor.u32 %v9440_v53, %v6967_v55  ;;  %v6951_v61 = vld [vmem:[%s14987_s1 + $0x618] sm:$0xf0] }
 0x1ea   :  { %4345 = vmatpush.bf16.msrb.mxu0 %v7050_v19  ;;  %v4119_v27 = vpop.f32.mrf.mxu2  ;;  %v7114_v51 = vor.u32 %v9476_v47, %v7111_v37  ;;  %v9536_v18 = vld [vmem:[%s14987_s1 + $0x92c] sm:$0xf]  ;;  %v7079_v2 = vld [vmem:[%s14987_s1 + $0x718] sm:$0xf0] }
 0x1eb   :  { %4358 = vmatpush.bf16.msrb.mxu1 %v7178_v45  ;;  %v4120_v19 = vadd.f32 %v4119_v27, %v4107_v15  ;;  %v4132_v45 = vpop.f32.mrf.mxu3  ;;  %v9436_v60 = vld [vmem:[%s14987_s1 + $0x60c] sm:$0xf]  ;;  %v7207_v4 = vld [vmem:[%s14987_s1 + $0x818] sm:$0xf0] }
 0x1ec   :  { %4371 = vmatpush.bf16.msrb.mxu2 %v7306_v46  ;;  %v9540_v46 = vld [vmem:[%s14987_s1 + $0x94c] sm:$0xf]  ;;  %v7335_v6 = vld [vmem:[%s14987_s1 + $0x918] sm:$0xf0]  ;;  %v6954_v13 = vor.u32 %v9436_v60, %v6951_v61 }
 0x1ed   :  { %4384 = vmatpush.bf16.msrb.mxu3 %v7434_v50  ;;  %v13243_v54 = vadd.f32 %v4132_v45, %v4120_v19  ;;  %v4095_v50 = vpop.f32.mrf.mxu0  ;;  %v9532_v5 = vld [vmem:[%s14987_s1 + $0x90c] sm:$0xf]  ;;  %v7575_v10 = vld [vmem:[%s14987_s1 + $0xaf8] sm:$0xf0] }
 0x1ee   :  { %4346 = vmatpush.bf16.msrb.mxu0 %v7034_v63  ;;  %v4108_v63 = vpop.f32.mrf.mxu1  ;;  %v9624_v12 = vld [vmem:[%s14987_s1 + $0xbec] sm:$0xf]  ;;  %v7703_v14 = vld [vmem:[%s14987_s1 + $0xbf8] sm:$0xf0]  ;;  %v7338_v24 = vor.u32 %v9532_v5, %v7335_v6 }
 0x1ef   :  { %4359 = vmatpush.bf16.msrb.mxu1 %v7162_v56  ;;  %v7370_v56 = vor.u32 %v9540_v46, %v7367_v48  ;;  %v9656_v26 = vld [vmem:[%s14987_s1 + $0xcec] sm:$0xf]  ;;  %v7831_v15 = vld [vmem:[%s14987_s1 + $0xcf8] sm:$0xf0]  ;;  %v7706_v27 = vor.u32 %v9624_v12, %v7703_v14 }
 0x1f0   :  { %4372 = vmatpush.bf16.msrb.mxu2 %v7290_v57  ;;  %v7095_v57 = vld [vmem:[%s14987_s1 + $0x738] sm:$0xf0]  ;;  %v9588_v37 = vld [vmem:[%s14987_s1 + $0xacc] sm:$0xf] }
 0x1f1   :  { %4385 = vmatpush.bf16.msrb.mxu3 %v7418_v44  ;;  %v7351_v44 = vld [vmem:[%s14987_s1 + $0x938] sm:$0xf0]  ;;  %v7098_v62 = vor.u32 %v9472_v41, %v7095_v57  ;;  %v9620_v43 = vld [vmem:[%s14987_s1 + $0xbcc] sm:$0xf] }
 0x1f2   :  { %4347 = vmatpush.bf16.msrb.mxu0 %v7018_v1  ;;  %v9468_v1 = vld [vmem:[%s14987_s1 + $0x70c] sm:$0xf]  ;;  %v7354_v11 = vor.u32 %v9536_v18, %v7351_v44  ;;  %v7959_v21 = vld [vmem:[%s14987_s1 + $0xdf8] sm:$0xf0] }
 0x1f3   :  { %4360 = vmatpush.bf16.msrb.mxu1 %v7146_v9  ;;  %v9500_v9 = vld [vmem:[%s14987_s1 + $0x80c] sm:$0xf]  ;;  %v4134_v7 = vpop.f32.mrf.mxu3  ;;  %v7559_v40 = vld [vmem:[%s14987_s1 + $0xad8] sm:$0xf0] }
 0x1f4   :  { %4373 = vmatpush.bf16.msrb.mxu2 %v7274_v3  ;;  %v4121_v3 = vpop.f32.mrf.mxu2  ;;  %v7687_v45 = vld [vmem:[%s14987_s1 + $0xbd8] sm:$0xf0]  ;;  %v9652_v46 = vld [vmem:[%s14987_s1 + $0xccc] sm:$0xf] }
 0x1f5   :  { %4386 = vmatpush.bf16.msrb.mxu3 %v7402_v8  ;;  %v9592_v8 = vld [vmem:[%s14987_s1 + $0xaec] sm:$0xf]  ;;  %v7815_v48 = vld [vmem:[%s14987_s1 + $0xcd8] sm:$0xf0] }
 0x1f6   :  { %4348 = vmatpush.bf16.msrb.mxu0 %v7002_v16  ;;  %v7082_v16 = vor.u32 %v9468_v1, %v7079_v2  ;;  %v7578_v47 = vor.u32 %v9592_v8, %v7575_v10  ;;  %v7943_v50 = vld [vmem:[%s14987_s1 + $0xdd8] sm:$0xf0]  ;;  %v7818_v53 = vor.u32 %v9652_v46, %v7815_v48  ;;  %v9584_v55 = vld [vmem:[%s14987_s1 + $0xaac] sm:$0xf] }
 0x1f7   :  { %4361 = vmatpush.bf16.msrb.mxu1 %v7130_v34  ;;  %v7210_v34 = vor.u32 %v9500_v9, %v7207_v4  ;;  %v7543_v41 = vld [vmem:[%s14987_s1 + $0xab8] sm:$0xf0]  ;;  %v9616_v63 = vld [vmem:[%s14987_s1 + $0xbac] sm:$0xf] }
 0x1f8   :  { %4374 = vmatpush.bf16.msrb.mxu2 %v7258_v17  ;;  %v9688_v17 = vld [vmem:[%s14987_s1 + $0xdec] sm:$0xf]  ;;  %v7671_v57 = vld [vmem:[%s14987_s1 + $0xbb8] sm:$0xf0]  ;;  %v7546_v44 = vor.u32 %v9584_v55, %v7543_v41 }
 0x1f9   :  { %4387 = vmatpush.bf16.msrb.mxu3 %v7386_v49  ;;  %v7834_v49 = vor.u32 %v9656_v26, %v7831_v15  ;;  %v7962_v19 = vor.u32 %v9688_v17, %v7959_v21  ;;  %v9648_v58 = vld [vmem:[%s14987_s1 + $0xcac] sm:$0xf]  ;;  %v7799_v59 = vld [vmem:[%s14987_s1 + $0xcb8] sm:$0xf0] }
 0x1fa   :  { %4349 = vmatpush.bf16.msrb.mxu0 %v6986_v22  ;;  %v9684_v22 = vld [vmem:[%s14987_s1 + $0xdcc] sm:$0xf]  ;;  %v7927_v18 = vld [vmem:[%s14987_s1 + $0xdb8] sm:$0xf0]  ;;  %v7802_v60 = vor.u32 %v9648_v58, %v7799_v59 }
 0x1fb   :  { %4362 = vmatpush.bf16.msrb.mxu1 %v7114_v51  ;;  %v7562_v51 = vor.u32 %v9588_v37, %v7559_v40  ;;  %v9612_v61 = vld [vmem:[%s14987_s1 + $0xb8c] sm:$0xf]  ;;  %v7783_v1 = vld [vmem:[%s14987_s1 + $0xc98] sm:$0xf0] }
 0x1fc   :  { %4375 = vmatpush.bf16.msrb.mxu2 %v7242_v52  ;;  %v7690_v52 = vor.u32 %v9620_v43, %v7687_v45  ;;  %v9676_v9 = vld [vmem:[%s14987_s1 + $0xd8c] sm:$0xf]  ;;  %v7911_v3 = vld [vmem:[%s14987_s1 + $0xd98] sm:$0xf0] }
 0x1fd   :  { %4388 = vmatpush.bf16.msrb.mxu3 %v7370_v56  ;;  %v7946_v56 = vor.u32 %v9684_v22, %v7943_v50  ;;  %v9576_v8 = vld [vmem:[%s14987_s1 + $0xa6c] sm:$0xf]  ;;  %v7511_v10 = vld [vmem:[%s14987_s1 + $0xa78] sm:$0xf0] }
 0x1fe   :  { %4350 = vmatpush.bf16.msrb.mxu0 %v6970_v20  ;;  %v7674_v20 = vor.u32 %v9616_v63, %v7671_v57  ;;  %v9608_v12 = vld [vmem:[%s14987_s1 + $0xb6c] sm:$0xf]  ;;  %v7639_v14 = vld [vmem:[%s14987_s1 + $0xb78] sm:$0xf0]  ;;  %v7514_v17 = vor.u32 %v9576_v8, %v7511_v10 }
 0x1ff   :  { %4363 = vmatpush.bf16.msrb.mxu1 %v7098_v62  ;;  %v7655_v62 = vld [vmem:[%s14987_s1 + $0xb98] sm:$0xf0]  ;;  %v9640_v26 = vld [vmem:[%s14987_s1 + $0xc6c] sm:$0xf]  ;;  %v7642_v21 = vor.u32 %v9608_v12, %v7639_v14 }
 0x200   :  { %4376 = vmatpush.bf16.msrb.mxu2 %v7226_v0  ;;  %v9644_v0 = vld [vmem:[%s14987_s1 + $0xc8c] sm:$0xf]  ;;  %v7658_v6 = vor.u32 %v9612_v61, %v7655_v62  ;;  %v7767_v15 = vld [vmem:[%s14987_s1 + $0xc78] sm:$0xf0] }
 0x201   :  { %4389 = vmatpush.bf16.msrb.mxu3 %v7354_v11  ;;  %v7786_v7 = vor.u32 %v9644_v0, %v7783_v1  ;;  %v7623_v43 = vld [vmem:[%s14987_s1 + $0xb58] sm:$0xf0]  ;;  %v9668_v22 = vld [vmem:[%s14987_s1 + $0xd4c] sm:$0xf] }
 0x202   :  { %4351 = vmatpush.bf16.msrb.mxu0 %v6954_v13  ;;  %v4145_v2 = vpop.f32.mrf.mxu0  ;;  %v7751_v45 = vld [vmem:[%s14987_s1 + $0xc58] sm:$0xf0]  ;;  %v9600_v58 = vld [vmem:[%s14987_s1 + $0xb2c] sm:$0xf] }
 0x203   :  { %4364 = vmatpush.bf16.msrb.mxu1 %v7082_v16  ;;  %v4146_v11 = vadd.f32 %v4145_v2, %v13243_v54  ;;  %v4158_v5 = vpop.f32.mrf.mxu1  ;;  %v7914_v54 = vor.u32 %v9676_v9, %v7911_v3  ;;  %v9672_v16 = vld [vmem:[%s14987_s1 + $0xd6c] sm:$0xf]  ;;  %v7879_v50 = vld [vmem:[%s14987_s1 + $0xd58] sm:$0xf0] }
 0x204   :  { %4377 = vmatpush.bf16.msrb.mxu2 %v7210_v34  ;;  %v7895_v34 = vld [vmem:[%s14987_s1 + $0xd78] sm:$0xf0]  ;;  %v7882_v59 = vor.u32 %v9668_v22, %v7879_v50  ;;  %v9596_v0 = vld [vmem:[%s14987_s1 + $0xb0c] sm:$0xf] }
 0x205   :  { %4390 = vmatpush.bf16.msrb.mxu3 %v7338_v24  ;;  %4352 = vmatmul.bf16.vlgmr.msrb.gmra.mxu0 %v10505_v38  ;;  %v9680_v38 = vld [vmem:[%s14987_s1 + $0xdac] sm:$0xf]  ;;  %v4159_v13 = vadd.f32 %v4158_v5, %v4146_v11  ;;  %v7770_v24 = vor.u32 %v9640_v26, %v7767_v15  ;;  %v7898_v37 = vor.u32 %v9672_v16, %v7895_v34  ;;  %v7479_v57 = vld [vmem:[%s14987_s1 + $0xa38] sm:$0xf0] }
 0x206   :  { %4396 = vmatpush.bf16.msra.mxu0 %v7578_v47  ;;  %4365 = vmatmul.bf16.vlgmr.msrb.gmra.mxu1 %v10515_v42  ;;  %v9580_v42 = vld [vmem:[%s14987_s1 + $0xa8c] sm:$0xf]  ;;  %v7463_v61 = vld [vmem:[%s14987_s1 + $0xa18] sm:$0xf0] }
 0x207   :  { %4409 = vmatpush.bf16.msra.mxu1 %v7706_v27  ;;  %4378 = vmatmul.bf16.vlgmr.msrb.gmra.mxu2 %v10706_v25  ;;  %v7527_v25 = vld [vmem:[%s14987_s1 + $0xa98] sm:$0xf0]  ;;  %v9572_v47 = vld [vmem:[%s14987_s1 + $0xa4c] sm:$0xf] }
 0x208   :  { %4422 = vmatpush.bf16.msra.mxu2 %v7834_v49  ;;  %4391 = vmatmul.bf16.vlgmr.msrb.gmra.mxu3 %v10719_v30  ;;  %v7930_v30 = vor.u32 %v9680_v38, %v7927_v18  ;;  %v7530_v4 = vor.u32 %v9580_v42, %v7527_v25  ;;  %v7495_v27 = vld [vmem:[%s14987_s1 + $0xa58] sm:$0xf0]  ;;  %v9604_v49 = vld [vmem:[%s14987_s1 + $0xb4c] sm:$0xf] }
 0x209   :  { %4435 = vmatpush.bf16.msra.mxu3 %v7962_v19  ;;  %v9636_v19 = vld [vmem:[%s14987_s1 + $0xc4c] sm:$0xf]  ;;  %v7626_v41 = vor.u32 %v9604_v49, %v7623_v43  ;;  %v7607_v38 = vld [vmem:[%s14987_s1 + $0xb38] sm:$0xf0] }
 0x20a   :  { %4397 = vmatpush.bf16.msra.mxu0 %v7562_v51  ;;  %v4171_v40 = vpop.f32.mrf.mxu2  ;;  %v4147_v51 = vpop.f32.mrf.mxu0  ;;  %v7754_v63 = vor.u32 %v9636_v19, %v7751_v45  ;;  %v9632_v18 = vld [vmem:[%s14987_s1 + $0xc2c] sm:$0xf]  ;;  %v7591_v1 = vld [vmem:[%s14987_s1 + $0xb18] sm:$0xf0] }
 0x20b   :  { %4410 = vmatpush.bf16.msra.mxu1 %v7690_v52  ;;  %v4172_v46 = vadd.f32 %v4171_v40, %v4159_v13  ;;  %v4184_v48 = vpop.f32.mrf.mxu3  ;;  %v7498_v52 = vor.u32 %v9572_v47, %v7495_v27  ;;  %v9564_v25 = vld [vmem:[%s14987_s1 + $0xa0c] sm:$0xf]  ;;  %v7719_v3 = vld [vmem:[%s14987_s1 + $0xc18] sm:$0xf0]  ;;  %v7594_v26 = vor.u32 %v9596_v0, %v7591_v1 }
 0x20c   :  { %4423 = vmatpush.bf16.msra.mxu2 %v7818_v53  ;;  %v4160_v53 = vpop.f32.mrf.mxu1  ;;  %v9628_v2 = vld [vmem:[%s14987_s1 + $0xc0c] sm:$0xf]  ;;  %v7466_v12 = vor.u32 %v9564_v25, %v7463_v61  ;;  %v8343_v14 = vld [vmem:[%s14987_s1 + $0x10f8] sm:$0xf0] }
 0x20d   :  { %4436 = vmatpush.bf16.msra.mxu3 %v7946_v56  ;;  %v13442_v55 = vadd.f32 %v4184_v48, %v4172_v46  ;;  %v9568_v56 = vld [vmem:[%s14987_s1 + $0xa2c] sm:$0xf]  ;;  %v7722_v15 = vor.u32 %v9628_v2, %v7719_v3  ;;  %v8471_v34 = vld [vmem:[%s14987_s1 + $0x11f8] sm:$0xf0] }
 0x20e   :  { %4398 = vmatpush.bf16.msra.mxu0 %v7546_v44  ;;  %v7735_v44 = vld [vmem:[%s14987_s1 + $0xc38] sm:$0xf0]  ;;  %v7482_v42 = vor.u32 %v9568_v56, %v7479_v57  ;;  %v9660_v11 = vld [vmem:[%s14987_s1 + $0xd0c] sm:$0xf] }
 0x20f   :  { %4411 = vmatpush.bf16.msra.mxu1 %v7674_v20  ;;  %v9664_v20 = vld [vmem:[%s14987_s1 + $0xd2c] sm:$0xf]  ;;  %v7738_v62 = vor.u32 %v9632_v18, %v7735_v44  ;;  %v8071_v49 = vld [vmem:[%s14987_s1 + $0xed8] sm:$0xf0] }
 0x210   :  { %4424 = vmatpush.bf16.msra.mxu2 %v7802_v60  ;;  %v7863_v60 = vld [vmem:[%s14987_s1 + $0xd38] sm:$0xf0]  ;;  %v9752_v8 = vld [vmem:[%s14987_s1 + $0xfec] sm:$0xf] }
 0x211   :  { %4437 = vmatpush.bf16.msra.mxu3 %v7930_v30  ;;  %v7610_v30 = vor.u32 %v9600_v58, %v7607_v38  ;;  %v7866_v9 = vor.u32 %v9664_v20, %v7863_v60  ;;  %v9784_v13 = vld [vmem:[%s14987_s1 + $0x10ec] sm:$0xf]  ;;  %v8199_v43 = vld [vmem:[%s14987_s1 + $0xfd8] sm:$0xf0] }
 0x212   :  { %4399 = vmatpush.bf16.msra.mxu0 %v7530_v4  ;;  %v7847_v4 = vld [vmem:[%s14987_s1 + $0xd18] sm:$0xf0]  ;;  %v4173_v5 = vpop.f32.mrf.mxu2  ;;  %v9816_v16 = vld [vmem:[%s14987_s1 + $0x11ec] sm:$0xf]  ;;  %v8346_v47 = vor.u32 %v9784_v13, %v8343_v14 }
 0x213   :  { %4412 = vmatpush.bf16.msra.mxu1 %v7658_v6  ;;  %v9720_v6 = vld [vmem:[%s14987_s1 + $0xeec] sm:$0xf]  ;;  %v4186_v10 = vpop.f32.mrf.mxu3  ;;  %v8474_v40 = vor.u32 %v9816_v16, %v8471_v34  ;;  %v8327_v45 = vld [vmem:[%s14987_s1 + $0x10d8] sm:$0xf0] }
 0x214   :  { %4425 = vmatpush.bf16.msra.mxu2 %v7786_v7  ;;  %v8087_v7 = vld [vmem:[%s14987_s1 + $0xef8] sm:$0xf0]  ;;  %v9716_v27 = vld [vmem:[%s14987_s1 + $0xecc] sm:$0xf] }
 0x215   :  { %4438 = vmatpush.bf16.msra.mxu3 %v7914_v54  ;;  %v8215_v54 = vld [vmem:[%s14987_s1 + $0xff8] sm:$0xf0]  ;;  %v9780_v19 = vld [vmem:[%s14987_s1 + $0x10cc] sm:$0xf]  ;;  %v8074_v22 = vor.u32 %v9716_v27, %v8071_v49 }
 0x216   :  { %4400 = vmatpush.bf16.msra.mxu0 %v7514_v17  ;;  %v7850_v17 = vor.u32 %v9660_v11, %v7847_v4  ;;  %v9812_v46 = vld [vmem:[%s14987_s1 + $0x11cc] sm:$0xf]  ;;  %v8455_v48 = vld [vmem:[%s14987_s1 + $0x11d8] sm:$0xf0]  ;;  %v8330_v51 = vor.u32 %v9780_v19, %v8327_v45 }
 0x217   :  { %4413 = vmatpush.bf16.msra.mxu1 %v7642_v21  ;;  %v8090_v21 = vor.u32 %v9720_v6, %v8087_v7  ;;  %v8055_v53 = vld [vmem:[%s14987_s1 + $0xeb8] sm:$0xf0]  ;;  %v9776_v57 = vld [vmem:[%s14987_s1 + $0x10ac] sm:$0xf] }
 0x218   :  { %4426 = vmatpush.bf16.msra.mxu2 %v7770_v24  ;;  %v8218_v24 = vor.u32 %v9752_v8, %v8215_v54  ;;  %v8183_v56 = vld [vmem:[%s14987_s1 + $0xfb8] sm:$0xf0]  ;;  %v9740_v20 = vld [vmem:[%s14987_s1 + $0xf8c] sm:$0xf] }
 0x219   :  { %4439 = vmatpush.bf16.msra.mxu3 %v7898_v37  ;;  %v9748_v37 = vld [vmem:[%s14987_s1 + $0xfcc] sm:$0xf]  ;;  %v8311_v58 = vld [vmem:[%s14987_s1 + $0x10b8] sm:$0xf0] }
 0x21a   :  { %4401 = vmatpush.bf16.msra.mxu0 %v7498_v52  ;;  %v8202_v50 = vor.u32 %v9748_v37, %v8199_v43  ;;  %v9712_v52 = vld [vmem:[%s14987_s1 + $0xeac] sm:$0xf]  ;;  %v8314_v44 = vor.u32 %v9776_v57, %v8311_v58  ;;  %v8167_v60 = vld [vmem:[%s14987_s1 + $0xf98] sm:$0xf0] }
 0x21b   :  { %4414 = vmatpush.bf16.msra.mxu1 %v7626_v41  ;;  %v9744_v41 = vld [vmem:[%s14987_s1 + $0xfac] sm:$0xf]  ;;  %v8058_v38 = vor.u32 %v9712_v52, %v8055_v53  ;;  %v8295_v25 = vld [vmem:[%s14987_s1 + $0x1098] sm:$0xf0] }
 0x21c   :  { %4427 = vmatpush.bf16.msra.mxu2 %v7754_v63  ;;  %v8458_v63 = vor.u32 %v9812_v46, %v8455_v48  ;;  %v8186_v18 = vor.u32 %v9744_v41, %v8183_v56  ;;  %v9704_v11 = vld [vmem:[%s14987_s1 + $0xe6c] sm:$0xf]  ;;  %v8023_v4 = vld [vmem:[%s14987_s1 + $0xe78] sm:$0xf0] }
 0x21d   :  { %4440 = vmatpush.bf16.msra.mxu3 %v7882_v59  ;;  %v8439_v59 = vld [vmem:[%s14987_s1 + $0x11b8] sm:$0xf0]  ;;  %v9736_v5 = vld [vmem:[%s14987_s1 + $0xf6c] sm:$0xf]  ;;  %v8026_v13 = vor.u32 %v9704_v11, %v8023_v4  ;;  %v9825_v4 = vld [vmem:[%s14990_s3 + $0x30] sm:$0xff] }
 0x21e   :  { %4402 = vmatpush.bf16.msra.mxu0 %v7482_v42  ;;  %v9772_v42 = vld [vmem:[%s14987_s1 + $0x108c] sm:$0xf]  ;;  %v8151_v7 = vld [vmem:[%s14987_s1 + $0xf78] sm:$0xf0] }
 0x21f   :  { %4415 = vmatpush.bf16.msra.mxu1 %v7610_v30  ;;  %v9804_v30 = vld [vmem:[%s14987_s1 + $0x118c] sm:$0xf]  ;;  %v8298_v3 = vor.u32 %v9772_v42, %v8295_v25  ;;  %v8279_v10 = vld [vmem:[%s14987_s1 + $0x1078] sm:$0xf0]  ;;  %v8154_v14 = vor.u32 %v9736_v5, %v8151_v7  ;;  %v9833_v5 = vld [vmem:[%s14990_s3 + $0x70] sm:$0xff] }
 0x220   :  { %4428 = vmatpush.bf16.msra.mxu2 %v7738_v62  ;;  %v8423_v62 = vld [vmem:[%s14987_s1 + $0x1198] sm:$0xf0]  ;;  %v9768_v8 = vld [vmem:[%s14987_s1 + $0x106c] sm:$0xf] }
 0x221   :  { %4441 = vmatpush.bf16.msra.mxu3 %v7866_v9  ;;  %v8170_v9 = vor.u32 %v9740_v20, %v8167_v60  ;;  %v8407_v54 = vld [vmem:[%s14987_s1 + $0x1178] sm:$0xf0]  ;;  %v9732_v34 = vld [vmem:[%s14987_s1 + $0xf4c] sm:$0xf] }
 0x222   :  { %4403 = vmatpush.bf16.msra.mxu0 %v7466_v12  ;;  %v4197_v61 = vpop.f32.mrf.mxu0  ;;  %v9800_v12 = vld [vmem:[%s14987_s1 + $0x116c] sm:$0xf]  ;;  %v8007_v16 = vld [vmem:[%s14987_s1 + $0xe58] sm:$0xf0] }
 0x223   :  { %4416 = vmatpush.bf16.msra.mxu1 %v7594_v26  ;;  %v4198_v0 = vadd.f32 %v4197_v61, %v13442_v55  ;;  %v4210_v2 = vpop.f32.mrf.mxu1  ;;  %v8426_v55 = vor.u32 %v9804_v30, %v8423_v62  ;;  %v8282_v26 = vor.u32 %v9768_v8, %v8279_v10  ;;  %v8263_v27 = vld [vmem:[%s14987_s1 + $0x1058] sm:$0xf0]  ;;  %v9728_v53 = vld [vmem:[%s14987_s1 + $0xf2c] sm:$0xf]  ;;  %v10014_v10 = vld [vmem:[%s14989_s2] sm:$0xf] }
 0x224   :  { %4429 = vmatpush.bf16.msra.mxu2 %v7722_v15  ;;  %v9700_v15 = vld [vmem:[%s14987_s1 + $0xe4c] sm:$0xf]  ;;  %v8391_v43 = vld [vmem:[%s14987_s1 + $0x1158] sm:$0xf0] }
 0x225   :  { %4442 = vmatpush.bf16.msra.mxu3 %v7850_v17  ;;  %4404 = vmatmul.bf16.vlgmr.msra.gmra.mxu0 %v10717_v29  ;;  %v9808_v29 = vld [vmem:[%s14987_s1 + $0x11ac] sm:$0xf]  ;;  %v4211_v6 = vadd.f32 %v4210_v2, %v4198_v0  ;;  %v8410_v17 = vor.u32 %v9800_v12, %v8407_v54  ;;  %v8010_v45 = vor.u32 %v9700_v15, %v8007_v16  ;;  %v7991_v52 = vld [vmem:[%s14987_s1 + $0xe38] sm:$0xf0]  ;;  %v616_v12 = vperm.slane %v10014_v10, 3 }
 0x226   :  { %4448 = vmatpush.bf16.msrb.mxu0 %v8090_v21  ;;  %4417 = vmatmul.bf16.vlgmr.msra.gmra.mxu1 %v10727_v33  ;;  %v9708_v33 = vld [vmem:[%s14987_s1 + $0xe8c] sm:$0xf]  ;;  %v8247_v57 = vld [vmem:[%s14987_s1 + $0x1038] sm:$0xf0] }
 0x227   :  { %4461 = vmatpush.bf16.msrb.mxu1 %v8218_v24  ;;  %4430 = vmatmul.bf16.vlgmr.msra.gmra.mxu2 %v10916_v23  ;;  %v8039_v23 = vld [vmem:[%s14987_s1 + $0xe98] sm:$0xf0]  ;;  %v9760_v56 = vld [vmem:[%s14987_s1 + $0x102c] sm:$0xf] }
 0x228   :  { %4474 = vmatpush.bf16.msrb.mxu2 %v8346_v47  ;;  %4443 = vmatmul.bf16.vlgmr.msra.gmra.mxu3 %v10929_v31  ;;  %v8442_v31 = vor.u32 %v9808_v29, %v8439_v59  ;;  %v8042_v1 = vor.u32 %v9708_v33, %v8039_v23  ;;  %v8135_v24 = vld [vmem:[%s14987_s1 + $0xf58] sm:$0xf0]  ;;  %v9764_v47 = vld [vmem:[%s14987_s1 + $0x104c] sm:$0xf] }
 0x229   :  { %4487 = vmatpush.bf16.msrb.mxu3 %v8474_v40  ;;  %v9796_v40 = vld [vmem:[%s14987_s1 + $0x114c] sm:$0xf]  ;;  %v8375_v29 = vld [vmem:[%s14987_s1 + $0x1138] sm:$0xf0] }
 0x22a   :  { %4449 = vmatpush.bf16.msrb.mxu0 %v8074_v22  ;;  %v4223_v21 = vpop.f32.mrf.mxu2  ;;  %v4199_v19 = vpop.f32.mrf.mxu0  ;;  %v8138_v22 = vor.u32 %v9732_v34, %v8135_v24  ;;  %v8394_v41 = vor.u32 %v9796_v40, %v8391_v43  ;;  %v9792_v58 = vld [vmem:[%s14987_s1 + $0x112c] sm:$0xf]  ;;  %v7975_v33 = vld [vmem:[%s14987_s1 + $0xe18] sm:$0xf0]  ;;  %v9821_v34 = vld [vmem:[%s14990_s3 + $0x10] sm:$0xff]  ;;  %v4543_v43 = vunpack.c.l.b16 %v12873_v36 }
 0x22b   :  { %4462 = vmatpush.bf16.msrb.mxu1 %v8202_v50  ;;  %v4224_v49 = vadd.f32 %v4223_v21, %v4211_v6  ;;  %v4236_v37 = vpop.f32.mrf.mxu3  ;;  %v4212_v46 = vpop.f32.mrf.mxu1  ;;  %v8266_v50 = vor.u32 %v9764_v47, %v8263_v27  ;;  %v9724_v23 = vld [vmem:[%s14987_s1 + $0xf0c] sm:$0xf]  ;;  %v8378_v20 = vor.u32 %v9792_v58, %v8375_v29  ;;  %v8231_v42 = vld [vmem:[%s14987_s1 + $0x1018] sm:$0xf0]  ;;  %v9829_v21 = vld [vmem:[%s14990_s3 + $0x50] sm:$0xff] }
 0x22c   :  { %4475 = vmatpush.bf16.msrb.mxu2 %v8330_v51  ;;  %v9696_v51 = vld [vmem:[%s14987_s1 + $0xe2c] sm:$0xf]  ;;  %v8359_v30 = vld [vmem:[%s14987_s1 + $0x1118] sm:$0xf0]  ;;  %v9819_v40 = vld [vmem:[%s14990_s3] sm:$0xff]  ;;  %v4545_v46 = vpack.c.b16 %v4543_v43, %v4543_v43 }
 0x22d   :  { %4488 = vmatpush.bf16.msrb.mxu3 %v8458_v63  ;;  %v4237_v48 = vadd.f32 %v4236_v37, %v4224_v49  ;;  %v8119_v63 = vld [vmem:[%s14987_s1 + $0xf38] sm:$0xf0]  ;;  %v7994_v59 = vor.u32 %v9696_v51, %v7991_v52  ;;  %v9756_v60 = vld [vmem:[%s14987_s1 + $0x100c] sm:$0xf]  ;;  %v9827_v19 = vld [vmem:[%s14990_s3 + $0x40] sm:$0xff] }
 0x22e   :  { %4450 = vmatpush.bf16.msrb.mxu0 %v8058_v38  ;;  %v8122_v38 = vor.u32 %v9728_v53, %v8119_v63  ;;  %v9788_v61 = vld [vmem:[%s14987_s1 + $0x110c] sm:$0xf]  ;;  %v8234_v2 = vor.u32 %v9756_v60, %v8231_v42  ;;  %v9834_v11 = vld [vmem:[%s14990_s3 + $0x78] sm:$0xff]  ;;  %v8805_v42 = vld [vmem:[%s14992_s5 + $0x210] sm:$0xf] }
 0x22f   :  { %4463 = vmatpush.bf16.msrb.mxu1 %v8186_v18  ;;  %v8250_v18 = vor.u32 %v9760_v56, %v8247_v57  ;;  %v9822_v54 = vld [vmem:[%s14990_s3 + $0x18] sm:$0xff]  ;;  %v9820_v47 = vld [vmem:[%s14990_s3 + $0x8] sm:$0xff] }
 0x230   :  { %4476 = vmatpush.bf16.msrb.mxu2 %v8314_v44  ;;  %v9692_v44 = vld [vmem:[%s14987_s1 + $0xe0c] sm:$0xf]  ;;  %v8849_v56 = vld [vmem:[%s14992_s5 + $0x268] sm:$0xf]  ;;  %v9203_v60 = vld [vmem:[%s14992_s5 + $0x554] sm:$0xf0] }
 0x231   :  { %4489 = vmatpush.bf16.msrb.mxu3 %v8442_v31  ;;  %v8103_v31 = vld [vmem:[%s14987_s1 + $0xf18] sm:$0xf0]  ;;  %v7978_v0 = vor.u32 %v9692_v44, %v7975_v33  ;;  %v9828_v27 = vld [vmem:[%s14990_s3 + $0x48] sm:$0xff]  ;;  %v8851_v44 = vld [vmem:[%s14992_s5 + $0x294] sm:$0xf0] }
 0x232   :  { %4451 = vmatpush.bf16.msrb.mxu0 %v8042_v1  ;;  %v4225_v25 = vpop.f32.mrf.mxu2  ;;  %v8106_v1 = vor.u32 %v9724_v23, %v8103_v31  ;;  %v9201_v57 = vld [vmem:[%s14992_s5 + $0x528] sm:$0xf]  ;;  %v10000_v31 = vld [vmem:[%s14992_s5 + $0x52c] sm:$0xf] }
 0x233   :  { %4464 = vmatpush.bf16.msrb.mxu1 %v8170_v9  ;;  %v4238_v62 = vpop.f32.mrf.mxu3  ;;  %v8362_v9 = vor.u32 %v9788_v61, %v8359_v30  ;;  %v9206_v25 = vor.u32 %v10000_v31, %v9203_v60  ;;  %v9906_v61 = vld [vmem:[%s14992_s5 + $0x238] sm:$0xf0]  ;;  %v9157_v30 = vld [vmem:[%s14992_s5 + $0x4d0] sm:$0xf]  ;;  %v9857_v60 = vld [vmem:[%s14992_s5 + $0xb4] sm:$0xf] }
 0x234   :  { %4477 = vmatpush.bf16.msrb.mxu2 %v8298_v3  ;;  %v9826_v3 = vld [vmem:[%s14990_s3 + $0x38] sm:$0xff] }
 0x235   :  { %4490 = vmatpush.bf16.msrb.mxu3 %v8426_v55  ;;  %v9824_v55 = vld [vmem:[%s14990_s3 + $0x28] sm:$0xff]  ;;  %v9994_v62 = vld [vmem:[%s14992_s5 + $0x4f8] sm:$0xf0] }
 0x236   :  { %4452 = vmatpush.bf16.msrb.mxu0 %v8026_v13  ;;  %v9830_v13 = vld [vmem:[%s14990_s3 + $0x58] sm:$0xff] }
 0x237   :  { %4465 = vmatpush.bf16.msrb.mxu1 %v8154_v14  ;;  %v9950_v31 = vld [vmem:[%s14992_s5 + $0x398] sm:$0xf0] }
 0x238   :  { %4478 = vmatpush.bf16.msrb.mxu2 %v8282_v26 }
 0x239   :  { %4491 = vmatpush.bf16.msrb.mxu3 %v8410_v17 }
 0x23a   :  { %4453 = vmatpush.bf16.msrb.mxu0 %v8010_v45  ;;  %v4544_v45 = vunpack.c.h.b16 %v12873_v36  ;;  %v9917_v36 = vld [vmem:[%s14992_s5 + $0x290] sm:$0xf0] }
 0x23b   :  { %4466 = vmatpush.bf16.msrb.mxu1 %v8138_v22 }
 0x23c   :  { %4479 = vmatpush.bf16.msrb.mxu2 %v8266_v50 }
 0x23d   :  { %4492 = vmatpush.bf16.msrb.mxu3 %v8394_v41 }
 0x23e   :  { %4454 = vmatpush.bf16.msrb.mxu0 %v7994_v59  ;;  %v8850_v59 = vor.u32 %v9917_v36, %v8849_v56  ;;  %v9956_v36 = vld [vmem:[%s14992_s5 + $0x3cc] sm:$0xf] }
 0x23f   :  { %4467 = vmatpush.bf16.msrb.mxu1 %v8122_v38  ;;  %v10005_v38 = vld [vmem:[%s14992_s5 + $0x550] sm:$0xf0] }
 0x240   :  { %4480 = vmatpush.bf16.msrb.mxu2 %v8250_v18  ;;  %v9912_v18 = vld [vmem:[%s14992_s5 + $0x26c] sm:$0xf]  ;;  %v9202_v23 = vor.u32 %v10005_v38, %v9201_v57  ;;  %v9027_v57 = vld [vmem:[%s14992_s5 + $0x3f4] sm:$0xf0]  ;;  %v8629_v38 = vld [vmem:[%s14992_s5 + $0xb0] sm:$0xf] }
 0x241   :  { %4493 = vmatpush.bf16.msrb.mxu3 %v8378_v20  ;;  %v8854_v20 = vor.u32 %v9912_v18, %v8851_v44  ;;  %v9862_v18 = vld [vmem:[%s14992_s5 + $0xd8] sm:$0xf0]  ;;  %v8981_v44 = vld [vmem:[%s14992_s5 + $0x370] sm:$0xf] }
 0x242   :  { %4455 = vmatpush.bf16.msrb.mxu0 %v7978_v0  ;;  %v4249_v6 = vpop.f32.mrf.mxu0  ;;  %v8806_v0 = vor.u32 %v9906_v61, %v8805_v42  ;;  %v8631_v42 = vld [vmem:[%s14992_s5 + $0xdc] sm:$0xf0]  ;;  %v8982_v61 = vor.u32 %v9950_v31, %v8981_v44  ;;  %v9167_v44 = vld [vmem:[%s14992_s5 + $0x504] sm:$0xf0] }
 0x243   :  { %4468 = vmatpush.bf16.msrb.mxu1 %v8106_v1  ;;  %v4250_v7 = vadd.f32 %v4249_v6, %v4237_v48  ;;  %v4546_v48 = vpack.c.b16 %v4544_v45, %v4544_v45  ;;  %v9158_v1 = vor.u32 %v9994_v62, %v9157_v30  ;;  %v9071_v45 = vld [vmem:[%s14992_s5 + $0x44c] sm:$0xf0]  ;;  %v8634_v30 = vor.u32 %v9857_v60, %v8631_v42  ;;  %v9945_v62 = vld [vmem:[%s14992_s5 + $0x374] sm:$0xf]  ;;  %v8769_v31 = vld [vmem:[%s14992_s5 + $0x1c0] sm:$0xf] }
 0x244   :  { %4481 = vmatpush.bf16.msrb.mxu2 %v8234_v2  ;;  %v9901_v2 = vld [vmem:[%s14992_s5 + $0x214] sm:$0xf]  ;;  %v9896_v60 = vld [vmem:[%s14992_s5 + $0x1e8] sm:$0xf0]  ;;  %v9121_v42 = vld [vmem:[%s14992_s5 + $0x480] sm:$0xf] }
 0x245   :  { %4494 = vmatpush.bf16.msrb.mxu3 %v8362_v9  ;;  %4456 = vmatmul.bf16.vlgmr.msrb.gmra.mxu0 %v10927_v28  ;;  %v9832_v28 = vld [vmem:[%s14990_s3 + $0x68] sm:$0xff]  ;;  %v8807_v9 = vld [vmem:[%s14992_s5 + $0x23c] sm:$0xf0] }
 0x246   :  { %4645 = vmatpush.bf16.msra.mxu0 %v9826_v3  ;;  %4469 = vmatmul.bf16.vlgmr.msrb.gmra.mxu1 %v10937_v35  ;;  %v9823_v35 = vld [vmem:[%s14990_s3 + $0x20] sm:$0xff]  ;;  %v9989_v3 = vld [vmem:[%s14992_s5 + $0x4d4] sm:$0xf] }
 0x247   :  { %4658 = vmatpush.bf16.msra.mxu1 %v9834_v11  ;;  %4482 = vmatmul.bf16.vlgmr.msrb.gmra.mxu2 %v11123_v32  ;;  %v4262_v32 = vpop.f32.mrf.mxu1  ;;  %v8810_v11 = vor.u32 %v9901_v2, %v8807_v9  ;;  %v9851_v9 = vld [vmem:[%s14992_s5 + $0x80] sm:$0xf0] }
 0x248   :  { %4495 = vmatmul.bf16.vlgmr.msrb.gmra.mxu3 %v11134_v39  ;;  %v9831_v39 = vld [vmem:[%s14990_s3 + $0x60] sm:$0xff]  ;;  %v13717_v8 = vadd.f32 %v4262_v32, %v4250_v7  ;;  %5792 = vmatpush.bf16.msra.mxu2 %v8850_v59  ;;  %v9113_v7 = vld [vmem:[%s14992_s5 + $0x478] sm:$0xf]  ;;  %v9890_v32 = vld [vmem:[%s14992_s5 + $0x1bc] sm:$0xf] }
 0x249   :  { %5805 = vmatpush.bf16.msra.mxu3 %v9202_v23 }
 0x24a   :  { %4646 = vmatpush.bf16.msra.mxu0 %v9825_v4  ;;  %v4275_v14 = vpop.f32.mrf.mxu2  ;;  %v4251_v16 = vpop.f32.mrf.mxu0  ;;  %v9159_v4 = vld [vmem:[%s14992_s5 + $0x4fc] sm:$0xf0] }
 0x24b   :  { %4659 = vmatpush.bf16.msra.mxu1 %v9833_v5  ;;  %v4276_v26 = vadd.f32 %v4275_v14, %v616_v12  ;;  %v4288_v15 = vpop.f32.mrf.mxu3  ;;  %v8761_v5 = vld [vmem:[%s14992_s5 + $0x1b8] sm:$0xf]  ;;  %v9162_v6 = vor.u32 %v9989_v3, %v9159_v4  ;;  %v8763_v12 = vld [vmem:[%s14992_s5 + $0x1e4] sm:$0xf0]  ;;  %v8717_v16 = vld [vmem:[%s14992_s5 + $0x160] sm:$0xf] }
 0x24c   :  { %5793 = vmatpush.bf16.msra.mxu2 %v8806_v0  ;;  %v8983_v0 = vld [vmem:[%s14992_s5 + $0x39c] sm:$0xf0]  ;;  %v8937_v3 = vld [vmem:[%s14992_s5 + $0x318] sm:$0xf] }
 0x24d   :  { %v4289_v24 = vadd.f32 %v4288_v15, %v4276_v26  ;;  %5806 = vmatpush.bf16.msra.mxu3 %v9158_v1  ;;  %v8766_v26 = vor.u32 %v9890_v32, %v8763_v12  ;;  %v8585_v1 = vld [vmem:[%s14992_s5 + $0x58] sm:$0xf]  ;;  %v8986_v2 = vor.u32 %v9945_v62, %v8983_v0  ;;  %v8541_v32 = vld [vmem:[%s14992_s5] sm:$0xf]  ;;  %v8771_v62 = vld [vmem:[%s14992_s5 + $0x1ec] sm:$0xf0] }
 0x24e   :  { %4647 = vmatpush.bf16.msra.mxu0 %v9824_v55  ;;  %v9895_v55 = vld [vmem:[%s14992_s5 + $0x1e0] sm:$0xf0]  ;;  %v8586_v4 = vor.u32 %v9851_v9, %v8585_v1  ;;  %v8893_v12 = vld [vmem:[%s14992_s5 + $0x2c0] sm:$0xf]  ;;  %v9123_v1 = vld [vmem:[%s14992_s5 + $0x4ac] sm:$0xf0] }
 0x24f   :  { %4660 = vmatpush.bf16.msra.mxu1 %v9832_v28  ;;  %v4264_v17 = vpop.f32.mrf.mxu1  ;;  %v8762_v10 = vor.u32 %v9895_v55, %v8761_v5  ;;  %v9846_v55 = vld [vmem:[%s14992_s5 + $0x5c] sm:$0xf]  ;;  %v9979_v0 = vld [vmem:[%s14992_s5 + $0x484] sm:$0xf] }
 0x250   :  { %v9069_v17 = vld [vmem:[%s14992_s5 + $0x420] sm:$0xf] }
 0x251   :  { %5794 = vmatpush.bf16.msra.mxu2 %v8762_v10 }
 0x252   :  { %4648 = vmatpush.bf16.msra.mxu0 %v9823_v35  ;;  %v4277_v49 = vpop.f32.mrf.mxu2  ;;  %v9983_v35 = vld [vmem:[%s14992_s5 + $0x4a0] sm:$0xf0] }
 0x253   :  { %4661 = vmatpush.bf16.msra.mxu1 %v9831_v39  ;;  %v4290_v37 = vpop.f32.mrf.mxu3  ;;  %v9114_v14 = vor.u32 %v9983_v35, %v9113_v7  ;;  %v8719_v49 = vld [vmem:[%s14992_s5 + $0x18c] sm:$0xf0]  ;;  %v8939_v35 = vld [vmem:[%s14992_s5 + $0x344] sm:$0xf0] }
 0x255   :  { %5807 = vmatpush.bf16.msra.mxu3 %v9114_v14 }
 0x256   :  { %4649 = vmatpush.bf16.msra.mxu0 %v9822_v54  ;;  %v9978_v54 = vld [vmem:[%s14992_s5 + $0x47c] sm:$0xf] }
 0x257   :  { %4662 = vmatpush.bf16.msra.mxu1 %v9830_v13  ;;  %v9115_v13 = vld [vmem:[%s14992_s5 + $0x4a4] sm:$0xf0] }
 0x258   :  { %v9118_v15 = vor.u32 %v9978_v54, %v9115_v13  ;;  %v9928_v54 = vld [vmem:[%s14992_s5 + $0x2e8] sm:$0xf0]  ;;  %v9835_v13 = vld [vmem:[%s14992_s5 + $0x4] sm:$0xf] }
 0x25a   :  { %4650 = vmatpush.bf16.msra.mxu0 %v9821_v34  ;;  %v9884_v34 = vld [vmem:[%s14992_s5 + $0x188] sm:$0xf0] }
 0x25b   :  { %4663 = vmatpush.bf16.msra.mxu1 %v9829_v21 }
 0x25e   :  { %4651 = vmatpush.bf16.msra.mxu0 %v9820_v47  ;;  %v9972_v47 = vld [vmem:[%s14992_s5 + $0x448] sm:$0xf0] }
 0x25f   :  { %4664 = vmatpush.bf16.msra.mxu1 %v9828_v27  ;;  %v9879_v27 = vld [vmem:[%s14992_s5 + $0x164] sm:$0xf] }
 0x260   :  { %v8722_v43 = vor.u32 %v9879_v27, %v8719_v49  ;;  %v9918_v27 = vld [vmem:[%s14992_s5 + $0x298] sm:$0xf0]  ;;  %v9209_v49 = vld [vmem:[%s14992_s5 + $0x530] sm:$0xf] }
 0x262   :  { %4652 = vmatpush.bf16.msra.mxu0 %v9819_v40  ;;  %v4301_v22 = vpop.f32.mrf.mxu0  ;;  %v9070_v40 = vor.u32 %v9972_v47, %v9069_v17  ;;  %v8894_v17 = vor.u32 %v9928_v54, %v8893_v12  ;;  %v8857_v47 = vld [vmem:[%s14992_s5 + $0x270] sm:$0xf]  ;;  %v9968_v12 = vld [vmem:[%s14992_s5 + $0x42c] sm:$0xf]  ;;  %v9079_v54 = vld [vmem:[%s14992_s5 + $0x454] sm:$0xf0] }
 0x263   :  { %4665 = vmatpush.bf16.msra.mxu1 %v9827_v19  ;;  %v4302_v50 = vadd.f32 %v4301_v22, %v4289_v24  ;;  %v4314_v51 = vpop.f32.mrf.mxu1  ;;  %v8718_v24 = vor.u32 %v9884_v34, %v8717_v16  ;;  %v9967_v19 = vld [vmem:[%s14992_s5 + $0x424] sm:$0xf]  ;;  %v9873_v22 = vld [vmem:[%s14992_s5 + $0x130] sm:$0xf0]  ;;  %v8895_v16 = vld [vmem:[%s14992_s5 + $0x2ec] sm:$0xf0] }
 0x264   :  { %5808 = vmatpush.bf16.msra.mxu3 %v9070_v40 }
 0x265   :  { %4653 = vmatmul.bf16.vlgmr.msra.gmra.mxu0 %v4545_v46  ;;  %v4315_v52 = vadd.f32 %v4314_v51, %v4302_v50  ;;  %5795 = vmatpush.bf16.msra.mxu2 %v8718_v24  ;;  %v9074_v46 = vor.u32 %v9967_v19, %v9071_v45  ;;  %v9025_v50 = vld [vmem:[%s14992_s5 + $0x3c8] sm:$0xf]  ;;  %v8858_v19 = vor.u32 %v9918_v27, %v8857_v47  ;;  %v10006_v45 = vld [vmem:[%s14992_s5 + $0x558] sm:$0xf0]  ;;  %v8683_v47 = vld [vmem:[%s14992_s5 + $0x13c] sm:$0xf0] }
 0x266   :  { %4666 = vmatmul.bf16.vlgmr.msra.gmra.mxu1 %v4546_v48  ;;  %5818 = vmatpush.bf16.msrb.mxu0 %v8854_v20  ;;  %v8673_v48 = vld [vmem:[%s14992_s5 + $0x108] sm:$0xf]  ;;  %v8630_v20 = vor.u32 %v9862_v18, %v8629_v38  ;;  %v9990_v38 = vld [vmem:[%s14992_s5 + $0x4dc] sm:$0xf] }
 0x267   :  { %5831 = vmatpush.bf16.msrb.mxu1 %v9206_v25  ;;  %v8674_v51 = vor.u32 %v9873_v22, %v8673_v48  ;;  %v8859_v48 = vld [vmem:[%s14992_s5 + $0x29c] sm:$0xf0]  ;;  %v9210_v22 = vor.u32 %v10006_v45, %v9209_v49  ;;  %v8637_v45 = vld [vmem:[%s14992_s5 + $0xb8] sm:$0xf] }
 0x269   :  { %5796 = vmatpush.bf16.msra.mxu2 %v8674_v51  ;;  %v10001_v51 = vld [vmem:[%s14992_s5 + $0x534] sm:$0xf] }
 0x26a   :  { %v4327_v53 = vpop.f32.mrf.mxu2  ;;  %v4303_v29 = vpop.f32.mrf.mxu0  ;;  %5819 = vmatpush.bf16.msrb.mxu0 %v8810_v11  ;;  %v9939_v11 = vld [vmem:[%s14992_s5 + $0x340] sm:$0xf0] }
 0x26b   :  { %v4328_v41 = vadd.f32 %v4327_v53, %v4315_v52  ;;  %v4340_v63 = vpop.f32.mrf.mxu3  ;;  %v4316_v33 = vpop.f32.mrf.mxu1  ;;  %5832 = vmatpush.bf16.msrb.mxu1 %v9162_v6  ;;  %v9961_v52 = vld [vmem:[%s14992_s5 + $0x3f0] sm:$0xf0]  ;;  %v9868_v53 = vld [vmem:[%s14992_s5 + $0x10c] sm:$0xf]  ;;  %v9030_v29 = vor.u32 %v9956_v36, %v9027_v57  ;;  %v8938_v5 = vor.u32 %v9939_v11, %v8937_v3  ;;  %v9934_v6 = vld [vmem:[%s14992_s5 + $0x31c] sm:$0xf]  ;;  %v9126_v11 = vor.u32 %v9979_v0, %v9123_v1 }
 0x26c   :  { %v8942_v10 = vor.u32 %v9934_v6, %v8939_v35  ;;  %v9995_v36 = vld [vmem:[%s14992_s5 + $0x500] sm:$0xf0]  ;;  %v9902_v57 = vld [vmem:[%s14992_s5 + $0x21c] sm:$0xf]  ;;  %v9973_v6 = vld [vmem:[%s14992_s5 + $0x450] sm:$0xf0] }
 0x26d   :  { %v13757_v58 = vadd.f32 %v4340_v63, %v4328_v41  ;;  %v8675_v41 = vld [vmem:[%s14992_s5 + $0x134] sm:$0xf0]  ;;  %v9026_v63 = vor.u32 %v9961_v52, %v9025_v50  ;;  %5797 = vmatpush.bf16.msra.mxu2 %v8630_v20  ;;  %v9211_v52 = vld [vmem:[%s14992_s5 + $0x55c] sm:$0xf0] }
 0x26e   :  { %5820 = vmatpush.bf16.msrb.mxu0 %v8766_v26  ;;  %v8678_v56 = vor.u32 %v9868_v53, %v8675_v41  ;;  %v8543_v26 = vld [vmem:[%s14992_s5 + $0x2c] sm:$0xf0]  ;;  %v8813_v53 = vld [vmem:[%s14992_s5 + $0x218] sm:$0xf]  ;;  %v9214_v41 = vor.u32 %v10001_v51, %v9211_v52  ;;  %v9951_v52 = vld [vmem:[%s14992_s5 + $0x3a0] sm:$0xf0] }
 0x26f   :  { %5833 = vmatpush.bf16.msrb.mxu1 %v9118_v15  ;;  %5809 = vmatpush.bf16.msra.mxu3 %v9026_v63  ;;  %v9923_v15 = vld [vmem:[%s14992_s5 + $0x2c4] sm:$0xf]  ;;  %v8546_v24 = vor.u32 %v9835_v13, %v8543_v26  ;;  %v8727_v35 = vld [vmem:[%s14992_s5 + $0x194] sm:$0xf0]  ;;  %v8681_v26 = vld [vmem:[%s14992_s5 + $0x110] sm:$0xf] }
 0x270   :  { %v9907_v63 = vld [vmem:[%s14992_s5 + $0x240] sm:$0xf0] }
 0x271   :  { %5798 = vmatpush.bf16.msra.mxu2 %v8586_v4  ;;  %v8814_v18 = vor.u32 %v9907_v63, %v8813_v53  ;;  %v8725_v4 = vld [vmem:[%s14992_s5 + $0x168] sm:$0xf]  ;;  %v9858_v53 = vld [vmem:[%s14992_s5 + $0xbc] sm:$0xf] }
 0x272   :  { %v4329_v28 = vpop.f32.mrf.mxu2  ;;  %5821 = vmatpush.bf16.msrb.mxu0 %v8722_v43  ;;  %v8898_v43 = vor.u32 %v9923_v15, %v8895_v16  ;;  %v9874_v15 = vld [vmem:[%s14992_s5 + $0x138] sm:$0xf0]  ;;  %v9033_v16 = vld [vmem:[%s14992_s5 + $0x3d0] sm:$0xf] }
 0x273   :  { %v4342_v39 = vpop.f32.mrf.mxu3  ;;  %5834 = vmatpush.bf16.msrb.mxu1 %v9074_v46  ;;  %5810 = vmatpush.bf16.msra.mxu3 %v8982_v61  ;;  %v8587_v28 = vld [vmem:[%s14992_s5 + $0x84] sm:$0xf0]  ;;  %v9913_v46 = vld [vmem:[%s14992_s5 + $0x274] sm:$0xf]  ;;  %v9984_v61 = vld [vmem:[%s14992_s5 + $0x4a8] sm:$0xf0] }
 0x274   :  { %v8590_v7 = vor.u32 %v9846_v55, %v8587_v28  ;;  %v9840_v39 = vld [vmem:[%s14992_s5 + $0x28] sm:$0xf0]  ;;  %v8862_v50 = vor.u32 %v9913_v46, %v8859_v48  ;;  %v9122_v9 = vor.u32 %v9984_v61, %v9121_v42  ;;  %v9077_v55 = vld [vmem:[%s14992_s5 + $0x428] sm:$0xf]  ;;  %v9863_v46 = vld [vmem:[%s14992_s5 + $0xe0] sm:$0xf0] }
 0x275   :  { %v8542_v14 = vor.u32 %v9840_v39, %v8541_v32  ;;  %v9078_v39 = vor.u32 %v9973_v6, %v9077_v55  ;;  %v8989_v48 = vld [vmem:[%s14992_s5 + $0x378] sm:$0xf]  ;;  %v8638_v51 = vor.u32 %v9863_v46, %v8637_v45  ;;  %v9847_v42 = vld [vmem:[%s14992_s5 + $0x64] sm:$0xf] }
 0x276   :  { %5822 = vmatpush.bf16.msrb.mxu0 %v8678_v56  ;;  %v9165_v56 = vld [vmem:[%s14992_s5 + $0x4d8] sm:$0xf]  ;;  %v9919_v46 = vld [vmem:[%s14992_s5 + $0x2a0] sm:$0xf0] }
 0x277   :  { %5835 = vmatpush.bf16.msrb.mxu1 %v9030_v29  ;;  %5811 = vmatpush.bf16.msra.mxu3 %v8938_v5  ;;  %v8815_v29 = vld [vmem:[%s14992_s5 + $0x244] sm:$0xf0]  ;;  %v9885_v5 = vld [vmem:[%s14992_s5 + $0x190] sm:$0xf0]  ;;  %v8551_v55 = vld [vmem:[%s14992_s5 + $0x34] sm:$0xf0] }
 0x278   :  { %5799 = vmatpush.bf16.msra.mxu2 %v8542_v14  ;;  %v8818_v20 = vor.u32 %v9902_v57, %v8815_v29  ;;  %v8726_v28 = vor.u32 %v9885_v5, %v8725_v4  ;;  %v9082_v14 = vor.u32 %v9968_v12, %v9079_v54  ;;  %v8991_v57 = vld [vmem:[%s14992_s5 + $0x3a4] sm:$0xf0]  ;;  %v9836_v5 = vld [vmem:[%s14992_s5 + $0xc] sm:$0xf] }
 0x27a   :  { %5823 = vmatpush.bf16.msrb.mxu0 %v8634_v30  ;;  %v9891_v30 = vld [vmem:[%s14992_s5 + $0x1c4] sm:$0xf] }
 0x27b   :  { %5836 = vmatpush.bf16.msrb.mxu1 %v8986_v2  ;;  %5812 = vmatpush.bf16.msra.mxu3 %v8894_v17  ;;  %v8770_v2 = vor.u32 %v9896_v60, %v8769_v31  ;;  %v8774_v3 = vor.u32 %v9891_v30, %v8771_v62  ;;  %v9962_v17 = vld [vmem:[%s14992_s5 + $0x3f8] sm:$0xf0]  ;;  %v9940_v60 = vld [vmem:[%s14992_s5 + $0x348] sm:$0xf0]  ;;  %v8947_v62 = vld [vmem:[%s14992_s5 + $0x34c] sm:$0xf0] }
 0x27c   :  { %5844 = vmatpush.bf16.msrb.mxu2 %v8858_v19  ;;  %v9034_v27 = vor.u32 %v9962_v17, %v9033_v16 }
 0x27e   :  { %5824 = vmatpush.bf16.msrb.mxu0 %v8590_v7  ;;  %v9880_v7 = vld [vmem:[%s14992_s5 + $0x16c] sm:$0xf] }
 0x27f   :  { %5837 = vmatpush.bf16.msrb.mxu1 %v8942_v10  ;;  %5857 = vmatpush.bf16.msrb.mxu3 %v9210_v22  ;;  %v8730_v10 = vor.u32 %v9880_v7, %v8727_v35  ;;  %v8554_v7 = vor.u32 %v9836_v5, %v8551_v55  ;;  %v9924_v35 = vld [vmem:[%s14992_s5 + $0x2cc] sm:$0xf] }
 0x280   :  { %5845 = vmatpush.bf16.msrb.mxu2 %v8814_v18  ;;  %v8593_v18 = vld [vmem:[%s14992_s5 + $0x60] sm:$0xf] }
 0x282   :  { %v13831_v21 = vpop.f32.mrf.mxu0  ;;  %5825 = vmatpush.bf16.msrb.mxu0 %v8546_v24  ;;  %v9869_v24 = vld [vmem:[%s14992_s5 + $0x114] sm:$0xf] }
 0x283   :  { %v13842_v37 = vpop.f32.mrf.mxu1  ;;  %5838 = vmatpush.bf16.msrb.mxu1 %v8898_v43  ;;  %v8686_v49 = vor.u32 %v9869_v24, %v8683_v47  ;;  %v9035_v43 = vld [vmem:[%s14992_s5 + $0x3fc] sm:$0xf0]  ;;  %v4354_v22 = vadd.f32 %v13831_v21, %v13757_v58  ;;  %v8990_v58 = vor.u32 %v9951_v52, %v8989_v48 }
 0x284   :  { %5846 = vmatpush.bf16.msrb.mxu2 %v8770_v2  ;;  %v8549_v2 = vld [vmem:[%s14992_s5 + $0x8] sm:$0xf] }
 0x286   :  { %5870 = vmatpush.bf16.msra.mxu0 %v8862_v50 }
 0x287   :  { %5883 = vmatpush.bf16.msra.mxu1 %v9214_v41  ;;  %v8639_v41 = vld [vmem:[%s14992_s5 + $0xe4] sm:$0xf0] }
 0x288   :  { %5847 = vmatpush.bf16.msrb.mxu2 %v8726_v28  ;;  %v8642_v21 = vor.u32 %v9858_v53, %v8639_v41  ;;  %v8867_v41 = vld [vmem:[%s14992_s5 + $0x2a4] sm:$0xf0] }
 0x28a   :  { %v13874_v59 = vpop.f32.mrf.mxu2  ;;  %v4355_v23 = vpop.f32.mrf.mxu0  ;;  %5871 = vmatpush.bf16.msra.mxu0 %v8818_v20  ;;  %v4367_v20 = vadd.f32 %v13842_v37, %v4354_v22  ;;  %v9935_v37 = vld [vmem:[%s14992_s5 + $0x324] sm:$0xf]  ;;  %v9217_v22 = vld [vmem:[%s14992_s5 + $0x538] sm:$0xf] }
 0x28b   :  { %v13885_v33 = vpop.f32.mrf.mxu3  ;;  %v4368_v25 = vpop.f32.mrf.mxu1  ;;  %v9166_v23 = vor.u32 %v9995_v36, %v9165_v56  ;;  %v9946_v36 = vld [vmem:[%s14992_s5 + $0x37c] sm:$0xf]  ;;  %v8950_v1 = vor.u32 %v9935_v37, %v8947_v62  ;;  %v8777_v37 = vld [vmem:[%s14992_s5 + $0x1c8] sm:$0xf]  ;;  %v9897_v62 = vld [vmem:[%s14992_s5 + $0x1f0] sm:$0xf0] }
 0x28c   :  { %v9170_v25 = vor.u32 %v9990_v38, %v9167_v44  ;;  %v8994_v38 = vor.u32 %v9946_v36, %v8991_v57  ;;  %v9852_v44 = vld [vmem:[%s14992_s5 + $0x88] sm:$0xf0]  ;;  %v4380_v0 = vadd.f32 %v13874_v59, %v4367_v20  ;;  %v9929_v59 = vld [vmem:[%s14992_s5 + $0x2f0] sm:$0xf0]  ;;  %v8778_v5 = vor.u32 %v9897_v62, %v8777_v37  ;;  %v8603_v37 = vld [vmem:[%s14992_s5 + $0x94] sm:$0xf0] }
 0x28d   :  { %5858 = vmatpush.bf16.msrb.mxu3 %v9166_v23  ;;  %v8945_v23 = vld [vmem:[%s14992_s5 + $0x320] sm:$0xf]  ;;  %v8594_v31 = vor.u32 %v9852_v44, %v8593_v18  ;;  %v9996_v20 = vld [vmem:[%s14992_s5 + $0x508] sm:$0xf0] }
 0x28e   :  { %5884 = vmatpush.bf16.msra.mxu1 %v9170_v25  ;;  %5872 = vmatpush.bf16.msra.mxu0 %v8774_v3  ;;  %v8595_v25 = vld [vmem:[%s14992_s5 + $0x8c] sm:$0xf0]  ;;  %v8946_v61 = vor.u32 %v9940_v60, %v8945_v23  ;;  %v8901_v3 = vld [vmem:[%s14992_s5 + $0x2c8] sm:$0xf]  ;;  %v9173_v23 = vld [vmem:[%s14992_s5 + $0x4e0] sm:$0xf] }
 0x28f   :  { %v8598_v30 = vor.u32 %v9847_v42, %v8595_v25  ;;  %v8902_v6 = vor.u32 %v9929_v59, %v8901_v3  ;;  %v8823_v60 = vld [vmem:[%s14992_s5 + $0x24c] sm:$0xf0]  ;;  %v9991_v42 = vld [vmem:[%s14992_s5 + $0x4e4] sm:$0xf]  ;;  %v9892_v3 = vld [vmem:[%s14992_s5 + $0x1cc] sm:$0xf] }
 0x290   :  { %v9175_v25 = vld [vmem:[%s14992_s5 + $0x50c] sm:$0xf0]  ;;  %v9131_v59 = vld [vmem:[%s14992_s5 + $0x4b4] sm:$0xf0]  ;;  %v9936_v62 = vld [vmem:[%s14992_s5 + $0x32c] sm:$0xf] }
 0x291   :  { %5859 = vmatpush.bf16.msrb.mxu3 %v9122_v9  ;;  %v9841_v9 = vld [vmem:[%s14992_s5 + $0x30] sm:$0xf0] }
 0x292   :  { %v4381_v34 = vpop.f32.mrf.mxu2  ;;  %5885 = vmatpush.bf16.msra.mxu1 %v9126_v11  ;;  %5873 = vmatpush.bf16.msra.mxu0 %v8730_v10  ;;  %v8550_v4 = vor.u32 %v9841_v9, %v8549_v2  ;;  %v4393_v10 = vadd.f32 %v13885_v33, %v4380_v0  ;;  %v9129_v2 = vld [vmem:[%s14992_s5 + $0x488] sm:$0xf]  ;;  %v9985_v9 = vld [vmem:[%s14992_s5 + $0x4b0] sm:$0xf0] }
 0x293   :  { %v4394_v40 = vpop.f32.mrf.mxu3  ;;  %v8682_v34 = vor.u32 %v9874_v15, %v8681_v26  ;;  %v9130_v55 = vor.u32 %v9985_v9, %v9129_v2 }
 0x294   :  { %v9957_v40 = vld [vmem:[%s14992_s5 + $0x3d4] sm:$0xf] }
 0x295   :  { %5860 = vmatpush.bf16.msrb.mxu3 %v9078_v39  ;;  %v9038_v19 = vor.u32 %v9957_v40, %v9035_v43  ;;  %5848 = vmatpush.bf16.msrb.mxu2 %v8682_v34  ;;  %v8903_v39 = vld [vmem:[%s14992_s5 + $0x2f4] sm:$0xf0] }
 0x296   :  { %5886 = vmatpush.bf16.msra.mxu1 %v9082_v14  ;;  %5874 = vmatpush.bf16.msra.mxu0 %v8686_v49  ;;  %v8906_v12 = vor.u32 %v9924_v35, %v8903_v39 }
 0x299   :  { %5861 = vmatpush.bf16.msrb.mxu3 %v9034_v27  ;;  %5849 = vmatpush.bf16.msrb.mxu2 %v8638_v51 }
 0x29a   :  { %5887 = vmatpush.bf16.msra.mxu1 %v9038_v19  ;;  %5875 = vmatpush.bf16.msra.mxu0 %v8642_v21  ;;  %v4502_v19 = vmax.f32 %v13717_v8, 0.0  ;;  %v9914_v8 = vld [vmem:[%s14992_s5 + $0x27c] sm:$0xf] }
 0x29b   :  { %v8870_v18 = vor.u32 %v9914_v8, %v8867_v41  ;;  %v8645_v8 = vld [vmem:[%s14992_s5 + $0xc0] sm:$0xf] }
 0x29c   :  { %v8997_v41 = vld [vmem:[%s14992_s5 + $0x380] sm:$0xf] }
 0x29d   :  { %5862 = vmatpush.bf16.msrb.mxu3 %v8990_v58  ;;  %5850 = vmatpush.bf16.msrb.mxu2 %v8594_v31  ;;  %v9903_v31 = vld [vmem:[%s14992_s5 + $0x224] sm:$0xf] }
 0x29e   :  { %5888 = vmatpush.bf16.msra.mxu1 %v8994_v38  ;;  %5876 = vmatpush.bf16.msra.mxu0 %v8598_v30  ;;  %v9908_v38 = vld [vmem:[%s14992_s5 + $0x248] sm:$0xf0]  ;;  %v9174_v30 = vor.u32 %v9996_v20, %v9173_v23  ;;  %v8826_v0 = vor.u32 %v9903_v31, %v8823_v60  ;;  %v8601_v23 = vld [vmem:[%s14992_s5 + $0x68] sm:$0xf]  ;;  %v9853_v20 = vld [vmem:[%s14992_s5 + $0x90] sm:$0xf0] }
 0x29f   :  { %v8602_v2 = vor.u32 %v9853_v20, %v8601_v23  ;;  %v8741_v23 = vld [vmem:[%s14992_s5 + $0x178] sm:$0xf]  ;;  %v9887_v20 = vld [vmem:[%s14992_s5 + $0x1a0] sm:$0xf0] }
 0x2a1   :  { %5863 = vmatpush.bf16.msrb.mxu3 %v8946_v61  ;;  %5851 = vmatpush.bf16.msrb.mxu2 %v8550_v4  ;;  %v9980_v4 = vld [vmem:[%s14992_s5 + $0x48c] sm:$0xf] }
 0x2a2   :  { %v14040_v32 = vpop.f32.mrf.mxu0  ;;  %5889 = vmatpush.bf16.msra.mxu1 %v8950_v1  ;;  %5877 = vmatpush.bf16.msra.mxu0 %v8554_v7  ;;  %v9178_v1 = vor.u32 %v9991_v42, %v9175_v25  ;;  %v9886_v7 = vld [vmem:[%s14992_s5 + $0x198] sm:$0xf0]  ;;  %v9134_v39 = vor.u32 %v9980_v4, %v9131_v59  ;;  %v8953_v25 = vld [vmem:[%s14992_s5 + $0x328] sm:$0xf] }
 0x2a3   :  { %v14048_v13 = vpop.f32.mrf.mxu1  ;;  %v4406_v54 = vadd.f32 %v14040_v32, %v4393_v10  ;;  %v9085_v10 = vld [vmem:[%s14992_s5 + $0x430] sm:$0xf]  ;;  %v9930_v4 = vld [vmem:[%s14992_s5 + $0x2f8] sm:$0xf0] }
 0x2a5   :  { %5864 = vmatpush.bf16.msrb.mxu3 %v8902_v6  ;;  %v4419_v14 = vadd.f32 %v14048_v13, %v4406_v54  ;;  %v8865_v13 = vld [vmem:[%s14992_s5 + $0x278] sm:$0xf]  ;;  %v8733_v6 = vld [vmem:[%s14992_s5 + $0x170] sm:$0xf]  ;;  %v9881_v54 = vld [vmem:[%s14992_s5 + $0x174] sm:$0xf] }
 0x2a6   :  { %5890 = vmatpush.bf16.msra.mxu1 %v8906_v12  ;;  %v8866_v36 = vor.u32 %v9919_v46, %v8865_v13  ;;  %v9974_v12 = vld [vmem:[%s14992_s5 + $0x458] sm:$0xf0]  ;;  %v9043_v46 = vld [vmem:[%s14992_s5 + $0x404] sm:$0xf0] }
 0x2a7   :  { %v9958_v13 = vld [vmem:[%s14992_s5 + $0x3dc] sm:$0xf] }
 0x2aa   :  { %v4431_v50 = vpop.f32.mrf.mxu2  ;;  %v4407_v56 = vpop.f32.mrf.mxu0 }
 0x2ab   :  { %v4444_v63 = vpop.f32.mrf.mxu3  ;;  %v4420_v29 = vpop.f32.mrf.mxu1  ;;  %v4432_v26 = vadd.f32 %v4431_v50, %v4419_v14  ;;  %v10007_v50 = vld [vmem:[%s14992_s5 + $0x560] sm:$0xf0]  ;;  %v9219_v56 = vld [vmem:[%s14992_s5 + $0x564] sm:$0xf0]  ;;  %v8735_v14 = vld [vmem:[%s14992_s5 + $0x19c] sm:$0xf0] }
 0x2ac   :  { %v9218_v57 = vor.u32 %v10007_v50, %v9217_v22  ;;  %v8821_v29 = vld [vmem:[%s14992_s5 + $0x220] sm:$0xf] }
 0x2ad   :  { %v4445_v15 = vadd.f32 %v4444_v63, %v4432_v26  ;;  %v10002_v63 = vld [vmem:[%s14992_s5 + $0x53c] sm:$0xf]  ;;  %v8822_v61 = vor.u32 %v9908_v38, %v8821_v29  ;;  %v9969_v26 = vld [vmem:[%s14992_s5 + $0x434] sm:$0xf]  ;;  %v8999_v29 = vld [vmem:[%s14992_s5 + $0x3ac] sm:$0xf0] }
 0x2ae   :  { %v9222_v44 = vor.u32 %v10002_v63, %v9219_v56  ;;  %v9952_v63 = vld [vmem:[%s14992_s5 + $0x3a8] sm:$0xf0]  ;;  %v9859_v56 = vld [vmem:[%s14992_s5 + $0xc4] sm:$0xf] }
 0x2b2   :  { %v4433_v11 = vpop.f32.mrf.mxu2 }
 0x2b3   :  { %v4446_v28 = vpop.f32.mrf.mxu3  ;;  %v8779_v11 = vld [vmem:[%s14992_s5 + $0x1f4] sm:$0xf0] }
 0x2b4   :  { %v10011_v28 = vld [vmem:[%s14991_s4] ss:$0 sm:$0xff]  ;;  %v8782_v35 = vor.u32 %v9892_v3, %v8779_v11  ;;  %v9842_v3 = vld [vmem:[%s14992_s5 + $0x38] sm:$0xf0]  ;;  %v8909_v11 = vld [vmem:[%s14992_s5 + $0x2d0] sm:$0xf] }
 0x2c2   :  { %v4457_v16 = vpop.f32.mrf.mxu0 }
 0x2c3   :  { %v4470_v34 = vpop.f32.mrf.mxu1  ;;  %v4458_v17 = vadd.f32 %v4457_v16, %v4445_v15  ;;  %v9087_v15 = vld [vmem:[%s14992_s5 + $0x45c] sm:$0xf0] }
 0x2c5   :  { %v4471_v24 = vadd.f32 %v4470_v34, %v4458_v17  ;;  %v8734_v34 = vor.u32 %v9886_v7, %v8733_v6  ;;  %v9086_v17 = vor.u32 %v9974_v12, %v9085_v10  ;;  %v9925_v6 = vld [vmem:[%s14992_s5 + $0x2d4] sm:$0xf]  ;;  %v8911_v7 = vld [vmem:[%s14992_s5 + $0x2fc] sm:$0xf0]  ;;  %v10008_v12 = vld [vmem:[%s14992_s5 + $0x568] sm:$0xf0] }
 0x2c6   :  { %v9225_v10 = vld [vmem:[%s14992_s5 + $0x540] sm:$0xf] }
 0x2ca   :  { %v4483_v47 = vpop.f32.mrf.mxu2  ;;  %v4459_v40 = vpop.f32.mrf.mxu0 }
 0x2cb   :  { %v4484_v27 = vadd.f32 %v4483_v47, %v4471_v24  ;;  %v4496_v49 = vpop.f32.mrf.mxu3  ;;  %v4472_v33 = vpop.f32.mrf.mxu1  ;;  %v8689_v24 = vld [vmem:[%s14992_s5 + $0x118] sm:$0xf]  ;;  %v9875_v47 = vld [vmem:[%s14992_s5 + $0x140] sm:$0xf0]  ;;  %v8738_v40 = vor.u32 %v9881_v54, %v8735_v14 }
 0x2cc   :  { %v9090_v33 = vor.u32 %v9969_v26, %v9087_v15  ;;  %v8690_v22 = vor.u32 %v9875_v47, %v8689_v24  ;;  %v9915_v54 = vld [vmem:[%s14992_s5 + $0x284] sm:$0xf]  ;;  %v8910_v26 = vor.u32 %v9930_v4, %v8909_v11  ;;  %v8875_v15 = vld [vmem:[%s14992_s5 + $0x2ac] sm:$0xf0]  ;;  %v8914_v24 = vor.u32 %v9925_v6, %v8911_v7  ;;  %v9049_v4 = vld [vmem:[%s14992_s5 + $0x3e0] sm:$0xf] }
 0x2cd   :  { %v4497_v43 = vadd.f32 %v4496_v49, %v4484_v27  ;;  %v9051_v6 = vld [vmem:[%s14992_s5 + $0x40c] sm:$0xf0] }
 0x2cf   :  { %v4503_v32 = vmax.f32 %v4497_v43, 0.0  ;;  %v9041_v43 = vld [vmem:[%s14992_s5 + $0x3d8] sm:$0xf] }
 0x2d1   :  { %v4505_v45 = vpack.c.bf16 %v4503_v32, %v4502_v19  ;;  %v9963_v19 = vld [vmem:[%s14992_s5 + $0x400] sm:$0xf0]  ;;  %v9870_v32 = vld [vmem:[%s14992_s5 + $0x11c] sm:$0xf] }
 0x2d2   :  { %v4485_v48 = vpop.f32.mrf.mxu2  ;;  %v9042_v50 = vor.u32 %v9963_v19, %v9041_v43  ;;  %v9181_v19 = vld [vmem:[%s14992_s5 + $0x4e8] sm:$0xf] }
 0x2d3   :  { %v4890_v51 = vunpack.c.l.b16 %v4505_v45  ;;  %v4891_v52 = vunpack.c.h.b16 %v4505_v45  ;;  %v4498_v53 = vpop.f32.mrf.mxu3  ;;  %v8691_v45 = vld [vmem:[%s14992_s5 + $0x144] sm:$0xf0] }
 0x2d4   :  { %v9046_v53 = vor.u32 %v9958_v13, %v9043_v46  ;;  %v8831_v13 = vld [vmem:[%s14992_s5 + $0x254] sm:$0xf0]  ;;  %v9992_v46 = vld [vmem:[%s14992_s5 + $0x4ec] sm:$0xf] }
 0x2d5   :  { %v14178_v58 = vpack.c.b16 %v4890_v51, %v4890_v51  ;;  %v14180_v21 = vpack.c.b16 %v4891_v52, %v4891_v52  ;;  %v9864_v51 = vld [vmem:[%s14992_s5 + $0xe8] sm:$0xf0]  ;;  %v8694_v52 = vor.u32 %v9870_v32, %v8691_v45  ;;  %v9997_v32 = vld [vmem:[%s14992_s5 + $0x510] sm:$0xf0] }
 0x2d6   :  { %v9904_v45 = vld [vmem:[%s14992_s5 + $0x22c] sm:$0xf] }
 0x2d7   :  { %5800 = vmatmul.bf16.vlgmr.msra.gmra.mxu2 %v14178_v58  ;;  %5813 = vmatmul.bf16.vlgmr.msra.gmra.mxu3 %v14180_v21 }
 0x2d8   :  { %5826 = vmatmul.bf16.vlgmr.msrb.gmra.mxu0 %v14178_v58  ;;  %5839 = vmatmul.bf16.vlgmr.msrb.gmra.mxu1 %v14180_v21 }
 0x2d9   :  { %5896 = vmatpush.bf16.msra.mxu2 %v8866_v36  ;;  %5909 = vmatpush.bf16.msra.mxu3 %v9218_v57  ;;  %v8647_v36 = vld [vmem:[%s14992_s5 + $0xec] sm:$0xf0]  ;;  %v9947_v57 = vld [vmem:[%s14992_s5 + $0x384] sm:$0xf] }
 0x2da   :  { %5922 = vmatpush.bf16.msrb.mxu0 %v8870_v18  ;;  %5935 = vmatpush.bf16.msrb.mxu1 %v9222_v44  ;;  %v8646_v18 = vor.u32 %v9864_v51, %v8645_v8  ;;  %v8998_v44 = vor.u32 %v9952_v63, %v8997_v41  ;;  %v8650_v60 = vor.u32 %v9859_v56, %v8647_v36  ;;  %v8785_v51 = vld [vmem:[%s14992_s5 + $0x1d0] sm:$0xf]  ;;  %v9986_v56 = vld [vmem:[%s14992_s5 + $0x4b8] sm:$0xf0]  ;;  %v9893_v36 = vld [vmem:[%s14992_s5 + $0x1d4] sm:$0xf] }
 0x2db   :  { %v9002_v42 = vor.u32 %v9947_v57, %v8999_v29  ;;  %v9182_v8 = vor.u32 %v9997_v32, %v9181_v19  ;;  %v9137_v63 = vld [vmem:[%s14992_s5 + $0x490] sm:$0xf]  ;;  %v8787_v57 = vld [vmem:[%s14992_s5 + $0x1fc] sm:$0xf0]  ;;  %v9981_v29 = vld [vmem:[%s14992_s5 + $0x494] sm:$0xf] }
 0x2dc   :  { %v9942_v19 = vld [vmem:[%s14992_s5 + $0x358] sm:$0xf0]  ;;  %v9849_v32 = vld [vmem:[%s14992_s5 + $0x74] sm:$0xf] }
 0x2dd   :  { %5897 = vmatpush.bf16.msra.mxu2 %v8822_v61  ;;  %5910 = vmatpush.bf16.msra.mxu3 %v9174_v30  ;;  %v9941_v61 = vld [vmem:[%s14992_s5 + $0x350] sm:$0xf0]  ;;  %v9848_v30 = vld [vmem:[%s14992_s5 + $0x6c] sm:$0xf] }
 0x2de   :  { %5923 = vmatpush.bf16.msrb.mxu0 %v8826_v0  ;;  %5936 = vmatpush.bf16.msrb.mxu1 %v9178_v1  ;;  %v8955_v0 = vld [vmem:[%s14992_s5 + $0x354] sm:$0xf0]  ;;  %v8557_v1 = vld [vmem:[%s14992_s5 + $0x10] sm:$0xf]  ;;  %v8954_v9 = vor.u32 %v9941_v61, %v8953_v25  ;;  %v8606_v59 = vor.u32 %v9848_v30, %v8603_v37  ;;  %v9975_v25 = vld [vmem:[%s14992_s5 + $0x460] sm:$0xf0] }
 0x2df   :  { %v8558_v14 = vor.u32 %v9842_v3, %v8557_v1  ;;  %v9882_v61 = vld [vmem:[%s14992_s5 + $0x17c] sm:$0xf]  ;;  %v8743_v30 = vld [vmem:[%s14992_s5 + $0x1a4] sm:$0xf0] }
 0x2e0   :  { %v9970_v37 = vld [vmem:[%s14992_s5 + $0x43c] sm:$0xf]  ;;  %v8746_v3 = vor.u32 %v9882_v61, %v8743_v30  ;;  %v9235_v61 = vld [vmem:[%s14992_s5 + $0x574] sm:$0xf0] }
 0x2e1   :  { %5898 = vmatpush.bf16.msra.mxu2 %v8778_v5  ;;  %5911 = vmatpush.bf16.msra.mxu3 %v9130_v55  ;;  %v8958_v5 = vor.u32 %v9936_v62, %v8955_v0  ;;  %v9837_v55 = vld [vmem:[%s14992_s5 + $0x14] sm:$0xf]  ;;  %v9095_v62 = vld [vmem:[%s14992_s5 + $0x464] sm:$0xf0]  ;;  %v8742_v0 = vor.u32 %v9887_v20, %v8741_v23  ;;  %v9916_v20 = vld [vmem:[%s14992_s5 + $0x28c] sm:$0xf] }
 0x2e2   :  { %v4654_v16 = vpop.f32.mrf.mxu0  ;;  %5924 = vmatpush.bf16.msrb.mxu0 %v8782_v35  ;;  %5937 = vmatpush.bf16.msrb.mxu1 %v9134_v39  ;;  %v8873_v35 = vld [vmem:[%s14992_s5 + $0x280] sm:$0xf]  ;;  %v9920_v39 = vld [vmem:[%s14992_s5 + $0x2a8] sm:$0xf0]  ;;  %v9098_v11 = vor.u32 %v9970_v37, %v9095_v62  ;;  %v10009_v23 = vld [vmem:[%s14992_s5 + $0x570] sm:$0xf0] }
 0x2e3   :  { %v4655_v27 = vadd.f32 %v10011_v28, %v4654_v16  ;;  %v4667_v49 = vpop.f32.mrf.mxu1  ;;  %v8559_v28 = vld [vmem:[%s14992_s5 + $0x3c] sm:$0xf0]  ;;  %v10003_v16 = vld [vmem:[%s14992_s5 + $0x544] sm:$0xf]  ;;  %v8874_v47 = vor.u32 %v9920_v39, %v8873_v35  ;;  %v8653_v39 = vld [vmem:[%s14992_s5 + $0xc8] sm:$0xf] }
 0x2e5   :  { %v14285_v48 = vadd.f32 %v4667_v49, %v4655_v27  ;;  %5899 = vmatpush.bf16.msra.mxu2 %v8734_v34  ;;  %5912 = vmatpush.bf16.msra.mxu3 %v9086_v17  ;;  %v9227_v34 = vld [vmem:[%s14992_s5 + $0x56c] sm:$0xf0]  ;;  %v8562_v17 = vor.u32 %v9837_v55, %v8559_v28  ;;  %v9226_v27 = vor.u32 %v10008_v12, %v9225_v10  ;;  %v8829_v49 = vld [vmem:[%s14992_s5 + $0x228] sm:$0xf]  ;;  %v9959_v28 = vld [vmem:[%s14992_s5 + $0x3e4] sm:$0xf] }
 0x2e6   :  { %5925 = vmatpush.bf16.msrb.mxu0 %v8738_v40  ;;  %5938 = vmatpush.bf16.msrb.mxu1 %v9090_v33  ;;  %v9909_v40 = vld [vmem:[%s14992_s5 + $0x250] sm:$0xf0]  ;;  %v8878_v33 = vor.u32 %v9915_v54, %v8875_v15  ;;  %v9230_v43 = vor.u32 %v10003_v16, %v9227_v34  ;;  %v8699_v55 = vld [vmem:[%s14992_s5 + $0x14c] sm:$0xf0]  ;;  %v9054_v54 = vor.u32 %v9959_v28, %v9051_v6  ;;  %v9860_v15 = vld [vmem:[%s14992_s5 + $0xcc] sm:$0xf] }
 0x2e7   :  { %5852 = vmatmul.bf16.vlgmr.msrb.gmra.mxu2 %v14178_v58  ;;  %5865 = vmatmul.bf16.vlgmr.msrb.gmra.mxu3 %v14180_v21  ;;  %v9865_v10 = vld [vmem:[%s14992_s5 + $0xf0] sm:$0xf0]  ;;  %v8655_v16 = vld [vmem:[%s14992_s5 + $0xf4] sm:$0xf0]  ;;  %v9948_v34 = vld [vmem:[%s14992_s5 + $0x38c] sm:$0xf] }
 0x2e8   :  { %5878 = vmatmul.bf16.vlgmr.msra.gmra.mxu0 %v14178_v58  ;;  %5891 = vmatmul.bf16.vlgmr.msra.gmra.mxu1 %v14180_v21  ;;  %v9191_v28 = vld [vmem:[%s14992_s5 + $0x51c] sm:$0xf0] }
 0x2e9   :  { %5900 = vmatpush.bf16.msra.mxu2 %v8690_v22  ;;  %5913 = vmatpush.bf16.msra.mxu3 %v9042_v50  ;;  %v9183_v22 = vld [vmem:[%s14992_s5 + $0x514] sm:$0xf0]  ;;  %v8830_v50 = vor.u32 %v9909_v40, %v8829_v49  ;;  %v9854_v49 = vld [vmem:[%s14992_s5 + $0x98] sm:$0xf0]  ;;  %v8658_v40 = vor.u32 %v9860_v15, %v8655_v16  ;;  %v8795_v15 = vld [vmem:[%s14992_s5 + $0x204] sm:$0xf0] }
 0x2ea   :  { %v4656_v38 = vpop.f32.mrf.mxu0  ;;  %5926 = vmatpush.bf16.msrb.mxu0 %v8694_v52  ;;  %5939 = vmatpush.bf16.msrb.mxu1 %v9046_v53  ;;  %v9898_v52 = vld [vmem:[%s14992_s5 + $0x1f8] sm:$0xf0]  ;;  %v8834_v53 = vor.u32 %v9904_v45, %v8831_v13  ;;  %v9186_v41 = vor.u32 %v9992_v46, %v9183_v22  ;;  %v8611_v45 = vld [vmem:[%s14992_s5 + $0x9c] sm:$0xf0]  ;;  %v9937_v13 = vld [vmem:[%s14992_s5 + $0x334] sm:$0xf] }
 0x2eb   :  { %v4669_v31 = vpop.f32.mrf.mxu1  ;;  %v9139_v38 = vld [vmem:[%s14992_s5 + $0x4bc] sm:$0xf0]  ;;  %v8565_v22 = vld [vmem:[%s14992_s5 + $0x18] sm:$0xf]  ;;  %v9982_v16 = vld [vmem:[%s14992_s5 + $0x49c] sm:$0xf] }
 0x2ec   :  { %v8790_v31 = vor.u32 %v9893_v36, %v8787_v57  ;;  %v8963_v46 = vld [vmem:[%s14992_s5 + $0x35c] sm:$0xf0]  ;;  %v8567_v36 = vld [vmem:[%s14992_s5 + $0x44] sm:$0xf0]  ;;  %v9926_v57 = vld [vmem:[%s14992_s5 + $0x2dc] sm:$0xf] }
 0x2ed   :  { %5901 = vmatpush.bf16.msra.mxu2 %v8646_v18  ;;  %5914 = vmatpush.bf16.msra.mxu3 %v8998_v44  ;;  %v8786_v18 = vor.u32 %v9898_v52, %v8785_v51  ;;  %v9138_v44 = vor.u32 %v9986_v56, %v9137_v63  ;;  %v9843_v51 = vld [vmem:[%s14992_s5 + $0x40] sm:$0xf0]  ;;  %v8917_v52 = vld [vmem:[%s14992_s5 + $0x2d8] sm:$0xf]  ;;  %v8966_v63 = vor.u32 %v9937_v13, %v8963_v46  ;;  %v9838_v56 = vld [vmem:[%s14992_s5 + $0x1c] sm:$0xf] }
 0x2ee   :  { %5927 = vmatpush.bf16.msrb.mxu0 %v8650_v60  ;;  %5940 = vmatpush.bf16.msrb.mxu1 %v9002_v42  ;;  %v9142_v60 = vor.u32 %v9981_v29, %v9139_v38  ;;  %v9093_v42 = vld [vmem:[%s14992_s5 + $0x438] sm:$0xf]  ;;  %v8919_v29 = vld [vmem:[%s14992_s5 + $0x304] sm:$0xf0]  ;;  %v8570_v30 = vor.u32 %v9838_v56, %v8567_v36  ;;  %v9103_v13 = vld [vmem:[%s14992_s5 + $0x46c] sm:$0xf0] }
 0x2ef   :  { %v9094_v1 = vor.u32 %v9975_v25, %v9093_v42  ;;  %v8881_v38 = vld [vmem:[%s14992_s5 + $0x288] sm:$0xf]  ;;  %v8883_v42 = vld [vmem:[%s14992_s5 + $0x2b4] sm:$0xf0]  ;;  %v10004_v25 = vld [vmem:[%s14992_s5 + $0x54c] sm:$0xf]  ;;  %v8922_v37 = vor.u32 %v9926_v57, %v8919_v29 }
 0x2f0   :  { %v8707_v56 = vld [vmem:[%s14992_s5 + $0x154] sm:$0xf0]  ;;  %v9960_v36 = vld [vmem:[%s14992_s5 + $0x3ec] sm:$0xf] }
 0x2f1   :  { %5902 = vmatpush.bf16.msra.mxu2 %v8602_v2  ;;  %5915 = vmatpush.bf16.msra.mxu3 %v8954_v9  ;;  %v8697_v2 = vld [vmem:[%s14992_s5 + $0x120] sm:$0xf]  ;;  %v9876_v9 = vld [vmem:[%s14992_s5 + $0x148] sm:$0xf0]  ;;  %v9059_v57 = vld [vmem:[%s14992_s5 + $0x414] sm:$0xf0] }
 0x2f2   :  { %5928 = vmatpush.bf16.msrb.mxu0 %v8606_v59  ;;  %5941 = vmatpush.bf16.msrb.mxu1 %v8958_v5  ;;  %v9964_v59 = vld [vmem:[%s14992_s5 + $0x408] sm:$0xf0]  ;;  %v9871_v5 = vld [vmem:[%s14992_s5 + $0x124] sm:$0xf]  ;;  %v8698_v7 = vor.u32 %v9876_v9, %v8697_v2  ;;  %v9910_v2 = vld [vmem:[%s14992_s5 + $0x258] sm:$0xf0]  ;;  %v8886_v9 = vor.u32 %v9916_v20, %v8883_v42  ;;  %v9062_v20 = vor.u32 %v9960_v36, %v9059_v57 }
 0x2f3   :  { %v9050_v35 = vor.u32 %v9964_v59, %v9049_v4  ;;  %v8702_v12 = vor.u32 %v9871_v5, %v8699_v55  ;;  %v9998_v4 = vld [vmem:[%s14992_s5 + $0x518] sm:$0xf0]  ;;  %v9905_v59 = vld [vmem:[%s14992_s5 + $0x234] sm:$0xf]  ;;  %v8839_v5 = vld [vmem:[%s14992_s5 + $0x25c] sm:$0xf0] }
 0x2f4   :  { %v9993_v55 = vld [vmem:[%s14992_s5 + $0x4f4] sm:$0xf]  ;;  %v9109_v57 = vld [vmem:[%s14992_s5 + $0x448] sm:$0xf] }
 0x2f5   :  { %5903 = vmatpush.bf16.msra.mxu2 %v8558_v14  ;;  %5916 = vmatpush.bf16.msra.mxu3 %v8910_v26  ;;  %v9005_v14 = vld [vmem:[%s14992_s5 + $0x388] sm:$0xf]  ;;  %v9953_v26 = vld [vmem:[%s14992_s5 + $0x3b0] sm:$0xf0] }
 0x2f6   :  { %5929 = vmatpush.bf16.msrb.mxu0 %v8562_v17  ;;  %5942 = vmatpush.bf16.msrb.mxu1 %v8914_v24  ;;  %v9007_v17 = vld [vmem:[%s14992_s5 + $0x3b4] sm:$0xf0]  ;;  %v8654_v24 = vor.u32 %v9865_v10, %v8653_v39  ;;  %v9899_v39 = vld [vmem:[%s14992_s5 + $0x200] sm:$0xf0]  ;;  %v8842_v10 = vor.u32 %v9905_v59, %v8839_v5  ;;  %v9861_v42 = vld [vmem:[%s14992_s5 + $0xd4] sm:$0xf] }
 0x2f7   :  { %v8619_v59 = vld [vmem:[%s14992_s5 + $0xa4] sm:$0xf0]  ;;  %v9938_v5 = vld [vmem:[%s14992_s5 + $0x33c] sm:$0xf]  ;;  %v9889_v36 = vld [vmem:[%s14992_s5 + $0x1b0] sm:$0xf0] }
 0x2f8   :  { %5904 = vmatmul.bf16.vlgmr.msra.gmra.mxu2 %v14178_v58  ;;  %5917 = vmatmul.bf16.vlgmr.msra.gmra.mxu3 %v14180_v21 }
 0x2f9   :  { %5948 = vmatpush.bf16.msrb.mxu2 %v8874_v47  ;;  %5961 = vmatpush.bf16.msrb.mxu3 %v9226_v27  ;;  %v9006_v47 = vor.u32 %v9953_v26, %v9005_v14  ;;  %v8609_v27 = vld [vmem:[%s14992_s5 + $0x70] sm:$0xf]  ;;  %v9987_v14 = vld [vmem:[%s14992_s5 + $0x4c0] sm:$0xf0]  ;;  %v9894_v26 = vld [vmem:[%s14992_s5 + $0x1dc] sm:$0xf] }
 0x2fa   :  { %5974 = vmatpush.bf16.msra.mxu0 %v8878_v33  ;;  %5987 = vmatpush.bf16.msra.mxu1 %v9230_v43  ;;  %v9010_v33 = vor.u32 %v9948_v34, %v9007_v17  ;;  %v8961_v43 = vld [vmem:[%s14992_s5 + $0x330] sm:$0xf]  ;;  %v9147_v34 = vld [vmem:[%s14992_s5 + $0x4c4] sm:$0xf0] }
 0x2fb   :  { %5930 = vmatmul.bf16.vlgmr.msrb.gmra.mxu0 %v14178_v58  ;;  %5943 = vmatmul.bf16.vlgmr.msrb.gmra.mxu1 %v14180_v21 }
 0x2fd   :  { %5949 = vmatpush.bf16.msrb.mxu2 %v8830_v50  ;;  %5962 = vmatpush.bf16.msrb.mxu3 %v9182_v8  ;;  %v8610_v50 = vor.u32 %v9854_v49, %v8609_v27  ;;  %v8962_v8 = vor.u32 %v9942_v19, %v8961_v43  ;;  %v9888_v27 = vld [vmem:[%s14992_s5 + $0x1a8] sm:$0xf0]  ;;  %v8798_v49 = vor.u32 %v9894_v26, %v8795_v15  ;;  %v9883_v19 = vld [vmem:[%s14992_s5 + $0x184] sm:$0xf]  ;;  %v8575_v26 = vld [vmem:[%s14992_s5 + $0x4c] sm:$0xf0] }
 0x2fe   :  { %5975 = vmatpush.bf16.msra.mxu0 %v8834_v53  ;;  %5988 = vmatpush.bf16.msra.mxu1 %v9186_v41  ;;  %v9931_v53 = vld [vmem:[%s14992_s5 + $0x300] sm:$0xf0]  ;;  %v8614_v41 = vor.u32 %v9849_v32, %v8611_v45  ;;  %v9976_v43 = vld [vmem:[%s14992_s5 + $0x468] sm:$0xf0]  ;;  %v8751_v32 = vld [vmem:[%s14992_s5 + $0x1ac] sm:$0xf0] }
 0x2ff   :  { %v9971_v45 = vld [vmem:[%s14992_s5 + $0x444] sm:$0xf] }
 0x300   :  { %v9927_v15 = vld [vmem:[%s14992_s5 + $0x2e4] sm:$0xf] }
 0x301   :  { %5950 = vmatpush.bf16.msrb.mxu2 %v8786_v18  ;;  %5963 = vmatpush.bf16.msrb.mxu3 %v9138_v44  ;;  %v9921_v18 = vld [vmem:[%s14992_s5 + $0x2b0] sm:$0xf0]  ;;  %v9233_v44 = vld [vmem:[%s14992_s5 + $0x548] sm:$0xf] }
 0x302   :  { %5976 = vmatpush.bf16.msra.mxu0 %v8790_v31  ;;  %5989 = vmatpush.bf16.msra.mxu1 %v9142_v60  ;;  %v8566_v31 = vor.u32 %v9843_v51, %v8565_v22  ;;  %v8918_v60 = vor.u32 %v9931_v53, %v8917_v52  ;;  %v8882_v62 = vor.u32 %v9921_v18, %v8881_v38  ;;  %v9057_v53 = vld [vmem:[%s14992_s5 + $0x3e8] sm:$0xf]  ;;  %v8661_v18 = vld [vmem:[%s14992_s5 + $0xd0] sm:$0xf] }
 0x303   :  { %v8754_v51 = vor.u32 %v9883_v19, %v8751_v32  ;;  %v9106_v52 = vor.u32 %v9971_v45, %v9103_v13  ;;  %v8845_v32 = vld [vmem:[%s14992_s5 + $0x238] sm:$0xf]  ;;  %v9911_v45 = vld [vmem:[%s14992_s5 + $0x260] sm:$0xf0] }
 0x304   :  { %v9197_v13 = vld [vmem:[%s14992_s5 + $0x4f8] sm:$0xf] }
 0x305   :  { %5951 = vmatpush.bf16.msrb.mxu2 %v8742_v0  ;;  %5964 = vmatpush.bf16.msrb.mxu3 %v9094_v1  ;;  %v9234_v0 = vor.u32 %v10009_v23, %v9233_v44  ;;  %v8837_v1 = vld [vmem:[%s14992_s5 + $0x230] sm:$0xf]  ;;  %v9866_v44 = vld [vmem:[%s14992_s5 + $0xf8] sm:$0xf0] }
 0x306   :  { %5977 = vmatpush.bf16.msra.mxu0 %v8746_v3  ;;  %5990 = vmatpush.bf16.msra.mxu1 %v9098_v11  ;;  %v9238_v3 = vor.u32 %v10004_v25, %v9235_v61  ;;  %v9189_v11 = vld [vmem:[%s14992_s5 + $0x4f0] sm:$0xf]  ;;  %v8838_v6 = vor.u32 %v9910_v2, %v8837_v1  ;;  %v8663_v25 = vld [vmem:[%s14992_s5 + $0xfc] sm:$0xf0]  ;;  %v9949_v61 = vld [vmem:[%s14992_s5 + $0x394] sm:$0xf] }
 0x307   :  { %v9855_v1 = vld [vmem:[%s14992_s5 + $0xa0] sm:$0xf0]  ;;  %v8666_v2 = vor.u32 %v9861_v42, %v8663_v25  ;;  %v8669_v25 = vld [vmem:[%s14992_s5 + $0xd8] sm:$0xf] }
 0x309   :  { %5952 = vmatpush.bf16.msrb.mxu2 %v8698_v7  ;;  %5965 = vmatpush.bf16.msrb.mxu3 %v9050_v35  ;;  %v9190_v7 = vor.u32 %v9998_v4, %v9189_v11  ;;  %v8793_v35 = vld [vmem:[%s14992_s5 + $0x1d8] sm:$0xf]  ;;  %v9943_v11 = vld [vmem:[%s14992_s5 + $0x360] sm:$0xf0]  ;;  %v9850_v4 = vld [vmem:[%s14992_s5 + $0x7c] sm:$0xf] }
 0x30a   :  { %5978 = vmatpush.bf16.msra.mxu0 %v8702_v12  ;;  %5991 = vmatpush.bf16.msra.mxu1 %v9054_v54  ;;  %v9194_v12 = vor.u32 %v9993_v55, %v9191_v28  ;;  %v9145_v54 = vld [vmem:[%s14992_s5 + $0x498] sm:$0xf]  ;;  %v8794_v17 = vor.u32 %v9899_v39, %v8793_v35  ;;  %v8971_v55 = vld [vmem:[%s14992_s5 + $0x364] sm:$0xf0]  ;;  %v9844_v35 = vld [vmem:[%s14992_s5 + $0x48] sm:$0xf0] }
 0x30b   :  { %v8925_v39 = vld [vmem:[%s14992_s5 + $0x2e0] sm:$0xf] }
 0x30d   :  { %5953 = vmatpush.bf16.msrb.mxu2 %v8654_v24  ;;  %5966 = vmatpush.bf16.msrb.mxu3 %v9006_v47  ;;  %v9146_v24 = vor.u32 %v9987_v14, %v9145_v54  ;;  %v8749_v47 = vld [vmem:[%s14992_s5 + $0x180] sm:$0xf]  ;;  %v9932_v54 = vld [vmem:[%s14992_s5 + $0x308] sm:$0xf0]  ;;  %v9839_v14 = vld [vmem:[%s14992_s5 + $0x24] sm:$0xf] }
 0x30e   :  { %5979 = vmatpush.bf16.msra.mxu0 %v8658_v40  ;;  %5992 = vmatpush.bf16.msra.mxu1 %v9010_v33  ;;  %v9150_v40 = vor.u32 %v9982_v16, %v9147_v34  ;;  %v9101_v33 = vld [vmem:[%s14992_s5 + $0x440] sm:$0xf]  ;;  %v8750_v46 = vor.u32 %v9888_v27, %v8749_v47  ;;  %v8927_v16 = vld [vmem:[%s14992_s5 + $0x30c] sm:$0xf0]  ;;  %v10010_v47 = vld [vmem:[%s14992_s5 + $0x578] sm:$0xf0] }
 0x30f   :  { %v9102_v22 = vor.u32 %v9976_v43, %v9101_v33  ;;  %v8889_v34 = vld [vmem:[%s14992_s5 + $0x290] sm:$0xf]  ;;  %v8930_v33 = vor.u32 %v9927_v15, %v8927_v16 }
 0x311   :  { %5954 = vmatpush.bf16.msrb.mxu2 %v8610_v50  ;;  %5967 = vmatpush.bf16.msrb.mxu3 %v8962_v8  ;;  %v8705_v50 = vld [vmem:[%s14992_s5 + $0x128] sm:$0xf]  ;;  %v9877_v8 = vld [vmem:[%s14992_s5 + $0x150] sm:$0xf0] }
 0x312   :  { %5980 = vmatpush.bf16.msra.mxu0 %v8614_v41  ;;  %5993 = vmatpush.bf16.msra.mxu1 %v8966_v63  ;;  %v9965_v41 = vld [vmem:[%s14992_s5 + $0x410] sm:$0xf0]  ;;  %v9872_v63 = vld [vmem:[%s14992_s5 + $0x12c] sm:$0xf]  ;;  %v8706_v29 = vor.u32 %v9877_v8, %v8705_v50  ;;  %v8801_v8 = vld [vmem:[%s14992_s5 + $0x1e0] sm:$0xf] }
 0x313   :  { %v9058_v38 = vor.u32 %v9965_v41, %v9057_v53  ;;  %v8710_v23 = vor.u32 %v9872_v63, %v8707_v56  ;;  %v9988_v53 = vld [vmem:[%s14992_s5 + $0x4c8] sm:$0xf0]  ;;  %v8757_v56 = vld [vmem:[%s14992_s5 + $0x188] sm:$0xf] }
 0x315   :  { %5955 = vmatpush.bf16.msrb.mxu2 %v8566_v31  ;;  %5968 = vmatpush.bf16.msrb.mxu3 %v8918_v60  ;;  %v9013_v31 = vld [vmem:[%s14992_s5 + $0x390] sm:$0xf]  ;;  %v9954_v60 = vld [vmem:[%s14992_s5 + $0x3b8] sm:$0xf0] }
 0x316   :  { %5981 = vmatpush.bf16.msra.mxu0 %v8570_v30  ;;  %5994 = vmatpush.bf16.msra.mxu1 %v8922_v37  ;;  %v9015_v30 = vld [vmem:[%s14992_s5 + $0x3bc] sm:$0xf0]  ;;  %v8662_v37 = vor.u32 %v9866_v44, %v8661_v18  ;;  %v8713_v44 = vld [vmem:[%s14992_s5 + $0x130] sm:$0xf] }
 0x318   :  { %5956 = vmatmul.bf16.vlgmr.msrb.gmra.mxu2 %v14178_v58  ;;  %5969 = vmatmul.bf16.vlgmr.msrb.gmra.mxu3 %v14180_v21 }
 0x319   :  { %6000 = vmatpush.bf16.msra.mxu2 %v8882_v62  ;;  %6013 = vmatpush.bf16.msra.mxu3 %v9234_v0  ;;  %v9014_v62 = vor.u32 %v9954_v60, %v9013_v31  ;;  %v8617_v0 = vld [vmem:[%s14992_s5 + $0x78] sm:$0xf]  ;;  %v9966_v31 = vld [vmem:[%s14992_s5 + $0x418] sm:$0xf0] }
 0x31a   :  { %6026 = vmatpush.bf16.msrb.mxu0 %v8886_v9  ;;  %6039 = vmatpush.bf16.msrb.mxu1 %v9238_v3  ;;  %v9018_v9 = vor.u32 %v9949_v61, %v9015_v30  ;;  %v8969_v3 = vld [vmem:[%s14992_s5 + $0x338] sm:$0xf]  ;;  %v8618_v28 = vor.u32 %v9855_v1, %v8617_v0  ;;  %v9867_v61 = vld [vmem:[%s14992_s5 + $0x100] sm:$0xf0]  ;;  %v8625_v1 = vld [vmem:[%s14992_s5 + $0x80] sm:$0xf] }
 0x31b   :  { %5982 = vmatmul.bf16.vlgmr.msra.gmra.mxu0 %v14178_v58  ;;  %5995 = vmatmul.bf16.vlgmr.msra.gmra.mxu1 %v14180_v21  ;;  %v9021_v30 = vld [vmem:[%s14992_s5 + $0x398] sm:$0xf] }
 0x31d   :  { %6001 = vmatpush.bf16.msra.mxu2 %v8838_v6  ;;  %6014 = vmatpush.bf16.msra.mxu3 %v9190_v7  ;;  %v8970_v6 = vor.u32 %v9943_v11, %v8969_v3  ;;  %v8573_v7 = vld [vmem:[%s14992_s5 + $0x20] sm:$0xf]  ;;  %v9944_v3 = vld [vmem:[%s14992_s5 + $0x368] sm:$0xf0] }
 0x31e   :  { %6027 = vmatpush.bf16.msrb.mxu0 %v8842_v10  ;;  %6040 = vmatpush.bf16.msrb.mxu1 %v9194_v12  ;;  %v8622_v10 = vor.u32 %v9850_v4, %v8619_v59  ;;  %v8974_v12 = vor.u32 %v9938_v5, %v8971_v55  ;;  %v8574_v27 = vor.u32 %v9844_v35, %v8573_v7  ;;  %v8581_v59 = vld [vmem:[%s14992_s5 + $0x28] sm:$0xf]  ;;  %v9845_v5 = vld [vmem:[%s14992_s5 + $0x50] sm:$0xf0]  ;;  %v14858_v35 = vld [vmem:[%s14993_s6] sm:$0xff] }
 0x31f   :  { %v8933_v55 = vld [vmem:[%s14992_s5 + $0x2e8] sm:$0xf] }
 0x321   :  { %6002 = vmatpush.bf16.msra.mxu2 %v8794_v17  ;;  %6015 = vmatpush.bf16.msra.mxu3 %v9146_v24  ;;  %v9922_v17 = vld [vmem:[%s14992_s5 + $0x2b8] sm:$0xf0]  ;;  %v9241_v24 = vld [vmem:[%s14992_s5 + $0x550] sm:$0xf] }
 0x322   :  { %6028 = vmatpush.bf16.msrb.mxu0 %v8798_v49  ;;  %6041 = vmatpush.bf16.msrb.mxu1 %v9150_v40  ;;  %v8926_v49 = vor.u32 %v9932_v54, %v8925_v39  ;;  %v8578_v40 = vor.u32 %v9839_v14, %v8575_v26  ;;  %v8890_v43 = vor.u32 %v9922_v17, %v8889_v34  ;;  %v4868_v39 = vperm.slane %v14858_v35, 1 }
 0x323   :  { %v9242_v19 = vor.u32 %v10010_v47, %v9241_v24  ;;  %v4867_v14 = vperm.slane %v14858_v35, 0 }
 0x325   :  { %6003 = vmatpush.bf16.msra.mxu2 %v8750_v46  ;;  %6016 = vmatpush.bf16.msra.mxu3 %v9102_v22  ;;  %v9999_v46 = vld [vmem:[%s14992_s5 + $0x520] sm:$0xf0]  ;;  %v8846_v22 = vor.u32 %v9911_v45, %v8845_v32  ;;  %v4869_v45 = vperm.slane %v14858_v35, 2 }
 0x326   :  { %6029 = vmatpush.bf16.msrb.mxu0 %v8754_v51  ;;  %6042 = vmatpush.bf16.msrb.mxu1 %v9106_v52  ;;  %v9198_v50 = vor.u32 %v9999_v46, %v9197_v13  ;;  %v9900_v51 = vld [vmem:[%s14992_s5 + $0x208] sm:$0xf0]  ;;  %v9153_v52 = vld [vmem:[%s14992_s5 + $0x4a0] sm:$0xf] }
 0x327   :  { %v8802_v41 = vor.u32 %v9900_v51, %v8801_v8  ;;  %v9154_v63 = vor.u32 %v9988_v53, %v9153_v52 }
 0x329   :  { %6004 = vmatpush.bf16.msra.mxu2 %v8706_v29  ;;  %6017 = vmatpush.bf16.msra.mxu3 %v9058_v38  ;;  %v9977_v29 = vld [vmem:[%s14992_s5 + $0x470] sm:$0xf0]  ;;  %v8758_v38 = vor.u32 %v9889_v36, %v8757_v56 }
 0x32a   :  { %6030 = vmatpush.bf16.msrb.mxu0 %v8710_v23  ;;  %6043 = vmatpush.bf16.msrb.mxu1 %v9062_v20  ;;  %v9110_v18 = vor.u32 %v9977_v29, %v9109_v57  ;;  %v9878_v23 = vld [vmem:[%s14992_s5 + $0x158] sm:$0xf0]  ;;  %v9065_v20 = vld [vmem:[%s14992_s5 + $0x3f0] sm:$0xf]  ;;  %v4872_v29 = vperm.slane %v14858_v35, 5 }
 0x32b   :  { %v8714_v60 = vor.u32 %v9878_v23, %v8713_v44  ;;  %v9066_v42 = vor.u32 %v9966_v31, %v9065_v20  ;;  %v4871_v23 = vperm.slane %v14858_v35, 4 }
 0x32d   :  { %6005 = vmatpush.bf16.msra.mxu2 %v8662_v37  ;;  %6018 = vmatpush.bf16.msra.mxu3 %v9014_v62  ;;  %v9955_v37 = vld [vmem:[%s14992_s5 + $0x3c0] sm:$0xf0]  ;;  %v8670_v62 = vor.u32 %v9867_v61, %v8669_v25 }
 0x32e   :  { %6031 = vmatpush.bf16.msrb.mxu0 %v8666_v2  ;;  %6044 = vmatpush.bf16.msrb.mxu1 %v9018_v9  ;;  %v9022_v0 = vor.u32 %v9955_v37, %v9021_v30  ;;  %v9856_v2 = vld [vmem:[%s14992_s5 + $0xa8] sm:$0xf0]  ;;  %v8977_v9 = vld [vmem:[%s14992_s5 + $0x340] sm:$0xf] }
 0x32f   :  { %v8626_v11 = vor.u32 %v9856_v2, %v8625_v1  ;;  %v8978_v4 = vor.u32 %v9944_v3, %v8977_v9 }
 0x331   :  { %6006 = vmatpush.bf16.msra.mxu2 %v8618_v28  ;;  %6019 = vmatpush.bf16.msra.mxu3 %v8970_v6  ;;  %v9933_v28 = vld [vmem:[%s14992_s5 + $0x310] sm:$0xf0]  ;;  %v8582_v6 = vor.u32 %v9845_v5, %v8581_v59 }
 0x332   :  { %6032 = vmatpush.bf16.msrb.mxu0 %v8622_v10  ;;  %6045 = vmatpush.bf16.msrb.mxu1 %v8974_v12  ;;  %v8934_v7 = vor.u32 %v9933_v28, %v8933_v55 }
 0x335   :  { %6007 = vmatpush.bf16.msra.mxu2 %v8574_v27  ;;  %6020 = vmatpush.bf16.msra.mxu3 %v8926_v49 }
 0x336   :  { %6033 = vmatpush.bf16.msrb.mxu0 %v8578_v40  ;;  %6046 = vmatpush.bf16.msrb.mxu1 %v8930_v33  ;;  %v4870_v33 = vperm.slane %v14858_v35, 3 }
 0x338   :  { %6008 = vmatmul.bf16.vlgmr.msra.gmra.mxu2 %v14178_v58  ;;  %6021 = vmatmul.bf16.vlgmr.msra.gmra.mxu3 %v14180_v21 }
 0x339   :  { %6052 = vmatpush.bf16.msrb.mxu2 %v8890_v43  ;;  %6065 = vmatpush.bf16.msrb.mxu3 %v9242_v19 }
 0x33a   :  { %6034 = vmatmul.bf16.vlgmr.msrb.gmra.mxu0 %v14178_v58  ;;  %6047 = vmatmul.bf16.vlgmr.msrb.gmra.mxu1 %v14180_v21 }
 0x33d   :  { %6053 = vmatpush.bf16.msrb.mxu2 %v8846_v22  ;;  %6066 = vmatpush.bf16.msrb.mxu3 %v9198_v50 }
 0x341   :  { %6054 = vmatpush.bf16.msrb.mxu2 %v8802_v41  ;;  %6067 = vmatpush.bf16.msrb.mxu3 %v9154_v63 }
 0x345   :  { %6055 = vmatpush.bf16.msrb.mxu2 %v8758_v38  ;;  %6068 = vmatpush.bf16.msrb.mxu3 %v9110_v18 }
 0x349   :  { %6056 = vmatpush.bf16.msrb.mxu2 %v8714_v60  ;;  %6069 = vmatpush.bf16.msrb.mxu3 %v9066_v42 }
 0x34d   :  { %6057 = vmatpush.bf16.msrb.mxu2 %v8670_v62  ;;  %6070 = vmatpush.bf16.msrb.mxu3 %v9022_v0 }
 0x351   :  { %6058 = vmatpush.bf16.msrb.mxu2 %v8626_v11  ;;  %6071 = vmatpush.bf16.msrb.mxu3 %v8978_v4 }
 0x355   :  { %6059 = vmatpush.bf16.msrb.mxu2 %v8582_v6  ;;  %6072 = vmatpush.bf16.msrb.mxu3 %v8934_v7  ;;  %v5827_v10 = vpop.f32.mrf.mxu0  ;;  %v5840_v12 = vpop.f32.mrf.mxu1 }
 0x356   :  { %v5828_v54 = vadd.f32 %v5827_v10, %v4868_v39 }
 0x358   :  { %6060 = vmatmul.bf16.vlgmr.msrb.gmra.mxu2 %v14178_v58  ;;  %6073 = vmatmul.bf16.vlgmr.msrb.gmra.mxu3 %v14180_v21  ;;  %v5841_v26 = vadd.f32 %v5840_v12, %v5828_v54 }
 0x35a   :  { %v14865_v15 = vadd.f32 %v5841_v26, %v14285_v48  ;;  %v5801_v16 = vpop.f32.mrf.mxu2  ;;  %v5814_v34 = vpop.f32.mrf.mxu3 }
 0x35b   :  { %v5802_v17 = vadd.f32 %v5801_v16, %v4867_v14 }
 0x35d   :  { %v5815_v24 = vadd.f32 %v5814_v34, %v5802_v17  ;;  %v5829_v47 = vpop.f32.mrf.mxu0  ;;  %v5842_v27 = vpop.f32.mrf.mxu1  ;;  %v4873_v34 = vperm.slane %v14858_v35, 6 }
 0x35e   :  { %v4874_v47 = vperm.slane %v14858_v35, 7 }
 0x35f   :  { %v6078_v58 = vadd.f32 %v5841_v26, %v5815_v24  ;;  %v14868_v21 = vadd.f32 %v5815_v24, %v14285_v48  ;;  %v4864_v24 = vld [vmem:[%s14993_s6 + $0x8] sm:$0x7] }
 0x360   :  { %v4875_v27 = vperm.slane %v4864_v24, 0 }
 0x362   :  { %v5803_v49 = vpop.f32.mrf.mxu2  ;;  %v5816_v40 = vpop.f32.mrf.mxu3 }
 0x365   :  { %v5879_v43 = vpop.f32.mrf.mxu0  ;;  %v5892_v19 = vpop.f32.mrf.mxu1 }
 0x366   :  { %v5880_v32 = vadd.f32 %v5879_v43, %v4870_v33  ;;  %v4876_v43 = vperm.slane %v4864_v24, 1 }
 0x368   :  { %v5893_v13 = vadd.f32 %v5892_v19, %v5880_v32 }
 0x36a   :  { %v14873_v46 = vadd.f32 %v5893_v13, %v14285_v48  ;;  %v5853_v22 = vpop.f32.mrf.mxu2  ;;  %v5866_v50 = vpop.f32.mrf.mxu3 }
 0x36b   :  { %v5854_v8 = vadd.f32 %v5853_v22, %v4869_v45  ;;  %v4877_v22 = vperm.slane %v4864_v24, 2 }
 0x36d   :  { %v5867_v51 = vadd.f32 %v5866_v50, %v5854_v8  ;;  %v5881_v52 = vpop.f32.mrf.mxu0  ;;  %v5894_v53 = vpop.f32.mrf.mxu1 }
 0x36f   :  { %v6079_v41 = vadd.f32 %v6078_v58, %v5867_v51  ;;  %v14876_v63 = vadd.f32 %v5867_v51, %v14285_v48 }
 0x371   :  { %v6080_v56 = vadd.f32 %v6079_v41, %v5893_v13 }
 0x372   :  { %v5855_v36 = vpop.f32.mrf.mxu2  ;;  %v5868_v57 = vpop.f32.mrf.mxu3 }
 0x378   :  { %v5931_v38 = vpop.f32.mrf.mxu0  ;;  %v5944_v18 = vpop.f32.mrf.mxu1 }
 0x379   :  { %v5932_v44 = vadd.f32 %v5931_v38, %v4872_v29 }
 0x37b   :  { %v5945_v20 = vadd.f32 %v5944_v18, %v5932_v44  ;;  %v5905_v60 = vpop.f32.mrf.mxu2  ;;  %v5918_v42 = vpop.f32.mrf.mxu3 }
 0x37c   :  { %v5906_v25 = vadd.f32 %v5905_v60, %v4871_v23 }
 0x37d   :  { %v14881_v31 = vadd.f32 %v5945_v20, %v14285_v48 }
 0x37e   :  { %v5919_v61 = vadd.f32 %v5918_v42, %v5906_v25 }
 0x380   :  { %v5933_v30 = vpop.f32.mrf.mxu0  ;;  %v5946_v37 = vpop.f32.mrf.mxu1  ;;  %v6081_v62 = vadd.f32 %v6080_v56, %v5919_v61  ;;  %v6118_v0 = vadd.f32 %v5919_v61, %v14285_v48 }
 0x382   :  { %v6082_v1 = vadd.f32 %v6081_v62, %v5945_v20 }
 0x383   :  { %v5907_v2 = vpop.f32.mrf.mxu2  ;;  %v5920_v9 = vpop.f32.mrf.mxu3 }
 0x398   :  { %v5983_v3 = vpop.f32.mrf.mxu0  ;;  %v5996_v11 = vpop.f32.mrf.mxu1 }
 0x399   :  { %v5984_v49 = vadd.f32 %v5983_v3, %v4874_v47 }
 0x39b   :  { %v5957_v4 = vpop.f32.mrf.mxu2  ;;  %v5970_v59 = vpop.f32.mrf.mxu3  ;;  %v5997_v19 = vadd.f32 %v5996_v11, %v5984_v49 }
 0x39c   :  { %v5958_v17 = vadd.f32 %v5957_v4, %v4873_v34 }
 0x39d   :  { %v6139_v57 = vadd.f32 %v5997_v19, %v14285_v48 }
 0x39e   :  { %v5971_v58 = vadd.f32 %v5970_v59, %v5958_v17 }
 0x3a0   :  { %v5985_v5 = vpop.f32.mrf.mxu0  ;;  %v5998_v55 = vpop.f32.mrf.mxu1  ;;  %v6083_v33 = vadd.f32 %v6082_v1, %v5971_v58  ;;  %v6132_v29 = vadd.f32 %v5971_v58, %v14285_v48 }
 0x3a2   :  { %v6084_v13 = vadd.f32 %v6083_v33, %v5997_v19 }
 0x3a3   :  { %v5959_v28 = vpop.f32.mrf.mxu2  ;;  %v5972_v6 = vpop.f32.mrf.mxu3 }
 0x3b7   :  { %v6035_v7 = vpop.f32.mrf.mxu0  ;;  %v6048_v39 = vpop.f32.mrf.mxu1 }
 0x3b8   :  { %v6036_v45 = vadd.f32 %v6035_v7, %v4876_v43 }
 0x3ba   :  { %v6049_v52 = vadd.f32 %v6048_v39, %v6036_v45 }
 0x3bb   :  { %v6009_v10 = vpop.f32.mrf.mxu2  ;;  %v6022_v12 = vpop.f32.mrf.mxu3 }
 0x3bc   :  { %v6010_v40 = vadd.f32 %v6009_v10, %v4875_v27  ;;  %v6153_v38 = vadd.f32 %v6049_v52, %v14285_v48 }
 0x3be   :  { %v6023_v32 = vadd.f32 %v6022_v12, %v6010_v40 }
 0x3bf   :  { %v6037_v54 = vpop.f32.mrf.mxu0  ;;  %v6050_v14 = vpop.f32.mrf.mxu1 }
 0x3c0   :  { %v6085_v50 = vadd.f32 %v6084_v13, %v6023_v32  ;;  %v6146_v62 = vadd.f32 %v6023_v32, %v14285_v48 }
 0x3c2   :  { %v6086_v56 = vadd.f32 %v6085_v50, %v6049_v52 }
 0x3c3   :  { %v6011_v26 = vpop.f32.mrf.mxu2  ;;  %v6024_v16 = vpop.f32.mrf.mxu3 }
 0x3db   :  { %v6061_v8 = vpop.f32.mrf.mxu2  ;;  %v6074_v51 = vpop.f32.mrf.mxu3 }
 0x3dc   :  { %v6062_v53 = vadd.f32 %v6061_v8, %v4877_v22 }
 0x3de   :  { %v6075_v41 = vadd.f32 %v6074_v51, %v6062_v53 }
 0x3e0   :  { %v6087_v36 = vadd.f32 %v6086_v56, %v6075_v41 }
 0x3e2   :  { %v6088_v35 = vmul.f32 0.09090909, %v6087_v36 }
 0x3e3   :  { %v6063_v18 = vpop.f32.mrf.mxu2  ;;  %v6076_v44 = vpop.f32.mrf.mxu3 }
 0x3e4   :  { %v6090_v23 = vsub.f32 %v14868_v21, %v6088_v35  ;;  %v6098_v20 = vsub.f32 %v14865_v15, %v6088_v35  ;;  %v6105_v60 = vsub.f32 %v14876_v63, %v6088_v35  ;;  %v6112_v42 = vsub.f32 %v14873_v46, %v6088_v35 }
 0x3e5   :  { %v6119_v25 = vsub.f32 %v6118_v0, %v6088_v35  ;;  %v6126_v61 = vsub.f32 %v14881_v31, %v6088_v35  ;;  %v6133_v30 = vsub.f32 %v6132_v29, %v6088_v35  ;;  %v6140_v37 = vsub.f32 %v6139_v57, %v6088_v35 }
 0x3e6   :  { %v6092_v1 = vrot.slane %v6090_v23, 1  ;;  %6095 = vst.msk [vmem:[%s14994_s7] sm:$0x1] %vm6094_vm0, %v6090_v23  ;;  %v6100_v21 = vrot.slane %v6098_v20, 1  ;;  %v6160_v15 = vadd.f32 %v6075_v41, %v14285_v48  ;;  %v6107_v46 = vrot.slane %v6105_v60, 1 }
 0x3e7   :  { %6102 = vst.msk [vmem:[%s14994_s7 + $0x1] sm:$0x1] %vm6094_vm0, %v6098_v20  ;;  %v6147_v63 = vsub.f32 %v6146_v62, %v6088_v35  ;;  %v6154_v31 = vsub.f32 %v6153_v38, %v6088_v35  ;;  %v6114_v48 = vrot.slane %v6112_v42, 1  ;;  %v6121_v2 = vrot.slane %v6119_v25, 1 }
 0x3e8   :  { %6096 = vst.msk [vmem:[%s14994_s7 + $0x10] sm:$0x1] %vm6094_vm0, %v6092_v1  ;;  %v6161_v0 = vsub.f32 %v6160_v15, %v6088_v35  ;;  %v6128_v9 = vrot.slane %v6126_v61, 1  ;;  %v6135_v3 = vrot.slane %v6133_v30, 1  ;;  %v6142_v11 = vrot.slane %v6140_v37, 1 }
 0x3e9   :  { %6103 = vst.msk [vmem:[%s14994_s7 + $0x11] sm:$0x1] %vm6094_vm0, %v6100_v21  ;;  %v6149_v4 = vrot.slane %v6147_v63, 1  ;;  %v6156_v59 = vrot.slane %v6154_v31, 1 }
 0x3ea   :  { %6109 = vst.msk [vmem:[%s14994_s7 + $0x2] sm:$0x1] %vm6094_vm0, %v6105_v60  ;;  %v6163_v5 = vrot.slane %v6161_v0, 1 }
 0x3eb   :  { %6110 = vst.msk [vmem:[%s14994_s7 + $0x12] sm:$0x1] %vm6094_vm0, %v6107_v46 }
 0x3ec   :  { %6116 = vst.msk [vmem:[%s14994_s7 + $0x3] sm:$0x1] %vm6094_vm0, %v6112_v42 }
 0x3ed   :  { %6117 = vst.msk [vmem:[%s14994_s7 + $0x13] sm:$0x1] %vm6094_vm0, %v6114_v48 }
 0x3ee   :  { %6123 = vst.msk [vmem:[%s14994_s7 + $0x4] sm:$0x1] %vm6094_vm0, %v6119_v25 }
 0x3ef   :  { %6124 = vst.msk [vmem:[%s14994_s7 + $0x14] sm:$0x1] %vm6094_vm0, %v6121_v2 }
 0x3f0   :  { %6130 = vst.msk [vmem:[%s14994_s7 + $0x5] sm:$0x1] %vm6094_vm0, %v6126_v61 }
 0x3f1   :  { %6131 = vst.msk [vmem:[%s14994_s7 + $0x15] sm:$0x1] %vm6094_vm0, %v6128_v9 }
 0x3f2   :  { %6137 = vst.msk [vmem:[%s14994_s7 + $0x6] sm:$0x1] %vm6094_vm0, %v6133_v30 }
 0x3f3   :  { %6138 = vst.msk [vmem:[%s14994_s7 + $0x16] sm:$0x1] %vm6094_vm0, %v6135_v3 }
 0x3f4   :  { %6144 = vst.msk [vmem:[%s14994_s7 + $0x7] sm:$0x1] %vm6094_vm0, %v6140_v37 }
 0x3f5   :  { %6145 = vst.msk [vmem:[%s14994_s7 + $0x17] sm:$0x1] %vm6094_vm0, %v6142_v11 }
 0x3f6   :  { %6151 = vst.msk [vmem:[%s14994_s7 + $0x8] sm:$0x1] %vm6094_vm0, %v6147_v63 }
 0x3f7   :  { %6152 = vst.msk [vmem:[%s14994_s7 + $0x18] sm:$0x1] %vm6094_vm0, %v6149_v4 }
 0x3f8   :  { %6158 = vst.msk [vmem:[%s14994_s7 + $0x9] sm:$0x1] %vm6094_vm0, %v6154_v31 }
 0x3f9   :  { %6159 = vst.msk [vmem:[%s14994_s7 + $0x19] sm:$0x1] %vm6094_vm0, %v6156_v59 }
 0x3fa   :  { %6165 = vst.msk [vmem:[%s14994_s7 + $0xa] sm:$0x1] %vm6094_vm0, %v6161_v0 }
 0x3fb   :  { %6166 = vst.msk [vmem:[%s14994_s7 + $0x1a] sm:$0x1] %vm6094_vm0, %v6163_v5 }

</bundles_post_ra>
